<compile_context>
chip_gen: v6e
topology: v6e:2x2x1
jax: 0.10.0
libtpu: 0.0.40
codegen_flags: <defaults>
</compile_context>

<pallas_src>
import functools

import jax
import jax.numpy as jnp
from jax import lax
from jax.experimental import pallas as pl
from jax.experimental.pallas import tpu as pltpu


def _round_up(n, m):
    return (n + m - 1) // m * m


# ----------------------------------------------------------------------------
# Fused forward kernel: one batch BLOCK (bb images) per grid step.
#
# Input row layout (built once in the wrapper, window-major / image-minor):
#   xe row m*bb + b : input rows 8m   .. 8m+7  of image b, flattened to lanes
#                     (feeds EVEN conv1 output rows oh1 = 2m)
#   xo row m*bb + b : input rows 8m+4 .. 8m+11 (feeds ODD rows oh1 = 2m+1)
# With bb % 8 == 0 every row-window slice below is contiguous and tile-aligned.
# ----------------------------------------------------------------------------
def _cnn_kernel(xe_ref, xo_ref, w1_ref, b1_ref, w2_ref, b2_ref,
                wf_ref, bf_ref, wa_ref, ba_ref, o_ref):
    f32 = jnp.float32
    bf16 = jnp.bfloat16
    bb = o_ref.shape[0]
    n9 = 9 * bb

    w1 = w1_ref[...]                       # (8*84*C, 320) banded conv1 weight (bf16)
    b1 = b1_ref[...]                       # (1, 320) f32

    # conv1 + ReLU: two M = 10*bb matmuls (at the default bb each already fills
    # the MXU row tile, so fusing even/odd would only be marginal).
    h1e = jnp.maximum(jnp.dot(xe_ref[...], w1, preferred_element_type=f32) + b1, 0.0)
    h1o = jnp.maximum(jnp.dot(xo_ref[...], w1, preferred_element_type=f32) + b1, 0.0)
    h1e = h1e.astype(bf16)                 # rows: m*bb + b   (conv1 row 2m)
    h1o = h1o.astype(bf16)                 # rows: m*bb + b   (conv1 row 2m+1)

    # conv2 (4x4, stride 2): accumulate over the 4 kernel rows.  Kernel row i
    # reads conv1 rows {2*oh2 + i}; with the parity-split layout those are the
    # contiguous (9*bb, 320) slices below.
    acc2 = jnp.dot(h1e[0:n9], w2_ref[0], preferred_element_type=f32)
    acc2 = acc2 + jnp.dot(h1o[0:n9], w2_ref[1], preferred_element_type=f32)
    acc2 = acc2 + jnp.dot(h1e[bb:bb + n9], w2_ref[2], preferred_element_type=f32)
    acc2 = acc2 + jnp.dot(h1o[bb:bb + n9], w2_ref[3], preferred_element_type=f32)
    h2 = jnp.maximum(acc2 + b2_ref[...], 0.0).astype(bf16)   # rows: oh2*bb + b

    # fc + ReLU: contract over the 9 conv2 output rows (Wf pre-permuted at
    # init); each term is an M = bb matmul (same FLOPs as one (bb,2592) dot).
    acc3 = jnp.dot(h2[0:bb], wf_ref[0], preferred_element_type=f32)
    for r in range(1, 9):
        acc3 = acc3 + jnp.dot(h2[r * bb:(r + 1) * bb], wf_ref[r],
                              preferred_element_type=f32)
    h3 = jnp.maximum(acc3 + bf_ref[...], 0.0).astype(bf16)   # (bb, 256)

    # actor head; output zero-padded to 128 lanes -> unmasked lane-dense store.
    o_ref[...] = (jnp.dot(h3, wa_ref[...], preferred_element_type=f32)
                  + ba_ref[...])


# ----------------------------------------------------------------------------
# One-time parameter preparation (PyTorch layout -> kernel layout, bf16)
# ----------------------------------------------------------------------------
def prepare_params(params, num_inputs, num_outputs):
    f32, bf16 = jnp.float32, jnp.bfloat16
    C = num_inputs

    # conv1 (16, C, 8, 8) -> banded matrix (8*84*C, 20*16):
    #   W1[rw*84*C + w*C + c, ow*16 + oc] = conv1_w[oc, c, rw, w - 4*ow]
    w1_t = jnp.transpose(params["conv1_w"].astype(f32), (2, 3, 1, 0))  # (8,8,C,16)
    W1 = jnp.zeros((8, 84, C, 20, 16), f32)
    for ow in range(20):
        W1 = W1.at[:, 4 * ow:4 * ow + 8, :, ow, :].set(w1_t)
    W1 = W1.reshape(8 * 84 * C, 20 * 16).astype(bf16)
    b1 = jnp.tile(params["conv1_b"].astype(f32), 20).reshape(1, 320)

    # conv2 (32, 16, 4, 4) -> per-kernel-row banded matrices (4, 20*16, 9*32)
    w2_t = jnp.transpose(params["conv2_w"].astype(f32), (2, 3, 1, 0))  # (4,4,16,32)
    W2 = jnp.zeros((4, 20, 16, 9, 32), f32)
    for ow in range(9):
        W2 = W2.at[:, 2 * ow:2 * ow + 4, :, ow, :].set(w2_t)
    W2 = W2.reshape(4, 20 * 16, 9 * 32).astype(bf16)
    b2 = jnp.tile(params["conv2_b"].astype(f32), 9).reshape(1, 288)

    # fc (256, 2592); PyTorch flatten order is (c, h, w).  Permute columns to
    # the kernel's (h, w*32 + c) layout and split the h axis: (9, 288, 256).
    Wf = params["fc_w"].astype(f32).reshape(256, 32, 9, 9)         # (n, c, h, w)
    Wf = jnp.transpose(Wf, (2, 3, 1, 0)).reshape(9, 9 * 32, 256).astype(bf16)
    bf = params["fc_b"].astype(f32).reshape(1, 256)

    # actor (num_outputs, 256) -> (256, n_pad), zero-padded for a lane-dense store.
    n_pad = _round_up(num_outputs, 128)
    Wa = jnp.zeros((256, n_pad), f32).at[:, :num_outputs].set(
        params["actor_w"].astype(f32).T).astype(bf16)
    ba = jnp.zeros((1, n_pad), f32).at[0, :num_outputs].set(
        params["actor_b"].astype(f32))

    return {"W1": W1, "b1": b1, "W2": W2, "b2": b2,
            "Wf": Wf, "bf": bf, "Wa": Wa, "ba": ba}


# ----------------------------------------------------------------------------
# Forward pass
# ----------------------------------------------------------------------------
def cnn_forward(kparams, x, num_outputs, block_b=32):
    B0, C, H, W = x.shape
    assert (H, W) == (84, 84), "fc_linear(32*9*9, ...) forces 84x84 inputs"
    kdim = 8 * W * C

    # --- batch blocking: bb images per grid step (bb % 8 == 0) ---------------
    bb = min(block_b, _round_up(B0, 8))
    bb = max(8, bb - bb % 8)
    Bp = _round_up(B0, bb)
    if Bp // bb < 2 and bb >= 16:          # keep >= 2 grid steps (v7x: 2 TCs)
        bb = max(8, (bb // 2) - (bb // 2) % 8)
        Bp = _round_up(B0, bb)
    nblk = Bp // bb

    if Bp != B0:
        x = jnp.pad(x, ((0, Bp - B0), (0, 0), (0, 0), (0, 0)))
    xt = x.astype(jnp.bfloat16)

    # NCHW -> lane-dense 8-row windows, block/window-major, image-minor:
    #   row  = blk*(10*bb) + m*bb + b_local
    #   lane = rw*(W*C) + w*C + c
    def windows(lo, hi):
        return (xt[:, :, lo:hi, :]
                .reshape(nblk, bb, C, 10, 8, W)
                .transpose(0, 3, 1, 4, 5, 2)
                .reshape(nblk * 10 * bb, kdim))

    xe = windows(0, 80)    # even conv1 output rows (input rows 8m .. 8m+7)
    xo = windows(4, 84)    # odd  conv1 output rows (input rows 8m+4 .. 8m+11)

    n_pad = kparams["Wa"].shape[1]

    flops = 2 * Bp * (20 * kdim * 320 + 4 * 9 * 320 * 288
                      + 9 * 288 * 256 + 256 * n_pad)
    w_bytes = sum(int(v.size) * v.dtype.itemsize for v in kparams.values())
    bytes_accessed = int(2 * Bp * 10 * kdim * 2 + w_bytes + Bp * n_pad * 4)

    out = pl.pallas_call(
        _cnn_kernel,
        out_shape=jax.ShapeDtypeStruct((Bp, n_pad), jnp.float32),
        grid=(nblk,),
        in_specs=[
            pl.BlockSpec((10 * bb, kdim), lambda i: (i, 0)),         # xe
            pl.BlockSpec((10 * bb, kdim), lambda i: (i, 0)),         # xo
            pl.BlockSpec(kparams["W1"].shape, lambda i: (0, 0)),     # W1
            pl.BlockSpec((1, 320), lambda i: (0, 0)),                # b1
            pl.BlockSpec(kparams["W2"].shape, lambda i: (0, 0, 0)),  # W2
            pl.BlockSpec((1, 288), lambda i: (0, 0)),                # b2
            pl.BlockSpec(kparams["Wf"].shape, lambda i: (0, 0, 0)),  # Wf
            pl.BlockSpec((1, 256), lambda i: (0, 0)),                # bf
            pl.BlockSpec(kparams["Wa"].shape, lambda i: (0, 0)),     # Wa
            pl.BlockSpec((1, n_pad), lambda i: (0, 0)),              # ba
        ],
        out_specs=pl.BlockSpec((bb, n_pad), lambda i: (i, 0)),
        compiler_params=pltpu.CompilerParams(
            dimension_semantics=("parallel",),
            vmem_limit_bytes=48 * 1024 * 1024,
        ),
        cost_estimate=pl.CostEstimate(
            flops=int(flops), transcendentals=0, bytes_accessed=bytes_accessed),
    )(xe, xo, kparams["W1"], kparams["b1"], kparams["W2"], kparams["b2"],
      kparams["Wf"], kparams["bf"], kparams["Wa"], kparams["ba"])

    return out[:B0, :num_outputs]


# ----------------------------------------------------------------------------
# Deterministic parameter init (PyTorch layouts / shapes from __init__)
# ----------------------------------------------------------------------------
def init_params(num_inputs, num_outputs, key):
    ks = jax.random.split(key, 8)
    f32 = jnp.float32

    def u(k, shape, fan_in):
        bound = 1.0 / jnp.sqrt(fan_in)
        return jax.random.uniform(k, shape, f32, -bound, bound)

    return {
        "conv1_w": u(ks[0], (16, num_inputs, 8, 8), num_inputs * 8 * 8),
        "conv1_b": u(ks[1], (16,), num_inputs * 8 * 8),
        "conv2_w": u(ks[2], (32, 16, 4, 4), 16 * 4 * 4),
        "conv2_b": u(ks[3], (32,), 16 * 4 * 4),
        "fc_w":    u(ks[4], (256, 32 * 9 * 9), 32 * 9 * 9),
        "fc_b":    u(ks[5], (256,), 32 * 9 * 9),
        "actor_w": u(ks[6], (num_outputs, 256), 256),
        "actor_b": u(ks[7], (num_outputs,), 256),
    }


# ----------------------------------------------------------------------------
# Pure-JAX reference (PyTorch-equivalent semantics, f32)
# ----------------------------------------------------------------------------
def cnn_reference(params, x):
    dn = ("NCHW", "OIHW", "NCHW")
    y = lax.conv_general_dilated(x, params["conv1_w"], (4, 4), "VALID",
                                 dimension_numbers=dn)
    y = jnp.maximum(y + params["conv1_b"][None, :, None, None], 0.0)
    y = lax.conv_general_dilated(y, params["conv2_w"], (2, 2), "VALID",
                                 dimension_numbers=dn)
    y = jnp.maximum(y + params["conv2_b"][None, :, None, None], 0.0)
    y = y.reshape(y.shape[0], 32 * 9 * 9)
    y = jnp.maximum(y @ params["fc_w"].T + params["fc_b"], 0.0)
    return y @ params["actor_w"].T + params["actor_b"]


if __name__ == "__main__":
    key = jax.random.PRNGKey(0)
    k_x, k_p = jax.random.split(key)

    num_inputs, num_outputs = 4, 6
    batch = 2
    # Input spatial size 84x84 is forced by the fc_linear(32*9*9, ...) layer.
    x = jax.random.normal(k_x, (batch, num_inputs, 84, 84), jnp.float32)
    params = init_params(num_inputs, num_outputs, k_p)
    kparams = prepare_params(params, num_inputs, num_outputs)

    fwd = jax.jit(functools.partial(cnn_forward, num_outputs=num_outputs))
    out = jax.block_until_ready(fwd(kparams, x))
    assert out.shape == (batch, num_outputs), out.shape

    ref = jax.block_until_ready(jax.jit(cnn_reference)(params, x))
    max_err = float(jnp.max(jnp.abs(out - ref)))
    # bf16 weights/activations (f32 accumulation) -> looser tolerance than f32.
    assert jnp.allclose(out, ref, rtol=5e-2, atol=2e-2), max_err

    print("KERNEL_OK")
</pallas_src>

<mosaic_0001>
module attributes {stable_mosaic.version = 11 : i64} {
  func.func @_cnn_kernel(%arg0: i32, %arg1: memref<80x2688xbf16, #tpu.memory_space<vmem>>, %arg2: memref<80x2688xbf16, #tpu.memory_space<vmem>>, %arg3: memref<2688x320xbf16, #tpu.memory_space<vmem>>, %arg4: memref<1x320xf32, #tpu.memory_space<vmem>>, %arg5: memref<4x320x288xbf16, #tpu.memory_space<vmem>>, %arg6: memref<1x288xf32, #tpu.memory_space<vmem>>, %arg7: memref<9x288x256xbf16, #tpu.memory_space<vmem>>, %arg8: memref<1x256xf32, #tpu.memory_space<vmem>>, %arg9: memref<256x128xbf16, #tpu.memory_space<vmem>>, %arg10: memref<1x128xf32, #tpu.memory_space<vmem>>, %arg11: memref<8x128xf32, #tpu.memory_space<vmem>>) attributes {dimension_semantics = [#tpu.dimension_semantics<parallel>], iteration_bounds = array<i64: 1>, scalar_prefetch = 0 : i64, scratch_operands = 0 : i64, tpu.core_type = #tpu.core_type<tc>, window_params = [{transform_indices = @transform_0, window_bounds = array<i64: 80, 2688>}, {transform_indices = @transform_1, window_bounds = array<i64: 80, 2688>}, {pipeline_mode = #tpu.pipeline_mode<synchronous>, transform_indices = @transform_2, window_bounds = array<i64: 2688, 320>}, {pipeline_mode = #tpu.pipeline_mode<synchronous>, transform_indices = @transform_3, window_bounds = array<i64: 1, 320>}, {pipeline_mode = #tpu.pipeline_mode<synchronous>, transform_indices = @transform_4, window_bounds = array<i64: 4, 320, 288>}, {pipeline_mode = #tpu.pipeline_mode<synchronous>, transform_indices = @transform_5, window_bounds = array<i64: 1, 288>}, {pipeline_mode = #tpu.pipeline_mode<synchronous>, transform_indices = @transform_6, window_bounds = array<i64: 9, 288, 256>}, {pipeline_mode = #tpu.pipeline_mode<synchronous>, transform_indices = @transform_7, window_bounds = array<i64: 1, 256>}, {pipeline_mode = #tpu.pipeline_mode<synchronous>, transform_indices = @transform_8, window_bounds = array<i64: 256, 128>}, {pipeline_mode = #tpu.pipeline_mode<synchronous>, transform_indices = @transform_9, window_bounds = array<i64: 1, 128>}, {transform_indices = @transform_10, window_bounds = array<i64: 8, 128>}]} {
    %c0 = arith.constant 0 : index
    %c0_0 = arith.constant 0 : index
    %0 = vector.load %arg3[%c0, %c0_0] : memref<2688x320xbf16, #tpu.memory_space<vmem>>, vector<2688x320xbf16>
    %c0_1 = arith.constant 0 : index
    %c0_2 = arith.constant 0 : index
    %1 = vector.load %arg4[%c0_1, %c0_2] : memref<1x320xf32, #tpu.memory_space<vmem>>, vector<1x320xf32>
    %c0_3 = arith.constant 0 : index
    %c0_4 = arith.constant 0 : index
    %2 = vector.load %arg1[%c0_3, %c0_4] : memref<80x2688xbf16, #tpu.memory_space<vmem>>, vector<80x2688xbf16>
    %cst = arith.constant dense<0.000000e+00> : vector<80x320xf32>
    %3 = tpu.matmul %2, %0, %cst {dimension_numbers = #tpu.dot_dimension_numbers<[1], [0], [0], [1], [0, 0, 1, 1], [], []>} : vector<80x2688xbf16>, vector<2688x320xbf16>, vector<80x320xf32> -> vector<80x320xf32>
    %4 = vector.broadcast %1 : vector<1x320xf32> to vector<80x320xf32>
    %5 = arith.addf %3, %4 : vector<80x320xf32>
    %cst_5 = arith.constant 0.000000e+00 : f32
    %6 = vector.broadcast %cst_5 : f32 to vector<80x320xf32>
    %7 = arith.maximumf %5, %6 : vector<80x320xf32>
    %c0_6 = arith.constant 0 : index
    %c0_7 = arith.constant 0 : index
    %8 = vector.load %arg2[%c0_6, %c0_7] : memref<80x2688xbf16, #tpu.memory_space<vmem>>, vector<80x2688xbf16>
    %cst_8 = arith.constant dense<0.000000e+00> : vector<80x320xf32>
    %9 = tpu.matmul %8, %0, %cst_8 {dimension_numbers = #tpu.dot_dimension_numbers<[1], [0], [0], [1], [0, 0, 1, 1], [], []>} : vector<80x2688xbf16>, vector<2688x320xbf16>, vector<80x320xf32> -> vector<80x320xf32>
    %10 = vector.broadcast %1 : vector<1x320xf32> to vector<80x320xf32>
    %11 = arith.addf %9, %10 : vector<80x320xf32>
    %cst_9 = arith.constant 0.000000e+00 : f32
    %12 = vector.broadcast %cst_9 : f32 to vector<80x320xf32>
    %13 = arith.maximumf %11, %12 : vector<80x320xf32>
    %14 = arith.truncf %7 : vector<80x320xf32> to vector<80x320xbf16>
    %15 = arith.truncf %13 : vector<80x320xf32> to vector<80x320xbf16>
    %16 = vector.extract_strided_slice %14 {offsets = [0, 0], sizes = [72, 320], strides = [1, 1]} : vector<80x320xbf16> to vector<72x320xbf16>
    %c0_10 = arith.constant 0 : index
    %c0_11 = arith.constant 0 : index
    %c0_12 = arith.constant 0 : index
    %17 = vector.load %arg5[%c0_10, %c0_11, %c0_12] : memref<4x320x288xbf16, #tpu.memory_space<vmem>>, vector<1x320x288xbf16>
    %18 = vector.shape_cast %17 : vector<1x320x288xbf16> to vector<320x288xbf16>
    %cst_13 = arith.constant dense<0.000000e+00> : vector<72x288xf32>
    %19 = tpu.matmul %16, %18, %cst_13 {dimension_numbers = #tpu.dot_dimension_numbers<[1], [0], [0], [1], [0, 0, 1, 1], [], []>} : vector<72x320xbf16>, vector<320x288xbf16>, vector<72x288xf32> -> vector<72x288xf32>
    %20 = vector.extract_strided_slice %15 {offsets = [0, 0], sizes = [72, 320], strides = [1, 1]} : vector<80x320xbf16> to vector<72x320xbf16>
    %c1 = arith.constant 1 : index
    %c0_14 = arith.constant 0 : index
    %c0_15 = arith.constant 0 : index
    %21 = vector.load %arg5[%c1, %c0_14, %c0_15] : memref<4x320x288xbf16, #tpu.memory_space<vmem>>, vector<1x320x288xbf16>
    %22 = vector.shape_cast %21 : vector<1x320x288xbf16> to vector<320x288xbf16>
    %cst_16 = arith.constant dense<0.000000e+00> : vector<72x288xf32>
    %23 = tpu.matmul %20, %22, %cst_16 {dimension_numbers = #tpu.dot_dimension_numbers<[1], [0], [0], [1], [0, 0, 1, 1], [], []>} : vector<72x320xbf16>, vector<320x288xbf16>, vector<72x288xf32> -> vector<72x288xf32>
    %24 = arith.addf %19, %23 : vector<72x288xf32>
    %25 = vector.extract_strided_slice %14 {offsets = [8, 0], sizes = [72, 320], strides = [1, 1]} : vector<80x320xbf16> to vector<72x320xbf16>
    %c2 = arith.constant 2 : index
    %c0_17 = arith.constant 0 : index
    %c0_18 = arith.constant 0 : index
    %26 = vector.load %arg5[%c2, %c0_17, %c0_18] : memref<4x320x288xbf16, #tpu.memory_space<vmem>>, vector<1x320x288xbf16>
    %27 = vector.shape_cast %26 : vector<1x320x288xbf16> to vector<320x288xbf16>
    %cst_19 = arith.constant dense<0.000000e+00> : vector<72x288xf32>
    %28 = tpu.matmul %25, %27, %cst_19 {dimension_numbers = #tpu.dot_dimension_numbers<[1], [0], [0], [1], [0, 0, 1, 1], [], []>} : vector<72x320xbf16>, vector<320x288xbf16>, vector<72x288xf32> -> vector<72x288xf32>
    %29 = arith.addf %24, %28 : vector<72x288xf32>
    %30 = vector.extract_strided_slice %15 {offsets = [8, 0], sizes = [72, 320], strides = [1, 1]} : vector<80x320xbf16> to vector<72x320xbf16>
    %c3 = arith.constant 3 : index
    %c0_20 = arith.constant 0 : index
    %c0_21 = arith.constant 0 : index
    %31 = vector.load %arg5[%c3, %c0_20, %c0_21] : memref<4x320x288xbf16, #tpu.memory_space<vmem>>, vector<1x320x288xbf16>
    %32 = vector.shape_cast %31 : vector<1x320x288xbf16> to vector<320x288xbf16>
    %cst_22 = arith.constant dense<0.000000e+00> : vector<72x288xf32>
    %33 = tpu.matmul %30, %32, %cst_22 {dimension_numbers = #tpu.dot_dimension_numbers<[1], [0], [0], [1], [0, 0, 1, 1], [], []>} : vector<72x320xbf16>, vector<320x288xbf16>, vector<72x288xf32> -> vector<72x288xf32>
    %34 = arith.addf %29, %33 : vector<72x288xf32>
    %c0_23 = arith.constant 0 : index
    %c0_24 = arith.constant 0 : index
    %35 = vector.load %arg6[%c0_23, %c0_24] : memref<1x288xf32, #tpu.memory_space<vmem>>, vector<1x288xf32>
    %36 = vector.broadcast %35 : vector<1x288xf32> to vector<72x288xf32>
    %37 = arith.addf %34, %36 : vector<72x288xf32>
    %cst_25 = arith.constant 0.000000e+00 : f32
    %38 = vector.broadcast %cst_25 : f32 to vector<72x288xf32>
    %39 = arith.maximumf %37, %38 : vector<72x288xf32>
    %40 = arith.truncf %39 : vector<72x288xf32> to vector<72x288xbf16>
    %41 = vector.extract_strided_slice %40 {offsets = [0, 0], sizes = [8, 288], strides = [1, 1]} : vector<72x288xbf16> to vector<8x288xbf16>
    %c0_26 = arith.constant 0 : index
    %c0_27 = arith.constant 0 : index
    %c0_28 = arith.constant 0 : index
    %42 = vector.load %arg7[%c0_26, %c0_27, %c0_28] : memref<9x288x256xbf16, #tpu.memory_space<vmem>>, vector<1x288x256xbf16>
    %43 = vector.shape_cast %42 : vector<1x288x256xbf16> to vector<288x256xbf16>
    %cst_29 = arith.constant dense<0.000000e+00> : vector<8x256xf32>
    %44 = tpu.matmul %41, %43, %cst_29 {dimension_numbers = #tpu.dot_dimension_numbers<[1], [0], [0], [1], [0, 0, 1, 1], [], []>} : vector<8x288xbf16>, vector<288x256xbf16>, vector<8x256xf32> -> vector<8x256xf32>
    %45 = vector.extract_strided_slice %40 {offsets = [8, 0], sizes = [8, 288], strides = [1, 1]} : vector<72x288xbf16> to vector<8x288xbf16>
    %c1_30 = arith.constant 1 : index
    %c0_31 = arith.constant 0 : index
    %c0_32 = arith.constant 0 : index
    %46 = vector.load %arg7[%c1_30, %c0_31, %c0_32] : memref<9x288x256xbf16, #tpu.memory_space<vmem>>, vector<1x288x256xbf16>
    %47 = vector.shape_cast %46 : vector<1x288x256xbf16> to vector<288x256xbf16>
    %cst_33 = arith.constant dense<0.000000e+00> : vector<8x256xf32>
    %48 = tpu.matmul %45, %47, %cst_33 {dimension_numbers = #tpu.dot_dimension_numbers<[1], [0], [0], [1], [0, 0, 1, 1], [], []>} : vector<8x288xbf16>, vector<288x256xbf16>, vector<8x256xf32> -> vector<8x256xf32>
    %49 = arith.addf %44, %48 : vector<8x256xf32>
    %50 = vector.extract_strided_slice %40 {offsets = [16, 0], sizes = [8, 288], strides = [1, 1]} : vector<72x288xbf16> to vector<8x288xbf16>
    %c2_34 = arith.constant 2 : index
    %c0_35 = arith.constant 0 : index
    %c0_36 = arith.constant 0 : index
    %51 = vector.load %arg7[%c2_34, %c0_35, %c0_36] : memref<9x288x256xbf16, #tpu.memory_space<vmem>>, vector<1x288x256xbf16>
    %52 = vector.shape_cast %51 : vector<1x288x256xbf16> to vector<288x256xbf16>
    %cst_37 = arith.constant dense<0.000000e+00> : vector<8x256xf32>
    %53 = tpu.matmul %50, %52, %cst_37 {dimension_numbers = #tpu.dot_dimension_numbers<[1], [0], [0], [1], [0, 0, 1, 1], [], []>} : vector<8x288xbf16>, vector<288x256xbf16>, vector<8x256xf32> -> vector<8x256xf32>
    %54 = arith.addf %49, %53 : vector<8x256xf32>
    %55 = vector.extract_strided_slice %40 {offsets = [24, 0], sizes = [8, 288], strides = [1, 1]} : vector<72x288xbf16> to vector<8x288xbf16>
    %c3_38 = arith.constant 3 : index
    %c0_39 = arith.constant 0 : index
    %c0_40 = arith.constant 0 : index
    %56 = vector.load %arg7[%c3_38, %c0_39, %c0_40] : memref<9x288x256xbf16, #tpu.memory_space<vmem>>, vector<1x288x256xbf16>
    %57 = vector.shape_cast %56 : vector<1x288x256xbf16> to vector<288x256xbf16>
    %cst_41 = arith.constant dense<0.000000e+00> : vector<8x256xf32>
    %58 = tpu.matmul %55, %57, %cst_41 {dimension_numbers = #tpu.dot_dimension_numbers<[1], [0], [0], [1], [0, 0, 1, 1], [], []>} : vector<8x288xbf16>, vector<288x256xbf16>, vector<8x256xf32> -> vector<8x256xf32>
    %59 = arith.addf %54, %58 : vector<8x256xf32>
    %60 = vector.extract_strided_slice %40 {offsets = [32, 0], sizes = [8, 288], strides = [1, 1]} : vector<72x288xbf16> to vector<8x288xbf16>
    %c4 = arith.constant 4 : index
    %c0_42 = arith.constant 0 : index
    %c0_43 = arith.constant 0 : index
    %61 = vector.load %arg7[%c4, %c0_42, %c0_43] : memref<9x288x256xbf16, #tpu.memory_space<vmem>>, vector<1x288x256xbf16>
    %62 = vector.shape_cast %61 : vector<1x288x256xbf16> to vector<288x256xbf16>
    %cst_44 = arith.constant dense<0.000000e+00> : vector<8x256xf32>
    %63 = tpu.matmul %60, %62, %cst_44 {dimension_numbers = #tpu.dot_dimension_numbers<[1], [0], [0], [1], [0, 0, 1, 1], [], []>} : vector<8x288xbf16>, vector<288x256xbf16>, vector<8x256xf32> -> vector<8x256xf32>
    %64 = arith.addf %59, %63 : vector<8x256xf32>
    %65 = vector.extract_strided_slice %40 {offsets = [40, 0], sizes = [8, 288], strides = [1, 1]} : vector<72x288xbf16> to vector<8x288xbf16>
    %c5 = arith.constant 5 : index
    %c0_45 = arith.constant 0 : index
    %c0_46 = arith.constant 0 : index
    %66 = vector.load %arg7[%c5, %c0_45, %c0_46] : memref<9x288x256xbf16, #tpu.memory_space<vmem>>, vector<1x288x256xbf16>
    %67 = vector.shape_cast %66 : vector<1x288x256xbf16> to vector<288x256xbf16>
    %cst_47 = arith.constant dense<0.000000e+00> : vector<8x256xf32>
    %68 = tpu.matmul %65, %67, %cst_47 {dimension_numbers = #tpu.dot_dimension_numbers<[1], [0], [0], [1], [0, 0, 1, 1], [], []>} : vector<8x288xbf16>, vector<288x256xbf16>, vector<8x256xf32> -> vector<8x256xf32>
    %69 = arith.addf %64, %68 : vector<8x256xf32>
    %70 = vector.extract_strided_slice %40 {offsets = [48, 0], sizes = [8, 288], strides = [1, 1]} : vector<72x288xbf16> to vector<8x288xbf16>
    %c6 = arith.constant 6 : index
    %c0_48 = arith.constant 0 : index
    %c0_49 = arith.constant 0 : index
    %71 = vector.load %arg7[%c6, %c0_48, %c0_49] : memref<9x288x256xbf16, #tpu.memory_space<vmem>>, vector<1x288x256xbf16>
    %72 = vector.shape_cast %71 : vector<1x288x256xbf16> to vector<288x256xbf16>
    %cst_50 = arith.constant dense<0.000000e+00> : vector<8x256xf32>
    %73 = tpu.matmul %70, %72, %cst_50 {dimension_numbers = #tpu.dot_dimension_numbers<[1], [0], [0], [1], [0, 0, 1, 1], [], []>} : vector<8x288xbf16>, vector<288x256xbf16>, vector<8x256xf32> -> vector<8x256xf32>
    %74 = arith.addf %69, %73 : vector<8x256xf32>
    %75 = vector.extract_strided_slice %40 {offsets = [56, 0], sizes = [8, 288], strides = [1, 1]} : vector<72x288xbf16> to vector<8x288xbf16>
    %c7 = arith.constant 7 : index
    %c0_51 = arith.constant 0 : index
    %c0_52 = arith.constant 0 : index
    %76 = vector.load %arg7[%c7, %c0_51, %c0_52] : memref<9x288x256xbf16, #tpu.memory_space<vmem>>, vector<1x288x256xbf16>
    %77 = vector.shape_cast %76 : vector<1x288x256xbf16> to vector<288x256xbf16>
    %cst_53 = arith.constant dense<0.000000e+00> : vector<8x256xf32>
    %78 = tpu.matmul %75, %77, %cst_53 {dimension_numbers = #tpu.dot_dimension_numbers<[1], [0], [0], [1], [0, 0, 1, 1], [], []>} : vector<8x288xbf16>, vector<288x256xbf16>, vector<8x256xf32> -> vector<8x256xf32>
    %79 = arith.addf %74, %78 : vector<8x256xf32>
    %80 = vector.extract_strided_slice %40 {offsets = [64, 0], sizes = [8, 288], strides = [1, 1]} : vector<72x288xbf16> to vector<8x288xbf16>
    %c8 = arith.constant 8 : index
    %c0_54 = arith.constant 0 : index
    %c0_55 = arith.constant 0 : index
    %81 = vector.load %arg7[%c8, %c0_54, %c0_55] : memref<9x288x256xbf16, #tpu.memory_space<vmem>>, vector<1x288x256xbf16>
    %82 = vector.shape_cast %81 : vector<1x288x256xbf16> to vector<288x256xbf16>
    %cst_56 = arith.constant dense<0.000000e+00> : vector<8x256xf32>
    %83 = tpu.matmul %80, %82, %cst_56 {dimension_numbers = #tpu.dot_dimension_numbers<[1], [0], [0], [1], [0, 0, 1, 1], [], []>} : vector<8x288xbf16>, vector<288x256xbf16>, vector<8x256xf32> -> vector<8x256xf32>
    %84 = arith.addf %79, %83 : vector<8x256xf32>
    %c0_57 = arith.constant 0 : index
    %c0_58 = arith.constant 0 : index
    %85 = vector.load %arg8[%c0_57, %c0_58] : memref<1x256xf32, #tpu.memory_space<vmem>>, vector<1x256xf32>
    %86 = vector.broadcast %85 : vector<1x256xf32> to vector<8x256xf32>
    %87 = arith.addf %84, %86 : vector<8x256xf32>
    %cst_59 = arith.constant 0.000000e+00 : f32
    %88 = vector.broadcast %cst_59 : f32 to vector<8x256xf32>
    %89 = arith.maximumf %87, %88 : vector<8x256xf32>
    %90 = arith.truncf %89 : vector<8x256xf32> to vector<8x256xbf16>
    %c0_60 = arith.constant 0 : index
    %c0_61 = arith.constant 0 : index
    %91 = vector.load %arg9[%c0_60, %c0_61] : memref<256x128xbf16, #tpu.memory_space<vmem>>, vector<256x128xbf16>
    %cst_62 = arith.constant dense<0.000000e+00> : vector<8x128xf32>
    %92 = tpu.matmul %90, %91, %cst_62 {dimension_numbers = #tpu.dot_dimension_numbers<[1], [0], [0], [1], [0, 0, 1, 1], [], []>} : vector<8x256xbf16>, vector<256x128xbf16>, vector<8x128xf32> -> vector<8x128xf32>
    %c0_63 = arith.constant 0 : index
    %c0_64 = arith.constant 0 : index
    %93 = vector.load %arg10[%c0_63, %c0_64] : memref<1x128xf32, #tpu.memory_space<vmem>>, vector<1x128xf32>
    %94 = vector.broadcast %93 : vector<1x128xf32> to vector<8x128xf32>
    %95 = arith.addf %92, %94 : vector<8x128xf32>
    %c0_65 = arith.constant 0 : index
    %c0_66 = arith.constant 0 : index
    %96 = vector.load %arg11[%c0_65, %c0_66] : memref<8x128xf32, #tpu.memory_space<vmem>>, vector<8x128xf32>
    tpu.vector_store %arg11[%c0_65, %c0_66], %95 {strides = array<i32>} : memref<8x128xf32, #tpu.memory_space<vmem>>, vector<8x128xf32>,
    return
  }
  func.func @transform_0(%arg0: i32) -> (i32, i32) {
    %c0_i32 = arith.constant 0 : i32
    %c0_i32_0 = arith.constant 0 : i32
    return %arg0, %c0_i32 : i32, i32
  }
  func.func @transform_1(%arg0: i32) -> (i32, i32) {
    %c0_i32 = arith.constant 0 : i32
    %c0_i32_0 = arith.constant 0 : i32
    return %arg0, %c0_i32 : i32, i32
  }
  func.func @transform_2(%arg0: i32) -> (i32, i32) {
    %c0_i32 = arith.constant 0 : i32
    %c0_i32_0 = arith.constant 0 : i32
    %c0_i32_1 = arith.constant 0 : i32
    return %c0_i32, %c0_i32_0 : i32, i32
  }
  func.func @transform_3(%arg0: i32) -> (i32, i32) {
    %c0_i32 = arith.constant 0 : i32
    %c0_i32_0 = arith.constant 0 : i32
    %c0_i32_1 = arith.constant 0 : i32
    return %c0_i32, %c0_i32_0 : i32, i32
  }
  func.func @transform_4(%arg0: i32) -> (i32, i32, i32) {
    %c0_i32 = arith.constant 0 : i32
    %c0_i32_0 = arith.constant 0 : i32
    %c0_i32_1 = arith.constant 0 : i32
    %c0_i32_2 = arith.constant 0 : i32
    return %c0_i32, %c0_i32_0, %c0_i32_1 : i32, i32, i32
  }
  func.func @transform_5(%arg0: i32) -> (i32, i32) {
    %c0_i32 = arith.constant 0 : i32
    %c0_i32_0 = arith.constant 0 : i32
    %c0_i32_1 = arith.constant 0 : i32
    return %c0_i32, %c0_i32_0 : i32, i32
  }
  func.func @transform_6(%arg0: i32) -> (i32, i32, i32) {
    %c0_i32 = arith.constant 0 : i32
    %c0_i32_0 = arith.constant 0 : i32
    %c0_i32_1 = arith.constant 0 : i32
    %c0_i32_2 = arith.constant 0 : i32
    return %c0_i32, %c0_i32_0, %c0_i32_1 : i32, i32, i32
  }
  func.func @transform_7(%arg0: i32) -> (i32, i32) {
    %c0_i32 = arith.constant 0 : i32
    %c0_i32_0 = arith.constant 0 : i32
    %c0_i32_1 = arith.constant 0 : i32
    return %c0_i32, %c0_i32_0 : i32, i32
  }
  func.func @transform_8(%arg0: i32) -> (i32, i32) {
    %c0_i32 = arith.constant 0 : i32
    %c0_i32_0 = arith.constant 0 : i32
    %c0_i32_1 = arith.constant 0 : i32
    return %c0_i32, %c0_i32_0 : i32, i32
  }
  func.func @transform_9(%arg0: i32) -> (i32, i32) {
    %c0_i32 = arith.constant 0 : i32
    %c0_i32_0 = arith.constant 0 : i32
    %c0_i32_1 = arith.constant 0 : i32
    return %c0_i32, %c0_i32_0 : i32, i32
  }
  func.func @transform_10(%arg0: i32) -> (i32, i32) {
    %c0_i32 = arith.constant 0 : i32
    %c0_i32_0 = arith.constant 0 : i32
    return %arg0, %c0_i32 : i32, i32
  }
}

</mosaic_0001>

<bundles_post_ra>
// kernel: cnn_forward.1
= control target key start
LH: loop header
LB: loop body
LE: loop exit
PB: predicated region body
PF: predicated region fallthrough
CT: control target
= control target key end

     0   :  { %vm20078_vm0 = vmmov 0   ;;  %vm9755_vm1 = vcmask 1043456   ;;  %vm8696_vm2 = vcmask 523264   ;;  %vm11609_vm3 = vcmask 261120   ;;  %s28450_s2 = inlined_call_operand.vmem [shape: bf16[2688,320], index: 2, kind: input, shape index: {}]   ;;  %s28451_s0 = inlined_call_operand.vmem [shape: bf16[80,2688], index: 0, kind: input, shape index: {}]   ;;  %s28452_s3 = inlined_call_operand.vmem [shape: f32[1,320], index: 3, kind: input, shape index: {}]   ;;  %s28453_s1 = inlined_call_operand.vmem [shape: bf16[80,2688], index: 1, kind: input, shape index: {}]   ;;  %s28454_s4 = inlined_call_operand.vmem [shape: bf16[4,320,288], index: 4, kind: input, shape index: {}]   ;;  %s28455_s6 = inlined_call_operand.vmem [shape: bf16[9,288,256], index: 6, kind: input, shape index: {}]   ;;  %s28456_s5 = inlined_call_operand.vmem [shape: f32[1,288], index: 5, kind: input, shape index: {}]   ;;  %s28457_s8 = inlined_call_operand.vmem [shape: bf16[256,128], index: 8, kind: input, shape index: {}]   ;;  %s28458_s7 = inlined_call_operand.vmem [shape: f32[1,256], index: 7, kind: input, shape index: {}]   ;;  %s28459_s9 = inlined_call_operand.vmem [shape: f32[1,128], index: 9, kind: input, shape index: {}]   ;;  %s28460_s10 = inlined_call_operand.vmem [shape: f32[8,128], index: 10, kind: output, shape index: {}]  }
   0x1   :  { %v17557_v0 = vld [vmem:[%s28450_s2 + $0xac] ss:$12 sps:$4 sm:$0xff]   ;;  %v17561_v2 = vld [vmem:[%s28450_s2 + $0xa8] ss:$12 sps:$4 sm:$0xff]   ;;  %v17567_v6 = vld [vmem:[%s28450_s2 + $0x90] ss:$12 sps:$4 sm:$0xff]  }
   0x2   :  { %v17559_v1 = vld [vmem:[%s28450_s2 + $0x22c] ss:$12 sps:$4 sm:$0xff]   ;;  %4053 = vmatprep.subr.bf16.mxu0 %v17557_v0  ;;  %v17562_v3 = vld [vmem:[%s28450_s2 + $0x228] ss:$12 sps:$4 sm:$0xff]   ;;  %v17568_v7 = vld [vmem:[%s28450_s2 + $0x210] ss:$12 sps:$4 sm:$0xff]  }
   0x3   :  { %4136 = vmatprep.subr.bf16.mxu1 %v17559_v1  ;;  %v17563_v4 = vld [vmem:[%s28450_s2 + $0x94] ss:$12 sps:$4 sm:$0xff]   ;;  %4054 = vmatpush1.bf16.msra.mxu0 %v17561_v2  ;;  %v17569_v8 = vld [vmem:[%s28450_s2 + $0x7c] ss:$12 sps:$4 sm:$0xff]   ;;  %v17573_v10 = vld [vmem:[%s28450_s2 + $0x78] ss:$12 sps:$4 sm:$0xff]  }
   0x4   :  { %4137 = vmatpush1.bf16.msra.mxu1 %v17562_v3  ;;  %v17565_v5 = vld [vmem:[%s28450_s2 + $0x214] ss:$12 sps:$4 sm:$0xff]   ;;  %4055 = vmatprep.subr.bf16.mxu0 %v17563_v4  ;;  %v17571_v9 = vld [vmem:[%s28450_s2 + $0x1fc] ss:$12 sps:$4 sm:$0xff]   ;;  %v17574_v11 = vld [vmem:[%s28450_s2 + $0x1f8] ss:$12 sps:$4 sm:$0xff]  }
   0x5   :  { %4138 = vmatprep.subr.bf16.mxu1 %v17565_v5  ;;  %v17575_v12 = vld [vmem:[%s28450_s2 + $0x64] ss:$12 sps:$4 sm:$0xff]   ;;  %v17579_v14 = vld [vmem:[%s28450_s2 + $0x60] ss:$12 sps:$4 sm:$0xff]   ;;  %v17585_v18 = vld [vmem:[%s28450_s2 + $0x48] ss:$12 sps:$4 sm:$0xff]  }
   0x6   :  { %v17577_v13 = vld [vmem:[%s28450_s2 + $0x1e4] ss:$12 sps:$4 sm:$0xff]   ;;  %v17580_v15 = vld [vmem:[%s28450_s2 + $0x1e0] ss:$12 sps:$4 sm:$0xff]   ;;  %v17586_v19 = vld [vmem:[%s28450_s2 + $0x1c8] ss:$12 sps:$4 sm:$0xff]  }
   0x7   :  { %4056 = vmatpush1.bf16.msra.mxu0 %v17567_v6  ;;  %v17581_v16 = vld [vmem:[%s28450_s2 + $0x4c] ss:$12 sps:$4 sm:$0xff]   ;;  %v17587_v20 = vld [vmem:[%s28450_s2 + $0x34] ss:$12 sps:$4 sm:$0xff]   ;;  %v17591_v22 = vld [vmem:[%s28450_s2 + $0x30] ss:$12 sps:$4 sm:$0xff]  }
   0x8   :  { %4139 = vmatpush1.bf16.msra.mxu1 %v17568_v7  ;;  %4057 = vmatprep.subr.bf16.mxu0 %v17569_v8  ;;  %v17583_v17 = vld [vmem:[%s28450_s2 + $0x1cc] ss:$12 sps:$4 sm:$0xff]   ;;  %v17589_v21 = vld [vmem:[%s28450_s2 + $0x1b4] ss:$12 sps:$4 sm:$0xff]   ;;  %v17592_v23 = vld [vmem:[%s28450_s2 + $0x1b0] ss:$12 sps:$4 sm:$0xff]  }
   0x9   :  { %4140 = vmatprep.subr.bf16.mxu1 %v17571_v9  ;;  %v17593_v24 = vld [vmem:[%s28450_s2 + $0x1c] ss:$12 sps:$4 sm:$0xff]   ;;  %v17597_v26 = vld [vmem:[%s28450_s2 + $0x18] ss:$12 sps:$4 sm:$0xff]   ;;  %v17603_v30 = vld [vmem:[%s28450_s2] ss:$12 sps:$4 sm:$0xff]  }
   0xa   :  { %v17595_v25 = vld [vmem:[%s28450_s2 + $0x19c] ss:$12 sps:$4 sm:$0xff]   ;;  %v17598_v27 = vld [vmem:[%s28450_s2 + $0x198] ss:$12 sps:$4 sm:$0xff]   ;;  %v17604_v31 = vld [vmem:[%s28450_s2 + $0x180] ss:$12 sps:$4 sm:$0xff]  }
   0xb   :  { %4058 = vmatpush1.bf16.msra.mxu0 %v17573_v10  ;;  %v17599_v28 = vld [vmem:[%s28450_s2 + $0x4] ss:$12 sps:$4 sm:$0xff]   ;;  %v17605_v32 = vld [vmem:[%s28450_s2 + $0x16c] ss:$12 sps:$4 sm:$0xff]   ;;  %v17609_v34 = vld [vmem:[%s28450_s2 + $0x168] ss:$12 sps:$4 sm:$0xff]  }
   0xc   :  { %4141 = vmatpush1.bf16.msra.mxu1 %v17574_v11  ;;  %4059 = vmatprep.subr.bf16.mxu0 %v17575_v12  ;;  %v17601_v29 = vld [vmem:[%s28450_s2 + $0x184] ss:$12 sps:$4 sm:$0xff]   ;;  %v17607_v33 = vld [vmem:[%s28450_s2 + $0x2ec] ss:$12 sps:$4 sm:$0xff]   ;;  %v17610_v35 = vld [vmem:[%s28450_s2 + $0x2e8] ss:$12 sps:$4 sm:$0xff]  }
   0xd   :  { %4142 = vmatprep.subr.bf16.mxu1 %v17577_v13  ;;  %v17611_v36 = vld [vmem:[%s28450_s2 + $0x154] ss:$12 sps:$4 sm:$0xff]   ;;  %v17615_v38 = vld [vmem:[%s28450_s2 + $0x150] ss:$12 sps:$4 sm:$0xff]   ;;  %v17621_v42 = vld [vmem:[%s28450_s2 + $0x138] ss:$12 sps:$4 sm:$0xff]  }
   0xe   :  { %v17613_v37 = vld [vmem:[%s28450_s2 + $0x2d4] ss:$12 sps:$4 sm:$0xff]   ;;  %v17616_v39 = vld [vmem:[%s28450_s2 + $0x2d0] ss:$12 sps:$4 sm:$0xff]   ;;  %v17622_v43 = vld [vmem:[%s28450_s2 + $0x2b8] ss:$12 sps:$4 sm:$0xff]  }
   0xf   :  { %4060 = vmatpush1.bf16.msra.mxu0 %v17579_v14  ;;  %v17617_v40 = vld [vmem:[%s28450_s2 + $0x13c] ss:$12 sps:$4 sm:$0xff]   ;;  %v17623_v44 = vld [vmem:[%s28450_s2 + $0x124] ss:$12 sps:$4 sm:$0xff]   ;;  %v17627_v46 = vld [vmem:[%s28450_s2 + $0x120] ss:$12 sps:$4 sm:$0xff]  }
  0x10   :  { %4143 = vmatpush1.bf16.msra.mxu1 %v17580_v15  ;;  %4061 = vmatprep.subr.bf16.mxu0 %v17581_v16  ;;  %v17619_v41 = vld [vmem:[%s28450_s2 + $0x2bc] ss:$12 sps:$4 sm:$0xff]   ;;  %v17625_v45 = vld [vmem:[%s28450_s2 + $0x2a4] ss:$12 sps:$4 sm:$0xff]   ;;  %v17628_v47 = vld [vmem:[%s28450_s2 + $0x2a0] ss:$12 sps:$4 sm:$0xff]  }
  0x11   :  { %4144 = vmatprep.subr.bf16.mxu1 %v17583_v17  ;;  %v17629_v48 = vld [vmem:[%s28450_s2 + $0x10c] ss:$12 sps:$4 sm:$0xff]   ;;  %v17633_v52 = vld [vmem:[%s28450_s2 + $0x108] ss:$12 sps:$4 sm:$0xff]   ;;  %v17639_v56 = vld [vmem:[%s28450_s2 + $0xf0] ss:$12 sps:$4 sm:$0xff]  }
  0x12   :  { %v17655_v49 = vld [vmem:[%s28451_s0 + $0x4] ss:$84 sps:$4 sm:$0xff]   ;;  %v17658_v51 = vld [vmem:[%s28451_s0 + $0xc] ss:$84 sps:$4 sm:$0xff]   ;;  %v17634_v53 = vld [vmem:[%s28450_s2 + $0x288] ss:$12 sps:$4 sm:$0xff]  }
  0x13   :  { %4062 = vmatpush1.bf16.msra.mxu0 %v17585_v18  ;;  %v17631_v50 = vld [vmem:[%s28450_s2 + $0x28c] ss:$12 sps:$4 sm:$0xff]   ;;  %4085 = vmatprep.mubr.bf16.mxu0 %v17655_v49  ;;  %v17635_v54 = vld [vmem:[%s28450_s2 + $0xf4] ss:$12 sps:$4 sm:$0xff]   ;;  %v17640_v57 = vld [vmem:[%s28450_s2 + $0x270] ss:$12 sps:$4 sm:$0xff]  }
  0x14   :  { %4145 = vmatpush1.bf16.msra.mxu1 %v17586_v19  ;;  %4063 = vmatprep.subr.bf16.mxu0 %v17587_v20  ;;  %v17637_v55 = vld [vmem:[%s28450_s2 + $0x274] ss:$12 sps:$4 sm:$0xff]   ;;  %v17641_v58 = vld [vmem:[%s28450_s2 + $0xdc] ss:$12 sps:$4 sm:$0xff]   ;;  %v17645_v60 = vld [vmem:[%s28450_s2 + $0xd8] ss:$12 sps:$4 sm:$0xff]  }
  0x15   :  { %4146 = vmatprep.subr.bf16.mxu1 %v17589_v21  ;;  %4168 = vmatprep.mubr.bf16.mxu1 %v17658_v51  ;;  %v17643_v59 = vld [vmem:[%s28450_s2 + $0x25c] ss:$12 sps:$4 sm:$0xff]   ;;  %v17646_v61 = vld [vmem:[%s28450_s2 + $0x258] ss:$12 sps:$4 sm:$0xff]   ;;  %v17651_v0 = vld [vmem:[%s28450_s2 + $0xc0] ss:$12 sps:$4 sm:$0xff]  }
  0x16   :  { %v17647_v62 = vld [vmem:[%s28450_s2 + $0xc4] ss:$12 sps:$4 sm:$0xff]   ;;  %v17652_v1 = vld [vmem:[%s28450_s2 + $0x240] ss:$12 sps:$4 sm:$0xff]   ;;  %v17656_v5 = vld [vmem:[%s28451_s0 + $0x8] ss:$84 sps:$4 sm:$0xff]  }
  0x17   :  { %4064 = vmatpush1.bf16.msra.mxu0 %v17591_v22  ;;  %v17649_v63 = vld [vmem:[%s28450_s2 + $0x244] ss:$12 sps:$4 sm:$0xff]   ;;  %v17661_v2 = vld [vmem:[%s28450_s2 + $0x3ac] ss:$12 sps:$4 sm:$0xff]   ;;  %v17653_v3 = vld [vmem:[%s28451_s0] ss:$84 sps:$4 sm:$0xff]  }
  0x18   :  { %4147 = vmatpush1.bf16.msra.mxu1 %v17592_v23  ;;  %4065 = vmatprep.subr.bf16.mxu0 %v17593_v24  ;;  %v17664_v4 = vld [vmem:[%s28450_s2 + $0x52c] ss:$12 sps:$4 sm:$0xff]   ;;  %v17659_v6 = vld [vmem:[%s28450_s2 + $0x3a8] ss:$12 sps:$4 sm:$0xff]   ;;  %v17665_v12 = vld [vmem:[%s28450_s2 + $0x390] ss:$12 sps:$4 sm:$0xff]  }
  0x19   :  { %4148 = vmatprep.subr.bf16.mxu1 %v17595_v25  ;;  %v17662_v7 = vld [vmem:[%s28450_s2 + $0x528] ss:$12 sps:$4 sm:$0xff]   ;;  %v17701_v10 = vld [vmem:[%s28451_s0 + $0xac] ss:$84 sps:$4 sm:$0xff]   ;;  %v17668_v13 = vld [vmem:[%s28450_s2 + $0x510] ss:$12 sps:$4 sm:$0xff]  }
  0x1a   :  { %v17667_v8 = vld [vmem:[%s28450_s2 + $0x394] ss:$12 sps:$4 sm:$0xff]   ;;  %v17673_v14 = vld [vmem:[%s28450_s2 + $0x37c] ss:$12 sps:$4 sm:$0xff]   ;;  %v17671_v16 = vld [vmem:[%s28450_s2 + $0x378] ss:$12 sps:$4 sm:$0xff]  }
  0x1b   :  { %4066 = vmatpush1.bf16.msra.mxu0 %v17597_v26  ;;  %v17670_v9 = vld [vmem:[%s28450_s2 + $0x514] ss:$12 sps:$4 sm:$0xff]   ;;  %v17676_v15 = vld [vmem:[%s28450_s2 + $0x4fc] ss:$12 sps:$4 sm:$0xff]   ;;  %v17674_v17 = vld [vmem:[%s28450_s2 + $0x4f8] ss:$12 sps:$4 sm:$0xff]  }
  0x1c   :  { %4149 = vmatpush1.bf16.msra.mxu1 %v17598_v27  ;;  %4067 = vmatprep.subr.bf16.mxu0 %v17599_v28  ;;  %v17704_v11 = vld [vmem:[%s28451_s0 + $0xb4] ss:$84 sps:$4 sm:$0xff]   ;;  %v17679_v18 = vld [vmem:[%s28450_s2 + $0x364] ss:$12 sps:$4 sm:$0xff]   ;;  %v17677_v24 = vld [vmem:[%s28450_s2 + $0x360] ss:$12 sps:$4 sm:$0xff]  }
  0x1d   :  { %4150 = vmatprep.subr.bf16.mxu1 %v17601_v29  ;;  %v17703_v19 = vld [vmem:[%s28451_s0 + $0xa8] ss:$84 sps:$4 sm:$0xff]   ;;  %v17712_v20 = vld [vmem:[%s28451_s0 + $0xb0] ss:$84 sps:$4 sm:$0xff]   ;;  %v17680_v25 = vld [vmem:[%s28450_s2 + $0x4e0] ss:$12 sps:$4 sm:$0xff]  }
  0x1e   :  { %v17682_v21 = vld [vmem:[%s28450_s2 + $0x4e4] ss:$12 sps:$4 sm:$0xff]   ;;  %v17719_v22 = vld [vmem:[%s28451_s0 + $0x154] ss:$84 sps:$4 sm:$0xff]   ;;  %v17685_v26 = vld [vmem:[%s28450_s2 + $0x34c] ss:$12 sps:$4 sm:$0xff]  }
  0x1f   :  { %4068 = vmatpush1.bf16.msra.mxu0 %v17603_v30  ;;  %v17722_v23 = vld [vmem:[%s28451_s0 + $0x15c] ss:$84 sps:$4 sm:$0xff]   ;;  %v17688_v27 = vld [vmem:[%s28450_s2 + $0x4cc] ss:$12 sps:$4 sm:$0xff]   ;;  %v17683_v28 = vld [vmem:[%s28450_s2 + $0x348] ss:$12 sps:$4 sm:$0xff]  }
  0x20   :  { %4151 = vmatpush1.bf16.msra.mxu1 %v17604_v31  ;;  %4069 = vmatprep.subr.bf16.mxu0 %v17605_v32  ;;  %v17686_v29 = vld [vmem:[%s28450_s2 + $0x4c8] ss:$12 sps:$4 sm:$0xff]   ;;  %v17721_v31 = vld [vmem:[%s28451_s0 + $0x150] ss:$84 sps:$4 sm:$0xff]   ;;  %v17730_v32 = vld [vmem:[%s28451_s0 + $0x158] ss:$84 sps:$4 sm:$0xff]  }
  0x21   :  { %4152 = vmatprep.subr.bf16.mxu1 %v17607_v33  ;;  %v17691_v30 = vld [vmem:[%s28450_s2 + $0x334] ss:$12 sps:$4 sm:$0xff]   ;;  %v17718_v51 = vld [vmem:[%s28450_s2 + $0x5ec] ss:$12 sps:$4 sm:$0xff]  }
  0x22   :  { %v17694_v33 = vld [vmem:[%s28450_s2 + $0x4b4] ss:$12 sps:$4 sm:$0xff]  }
  0x23   :  { %4070 = vmatpush2.bf16.msra.mxu0 %v17609_v34  ;;  %v17737_v34 = vld [vmem:[%s28451_s0 + $0x1fc] ss:$84 sps:$4 sm:$0xff]   ;;  %v17709_v49 = vld [vmem:[%s28450_s2 + $0x480] ss:$12 sps:$4 sm:$0xff]  }
  0x24   :  { %4153 = vmatpush2.bf16.msra.mxu1 %v17610_v35  ;;  %4071 = vmatprep.subr.bf16.mxu0 %v17611_v36  ;;  %v17740_v35 = vld [vmem:[%s28451_s0 + $0x204] ss:$84 sps:$4 sm:$0xff]   ;;  %v17689_v36 = vld [vmem:[%s28450_s2 + $0x330] ss:$12 sps:$4 sm:$0xff]  }
  0x25   :  { %4154 = vmatprep.subr.bf16.mxu1 %v17613_v37  ;;  %v17692_v37 = vld [vmem:[%s28450_s2 + $0x4b0] ss:$12 sps:$4 sm:$0xff]  }
  0x27   :  { %4072 = vmatpush2.bf16.msra.mxu0 %v17615_v38  ;;  %v17697_v38 = vld [vmem:[%s28450_s2 + $0x31c] ss:$12 sps:$4 sm:$0xff]  }
  0x28   :  { %4155 = vmatpush2.bf16.msra.mxu1 %v17616_v39  ;;  %4073 = vmatprep.subr.bf16.mxu0 %v17617_v40  ;;  %v17700_v39 = vld [vmem:[%s28450_s2 + $0x49c] ss:$12 sps:$4 sm:$0xff]   ;;  %v17695_v40 = vld [vmem:[%s28450_s2 + $0x318] ss:$12 sps:$4 sm:$0xff]  }
  0x29   :  { %4156 = vmatprep.subr.bf16.mxu1 %v17619_v41  ;;  %v17698_v41 = vld [vmem:[%s28450_s2 + $0x498] ss:$12 sps:$4 sm:$0xff]  }
  0x2b   :  { %4074 = vmatpush2.bf16.msra.mxu0 %v17621_v42  ;;  %v17708_v42 = vld [vmem:[%s28450_s2 + $0x304] ss:$12 sps:$4 sm:$0xff]  }
  0x2c   :  { %4157 = vmatpush2.bf16.msra.mxu1 %v17622_v43  ;;  %4075 = vmatprep.subr.bf16.mxu0 %v17623_v44  ;;  %v17739_v43 = vld [vmem:[%s28451_s0 + $0x1f8] ss:$84 sps:$4 sm:$0xff]   ;;  %v17748_v44 = vld [vmem:[%s28451_s0 + $0x200] ss:$84 sps:$4 sm:$0xff]  }
  0x2d   :  { %4158 = vmatprep.subr.bf16.mxu1 %v17625_v45  ;;  %v17711_v45 = vld [vmem:[%s28450_s2 + $0x484] ss:$12 sps:$4 sm:$0xff]  }
  0x2f   :  { %4076 = vmatpush2.bf16.msra.mxu0 %v17627_v46  ;;  %v17755_v46 = vld [vmem:[%s28451_s0 + $0x2a4] ss:$84 sps:$4 sm:$0xff]  }
  0x30   :  { %4159 = vmatpush2.bf16.msra.mxu1 %v17628_v47  ;;  %4077 = vmatprep.subr.bf16.mxu0 %v17629_v48  ;;  %v17758_v47 = vld [vmem:[%s28451_s0 + $0x2ac] ss:$84 sps:$4 sm:$0xff]  }
  0x31   :  { %4160 = vmatprep.subr.bf16.mxu1 %v17631_v50  ;;  %v17706_v48 = vld [vmem:[%s28450_s2 + $0x300] ss:$12 sps:$4 sm:$0xff]  }
  0x32   :  { %v17715_v50 = vld [vmem:[%s28450_s2 + $0x46c] ss:$12 sps:$4 sm:$0xff]  }
  0x33   :  { %4078 = vmatpush2.bf16.msra.mxu0 %v17633_v52  ;;  %v17713_v52 = vld [vmem:[%s28450_s2 + $0x468] ss:$12 sps:$4 sm:$0xff]  }
  0x34   :  { %4161 = vmatpush2.bf16.msra.mxu1 %v17634_v53  ;;  %4079 = vmatprep.subr.bf16.mxu0 %v17635_v54  ;;  %v17716_v53 = vld [vmem:[%s28450_s2 + $0x5e8] ss:$12 sps:$4 sm:$0xff]  }
  0x35   :  { %4162 = vmatprep.subr.bf16.mxu1 %v17637_v55  ;;  %v17757_v54 = vld [vmem:[%s28451_s0 + $0x2a0] ss:$84 sps:$4 sm:$0xff]   ;;  %v17766_v55 = vld [vmem:[%s28451_s0 + $0x2a8] ss:$84 sps:$4 sm:$0xff]  }
  0x37   :  { %4080 = vmatpush2.bf16.msra.mxu0 %v17639_v56  ;;  %v17726_v56 = vld [vmem:[%s28450_s2 + $0x454] ss:$12 sps:$4 sm:$0xff]  }
  0x38   :  { %4163 = vmatpush2.bf16.msra.mxu1 %v17640_v57  ;;  %4081 = vmatprep.subr.bf16.mxu0 %v17641_v58  ;;  %v17729_v57 = vld [vmem:[%s28450_s2 + $0x5d4] ss:$12 sps:$4 sm:$0xff]   ;;  %v17724_v58 = vld [vmem:[%s28450_s2 + $0x450] ss:$12 sps:$4 sm:$0xff]  }
  0x39   :  { %4164 = vmatprep.subr.bf16.mxu1 %v17643_v59  ;;  %v17727_v59 = vld [vmem:[%s28450_s2 + $0x5d0] ss:$12 sps:$4 sm:$0xff]  }
  0x3b   :  { %4082 = vmatpush2.bf16.msra.mxu0 %v17645_v60  ;;  %v17733_v60 = vld [vmem:[%s28450_s2 + $0x43c] ss:$12 sps:$4 sm:$0xff]  }
  0x3c   :  { %4165 = vmatpush2.bf16.msra.mxu1 %v17646_v61  ;;  %4083 = vmatprep.subr.bf16.mxu0 %v17647_v62  ;;  %v17781_v61 = vld [vmem:[%s28451_s0 + $0x14] ss:$84 sps:$4 sm:$0xff]  }
  0x3d   :  { %4166 = vmatprep.subr.bf16.mxu1 %v17649_v63  ;;  %v17736_v62 = vld [vmem:[%s28450_s2 + $0x5bc] ss:$12 sps:$4 sm:$0xff]  }
  0x3e   :  { %v17784_v63 = vld [vmem:[%s28451_s0 + $0x1c] ss:$84 sps:$4 sm:$0xff]  }
  0x3f   :  { %4084 = vmatpush2.bf16.msra.mxu0 %v17651_v0  ;;  %v17731_v0 = vld [vmem:[%s28450_s2 + $0x438] ss:$12 sps:$4 sm:$0xff]  }
  0x40   :  { %4167 = vmatpush2.bf16.msra.mxu1 %v17652_v1  ;;  %4219 = vmatprep.subr.bf16.mxu0 %v17661_v2  ;;  %v17734_v1 = vld [vmem:[%s28450_s2 + $0x5b8] ss:$12 sps:$4 sm:$0xff]  }
  0x41   :  { %4302 = vmatprep.subr.bf16.mxu1 %v17664_v4  ;;  %v17744_v2 = vld [vmem:[%s28450_s2 + $0x424] ss:$12 sps:$4 sm:$0xff]   ;;  %v17742_v4 = vld [vmem:[%s28450_s2 + $0x420] ss:$12 sps:$4 sm:$0xff]  }
  0x42   :  { %4086 = vmatmul.mubr.bf16.vlgmr.msra.gmra.mxu0 %v17653_v3  ;;  %v17747_v3 = vld [vmem:[%s28450_s2 + $0x5a4] ss:$12 sps:$4 sm:$0xff]  }
  0x43   :  { %4169 = vmatmul.mubr.bf16.vlgmr.msra.gmra.mxu1 %v17656_v5  ;;  %4220 = vmatpush1.bf16.msra.mxu0 %v17659_v6  ;;  %v17745_v5 = vld [vmem:[%s28450_s2 + $0x5a0] ss:$12 sps:$4 sm:$0xff]  }
  0x44   :  { %4303 = vmatpush1.bf16.msra.mxu1 %v17662_v7  ;;  %4221 = vmatprep.subr.bf16.mxu0 %v17667_v8  ;;  %v17751_v6 = vld [vmem:[%s28450_s2 + $0x40c] ss:$12 sps:$4 sm:$0xff]   ;;  %v17749_v8 = vld [vmem:[%s28450_s2 + $0x408] ss:$12 sps:$4 sm:$0xff]  }
  0x45   :  { %4304 = vmatprep.subr.bf16.mxu1 %v17670_v9  ;;  %4095 = vmatprep.mubr.bf16.mxu0 %v17701_v10  ;;  %v17754_v7 = vld [vmem:[%s28450_s2 + $0x58c] ss:$12 sps:$4 sm:$0xff]   ;;  %v17752_v9 = vld [vmem:[%s28450_s2 + $0x588] ss:$12 sps:$4 sm:$0xff]  }
  0x46   :  { %4178 = vmatprep.mubr.bf16.mxu1 %v17704_v11  ;;  %v17762_v10 = vld [vmem:[%s28450_s2 + $0x3f4] ss:$12 sps:$4 sm:$0xff]  }
  0x47   :  { %4222 = vmatpush1.bf16.msra.mxu0 %v17665_v12  ;;  %v17765_v11 = vld [vmem:[%s28450_s2 + $0x574] ss:$12 sps:$4 sm:$0xff]   ;;  %v17760_v12 = vld [vmem:[%s28450_s2 + $0x3f0] ss:$12 sps:$4 sm:$0xff]  }
  0x48   :  { %4305 = vmatpush1.bf16.msra.mxu1 %v17668_v13  ;;  %4223 = vmatprep.subr.bf16.mxu0 %v17673_v14  ;;  %v17763_v13 = vld [vmem:[%s28450_s2 + $0x570] ss:$12 sps:$4 sm:$0xff]  }
  0x49   :  { %4306 = vmatprep.subr.bf16.mxu1 %v17676_v15  ;;  %v17769_v14 = vld [vmem:[%s28450_s2 + $0x3dc] ss:$12 sps:$4 sm:$0xff]  }
  0x4a   :  { %4096 = vmatmul.mubr.bf16.gmra.mxu0 %v17703_v19  ;;  %v17772_v15 = vld [vmem:[%s28450_s2 + $0x55c] ss:$12 sps:$4 sm:$0xff]   ;;  %v17778_v19 = vld [vmem:[%s28450_s2 + $0x544] ss:$12 sps:$4 sm:$0xff]  }
  0x4b   :  { %4179 = vmatmul.mubr.bf16.gmra.mxu1 %v17712_v20  ;;  %4224 = vmatpush1.bf16.msra.mxu0 %v17671_v16  ;;  %v17767_v16 = vld [vmem:[%s28450_s2 + $0x3d8] ss:$12 sps:$4 sm:$0xff]   ;;  %v17773_v20 = vld [vmem:[%s28450_s2 + $0x3c0] ss:$12 sps:$4 sm:$0xff]  }
  0x4c   :  { %4307 = vmatpush1.bf16.msra.mxu1 %v17674_v17  ;;  %4225 = vmatprep.subr.bf16.mxu0 %v17679_v18  ;;  %v17770_v17 = vld [vmem:[%s28450_s2 + $0x558] ss:$12 sps:$4 sm:$0xff]  }
  0x4d   :  { %4308 = vmatprep.subr.bf16.mxu1 %v17682_v21  ;;  %4105 = vmatprep.mubr.bf16.mxu0 %v17719_v22  ;;  %v17775_v18 = vld [vmem:[%s28450_s2 + $0x3c4] ss:$12 sps:$4 sm:$0xff]   ;;  %v17776_v21 = vld [vmem:[%s28450_s2 + $0x540] ss:$12 sps:$4 sm:$0xff]  }
  0x4e   :  { %4188 = vmatprep.mubr.bf16.mxu1 %v17722_v23  ;;  %v17787_v22 = vld [vmem:[%s28450_s2 + $0x6ac] ss:$12 sps:$4 sm:$0xff]  }
  0x4f   :  { %4226 = vmatpush1.bf16.msra.mxu0 %v17677_v24  ;;  %v17790_v23 = vld [vmem:[%s28450_s2 + $0x82c] ss:$12 sps:$4 sm:$0xff]   ;;  %v17779_v24 = vld [vmem:[%s28451_s0 + $0x10] ss:$84 sps:$4 sm:$0xff]  }
  0x50   :  { %4309 = vmatpush1.bf16.msra.mxu1 %v17680_v25  ;;  %4227 = vmatprep.subr.bf16.mxu0 %v17685_v26  ;;  %v17782_v25 = vld [vmem:[%s28451_s0 + $0x18] ss:$84 sps:$4 sm:$0xff]   ;;  %v17785_v26 = vld [vmem:[%s28450_s2 + $0x6a8] ss:$12 sps:$4 sm:$0xff]  }
  0x51   :  { %4310 = vmatprep.subr.bf16.mxu1 %v17688_v27  ;;  %v17788_v27 = vld [vmem:[%s28450_s2 + $0x828] ss:$12 sps:$4 sm:$0xff]  }
  0x52   :  { %4106 = vmatmul.mubr.bf16.gmra.mxu0 %v17721_v31  ;;  %v17806_v31 = vld [vmem:[%s28451_s0 + $0xc4] ss:$84 sps:$4 sm:$0xff]  }
  0x53   :  { %4189 = vmatmul.mubr.bf16.gmra.mxu1 %v17730_v32  ;;  %4228 = vmatpush1.bf16.msra.mxu0 %v17683_v28  ;;  %v17793_v28 = vld [vmem:[%s28450_s2 + $0x694] ss:$12 sps:$4 sm:$0xff]   ;;  %v17791_v32 = vld [vmem:[%s28450_s2 + $0x690] ss:$12 sps:$4 sm:$0xff]  }
  0x54   :  { %4311 = vmatpush1.bf16.msra.mxu1 %v17686_v29  ;;  %4229 = vmatprep.subr.bf16.mxu0 %v17691_v30  ;;  %v17796_v29 = vld [vmem:[%s28450_s2 + $0x814] ss:$12 sps:$4 sm:$0xff]   ;;  %v17797_v30 = vld [vmem:[%s28451_s0 + $0xbc] ss:$84 sps:$4 sm:$0xff]  }
  0x55   :  { %4312 = vmatprep.subr.bf16.mxu1 %v17694_v33  ;;  %4115 = vmatprep.mubr.bf16.mxu0 %v17737_v34  ;;  %v17794_v33 = vld [vmem:[%s28450_s2 + $0x810] ss:$12 sps:$4 sm:$0xff]  }
  0x56   :  { %4198 = vmatprep.mubr.bf16.mxu1 %v17740_v35  ;;  %v17802_v34 = vld [vmem:[%s28450_s2 + $0x67c] ss:$12 sps:$4 sm:$0xff]  }
  0x57   :  { %4230 = vmatpush1.bf16.msra.mxu0 %v17689_v36  ;;  %v17805_v35 = vld [vmem:[%s28450_s2 + $0x7fc] ss:$12 sps:$4 sm:$0xff]   ;;  %v17799_v36 = vld [vmem:[%s28451_s0 + $0xb8] ss:$84 sps:$4 sm:$0xff]  }
  0x58   :  { %4313 = vmatpush1.bf16.msra.mxu1 %v17692_v37  ;;  %4231 = vmatprep.subr.bf16.mxu0 %v17697_v38  ;;  %v17800_v37 = vld [vmem:[%s28450_s2 + $0x678] ss:$12 sps:$4 sm:$0xff]  }
  0x59   :  { %4314 = vmatprep.subr.bf16.mxu1 %v17700_v39  ;;  %v17803_v38 = vld [vmem:[%s28450_s2 + $0x7f8] ss:$12 sps:$4 sm:$0xff]   ;;  %v17808_v39 = vld [vmem:[%s28451_s0 + $0xc0] ss:$84 sps:$4 sm:$0xff]  }
  0x5a   :  { %4116 = vmatmul.mubr.bf16.gmra.mxu0 %v17739_v43  ;;  %v17824_v43 = vld [vmem:[%s28451_s0 + $0x16c] ss:$84 sps:$4 sm:$0xff]  }
  0x5b   :  { %4199 = vmatmul.mubr.bf16.gmra.mxu1 %v17748_v44  ;;  %4232 = vmatpush1.bf16.msra.mxu0 %v17695_v40  ;;  %v17811_v40 = vld [vmem:[%s28450_s2 + $0x664] ss:$12 sps:$4 sm:$0xff]   ;;  %v17809_v44 = vld [vmem:[%s28450_s2 + $0x660] ss:$12 sps:$4 sm:$0xff]  }
  0x5c   :  { %4315 = vmatpush1.bf16.msra.mxu1 %v17698_v41  ;;  %4233 = vmatprep.subr.bf16.mxu0 %v17708_v42  ;;  %v17814_v41 = vld [vmem:[%s28450_s2 + $0x7e4] ss:$12 sps:$4 sm:$0xff]  }
  0x5d   :  { %4316 = vmatprep.subr.bf16.mxu1 %v17711_v45  ;;  %4125 = vmatprep.mubr.bf16.mxu0 %v17755_v46  ;;  %v17815_v42 = vld [vmem:[%s28451_s0 + $0x164] ss:$84 sps:$4 sm:$0xff]   ;;  %v17812_v45 = vld [vmem:[%s28450_s2 + $0x7e0] ss:$12 sps:$4 sm:$0xff]  }
  0x5e   :  { %4208 = vmatprep.mubr.bf16.mxu1 %v17758_v47  ;;  %v17820_v46 = vld [vmem:[%s28450_s2 + $0x64c] ss:$12 sps:$4 sm:$0xff]  }
  0x5f   :  { %4234 = vmatpush1.bf16.msra.mxu0 %v17706_v48  ;;  %v17823_v47 = vld [vmem:[%s28450_s2 + $0x7cc] ss:$12 sps:$4 sm:$0xff]   ;;  %v17817_v48 = vld [vmem:[%s28451_s0 + $0x160] ss:$84 sps:$4 sm:$0xff]  }
  0x60   :  { %4317 = vmatpush1.bf16.msra.mxu1 %v17709_v49  ;;  %4235 = vmatprep.subr.bf16.mxu0 %v17715_v50  ;;  %v17818_v49 = vld [vmem:[%s28450_s2 + $0x648] ss:$12 sps:$4 sm:$0xff]  }
  0x61   :  { %4318 = vmatprep.subr.bf16.mxu1 %v17718_v51  ;;  %v17821_v50 = vld [vmem:[%s28450_s2 + $0x7c8] ss:$12 sps:$4 sm:$0xff]  }
  0x62   :  { %4126 = vmatmul.mubr.bf16.gmra.mxu0 %v17757_v54  ;;  %v17826_v51 = vld [vmem:[%s28451_s0 + $0x168] ss:$84 sps:$4 sm:$0xff]   ;;  %v17833_v54 = vld [vmem:[%s28451_s0 + $0x20c] ss:$84 sps:$4 sm:$0xff]  }
  0x63   :  { %4209 = vmatmul.mubr.bf16.gmra.mxu1 %v17766_v55  ;;  %4236 = vmatpush2.bf16.msra.mxu0 %v17713_v52  ;;  %v17829_v52 = vld [vmem:[%s28450_s2 + $0x634] ss:$12 sps:$4 sm:$0xff]  }
  0x64   :  { %4319 = vmatpush2.bf16.msra.mxu1 %v17716_v53  ;;  %4237 = vmatprep.subr.bf16.mxu0 %v17726_v56  ;;  %v17832_v53 = vld [vmem:[%s28450_s2 + $0x7b4] ss:$12 sps:$4 sm:$0xff]   ;;  %v17827_v56 = vld [vmem:[%s28450_s2 + $0x630] ss:$12 sps:$4 sm:$0xff]  }
  0x65   :  { %4320 = vmatprep.subr.bf16.mxu1 %v17729_v57  ;;  %4251 = vmatprep.mubr.bf16.mxu0 %v17781_v61  ;;  %v17842_v55 = vld [vmem:[%s28451_s0 + $0x214] ss:$84 sps:$4 sm:$0xff]   ;;  %v17830_v57 = vld [vmem:[%s28450_s2 + $0x7b0] ss:$12 sps:$4 sm:$0xff]   ;;  %v17836_v61 = vld [vmem:[%s28450_s2 + $0x618] ss:$12 sps:$4 sm:$0xff]  }
  0x66   :  { %4334 = vmatprep.mubr.bf16.mxu1 %v17784_v63  ;;  %v17844_v63 = vld [vmem:[%s28451_s0 + $0x210] ss:$84 sps:$4 sm:$0xff]  }
  0x67   :  { %4238 = vmatpush2.bf16.msra.mxu0 %v17724_v58  ;;  %v17838_v58 = vld [vmem:[%s28450_s2 + $0x61c] ss:$12 sps:$4 sm:$0xff]  }
  0x68   :  { %4321 = vmatpush2.bf16.msra.mxu1 %v17727_v59  ;;  %4239 = vmatprep.subr.bf16.mxu0 %v17733_v60  ;;  %v17841_v59 = vld [vmem:[%s28450_s2 + $0x79c] ss:$12 sps:$4 sm:$0xff]  }
  0x69   :  { %4322 = vmatprep.subr.bf16.mxu1 %v17736_v62  ;;  %v17835_v60 = vld [vmem:[%s28451_s0 + $0x208] ss:$84 sps:$4 sm:$0xff]   ;;  %v17839_v62 = vld [vmem:[%s28450_s2 + $0x798] ss:$12 sps:$4 sm:$0xff]  }
  0x6b   :  { %4240 = vmatpush2.bf16.msra.mxu0 %v17731_v0  ;;  %v17847_v0 = vld [vmem:[%s28450_s2 + $0x604] ss:$12 sps:$4 sm:$0xff]  }
  0x6c   :  { %4323 = vmatpush2.bf16.msra.mxu1 %v17734_v1  ;;  %4241 = vmatprep.subr.bf16.mxu0 %v17744_v2  ;;  %v17850_v1 = vld [vmem:[%s28450_s2 + $0x784] ss:$12 sps:$4 sm:$0xff]   ;;  %v17851_v2 = vld [vmem:[%s28451_s0 + $0x2b4] ss:$84 sps:$4 sm:$0xff]  }
  0x6d   :  { %4324 = vmatprep.subr.bf16.mxu1 %v17747_v3  ;;  %v17860_v3 = vld [vmem:[%s28451_s0 + $0x2bc] ss:$84 sps:$4 sm:$0xff]  }
  0x6f   :  { %4242 = vmatpush2.bf16.msra.mxu0 %v17742_v4  ;;  %v17845_v4 = vld [vmem:[%s28450_s2 + $0x600] ss:$12 sps:$4 sm:$0xff]  }
  0x70   :  { %4325 = vmatpush2.bf16.msra.mxu1 %v17745_v5  ;;  %4243 = vmatprep.subr.bf16.mxu0 %v17751_v6  ;;  %v17848_v5 = vld [vmem:[%s28450_s2 + $0x780] ss:$12 sps:$4 sm:$0xff]  }
  0x71   :  { %4326 = vmatprep.subr.bf16.mxu1 %v17754_v7  ;;  %v17856_v6 = vld [vmem:[%s28450_s2 + $0x76c] ss:$12 sps:$4 sm:$0xff]  }
  0x72   :  { %v17859_v7 = vld [vmem:[%s28450_s2 + $0x8ec] ss:$12 sps:$4 sm:$0xff]  }
  0x73   :  { %4244 = vmatpush2.bf16.msra.mxu0 %v17749_v8  ;;  %v17853_v8 = vld [vmem:[%s28451_s0 + $0x2b0] ss:$84 sps:$4 sm:$0xff]  }
  0x74   :  { %4327 = vmatpush2.bf16.msra.mxu1 %v17752_v9  ;;  %4245 = vmatprep.subr.bf16.mxu0 %v17762_v10  ;;  %v17854_v9 = vld [vmem:[%s28450_s2 + $0x768] ss:$12 sps:$4 sm:$0xff]  }
  0x75   :  { %4328 = vmatprep.subr.bf16.mxu1 %v17765_v11  ;;  %v17857_v10 = vld [vmem:[%s28450_s2 + $0x8e8] ss:$12 sps:$4 sm:$0xff]   ;;  %v17862_v11 = vld [vmem:[%s28451_s0 + $0x2b8] ss:$84 sps:$4 sm:$0xff]  }
  0x77   :  { %4246 = vmatpush2.bf16.msra.mxu0 %v17760_v12  ;;  %v17865_v12 = vld [vmem:[%s28450_s2 + $0x754] ss:$12 sps:$4 sm:$0xff]  }
  0x78   :  { %4329 = vmatpush2.bf16.msra.mxu1 %v17763_v13  ;;  %4247 = vmatprep.subr.bf16.mxu0 %v17769_v14  ;;  %v17868_v13 = vld [vmem:[%s28450_s2 + $0x8d4] ss:$12 sps:$4 sm:$0xff]   ;;  %v17907_v14 = vld [vmem:[%s28451_s0 + $0x24] ss:$84 sps:$4 sm:$0xff]  }
  0x79   :  { %4330 = vmatprep.subr.bf16.mxu1 %v17772_v15  ;;  %v17910_v15 = vld [vmem:[%s28451_s0 + $0x2c] ss:$84 sps:$4 sm:$0xff]  }
  0x7b   :  { %4248 = vmatpush2.bf16.msra.mxu0 %v17767_v16  ;;  %v17863_v16 = vld [vmem:[%s28450_s2 + $0x750] ss:$12 sps:$4 sm:$0xff]  }
  0x7c   :  { %4331 = vmatpush2.bf16.msra.mxu1 %v17770_v17  ;;  %4249 = vmatprep.subr.bf16.mxu0 %v17775_v18  ;;  %v17866_v17 = vld [vmem:[%s28450_s2 + $0x8d0] ss:$12 sps:$4 sm:$0xff]  }
  0x7d   :  { %4332 = vmatprep.subr.bf16.mxu1 %v17778_v19  ;;  %v17871_v18 = vld [vmem:[%s28450_s2 + $0x73c] ss:$12 sps:$4 sm:$0xff]  }
  0x7e   :  { %v17874_v19 = vld [vmem:[%s28450_s2 + $0x8bc] ss:$12 sps:$4 sm:$0xff]  }
  0x7f   :  { %4250 = vmatpush2.bf16.msra.mxu0 %v17773_v20  ;;  %v17869_v20 = vld [vmem:[%s28450_s2 + $0x738] ss:$12 sps:$4 sm:$0xff]  }
  0x80   :  { %4333 = vmatpush2.bf16.msra.mxu1 %v17776_v21  ;;  %4385 = vmatprep.subr.bf16.mxu0 %v17787_v22  ;;  %v17872_v21 = vld [vmem:[%s28450_s2 + $0x8b8] ss:$12 sps:$4 sm:$0xff]  }
  0x81   :  { %4468 = vmatprep.subr.bf16.mxu1 %v17790_v23  ;;  %v17877_v22 = vld [vmem:[%s28450_s2 + $0x724] ss:$12 sps:$4 sm:$0xff]  }
  0x82   :  { %4252 = vmatmul.mubr.bf16.vlgmr.msra.gmra.mxu0 %v17779_v24  ;;  %v17880_v23 = vld [vmem:[%s28450_s2 + $0x8a4] ss:$12 sps:$4 sm:$0xff]   ;;  %v17875_v24 = vld [vmem:[%s28450_s2 + $0x720] ss:$12 sps:$4 sm:$0xff]  }
  0x83   :  { %4335 = vmatmul.mubr.bf16.vlgmr.msra.gmra.mxu1 %v17782_v25  ;;  %4386 = vmatpush1.bf16.msra.mxu0 %v17785_v26  ;;  %v17878_v25 = vld [vmem:[%s28450_s2 + $0x8a0] ss:$12 sps:$4 sm:$0xff]  }
  0x84   :  { %4469 = vmatpush1.bf16.msra.mxu1 %v17788_v27  ;;  %4387 = vmatprep.subr.bf16.mxu0 %v17793_v28  ;;  %v17883_v26 = vld [vmem:[%s28450_s2 + $0x70c] ss:$12 sps:$4 sm:$0xff]   ;;  %v17881_v28 = vld [vmem:[%s28450_s2 + $0x708] ss:$12 sps:$4 sm:$0xff]  }
  0x85   :  { %4470 = vmatprep.subr.bf16.mxu1 %v17796_v29  ;;  %4261 = vmatprep.mubr.bf16.mxu0 %v17797_v30  ;;  %v17886_v27 = vld [vmem:[%s28450_s2 + $0x88c] ss:$12 sps:$4 sm:$0xff]   ;;  %v17884_v29 = vld [vmem:[%s28450_s2 + $0x888] ss:$12 sps:$4 sm:$0xff]  }
  0x86   :  { %4344 = vmatprep.mubr.bf16.mxu1 %v17806_v31  ;;  %v17889_v30 = vld [vmem:[%s28450_s2 + $0x6f4] ss:$12 sps:$4 sm:$0xff]  }
  0x87   :  { %4388 = vmatpush1.bf16.msra.mxu0 %v17791_v32  ;;  %v17892_v31 = vld [vmem:[%s28450_s2 + $0x874] ss:$12 sps:$4 sm:$0xff]   ;;  %v17887_v32 = vld [vmem:[%s28450_s2 + $0x6f0] ss:$12 sps:$4 sm:$0xff]  }
  0x88   :  { %4471 = vmatpush1.bf16.msra.mxu1 %v17794_v33  ;;  %4389 = vmatprep.subr.bf16.mxu0 %v17802_v34  ;;  %v17890_v33 = vld [vmem:[%s28450_s2 + $0x870] ss:$12 sps:$4 sm:$0xff]  }
  0x89   :  { %4472 = vmatprep.subr.bf16.mxu1 %v17805_v35  ;;  %v17895_v34 = vld [vmem:[%s28450_s2 + $0x6dc] ss:$12 sps:$4 sm:$0xff]  }
  0x8a   :  { %4262 = vmatmul.mubr.bf16.gmra.mxu0 %v17799_v36  ;;  %v17898_v35 = vld [vmem:[%s28450_s2 + $0x85c] ss:$12 sps:$4 sm:$0xff]   ;;  %v17893_v36 = vld [vmem:[%s28450_s2 + $0x6d8] ss:$12 sps:$4 sm:$0xff]  }
  0x8b   :  { %4345 = vmatmul.mubr.bf16.gmra.mxu1 %v17808_v39  ;;  %4390 = vmatpush1.bf16.msra.mxu0 %v17800_v37  ;;  %v17896_v37 = vld [vmem:[%s28450_s2 + $0x858] ss:$12 sps:$4 sm:$0xff]  }
  0x8c   :  { %4473 = vmatpush1.bf16.msra.mxu1 %v17803_v38  ;;  %4391 = vmatprep.subr.bf16.mxu0 %v17811_v40  ;;  %v17901_v38 = vld [vmem:[%s28450_s2 + $0x6c4] ss:$12 sps:$4 sm:$0xff]   ;;  %v17899_v40 = vld [vmem:[%s28450_s2 + $0x6c0] ss:$12 sps:$4 sm:$0xff]  }
  0x8d   :  { %4474 = vmatprep.subr.bf16.mxu1 %v17814_v41  ;;  %4271 = vmatprep.mubr.bf16.mxu0 %v17815_v42  ;;  %v17904_v39 = vld [vmem:[%s28450_s2 + $0x844] ss:$12 sps:$4 sm:$0xff]   ;;  %v17902_v41 = vld [vmem:[%s28450_s2 + $0x840] ss:$12 sps:$4 sm:$0xff]  }
  0x8e   :  { %4354 = vmatprep.mubr.bf16.mxu1 %v17824_v43  ;;  %v17913_v42 = vld [vmem:[%s28450_s2 + $0x9ac] ss:$12 sps:$4 sm:$0xff]  }
  0x8f   :  { %4392 = vmatpush1.bf16.msra.mxu0 %v17809_v44  ;;  %v17916_v43 = vld [vmem:[%s28450_s2 + $0xb2c] ss:$12 sps:$4 sm:$0xff]   ;;  %v17905_v44 = vld [vmem:[%s28451_s0 + $0x20] ss:$84 sps:$4 sm:$0xff]  }
  0x90   :  { %4475 = vmatpush1.bf16.msra.mxu1 %v17812_v45  ;;  %4393 = vmatprep.subr.bf16.mxu0 %v17820_v46  ;;  %v17908_v45 = vld [vmem:[%s28451_s0 + $0x28] ss:$84 sps:$4 sm:$0xff]  }
  0x91   :  { %4476 = vmatprep.subr.bf16.mxu1 %v17823_v47  ;;  %v17911_v46 = vld [vmem:[%s28450_s2 + $0x9a8] ss:$12 sps:$4 sm:$0xff]  }
  0x92   :  { %4272 = vmatmul.mubr.bf16.gmra.mxu0 %v17817_v48  ;;  %v17914_v47 = vld [vmem:[%s28450_s2 + $0xb28] ss:$12 sps:$4 sm:$0xff]  }
  0x93   :  { %4355 = vmatmul.mubr.bf16.gmra.mxu1 %v17826_v51  ;;  %4394 = vmatpush1.bf16.msra.mxu0 %v17818_v49  ;;  %v17919_v48 = vld [vmem:[%s28450_s2 + $0x994] ss:$12 sps:$4 sm:$0xff]  }
  0x94   :  { %4477 = vmatpush1.bf16.msra.mxu1 %v17821_v50  ;;  %4395 = vmatprep.subr.bf16.mxu0 %v17829_v52  ;;  %v17922_v49 = vld [vmem:[%s28450_s2 + $0xb14] ss:$12 sps:$4 sm:$0xff]   ;;  %v17917_v52 = vld [vmem:[%s28450_s2 + $0x990] ss:$12 sps:$4 sm:$0xff]  }
  0x95   :  { %4478 = vmatprep.subr.bf16.mxu1 %v17832_v53  ;;  %4281 = vmatprep.mubr.bf16.mxu0 %v17833_v54  ;;  %v17923_v50 = vld [vmem:[%s28451_s0 + $0xcc] ss:$84 sps:$4 sm:$0xff]   ;;  %v17932_v51 = vld [vmem:[%s28451_s0 + $0xd4] ss:$84 sps:$4 sm:$0xff]   ;;  %v17920_v53 = vld [vmem:[%s28450_s2 + $0xb10] ss:$12 sps:$4 sm:$0xff]  }
  0x96   :  { %4364 = vmatprep.mubr.bf16.mxu1 %v17842_v55  ;;  %v17928_v54 = vld [vmem:[%s28450_s2 + $0x97c] ss:$12 sps:$4 sm:$0xff]  }
  0x97   :  { %4396 = vmatpush1.bf16.msra.mxu0 %v17827_v56  ;;  %v17931_v55 = vld [vmem:[%s28450_s2 + $0xafc] ss:$12 sps:$4 sm:$0xff]  }
  0x98   :  { %4479 = vmatpush1.bf16.msra.mxu1 %v17830_v57  ;;  %4397 = vmatprep.subr.bf16.mxu0 %v17838_v58  ;;  %v17925_v56 = vld [vmem:[%s28451_s0 + $0xc8] ss:$84 sps:$4 sm:$0xff]   ;;  %v17926_v57 = vld [vmem:[%s28450_s2 + $0x978] ss:$12 sps:$4 sm:$0xff]  }
  0x99   :  { %4480 = vmatprep.subr.bf16.mxu1 %v17841_v59  ;;  %v17929_v58 = vld [vmem:[%s28450_s2 + $0xaf8] ss:$12 sps:$4 sm:$0xff]  }
  0x9a   :  { %4282 = vmatmul.mubr.bf16.gmra.mxu0 %v17835_v60  ;;  %v17934_v59 = vld [vmem:[%s28451_s0 + $0xd0] ss:$84 sps:$4 sm:$0xff]  }
  0x9b   :  { %4365 = vmatmul.mubr.bf16.gmra.mxu1 %v17844_v63  ;;  %4398 = vmatpush1.bf16.msra.mxu0 %v17836_v61  ;;  %v17937_v60 = vld [vmem:[%s28450_s2 + $0x964] ss:$12 sps:$4 sm:$0xff]  }
  0x9c   :  { %4481 = vmatpush1.bf16.msra.mxu1 %v17839_v62  ;;  %4399 = vmatprep.subr.bf16.mxu0 %v17847_v0  ;;  %v17940_v61 = vld [vmem:[%s28450_s2 + $0xae4] ss:$12 sps:$4 sm:$0xff]   ;;  %v17941_v62 = vld [vmem:[%s28451_s0 + $0x174] ss:$84 sps:$4 sm:$0xff]   ;;  %v17935_v0 = vld [vmem:[%s28450_s2 + $0x960] ss:$12 sps:$4 sm:$0xff]  }
  0x9d   :  { %4482 = vmatprep.subr.bf16.mxu1 %v17850_v1  ;;  %4291 = vmatprep.mubr.bf16.mxu0 %v17851_v2  ;;  %v17950_v63 = vld [vmem:[%s28451_s0 + $0x17c] ss:$84 sps:$4 sm:$0xff]   ;;  %v17938_v1 = vld [vmem:[%s28450_s2 + $0xae0] ss:$12 sps:$4 sm:$0xff]  }
  0x9e   :  { %4374 = vmatprep.mubr.bf16.mxu1 %v17860_v3  ;;  %v17946_v2 = vld [vmem:[%s28450_s2 + $0x94c] ss:$12 sps:$4 sm:$0xff]  }
  0x9f   :  { %4400 = vmatpush1.bf16.msra.mxu0 %v17845_v4  ;;  %v17949_v3 = vld [vmem:[%s28450_s2 + $0xacc] ss:$12 sps:$4 sm:$0xff]   ;;  %v17943_v4 = vld [vmem:[%s28451_s0 + $0x170] ss:$84 sps:$4 sm:$0xff]  }
  0xa0   :  { %4483 = vmatpush1.bf16.msra.mxu1 %v17848_v5  ;;  %4401 = vmatprep.subr.bf16.mxu0 %v17856_v6  ;;  %v17944_v5 = vld [vmem:[%s28450_s2 + $0x948] ss:$12 sps:$4 sm:$0xff]  }
  0xa1   :  { %4484 = vmatprep.subr.bf16.mxu1 %v17859_v7  ;;  %v17947_v6 = vld [vmem:[%s28450_s2 + $0xac8] ss:$12 sps:$4 sm:$0xff]   ;;  %v17952_v7 = vld [vmem:[%s28451_s0 + $0x178] ss:$84 sps:$4 sm:$0xff]  }
  0xa2   :  { %4292 = vmatmul.mubr.bf16.gmra.mxu0 %v17853_v8  ;;  %v17955_v8 = vld [vmem:[%s28450_s2 + $0x934] ss:$12 sps:$4 sm:$0xff]  }
  0xa3   :  { %4375 = vmatmul.mubr.bf16.gmra.mxu1 %v17862_v11  ;;  %4402 = vmatpush2.bf16.msra.mxu0 %v17854_v9  ;;  %v17958_v9 = vld [vmem:[%s28450_s2 + $0xab4] ss:$12 sps:$4 sm:$0xff]   ;;  %v17968_v11 = vld [vmem:[%s28451_s0 + $0x224] ss:$84 sps:$4 sm:$0xff]  }
  0xa4   :  { %4485 = vmatpush2.bf16.msra.mxu1 %v17857_v10  ;;  %4403 = vmatprep.subr.bf16.mxu0 %v17865_v12  ;;  %v17959_v10 = vld [vmem:[%s28451_s0 + $0x21c] ss:$84 sps:$4 sm:$0xff]  }
  0xa5   :  { %4486 = vmatprep.subr.bf16.mxu1 %v17868_v13  ;;  %4417 = vmatprep.mubr.bf16.mxu0 %v17907_v14  ;;  %v17953_v12 = vld [vmem:[%s28450_s2 + $0x930] ss:$12 sps:$4 sm:$0xff]  }
  0xa6   :  { %4500 = vmatprep.mubr.bf16.mxu1 %v17910_v15  ;;  %v17956_v13 = vld [vmem:[%s28450_s2 + $0xab0] ss:$12 sps:$4 sm:$0xff]  }
  0xa7   :  { %4404 = vmatpush2.bf16.msra.mxu0 %v17863_v16  ;;  %v17964_v14 = vld [vmem:[%s28450_s2 + $0x91c] ss:$12 sps:$4 sm:$0xff]   ;;  %v17961_v16 = vld [vmem:[%s28451_s0 + $0x218] ss:$84 sps:$4 sm:$0xff]  }
  0xa8   :  { %4487 = vmatpush2.bf16.msra.mxu1 %v17866_v17  ;;  %4405 = vmatprep.subr.bf16.mxu0 %v17871_v18  ;;  %v17967_v15 = vld [vmem:[%s28450_s2 + $0xa9c] ss:$12 sps:$4 sm:$0xff]   ;;  %v17962_v17 = vld [vmem:[%s28450_s2 + $0x918] ss:$12 sps:$4 sm:$0xff]   ;;  %v17970_v18 = vld [vmem:[%s28451_s0 + $0x220] ss:$84 sps:$4 sm:$0xff]  }
  0xa9   :  { %4488 = vmatprep.subr.bf16.mxu1 %v17874_v19  ;;  %v17965_v19 = vld [vmem:[%s28450_s2 + $0xa98] ss:$12 sps:$4 sm:$0xff]  }
  0xab   :  { %4406 = vmatpush2.bf16.msra.mxu0 %v17869_v20  ;;  %v17973_v20 = vld [vmem:[%s28450_s2 + $0x904] ss:$12 sps:$4 sm:$0xff]  }
  0xac   :  { %4489 = vmatpush2.bf16.msra.mxu1 %v17872_v21  ;;  %4407 = vmatprep.subr.bf16.mxu0 %v17877_v22  ;;  %v17976_v21 = vld [vmem:[%s28450_s2 + $0xa84] ss:$12 sps:$4 sm:$0xff]  }
  0xad   :  { %4490 = vmatprep.subr.bf16.mxu1 %v17880_v23  ;;  %v17977_v22 = vld [vmem:[%s28451_s0 + $0x2c4] ss:$84 sps:$4 sm:$0xff]   ;;  %v17986_v23 = vld [vmem:[%s28451_s0 + $0x2cc] ss:$84 sps:$4 sm:$0xff]  }
  0xaf   :  { %4408 = vmatpush2.bf16.msra.mxu0 %v17875_v24  ;;  %v17971_v24 = vld [vmem:[%s28450_s2 + $0x900] ss:$12 sps:$4 sm:$0xff]  }
  0xb0   :  { %4491 = vmatpush2.bf16.msra.mxu1 %v17878_v25  ;;  %4409 = vmatprep.subr.bf16.mxu0 %v17883_v26  ;;  %v17974_v25 = vld [vmem:[%s28450_s2 + $0xa80] ss:$12 sps:$4 sm:$0xff]  }
  0xb1   :  { %4492 = vmatprep.subr.bf16.mxu1 %v17886_v27  ;;  %v17982_v26 = vld [vmem:[%s28450_s2 + $0xa6c] ss:$12 sps:$4 sm:$0xff]  }
  0xb2   :  { %v17985_v27 = vld [vmem:[%s28450_s2 + $0xbec] ss:$12 sps:$4 sm:$0xff]  }
  0xb3   :  { %4410 = vmatpush2.bf16.msra.mxu0 %v17881_v28  ;;  %v17979_v28 = vld [vmem:[%s28451_s0 + $0x2c0] ss:$84 sps:$4 sm:$0xff]  }
  0xb4   :  { %4493 = vmatpush2.bf16.msra.mxu1 %v17884_v29  ;;  %4411 = vmatprep.subr.bf16.mxu0 %v17889_v30  ;;  %v17980_v29 = vld [vmem:[%s28450_s2 + $0xa68] ss:$12 sps:$4 sm:$0xff]  }
  0xb5   :  { %4494 = vmatprep.subr.bf16.mxu1 %v17892_v31  ;;  %v17988_v30 = vld [vmem:[%s28451_s0 + $0x2c8] ss:$84 sps:$4 sm:$0xff]  }
  0xb6   :  { %v17983_v31 = vld [vmem:[%s28450_s2 + $0xbe8] ss:$12 sps:$4 sm:$0xff]  }
  0xb7   :  { %4412 = vmatpush2.bf16.msra.mxu0 %v17887_v32  ;;  %v17991_v32 = vld [vmem:[%s28450_s2 + $0xa54] ss:$12 sps:$4 sm:$0xff]  }
  0xb8   :  { %4495 = vmatpush2.bf16.msra.mxu1 %v17890_v33  ;;  %4413 = vmatprep.subr.bf16.mxu0 %v17895_v34  ;;  %v17994_v33 = vld [vmem:[%s28450_s2 + $0xbd4] ss:$12 sps:$4 sm:$0xff]  }
  0xb9   :  { %4496 = vmatprep.subr.bf16.mxu1 %v17898_v35  ;;  %v18033_v34 = vld [vmem:[%s28451_s0 + $0x34] ss:$84 sps:$4 sm:$0xff]   ;;  %v18036_v35 = vld [vmem:[%s28451_s0 + $0x3c] ss:$84 sps:$4 sm:$0xff]  }
  0xbb   :  { %4414 = vmatpush2.bf16.msra.mxu0 %v17893_v36  ;;  %v17989_v36 = vld [vmem:[%s28450_s2 + $0xa50] ss:$12 sps:$4 sm:$0xff]  }
  0xbc   :  { %4497 = vmatpush2.bf16.msra.mxu1 %v17896_v37  ;;  %4415 = vmatprep.subr.bf16.mxu0 %v17901_v38  ;;  %v17992_v37 = vld [vmem:[%s28450_s2 + $0xbd0] ss:$12 sps:$4 sm:$0xff]  }
  0xbd   :  { %4498 = vmatprep.subr.bf16.mxu1 %v17904_v39  ;;  %v17997_v38 = vld [vmem:[%s28450_s2 + $0xa3c] ss:$12 sps:$4 sm:$0xff]  }
  0xbe   :  { %v18000_v39 = vld [vmem:[%s28450_s2 + $0xbbc] ss:$12 sps:$4 sm:$0xff]  }
  0xbf   :  { %4416 = vmatpush2.bf16.msra.mxu0 %v17899_v40  ;;  %v17995_v40 = vld [vmem:[%s28450_s2 + $0xa38] ss:$12 sps:$4 sm:$0xff]  }
  0xc0   :  { %4499 = vmatpush2.bf16.msra.mxu1 %v17902_v41  ;;  %4551 = vmatprep.subr.bf16.mxu0 %v17913_v42  ;;  %v17998_v41 = vld [vmem:[%s28450_s2 + $0xbb8] ss:$12 sps:$4 sm:$0xff]  }
  0xc1   :  { %4634 = vmatprep.subr.bf16.mxu1 %v17916_v43  ;;  %v18003_v42 = vld [vmem:[%s28450_s2 + $0xa24] ss:$12 sps:$4 sm:$0xff]  }
  0xc2   :  { %4418 = vmatmul.mubr.bf16.vlgmr.msra.gmra.mxu0 %v17905_v44  ;;  %v18006_v43 = vld [vmem:[%s28450_s2 + $0xba4] ss:$12 sps:$4 sm:$0xff]   ;;  %v18001_v44 = vld [vmem:[%s28450_s2 + $0xa20] ss:$12 sps:$4 sm:$0xff]  }
  0xc3   :  { %4501 = vmatmul.mubr.bf16.vlgmr.msra.gmra.mxu1 %v17908_v45  ;;  %4552 = vmatpush1.bf16.msra.mxu0 %v17911_v46  ;;  %v18004_v45 = vld [vmem:[%s28450_s2 + $0xba0] ss:$12 sps:$4 sm:$0xff]  }
  0xc4   :  { %4635 = vmatpush1.bf16.msra.mxu1 %v17914_v47  ;;  %4553 = vmatprep.subr.bf16.mxu0 %v17919_v48  ;;  %v18009_v46 = vld [vmem:[%s28450_s2 + $0xa0c] ss:$12 sps:$4 sm:$0xff]   ;;  %v18007_v48 = vld [vmem:[%s28450_s2 + $0xa08] ss:$12 sps:$4 sm:$0xff]  }
  0xc5   :  { %4636 = vmatprep.subr.bf16.mxu1 %v17922_v49  ;;  %4427 = vmatprep.mubr.bf16.mxu0 %v17923_v50  ;;  %v18012_v47 = vld [vmem:[%s28450_s2 + $0xb8c] ss:$12 sps:$4 sm:$0xff]   ;;  %v18010_v49 = vld [vmem:[%s28450_s2 + $0xb88] ss:$12 sps:$4 sm:$0xff]  }
  0xc6   :  { %4510 = vmatprep.mubr.bf16.mxu1 %v17932_v51  ;;  %v18015_v50 = vld [vmem:[%s28450_s2 + $0x9f4] ss:$12 sps:$4 sm:$0xff]  }
  0xc7   :  { %4554 = vmatpush1.bf16.msra.mxu0 %v17917_v52  ;;  %v18018_v51 = vld [vmem:[%s28450_s2 + $0xb74] ss:$12 sps:$4 sm:$0xff]   ;;  %v18013_v52 = vld [vmem:[%s28450_s2 + $0x9f0] ss:$12 sps:$4 sm:$0xff]  }
  0xc8   :  { %4637 = vmatpush1.bf16.msra.mxu1 %v17920_v53  ;;  %4555 = vmatprep.subr.bf16.mxu0 %v17928_v54  ;;  %v18016_v53 = vld [vmem:[%s28450_s2 + $0xb70] ss:$12 sps:$4 sm:$0xff]   ;;  %v820_v54 = vlaneseq }
  0xc9   :  { %4638 = vmatprep.subr.bf16.mxu1 %v17931_v55  ;;  %v18021_v55 = vld [vmem:[%s28450_s2 + $0x9dc] ss:$12 sps:$4 sm:$0xff]  }
  0xca   :  { %4428 = vmatmul.mubr.bf16.gmra.mxu0 %v17925_v56  ;;  %v18024_v56 = vld [vmem:[%s28450_s2 + $0xb5c] ss:$12 sps:$4 sm:$0xff]  }
  0xcb   :  { %4511 = vmatmul.mubr.bf16.gmra.mxu1 %v17934_v59  ;;  %4556 = vmatpush1.bf16.msra.mxu0 %v17926_v57  ;;  %v18019_v57 = vld [vmem:[%s28450_s2 + $0x9d8] ss:$12 sps:$4 sm:$0xff]   ;;  %v21076_v59 = vshrl.u32 %v820_v54, 7 }
  0xcc   :  { %4639 = vmatpush1.bf16.msra.mxu1 %v17929_v58  ;;  %4557 = vmatprep.subr.bf16.mxu0 %v17937_v60  ;;  %v18022_v58 = vld [vmem:[%s28450_s2 + $0xb58] ss:$12 sps:$4 sm:$0xff]  }
  0xcd   :  { %4640 = vmatprep.subr.bf16.mxu1 %v17940_v61  ;;  %4437 = vmatprep.mubr.bf16.mxu0 %v17941_v62  ;;  %28525 = vst [vmem:[#allocation2_spill] sm:$0xff] %v21076_v59  ;;  %v18027_v60 = vld [vmem:[%s28450_s2 + $0x9c4] ss:$12 sps:$4 sm:$0xff]   ;;  %v18025_v62 = vld [vmem:[%s28450_s2 + $0x9c0] ss:$12 sps:$4 sm:$0xff]  }
  0xce   :  { %4520 = vmatprep.mubr.bf16.mxu1 %v17950_v63  ;;  %v18030_v61 = vld [vmem:[%s28450_s2 + $0xb44] ss:$12 sps:$4 sm:$0xff]   ;;  %v18028_v63 = vld [vmem:[%s28450_s2 + $0xb40] ss:$12 sps:$4 sm:$0xff]  }
  0xcf   :  { %4558 = vmatpush1.bf16.msra.mxu0 %v17935_v0  ;;  %v708_v0 = vld [vmem:[%s28452_s3] sm:$0x7] }
  0xd0   :  { %4641 = vmatpush1.bf16.msra.mxu1 %v17938_v1  ;;  %4559 = vmatprep.subr.bf16.mxu0 %v17946_v2  ;;  %v21094_v1 = vsub.s32 0, %v21076_v59  ;;  %v18039_v2 = vld [vmem:[%s28450_s2 + $0xcac] ss:$12 sps:$4 sm:$0xff]  }
  0xd1   :  { %4642 = vmatprep.subr.bf16.mxu1 %v17949_v3  ;;  %v18042_v3 = vld [vmem:[%s28450_s2 + $0xe2c] ss:$12 sps:$4 sm:$0xff]  }
  0xd2   :  { %4438 = vmatmul.mubr.bf16.gmra.mxu0 %v17943_v4  ;;  %28526 = vst [vmem:[#allocation3_spill] sm:$0xff] %v21094_v1  ;;  %v18031_v4 = vld [vmem:[%s28451_s0 + $0x30] ss:$84 sps:$4 sm:$0xff]  }
  0xd3   :  { %4521 = vmatmul.mubr.bf16.gmra.mxu1 %v17952_v7  ;;  %4560 = vmatpush1.bf16.msra.mxu0 %v17944_v5  ;;  %v18034_v5 = vld [vmem:[%s28451_s0 + $0x38] ss:$84 sps:$4 sm:$0xff]   ;;  %v18037_v7 = vld [vmem:[%s28450_s2 + $0xca8] ss:$12 sps:$4 sm:$0xff]  }
  0xd4   :  { %4643 = vmatpush1.bf16.msra.mxu1 %v17947_v6  ;;  %4561 = vmatprep.subr.bf16.mxu0 %v17955_v8  ;;  %v21109_v6 = vsub.s32 1, %v21076_v59  ;;  %v21115_v8 = vrot.slane %v708_v0, %v21094_v1 }
  0xd5   :  { %4644 = vmatprep.subr.bf16.mxu1 %v17958_v9  ;;  %4447 = vmatprep.mubr.bf16.mxu0 %v17959_v10  ;;  %v18040_v9 = vld [vmem:[%s28450_s2 + $0xe28] ss:$12 sps:$4 sm:$0xff]  }
  0xd6   :  { %4530 = vmatprep.mubr.bf16.mxu1 %v17968_v11  ;;  %28527 = vst [vmem:[#allocation4_spill] sm:$0xff] %v21109_v6  ;;  %v18045_v10 = vld [vmem:[%s28450_s2 + $0xc94] ss:$12 sps:$4 sm:$0xff]  }
  0xd7   :  { %4562 = vmatpush1.bf16.msra.mxu0 %v17953_v12  ;;  %v18048_v11 = vld [vmem:[%s28450_s2 + $0xe14] ss:$12 sps:$4 sm:$0xff]   ;;  %v21127_v12 = vrot.slane %v708_v0, %v21109_v6 }
  0xd8   :  { %4645 = vmatpush1.bf16.msra.mxu1 %v17956_v13  ;;  %4563 = vmatprep.subr.bf16.mxu0 %v17964_v14  ;;  %v18049_v13 = vld [vmem:[%s28451_s0 + $0xdc] ss:$84 sps:$4 sm:$0xff]   ;;  %v18058_v14 = vld [vmem:[%s28451_s0 + $0xe4] ss:$84 sps:$4 sm:$0xff]  }
  0xd9   :  { %4646 = vmatprep.subr.bf16.mxu1 %v17967_v15 }
  0xda   :  { %4448 = vmatmul.mubr.bf16.gmra.mxu0 %v17961_v16 }
  0xdb   :  { %4531 = vmatmul.mubr.bf16.gmra.mxu1 %v17970_v18  ;;  %4564 = vmatpush1.bf16.msra.mxu0 %v17962_v17  ;;  %v18043_v17 = vld [vmem:[%s28450_s2 + $0xc90] ss:$12 sps:$4 sm:$0xff]  }
  0xdc   :  { %4647 = vmatpush1.bf16.msra.mxu1 %v17965_v19  ;;  %4565 = vmatprep.subr.bf16.mxu0 %v17973_v20  ;;  %v18046_v19 = vld [vmem:[%s28450_s2 + $0xe10] ss:$12 sps:$4 sm:$0xff]  }
  0xdd   :  { %4648 = vmatprep.subr.bf16.mxu1 %v17976_v21  ;;  %4457 = vmatprep.mubr.bf16.mxu0 %v17977_v22  ;;  %v18054_v22 = vld [vmem:[%s28450_s2 + $0xc7c] ss:$12 sps:$4 sm:$0xff]  }
  0xde   :  { %4540 = vmatprep.mubr.bf16.mxu1 %v17986_v23  ;;  %v18057_v23 = vld [vmem:[%s28450_s2 + $0xdfc] ss:$12 sps:$4 sm:$0xff]  }
  0xdf   :  { %4566 = vmatpush1.bf16.msra.mxu0 %v17971_v24 }
  0xe0   :  { %4649 = vmatpush1.bf16.msra.mxu1 %v17974_v25  ;;  %4567 = vmatprep.subr.bf16.mxu0 %v17982_v26  ;;  %v18051_v26 = vld [vmem:[%s28451_s0 + $0xd8] ss:$84 sps:$4 sm:$0xff]  }
  0xe1   :  { %4650 = vmatprep.subr.bf16.mxu1 %v17985_v27  ;;  %v18052_v27 = vld [vmem:[%s28450_s2 + $0xc78] ss:$12 sps:$4 sm:$0xff]  }
  0xe2   :  { %4458 = vmatmul.mubr.bf16.gmra.mxu0 %v17979_v28 }
  0xe3   :  { %4541 = vmatmul.mubr.bf16.gmra.mxu1 %v17988_v30  ;;  %4568 = vmatpush2.bf16.msra.mxu0 %v17980_v29  ;;  %v18060_v30 = vld [vmem:[%s28451_s0 + $0xe0] ss:$84 sps:$4 sm:$0xff]  }
  0xe4   :  { %4651 = vmatpush2.bf16.msra.mxu1 %v17983_v31  ;;  %4569 = vmatprep.subr.bf16.mxu0 %v17991_v32 }
  0xe5   :  { %4652 = vmatprep.subr.bf16.mxu1 %v17994_v33  ;;  %4583 = vmatprep.mubr.bf16.mxu0 %v18033_v34  ;;  %v18055_v33 = vld [vmem:[%s28450_s2 + $0xdf8] ss:$12 sps:$4 sm:$0xff]  }
  0xe6   :  { %4666 = vmatprep.mubr.bf16.mxu1 %v18036_v35 }
  0xe7   :  { %4570 = vmatpush2.bf16.msra.mxu0 %v17989_v36  ;;  %v18063_v36 = vld [vmem:[%s28450_s2 + $0xc64] ss:$12 sps:$4 sm:$0xff]  }
  0xe8   :  { %4653 = vmatpush2.bf16.msra.mxu1 %v17992_v37  ;;  %4571 = vmatprep.subr.bf16.mxu0 %v17997_v38  ;;  %v18066_v37 = vld [vmem:[%s28450_s2 + $0xde4] ss:$12 sps:$4 sm:$0xff]  }
  0xe9   :  { %4654 = vmatprep.subr.bf16.mxu1 %v18000_v39  ;;  %v18067_v39 = vld [vmem:[%s28451_s0 + $0x184] ss:$84 sps:$4 sm:$0xff]  }
  0xeb   :  { %4572 = vmatpush2.bf16.msra.mxu0 %v17995_v40  ;;  %v18076_v40 = vld [vmem:[%s28451_s0 + $0x18c] ss:$84 sps:$4 sm:$0xff]  }
  0xec   :  { %4655 = vmatpush2.bf16.msra.mxu1 %v17998_v41  ;;  %4573 = vmatprep.subr.bf16.mxu0 %v18003_v42  ;;  %v18061_v41 = vld [vmem:[%s28450_s2 + $0xc60] ss:$12 sps:$4 sm:$0xff]  }
  0xed   :  { %4656 = vmatprep.subr.bf16.mxu1 %v18006_v43 }
  0xef   :  { %4574 = vmatpush2.bf16.msra.mxu0 %v18001_v44  ;;  %v18064_v44 = vld [vmem:[%s28450_s2 + $0xde0] ss:$12 sps:$4 sm:$0xff]  }
  0xf0   :  { %4657 = vmatpush2.bf16.msra.mxu1 %v18004_v45  ;;  %4575 = vmatprep.subr.bf16.mxu0 %v18009_v46  ;;  %v18069_v46 = vld [vmem:[%s28451_s0 + $0x180] ss:$84 sps:$4 sm:$0xff]  }
  0xf1   :  { %4658 = vmatprep.subr.bf16.mxu1 %v18012_v47  ;;  %v18072_v47 = vld [vmem:[%s28450_s2 + $0xc4c] ss:$12 sps:$4 sm:$0xff]  }
  0xf3   :  { %4576 = vmatpush2.bf16.msra.mxu0 %v18007_v48  ;;  %v18075_v48 = vld [vmem:[%s28450_s2 + $0xdcc] ss:$12 sps:$4 sm:$0xff]  }
  0xf4   :  { %4659 = vmatpush2.bf16.msra.mxu1 %v18010_v49  ;;  %4577 = vmatprep.subr.bf16.mxu0 %v18015_v50 }
  0xf5   :  { %4660 = vmatprep.subr.bf16.mxu1 %v18018_v51  ;;  %v18070_v51 = vld [vmem:[%s28450_s2 + $0xc48] ss:$12 sps:$4 sm:$0xff]  }
  0xf7   :  { %4578 = vmatpush2.bf16.msra.mxu0 %v18013_v52  ;;  %v18073_v52 = vld [vmem:[%s28450_s2 + $0xdc8] ss:$12 sps:$4 sm:$0xff]  }
  0xf8   :  { %4661 = vmatpush2.bf16.msra.mxu1 %v18016_v53  ;;  %4579 = vmatprep.subr.bf16.mxu0 %v18021_v55  ;;  %v18078_v53 = vld [vmem:[%s28451_s0 + $0x188] ss:$84 sps:$4 sm:$0xff]  }
  0xf9   :  { %4662 = vmatprep.subr.bf16.mxu1 %v18024_v56  ;;  %v18081_v56 = vld [vmem:[%s28450_s2 + $0xc34] ss:$12 sps:$4 sm:$0xff]  }
  0xfb   :  { %4580 = vmatpush2.bf16.msra.mxu0 %v18019_v57 }
  0xfc   :  { %4663 = vmatpush2.bf16.msra.mxu1 %v18022_v58  ;;  %4581 = vmatprep.subr.bf16.mxu0 %v18027_v60  ;;  %v18084_v60 = vld [vmem:[%s28450_s2 + $0xdb4] ss:$12 sps:$4 sm:$0xff]  }
  0xfd   :  { %4664 = vmatprep.subr.bf16.mxu1 %v18030_v61 }
  0xff   :  { %4582 = vmatpush2.bf16.msra.mxu0 %v18025_v62 }
 0x100   :  { %4665 = vmatpush2.bf16.msra.mxu1 %v18028_v63  ;;  %4717 = vmatprep.subr.bf16.mxu0 %v18039_v2  ;;  %v18085_v63 = vld [vmem:[%s28451_s0 + $0x22c] ss:$84 sps:$4 sm:$0xff]  }
 0x101   :  { %4800 = vmatprep.subr.bf16.mxu1 %v18042_v3  ;;  %v18094_v3 = vld [vmem:[%s28451_s0 + $0x234] ss:$84 sps:$4 sm:$0xff]  }
 0x102   :  { %v4087_v15 = vpop.f32.mrf.mxu0  ;;  %4584 = vmatmul.mubr.bf16.vlgmr.msra.gmra.mxu0 %v18031_v4 }
 0x103   :  { %v4170_v16 = vpop.f32.mrf.mxu1  ;;  %4667 = vmatmul.mubr.bf16.vlgmr.msra.gmra.mxu1 %v18034_v5  ;;  %v4088_v18 = vadd.f32 %v4087_v15, %v21115_v8  ;;  %4718 = vmatpush1.bf16.msra.mxu0 %v18037_v7  ;;  %v18093_v15 = vld [vmem:[%s28450_s2 + $0xd9c] ss:$12 sps:$4 sm:$0xff]  }
 0x104   :  { %4801 = vmatpush1.bf16.msra.mxu1 %v18040_v9  ;;  %v4089_v20 = vpop.f32.mrf.mxu0  ;;  %4719 = vmatprep.subr.bf16.mxu0 %v18045_v10  ;;  %v18079_v9 = vld [vmem:[%s28450_s2 + $0xc30] ss:$12 sps:$4 sm:$0xff]  }
 0x105   :  { %v4172_v21 = vpop.f32.mrf.mxu1  ;;  %4802 = vmatprep.subr.bf16.mxu1 %v18048_v11  ;;  %v21148_v24 = vadd.f32 %v4170_v16, %v4088_v18  ;;  %v4090_v25 = vadd.f32 %v4089_v20, %v21127_v12  ;;  %4593 = vmatprep.mubr.bf16.mxu0 %v18049_v13  ;;  %v18082_v10 = vld [vmem:[%s28450_s2 + $0xdb0] ss:$12 sps:$4 sm:$0xff]   ;;  %v18088_v18 = vld [vmem:[%s28450_s2 + $0xc18] ss:$12 sps:$4 sm:$0xff]  }
 0x106   :  { %4676 = vmatprep.mubr.bf16.mxu1 %v18058_v14  ;;  %v4091_v28 = vpop.f32.mrf.mxu0  ;;  %v18090_v11 = vld [vmem:[%s28450_s2 + $0xc1c] ss:$12 sps:$4 sm:$0xff]   ;;  %v18096_v20 = vld [vmem:[%s28451_s0 + $0x230] ss:$84 sps:$4 sm:$0xff]  }
 0x107   :  { %v4174_v29 = vpop.f32.mrf.mxu1  ;;  %v21160_v31 = vadd.f32 %v4172_v21, %v4090_v25  ;;  %v4092_v32 = vadd.f32 %v4091_v28, %v21115_v8  ;;  %4720 = vmatpush1.bf16.msra.mxu0 %v18043_v17  ;;  %v18087_v14 = vld [vmem:[%s28451_s0 + $0x228] ss:$84 sps:$4 sm:$0xff]  }
 0x108   :  { %4803 = vmatpush1.bf16.msra.mxu1 %v18046_v19  ;;  %v21166_v34 = vpop.f32.mrf.mxu0  ;;  %4721 = vmatprep.subr.bf16.mxu0 %v18054_v22  ;;  %v18091_v19 = vld [vmem:[%s28450_s2 + $0xd98] ss:$12 sps:$4 sm:$0xff]  }
 0x109   :  { %v21168_v35 = vpop.f32.mrf.mxu1  ;;  %4804 = vmatprep.subr.bf16.mxu1 %v18057_v23  ;;  %v21176_v38 = vadd.f32 %v4174_v29, %v4092_v32  ;;  %v18099_v23 = vld [vmem:[%s28450_s2 + $0xc04] ss:$12 sps:$4 sm:$0xff]  }
 0x10a   :  { %4594 = vmatmul.mubr.bf16.gmra.mxu0 %v18051_v26  ;;  %v4097_v42 = vpop.f32.mrf.mxu0 }
 0x10b   :  { %4677 = vmatmul.mubr.bf16.gmra.mxu1 %v18060_v30  ;;  %v4180_v43 = vpop.f32.mrf.mxu1  ;;  %4722 = vmatpush1.bf16.msra.mxu0 %v18052_v27  ;;  %v4098_v45 = vadd.f32 %v4097_v42, %v21115_v8  ;;  %v18102_v27 = vld [vmem:[%s28450_s2 + $0xd84] ss:$12 sps:$4 sm:$0xff]   ;;  %v18103_v30 = vld [vmem:[%s28451_s0 + $0x2d4] ss:$84 sps:$4 sm:$0xff]  }
 0x10c   :  { %4805 = vmatpush1.bf16.msra.mxu1 %v18055_v33  ;;  %4723 = vmatprep.subr.bf16.mxu0 %v18063_v36  ;;  %v4099_v49 = vpop.f32.mrf.mxu0  ;;  %v18112_v36 = vld [vmem:[%s28451_s0 + $0x2dc] ss:$84 sps:$4 sm:$0xff]  }
 0x10d   :  { %4806 = vmatprep.subr.bf16.mxu1 %v18066_v37  ;;  %v4182_v50 = vpop.f32.mrf.mxu1  ;;  %4603 = vmatprep.mubr.bf16.mxu0 %v18067_v39  ;;  %v4100_v54 = vadd.f32 %v4099_v49, %v21127_v12  ;;  %v21210_v55 = vadd.f32 %v4180_v43, %v4098_v45  ;;  %v18097_v39 = vld [vmem:[%s28450_s2 + $0xc00] ss:$12 sps:$4 sm:$0xff]   ;;  %v18105_v45 = vld [vmem:[%s28451_s0 + $0x2d0] ss:$84 sps:$4 sm:$0xff]   ;;  %v18106_v49 = vld [vmem:[%s28450_s2 + $0xd68] ss:$12 sps:$4 sm:$0xff]  }
 0x10e   :  { %4686 = vmatprep.mubr.bf16.mxu1 %v18076_v40  ;;  %v4101_v57 = vpop.f32.mrf.mxu0  ;;  %v18100_v40 = vld [vmem:[%s28450_s2 + $0xd80] ss:$12 sps:$4 sm:$0xff]  }
 0x10f   :  { %v4184_v58 = vpop.f32.mrf.mxu1  ;;  %4724 = vmatpush1.bf16.msra.mxu0 %v18061_v41  ;;  %v4102_v61 = vadd.f32 %v4101_v57, %v21115_v8  ;;  %v21219_v62 = vadd.f32 %v4182_v50, %v4100_v54  ;;  %v18108_v43 = vld [vmem:[%s28450_s2 + $0xd6c] ss:$12 sps:$4 sm:$0xff]   ;;  %v18109_v50 = vld [vmem:[%s28450_s2 + $0xee8] ss:$12 sps:$4 sm:$0xff]  }
 0x110   :  { %4807 = vmatpush1.bf16.msra.mxu1 %v18064_v44  ;;  %4725 = vmatprep.subr.bf16.mxu0 %v18072_v47  ;;  %v21224_v0 = vpop.f32.mrf.mxu0  ;;  %v18117_v54 = vld [vmem:[%s28450_s2 + $0xd54] ss:$12 sps:$4 sm:$0xff]  }
 0x111   :  { %4808 = vmatprep.subr.bf16.mxu1 %v18075_v48  ;;  %v21226_v2 = vpop.f32.mrf.mxu1  ;;  %v21231_v4 = vadd.f32 %v4184_v58, %v4102_v61  ;;  %v18120_v58 = vld [vmem:[%s28450_s2 + $0xed4] ss:$12 sps:$4 sm:$0xff]  }
 0x112   :  { %4604 = vmatmul.mubr.bf16.gmra.mxu0 %v18069_v46  ;;  %v4107_v5 = vpop.f32.mrf.mxu0  ;;  %v18111_v46 = vld [vmem:[%s28450_s2 + $0xeec] ss:$12 sps:$4 sm:$0xff]  }
 0x113   :  { %4687 = vmatmul.mubr.bf16.gmra.mxu1 %v18078_v53  ;;  %v4190_v7 = vpop.f32.mrf.mxu1  ;;  %4726 = vmatpush1.bf16.msra.mxu0 %v18070_v51  ;;  %v4108_v13 = vadd.f32 %v4107_v5, %v21115_v8  ;;  %v18114_v53 = vld [vmem:[%s28451_s0 + $0x2d8] ss:$84 sps:$4 sm:$0xff]  }
 0x114   :  { %4809 = vmatpush1.bf16.msra.mxu1 %v18073_v52  ;;  %4727 = vmatprep.subr.bf16.mxu0 %v18081_v56  ;;  %v4109_v16 = vpop.f32.mrf.mxu0  ;;  %v18159_v5 = vld [vmem:[%s28451_s0 + $0x44] ss:$84 sps:$4 sm:$0xff]  }
 0x115   :  { %4810 = vmatprep.subr.bf16.mxu1 %v18084_v60  ;;  %v4192_v17 = vpop.f32.mrf.mxu1  ;;  %4613 = vmatprep.mubr.bf16.mxu0 %v18085_v63  ;;  %v4110_v21 = vadd.f32 %v4109_v16, %v21127_v12  ;;  %v21259_v22 = vadd.f32 %v4190_v7, %v4108_v13 }
 0x116   :  { %4696 = vmatprep.mubr.bf16.mxu1 %v18094_v3  ;;  %v4111_v25 = vpop.f32.mrf.mxu0 }
 0x117   :  { %v4194_v26 = vpop.f32.mrf.mxu1  ;;  %4728 = vmatpush1.bf16.msra.mxu0 %v18079_v9  ;;  %v4112_v28 = vadd.f32 %v4111_v25, %v21115_v8  ;;  %v21268_v29 = vadd.f32 %v4192_v17, %v4110_v21  ;;  %v18162_v9 = vld [vmem:[%s28451_s0 + $0x4c] ss:$84 sps:$4 sm:$0xff]   ;;  %v18126_v17 = vld [vmem:[%s28450_s2 + $0xebc] ss:$12 sps:$4 sm:$0xff]   ;;  %v18124_v25 = vld [vmem:[%s28450_s2 + $0xeb8] ss:$12 sps:$4 sm:$0xff]  }
 0x118   :  { %4811 = vmatpush1.bf16.msra.mxu1 %v18082_v10  ;;  %4729 = vmatprep.subr.bf16.mxu0 %v18090_v11  ;;  %v21273_v32 = vpop.f32.mrf.mxu0  ;;  %v18115_v10 = vld [vmem:[%s28450_s2 + $0xd50] ss:$12 sps:$4 sm:$0xff]  }
 0x119   :  { %4812 = vmatprep.subr.bf16.mxu1 %v18093_v15  ;;  %v21275_v33 = vpop.f32.mrf.mxu1  ;;  %v21280_v37 = vadd.f32 %v4194_v26, %v4112_v28  ;;  %v18118_v11 = vld [vmem:[%s28450_s2 + $0xed0] ss:$12 sps:$4 sm:$0xff]  }
 0x11a   :  { %4614 = vmatmul.mubr.bf16.gmra.mxu0 %v18087_v14  ;;  %v4117_v41 = vpop.f32.mrf.mxu0  ;;  %v18123_v15 = vld [vmem:[%s28450_s2 + $0xd3c] ss:$12 sps:$4 sm:$0xff]  }
 0x11b   :  { %4697 = vmatmul.mubr.bf16.gmra.mxu1 %v18096_v20  ;;  %v4200_v42 = vpop.f32.mrf.mxu1  ;;  %4730 = vmatpush1.bf16.msra.mxu0 %v18088_v18  ;;  %v4118_v44 = vadd.f32 %v4117_v41, %v21115_v8  ;;  %v18121_v20 = vld [vmem:[%s28450_s2 + $0xd38] ss:$12 sps:$4 sm:$0xff]   ;;  %v18127_v41 = vld [vmem:[%s28450_s2 + $0xd20] ss:$12 sps:$4 sm:$0xff]  }
 0x11c   :  { %4813 = vmatpush1.bf16.msra.mxu1 %v18091_v19  ;;  %4731 = vmatprep.subr.bf16.mxu0 %v18099_v23  ;;  %v4119_v47 = vpop.f32.mrf.mxu0 }
 0x11d   :  { %4814 = vmatprep.subr.bf16.mxu1 %v18102_v27  ;;  %v4202_v48 = vpop.f32.mrf.mxu1  ;;  %4623 = vmatprep.mubr.bf16.mxu0 %v18103_v30  ;;  %v4120_v51 = vadd.f32 %v4119_v47, %v21127_v12  ;;  %v21305_v52 = vadd.f32 %v4200_v42, %v4118_v44  ;;  %v18129_v27 = vld [vmem:[%s28450_s2 + $0xd24] ss:$12 sps:$4 sm:$0xff]   ;;  %v18130_v42 = vld [vmem:[%s28450_s2 + $0xea0] ss:$12 sps:$4 sm:$0xff]  }
 0x11e   :  { %4706 = vmatprep.mubr.bf16.mxu1 %v18112_v36  ;;  %v4121_v56 = vpop.f32.mrf.mxu0  ;;  %v18132_v36 = vld [vmem:[%s28450_s2 + $0xea4] ss:$12 sps:$4 sm:$0xff]   ;;  %v18138_v44 = vld [vmem:[%s28450_s2 + $0xe8c] ss:$12 sps:$4 sm:$0xff]   ;;  %v18141_v47 = vld [vmem:[%s28450_s2 + $0xcf4] ss:$12 sps:$4 sm:$0xff]  }
 0x11f   :  { %v4204_v57 = vpop.f32.mrf.mxu1  ;;  %4732 = vmatpush1.bf16.msra.mxu0 %v18097_v39  ;;  %v4122_v60 = vadd.f32 %v4121_v56, %v21115_v8  ;;  %v21317_v61 = vadd.f32 %v4202_v48, %v4120_v51  ;;  %v18144_v48 = vld [vmem:[%s28450_s2 + $0xe74] ss:$12 sps:$4 sm:$0xff]   ;;  %v18147_v51 = vld [vmem:[%s28450_s2 + $0xcdc] ss:$12 sps:$4 sm:$0xff]   ;;  %v18148_v56 = vld [vmem:[%s28450_s2 + $0xe58] ss:$12 sps:$4 sm:$0xff]  }
 0x120   :  { %4815 = vmatpush1.bf16.msra.mxu1 %v18100_v40  ;;  %4733 = vmatprep.subr.bf16.mxu0 %v18108_v43  ;;  %v21319_v63 = vpop.f32.mrf.mxu0  ;;  %v18135_v43 = vld [vmem:[%s28450_s2 + $0xd0c] ss:$12 sps:$4 sm:$0xff]  }
 0x121   :  { %4816 = vmatprep.subr.bf16.mxu1 %v18111_v46  ;;  %v21321_v3 = vpop.f32.mrf.mxu1  ;;  %v21326_v7 = vadd.f32 %v4204_v57, %v4122_v60  ;;  %v18136_v46 = vld [vmem:[%s28450_s2 + $0xe88] ss:$12 sps:$4 sm:$0xff]   ;;  %v18153_v57 = vld [vmem:[%s28450_s2 + $0xcc4] ss:$12 sps:$4 sm:$0xff]   ;;  %v18151_v60 = vld [vmem:[%s28450_s2 + $0xcc0] ss:$12 sps:$4 sm:$0xff]  }
 0x122   :  { %4624 = vmatmul.mubr.bf16.gmra.mxu0 %v18105_v45  ;;  %v4127_v13 = vpop.f32.mrf.mxu0  ;;  %v18133_v45 = vld [vmem:[%s28450_s2 + $0xd08] ss:$12 sps:$4 sm:$0xff]  }
 0x123   :  { %4707 = vmatmul.mubr.bf16.gmra.mxu1 %v18114_v53  ;;  %v4210_v14 = vpop.f32.mrf.mxu1  ;;  %4734 = vmatpush2.bf16.msra.mxu0 %v18106_v49  ;;  %v4128_v16 = vadd.f32 %v4127_v13, %v21115_v8  ;;  %v18139_v49 = vld [vmem:[%s28450_s2 + $0xcf0] ss:$12 sps:$4 sm:$0xff]  }
 0x124   :  { %4817 = vmatpush2.bf16.msra.mxu1 %v18109_v50  ;;  %4735 = vmatprep.subr.bf16.mxu0 %v18117_v54  ;;  %v4129_v18 = vpop.f32.mrf.mxu0  ;;  %v18142_v50 = vld [vmem:[%s28450_s2 + $0xe70] ss:$12 sps:$4 sm:$0xff]   ;;  %v18145_v54 = vld [vmem:[%s28450_s2 + $0xcd8] ss:$12 sps:$4 sm:$0xff]  }
 0x125   :  { %4818 = vmatprep.subr.bf16.mxu1 %v18120_v58  ;;  %v4212_v19 = vpop.f32.mrf.mxu1  ;;  %v4130_v21 = vadd.f32 %v4129_v18, %v21127_v12  ;;  %v21348_v23 = vadd.f32 %v4210_v14, %v4128_v16  ;;  %4749 = vmatprep.mubr.bf16.mxu0 %v18159_v5  ;;  %v18150_v53 = vld [vmem:[%s28450_s2 + $0xe5c] ss:$12 sps:$4 sm:$0xff]   ;;  %v18156_v58 = vld [vmem:[%s28450_s2 + $0xe44] ss:$12 sps:$4 sm:$0xff]   ;;  %v18154_v5 = vld [vmem:[%s28450_s2 + $0xe40] ss:$12 sps:$4 sm:$0xff]  }
 0x126   :  { %4832 = vmatprep.mubr.bf16.mxu1 %v18162_v9  ;;  %v4131_v26 = vpop.f32.mrf.mxu0  ;;  %v18165_v9 = vld [vmem:[%s28450_s2 + $0xfac] ss:$12 sps:$4 sm:$0xff]   ;;  %v18169_v13 = vld [vmem:[%s28450_s2 + $0x170] ss:$12 sps:$4 sm:$0xff]   ;;  %v18163_v14 = vld [vmem:[%s28450_s2 + $0xfa8] ss:$12 sps:$4 sm:$0xff]  }
 0x127   :  { %4736 = vmatpush2.bf16.msra.mxu0 %v18115_v10  ;;  %v4132_v28 = vadd.f32 %v4131_v26, %v21115_v8  ;;  %v21357_v30 = vadd.f32 %v4212_v19, %v4130_v21  ;;  %v4214_v39 = vpop.f32.mrf.mxu1  ;;  %v18157_v10 = vld [vmem:[%s28451_s0 + $0x40] ss:$84 sps:$4 sm:$0xff]   ;;  %v18180_v26 = vld [vmem:[%s28450_s2 + $0x158] ss:$12 sps:$4 sm:$0xff]  }
 0x128   :  { %4819 = vmatpush2.bf16.msra.mxu1 %v18118_v11  ;;  %4737 = vmatprep.subr.bf16.mxu0 %v18123_v15  ;;  %v18160_v11 = vld [vmem:[%s28451_s0 + $0x48] ss:$84 sps:$4 sm:$0xff]   ;;  %v18168_v15 = vld [vmem:[%s28450_s2 + $0xf94] ss:$12 sps:$4 sm:$0xff]  }
 0x129   :  { %4820 = vmatprep.subr.bf16.mxu1 %v18126_v17  ;;  %v21362_v40 = vadd.f32 %v4214_v39, %v4132_v28  ;;  %v18170_v16 = vld [vmem:[%s28451_s0 + $0xec] ss:$84 sps:$4 sm:$0xff]   ;;  %v21439_v17 = vpop.f32.mrf.mxu0  ;;  %v21441_v18 = vpop.f32.mrf.mxu1  ;;  %v18172_v19 = vld [vmem:[%s28451_s0 + $0xf4] ss:$84 sps:$4 sm:$0xff]   ;;  %v18166_v28 = vld [vmem:[%s28450_s2 + $0xf90] ss:$12 sps:$4 sm:$0xff]  }
 0x12b   :  { %4738 = vmatpush2.bf16.msra.mxu0 %v18121_v20  ;;  %v18174_v20 = vld [vmem:[%s28450_s2 + $0xb0] ss:$12 sps:$4 sm:$0xff]  }
 0x12c   :  { %4821 = vmatpush2.bf16.msra.mxu1 %v18124_v25  ;;  %4739 = vmatprep.subr.bf16.mxu0 %v18129_v27 }
 0x12d   :  { %4822 = vmatprep.subr.bf16.mxu1 %v18132_v36 }
 0x12f   :  { %4740 = vmatpush2.bf16.msra.mxu0 %v18127_v41  ;;  %v18175_v41 = vld [vmem:[%s28451_s0 + $0xe8] ss:$84 sps:$4 sm:$0xff]  }
 0x130   :  { %4823 = vmatpush2.bf16.msra.mxu1 %v18130_v42  ;;  %4741 = vmatprep.subr.bf16.mxu0 %v18135_v43  ;;  %v18176_v42 = vld [vmem:[%s28451_s0 + $0xf0] ss:$84 sps:$4 sm:$0xff]  }
 0x131   :  { %4824 = vmatprep.subr.bf16.mxu1 %v18138_v44 }
 0x133   :  { %4742 = vmatpush2.bf16.msra.mxu0 %v18133_v45  ;;  %v18177_v45 = vld [vmem:[%s28450_s2 + $0xf78] ss:$12 sps:$4 sm:$0xff]  }
 0x134   :  { %4825 = vmatpush2.bf16.msra.mxu1 %v18136_v46  ;;  %4743 = vmatprep.subr.bf16.mxu0 %v18141_v47  ;;  %v18181_v46 = vld [vmem:[%s28450_s2 + $0x98] ss:$12 sps:$4 sm:$0xff]  }
 0x135   :  { %4826 = vmatprep.subr.bf16.mxu1 %v18144_v48 }
 0x137   :  { %4744 = vmatpush2.bf16.msra.mxu0 %v18139_v49  ;;  %v18182_v49 = vld [vmem:[%s28451_s0 + $0x194] ss:$84 sps:$4 sm:$0xff]  }
 0x138   :  { %4827 = vmatpush2.bf16.msra.mxu1 %v18142_v50  ;;  %4745 = vmatprep.subr.bf16.mxu0 %v18147_v51  ;;  %v18184_v51 = vld [vmem:[%s28451_s0 + $0x19c] ss:$84 sps:$4 sm:$0xff]  }
 0x139   :  { %4828 = vmatprep.subr.bf16.mxu1 %v18150_v53 }
 0x13b   :  { %4746 = vmatpush2.bf16.msra.mxu0 %v18145_v54 }
 0x13c   :  { %4829 = vmatpush2.bf16.msra.mxu1 %v18148_v56  ;;  %4747 = vmatprep.subr.bf16.mxu0 %v18153_v57  ;;  %v18188_v56 = vld [vmem:[%s28450_s2 + $0xf64] ss:$12 sps:$4 sm:$0xff]  }
 0x13d   :  { %4830 = vmatprep.subr.bf16.mxu1 %v18156_v58  ;;  %v18191_v58 = vld [vmem:[%s28450_s2 + $0x140] ss:$12 sps:$4 sm:$0xff]  }
 0x13f   :  { %4748 = vmatpush2.bf16.msra.mxu0 %v18151_v60 }
 0x140   :  { %4831 = vmatpush2.bf16.msra.mxu1 %v18154_v5  ;;  %4883 = vmatprep.subr.bf16.mxu0 %v18165_v9  ;;  %v18192_v9 = vld [vmem:[%s28450_s2 + $0x80] ss:$12 sps:$4 sm:$0xff]  }
 0x141   :  { %16182 = vmatprep.subr.bf16.mxu1 %v18169_v13 }
 0x142   :  { %v4253_v21 = vpop.f32.mrf.mxu0  ;;  %4750 = vmatmul.mubr.bf16.vlgmr.msra.gmra.mxu0 %v18157_v10 }
 0x143   :  { %4833 = vmatmul.mubr.bf16.vlgmr.msra.gmra.mxu1 %v18160_v11  ;;  %v4336_v25 = vpop.f32.mrf.mxu1  ;;  %v4254_v27 = vadd.f32 %v4253_v21, %v21148_v24  ;;  %4884 = vmatpush1.bf16.msra.mxu0 %v18163_v14  ;;  %v18179_v24 = vld [vmem:[%s28450_s2 + $0xf7c] ss:$12 sps:$4 sm:$0xff]  }
 0x144   :  { %4759 = vmatprep.mubr.bf16.mxu0 %v18170_v16  ;;  %v4255_v36 = vpop.f32.mrf.mxu0  ;;  %4885 = vmatprep.subr.bf16.mxu0 %v18168_v15  ;;  %v18196_v11 = vld [vmem:[%s28450_s2 + $0x128] ss:$12 sps:$4 sm:$0xff]   ;;  %v18189_v15 = vld [vmem:[%s28451_s0 + $0x190] ss:$84 sps:$4 sm:$0xff]   ;;  %v18190_v16 = vld [vmem:[%s28451_s0 + $0x198] ss:$84 sps:$4 sm:$0xff]  }
 0x145   :  { %v4338_v39 = vpop.f32.mrf.mxu1  ;;  %4842 = vmatprep.mubr.bf16.mxu1 %v18172_v19  ;;  %v21465_v43 = vadd.f32 %v4336_v25, %v4254_v27  ;;  %v4256_v44 = vadd.f32 %v4255_v36, %v21160_v31  ;;  %16183 = vmatpush3.bf16.msra.mxu1 %v18174_v20  ;;  %v18193_v21 = vld [vmem:[%s28450_s2 + $0xf48] ss:$12 sps:$4 sm:$0xff]  }
 0x146   :  { %v4257_v47 = vpop.f32.mrf.mxu0  ;;  %16184 = vmatprep.subr.bf16.mxu1 %v18180_v26  ;;  %v18197_v25 = vld [vmem:[%s28450_s2 + $0x68] ss:$12 sps:$4 sm:$0xff]  }
 0x147   :  { %v4340_v48 = vpop.f32.mrf.mxu1  ;;  %v21477_v50 = vadd.f32 %v4338_v39, %v4256_v44  ;;  %v4258_v31 = vadd.f32 %v4257_v47, %v21176_v38  ;;  %4886 = vmatpush1.bf16.msra.mxu0 %v18166_v28  ;;  %v18186_v38 = vld [vmem:[%s28450_s2 + $0xf60] ss:$12 sps:$4 sm:$0xff]   ;;  %v18198_v28 = vld [vmem:[%s28451_s0 + $0x23c] ss:$84 sps:$4 sm:$0xff]   ;;  %v18200_v39 = vld [vmem:[%s28451_s0 + $0x244] ss:$84 sps:$4 sm:$0xff]  }
 0x148   :  { %v21483_v53 = vpop.f32.mrf.mxu0  ;;  %4887 = vmatprep.subr.bf16.mxu0 %v18179_v24  ;;  %v18204_v24 = vld [vmem:[%s28450_s2 + $0x110] ss:$12 sps:$4 sm:$0xff]  }
 0x149   :  { %v21485_v54 = vpop.f32.mrf.mxu1  ;;  %v21490_v57 = vadd.f32 %v4340_v48, %v4258_v31  ;;  %16185 = vmatpush3.bf16.msra.mxu1 %v18181_v46  ;;  %v18208_v48 = vld [vmem:[%s28450_s2 + $0x50] ss:$12 sps:$4 sm:$0xff]   ;;  %v18209_v31 = vld [vmem:[%s28450_s2 + $0xf8] ss:$12 sps:$4 sm:$0xff]  }
 0x14a   :  { %v4263_v60 = vpop.f32.mrf.mxu0  ;;  %4760 = vmatmul.mubr.bf16.gmra.mxu0 %v18175_v41  ;;  %16186 = vmatprep.subr.bf16.mxu1 %v18191_v58  ;;  %v18203_v58 = vld [vmem:[%s28451_s0 + $0x240] ss:$84 sps:$4 sm:$0xff]  }
 0x14b   :  { %4843 = vmatmul.mubr.bf16.gmra.mxu1 %v18176_v42  ;;  %v4346_v5 = vpop.f32.mrf.mxu1  ;;  %v4264_v10 = vadd.f32 %v4263_v60, %v21210_v55  ;;  %4888 = vmatpush1.bf16.msra.mxu0 %v18177_v45  ;;  %v18195_v55 = vld [vmem:[%s28450_s2 + $0xf4c] ss:$12 sps:$4 sm:$0xff]   ;;  %v18207_v45 = vld [vmem:[%s28450_s2 + $0xf34] ss:$12 sps:$4 sm:$0xff]  }
 0x14c   :  { %4769 = vmatprep.mubr.bf16.mxu0 %v18182_v49  ;;  %v4265_v13 = vpop.f32.mrf.mxu0  ;;  %4852 = vmatprep.mubr.bf16.mxu1 %v18184_v51 }
 0x14d   :  { %v4348_v14 = vpop.f32.mrf.mxu1  ;;  %4889 = vmatprep.subr.bf16.mxu0 %v18188_v56  ;;  %v4266_v19 = vadd.f32 %v4265_v13, %v21219_v62  ;;  %v21515_v20 = vadd.f32 %v4346_v5, %v4264_v10  ;;  %16187 = vmatpush3.bf16.msra.mxu1 %v18192_v9  ;;  %v18210_v9 = vld [vmem:[%s28450_s2 + $0x38] ss:$12 sps:$4 sm:$0xff]  }
 0x14e   :  { %v4267_v26 = vpop.f32.mrf.mxu0  ;;  %16188 = vmatprep.subr.bf16.mxu1 %v18196_v11  ;;  %v18211_v13 = vld [vmem:[%s28450_s2 + $0xf18] ss:$12 sps:$4 sm:$0xff]  }
 0x14f   :  { %v4350_v27 = vpop.f32.mrf.mxu1  ;;  %v4268_v62 = vadd.f32 %v4267_v26, %v21231_v4  ;;  %v21527_v36 = vadd.f32 %v4348_v14, %v4266_v19  ;;  %4890 = vmatpush1.bf16.msra.mxu0 %v18186_v38  ;;  %v18205_v4 = vld [vmem:[%s28450_s2 + $0xf30] ss:$12 sps:$4 sm:$0xff]   ;;  %v18202_v38 = vld [vmem:[%s28451_s0 + $0x238] ss:$84 sps:$4 sm:$0xff]  }
 0x150   :  { %v21532_v41 = vpop.f32.mrf.mxu0  ;;  %4891 = vmatprep.subr.bf16.mxu0 %v18195_v55  ;;  %v18214_v14 = vld [vmem:[%s28451_s0 + $0x2e4] ss:$84 sps:$4 sm:$0xff]  }
 0x151   :  { %v21534_v42 = vpop.f32.mrf.mxu1  ;;  %v21539_v44 = vadd.f32 %v4350_v27, %v4268_v62  ;;  %16189 = vmatpush3.bf16.msra.mxu1 %v18197_v25 }
 0x152   :  { %v4273_v46 = vpop.f32.mrf.mxu0  ;;  %4770 = vmatmul.mubr.bf16.gmra.mxu0 %v18189_v15  ;;  %16190 = vmatprep.subr.bf16.mxu1 %v18204_v24 }
 0x153   :  { %4853 = vmatmul.mubr.bf16.gmra.mxu1 %v18190_v16  ;;  %v4356_v47 = vpop.f32.mrf.mxu1  ;;  %v4274_v49 = vadd.f32 %v4273_v46, %v21259_v22  ;;  %4892 = vmatpush1.bf16.msra.mxu0 %v18193_v21  ;;  %v18213_v22 = vld [vmem:[%s28450_s2 + $0xf1c] ss:$12 sps:$4 sm:$0xff]   ;;  %v18216_v16 = vld [vmem:[%s28451_s0 + $0x2ec] ss:$84 sps:$4 sm:$0xff]  }
 0x154   :  { %v4275_v51 = vpop.f32.mrf.mxu0  ;;  %4779 = vmatprep.mubr.bf16.mxu0 %v18198_v28  ;;  %4862 = vmatprep.mubr.bf16.mxu1 %v18200_v39  ;;  %v18220_v21 = vld [vmem:[%s28450_s2 + $0xe0] ss:$12 sps:$4 sm:$0xff]   ;;  %v18225_v46 = vld [vmem:[%s28450_s2 + $0xc8] ss:$12 sps:$4 sm:$0xff]  }
 0x155   :  { %v4358_v56 = vpop.f32.mrf.mxu1  ;;  %v4276_v60 = vadd.f32 %v4275_v51, %v21268_v29  ;;  %v21564_v5 = vadd.f32 %v4356_v47, %v4274_v49  ;;  %4893 = vmatprep.subr.bf16.mxu0 %v18207_v45  ;;  %16191 = vmatpush3.bf16.msra.mxu1 %v18208_v48  ;;  %v18221_v28 = vld [vmem:[%s28450_s2 + $0x20] ss:$12 sps:$4 sm:$0xff]   ;;  %v18228_v48 = vld [vmem:[%s28450_s2 + $0x2f0] ss:$12 sps:$4 sm:$0xff]  }
 0x156   :  { %v4277_v10 = vpop.f32.mrf.mxu0  ;;  %16192 = vmatprep.subr.bf16.mxu1 %v18209_v31  ;;  %v18222_v39 = vld [vmem:[%s28450_s2 + $0xf00] ss:$12 sps:$4 sm:$0xff]   ;;  %v18219_v51 = vld [vmem:[%s28451_s0 + $0x2e8] ss:$84 sps:$4 sm:$0xff]  }
 0x157   :  { %v4360_v11 = vpop.f32.mrf.mxu1  ;;  %v4278_v29 = vadd.f32 %v4277_v10, %v21280_v37  ;;  %v21576_v15 = vadd.f32 %v4358_v56, %v4276_v60  ;;  %4894 = vmatpush1.bf16.msra.mxu0 %v18205_v4  ;;  %v18224_v37 = vld [vmem:[%s28450_s2 + $0xf04] ss:$12 sps:$4 sm:$0xff]   ;;  %v18218_v45 = vld [vmem:[%s28451_s0 + $0x2e0] ss:$84 sps:$4 sm:$0xff]  }
 0x158   :  { %v21581_v55 = vpop.f32.mrf.mxu0  ;;  %4895 = vmatprep.subr.bf16.mxu0 %v18213_v22  ;;  %v18232_v60 = vld [vmem:[%s28450_s2 + $0x470] ss:$12 sps:$4 sm:$0xff]  }
 0x159   :  { %v21583_v19 = vpop.f32.mrf.mxu1  ;;  %v21588_v25 = vadd.f32 %v4360_v11, %v4278_v29  ;;  %16193 = vmatpush3.bf16.msra.mxu1 %v18210_v9 }
 0x15a   :  { %v4283_v26 = vpop.f32.mrf.mxu0  ;;  %4780 = vmatmul.mubr.bf16.gmra.mxu0 %v18202_v38  ;;  %16194 = vmatprep.subr.bf16.mxu1 %v18220_v21 }
 0x15b   :  { %4863 = vmatmul.mubr.bf16.gmra.mxu1 %v18203_v58  ;;  %v4366_v27 = vpop.f32.mrf.mxu1  ;;  %v4284_v62 = vadd.f32 %v4283_v26, %v21305_v52  ;;  %4789 = vmatprep.mubr.bf16.mxu0 %v18214_v14 }
 0x15c   :  { %v4285_v24 = vpop.f32.mrf.mxu0  ;;  %4872 = vmatprep.mubr.bf16.mxu1 %v18216_v16  ;;  %4896 = vmatpush1.bf16.msra.mxu0 %v18211_v13  ;;  %v28461_v13 = vmov 0   ;;  %v19361_v16 = vld [vmem:[%s28451_s0 + $0x4] ss:$84 sps:$4 sm:$0xff]  }
 0x15d   :  { %v4368_v4 = vpop.f32.mrf.mxu1  ;;  %v4286_v52 = vadd.f32 %v4285_v24, %v21317_v61  ;;  %v21607_v47 = vadd.f32 %v4366_v27, %v4284_v62  ;;  %4897 = vmatprep.subr.bf16.mxu0 %v18224_v37  ;;  %16195 = vmatpush3.bf16.msra.mxu1 %v18221_v28  ;;  %v18226_v61 = vld [vmem:[%s28450_s2 + $0x8] ss:$12 sps:$4 sm:$0xff]  }
 0x15e   :  { %v4287_v49 = vpop.f32.mrf.mxu0  ;;  %16196 = vmatprep.subr.bf16.mxu1 %v18225_v46  ;;  %v18231_v46 = vld [vmem:[%s28450_s2 + $0x218] ss:$12 sps:$4 sm:$0xff]  }
 0x15f   :  { %v4370_v31 = vpop.f32.mrf.mxu1  ;;  %v4288_v56 = vadd.f32 %v4287_v49, %v21326_v7  ;;  %v21616_v38 = vadd.f32 %v4368_v4, %v4286_v52  ;;  %v18233_v4 = vld [vmem:[%s28450_s2 + $0x3b0] ss:$12 sps:$4 sm:$0xff]   ;;  %v19363_v52 = vld [vmem:[%s28451_s0 + $0xac] ss:$84 sps:$4 sm:$0xff]   ;;  %v18238_v49 = vld [vmem:[%s28450_s2 + $0x398] ss:$12 sps:$4 sm:$0xff]  }
 0x160   :  { %v21621_v58 = vpop.f32.mrf.mxu0  ;;  %4898 = vmatpush1.bf16.msra.mxu0 %v18222_v39  ;;  %v18229_v39 = vld [vmem:[%s28450_s2 + $0x230] ss:$12 sps:$4 sm:$0xff]  }
 0x161   :  { %v21623_v22 = vpop.f32.mrf.mxu1  ;;  %v21628_v9 = vadd.f32 %v4370_v31, %v4288_v56  ;;  %16228 = vmatprep.subr.bf16.mxu0 %v18228_v48  ;;  %16197 = vmatpush3.bf16.msra.mxu1 %v18226_v61  ;;  %v18235_v48 = vld [vmem:[%s28450_s2 + $0x2c0] ss:$12 sps:$4 sm:$0xff]   ;;  %v18239_v56 = vld [vmem:[%s28450_s2 + $0x2a8] ss:$12 sps:$4 sm:$0xff]  }
 0x162   :  { %v4293_v7 = vpop.f32.mrf.mxu0  ;;  %4790 = vmatmul.mubr.bf16.gmra.mxu0 %v18218_v45  ;;  %16274 = vmatprep.subr.bf16.mxu1 %v18232_v60  ;;  %v18237_v45 = vld [vmem:[%s28450_s2 + $0x458] ss:$12 sps:$4 sm:$0xff]   ;;  %v18241_v61 = vld [vmem:[%s28450_s2 + $0x1e8] ss:$12 sps:$4 sm:$0xff]   ;;  %v18242_v60 = vld [vmem:[%s28450_s2 + $0x440] ss:$12 sps:$4 sm:$0xff]  }
 0x163   :  { %4873 = vmatmul.mubr.bf16.gmra.mxu1 %v18219_v51  ;;  %v4376_v10 = vpop.f32.mrf.mxu1  ;;  %v4294_v11 = vadd.f32 %v4293_v7, %v21348_v23  ;;  %4915 = vmatprep.mubr.bf16.mxu0 %v28461_v13  ;;  %v18227_v23 = vld [vmem:[%s28451_s0 + $0x50] ss:$84 sps:$4 sm:$0xff]   ;;  %v18234_v31 = vld [vmem:[%s28451_s0 + $0xf8] ss:$84 sps:$4 sm:$0xff]   ;;  %v19364_v7 = vld [vmem:[%s28451_s0 + $0xa8] ss:$84 sps:$4 sm:$0xff]  }
 0x164   :  { %v4295_v14 = vpop.f32.mrf.mxu0  ;;  %4998 = vmatprep.mubr.bf16.mxu1 %v19361_v16  ;;  %v18236_v51 = vld [vmem:[%s28450_s2 + $0x200] ss:$12 sps:$4 sm:$0xff]   ;;  %v18244_v16 = vld [vmem:[%s28450_s2 + $0x290] ss:$12 sps:$4 sm:$0xff]  }
 0x165   :  { %v4378_v29 = vpop.f32.mrf.mxu1  ;;  %v4296_v21 = vadd.f32 %v4295_v14, %v21357_v30  ;;  %v21636_v37 = vadd.f32 %v4376_v10, %v4294_v11  ;;  %v18230_v30 = vld [vmem:[%s28450_s2 + $0x2d8] ss:$12 sps:$4 sm:$0xff]   ;;  %v18243_v10 = vld [vmem:[%s28450_s2 + $0x380] ss:$12 sps:$4 sm:$0xff]   ;;  %v18245_v11 = vld [vmem:[%s28450_s2 + $0x428] ss:$12 sps:$4 sm:$0xff]  }
 0x166   :  { %v4297_v26 = vpop.f32.mrf.mxu0  ;;  %v19365_v14 = vld [vmem:[%s28451_s0 + $0x154] ss:$84 sps:$4 sm:$0xff]  }
 0x167   :  { %v4380_v27 = vpop.f32.mrf.mxu1  ;;  %v4298_v28 = vadd.f32 %v4297_v26, %v21362_v40  ;;  %v21642_v62 = vadd.f32 %v4378_v29, %v4296_v21  ;;  %v19362_v40 = vld [vmem:[%s28451_s0] ss:$84 sps:$4 sm:$0xff]   ;;  %v18246_v21 = vld [vmem:[%s28450_s2 + $0x1d0] ss:$12 sps:$4 sm:$0xff]  }
 0x168   :  { %v18240_v29 = vld [vmem:[%s28451_s0 + $0x1a0] ss:$84 sps:$4 sm:$0xff]  }
 0x169   :  { %v21650_v24 = vadd.f32 %v4380_v27, %v4298_v28  ;;  %v18247_v26 = vld [vmem:[%s28450_s2 + $0x368] ss:$12 sps:$4 sm:$0xff]   ;;  %v18249_v27 = vld [vmem:[%s28450_s2 + $0x410] ss:$12 sps:$4 sm:$0xff]  }
 0x16a   :  { %4916 = vmatmul.mubr.bf16.vlgmr.msra.gmra.mxu0 %v18227_v23  ;;  %v18250_v23 = vld [vmem:[%s28450_s2 + $0x278] ss:$12 sps:$4 sm:$0xff]   ;;  %v18251_v28 = vld [vmem:[%s28450_s2 + $0x350] ss:$12 sps:$4 sm:$0xff]  }
 0x16b   :  { %4999 = vmatmul.mubr.bf16.vlgmr.msra.gmra.mxu1 %v19362_v40  ;;  %16229 = vmatpush3.bf16.msra.mxu0 %v18229_v39  ;;  %v19366_v39 = vld [vmem:[%s28451_s0 + $0x150] ss:$84 sps:$4 sm:$0xff]  }
 0x16c   :  { %4925 = vmatprep.mubr.bf16.mxu0 %v28461_v13  ;;  %16230 = vmatprep.subr.bf16.mxu0 %v18230_v30  ;;  %v18252_v30 = vld [vmem:[%s28450_s2 + $0x1b8] ss:$12 sps:$4 sm:$0xff]   ;;  %v19367_v40 = vld [vmem:[%s28451_s0 + $0x1fc] ss:$84 sps:$4 sm:$0xff]  }
 0x16d   :  { %5006 = vmatprep.mubr.bf16.mxu1 %v19363_v52  ;;  %16275 = vmatpush3.bf16.msra.mxu1 %v18233_v4  ;;  %v18253_v4 = vld [vmem:[%s28450_s2 + $0x3f8] ss:$12 sps:$4 sm:$0xff]  }
 0x16e   :  { %16276 = vmatprep.subr.bf16.mxu1 %v18237_v45  ;;  %v18255_v45 = vld [vmem:[%s28450_s2 + $0x260] ss:$12 sps:$4 sm:$0xff]   ;;  %v18254_v52 = vld [vmem:[%s28450_s2 + $0x338] ss:$12 sps:$4 sm:$0xff]  }
 0x16f   :  { %16231 = vmatpush3.bf16.msra.mxu0 %v18231_v46  ;;  %v18248_v46 = vld [vmem:[%s28451_s0 + $0x248] ss:$84 sps:$4 sm:$0xff]  }
 0x170   :  { %16232 = vmatprep.subr.bf16.mxu0 %v18235_v48  ;;  %v18256_v48 = vld [vmem:[%s28450_s2 + $0x1a0] ss:$12 sps:$4 sm:$0xff]  }
 0x171   :  { %16277 = vmatpush3.bf16.msra.mxu1 %v18238_v49  ;;  %v21748_v49 = vpop.f32.mrf.mxu0 }
 0x172   :  { %4926 = vmatmul.mubr.bf16.gmra.mxu0 %v18234_v31  ;;  %16278 = vmatprep.subr.bf16.mxu1 %v18242_v60  ;;  %v21750_v31 = vpop.f32.mrf.mxu1  ;;  %v19368_v60 = vld [vmem:[%s28451_s0 + $0x1f8] ss:$84 sps:$4 sm:$0xff]  }
 0x173   :  { %5007 = vmatmul.mubr.bf16.gmra.mxu1 %v19364_v7  ;;  %16233 = vmatpush3.bf16.msra.mxu0 %v18236_v51  ;;  %v18258_v51 = vld [vmem:[%s28450_s2 + $0x3e0] ss:$12 sps:$4 sm:$0xff]  }
 0x174   :  { %4935 = vmatprep.mubr.bf16.mxu0 %v28461_v13  ;;  %5014 = vmatprep.mubr.bf16.mxu1 %v19365_v14  ;;  %v18261_v14 = vld [vmem:[%s28450_s2 + $0x188] ss:$12 sps:$4 sm:$0xff]  }
 0x175   :  { %16234 = vmatprep.subr.bf16.mxu0 %v18239_v56  ;;  %16279 = vmatpush3.bf16.msra.mxu1 %v18243_v10  ;;  %v18260_v56 = vld [vmem:[%s28450_s2 + $0x248] ss:$12 sps:$4 sm:$0xff]   ;;  %v18259_v10 = vld [vmem:[%s28450_s2 + $0x320] ss:$12 sps:$4 sm:$0xff]  }
 0x176   :  { %16280 = vmatprep.subr.bf16.mxu1 %v18245_v11 }
 0x177   :  { %16235 = vmatpush3.bf16.msra.mxu0 %v18241_v61 }
 0x178   :  { %16236 = vmatprep.subr.bf16.mxu0 %v18244_v16 }
 0x179   :  { %16281 = vmatpush3.bf16.msra.mxu1 %v18247_v26  ;;  %v18262_v26 = vld [vmem:[%s28450_s2 + $0x3c8] ss:$12 sps:$4 sm:$0xff]  }
 0x17a   :  { %4936 = vmatmul.mubr.bf16.gmra.mxu0 %v18240_v29  ;;  %16282 = vmatprep.subr.bf16.mxu1 %v18249_v27 }
 0x17b   :  { %5015 = vmatmul.mubr.bf16.gmra.mxu1 %v19366_v39  ;;  %16237 = vmatpush3.bf16.msra.mxu0 %v18246_v21  ;;  %v19369_v21 = vld [vmem:[%s28451_s0 + $0x2a4] ss:$84 sps:$4 sm:$0xff]  }
 0x17c   :  { %4945 = vmatprep.mubr.bf16.mxu0 %v28461_v13  ;;  %5022 = vmatprep.mubr.bf16.mxu1 %v19367_v40 }
 0x17d   :  { %16238 = vmatprep.subr.bf16.mxu0 %v18250_v23  ;;  %16283 = vmatpush3.bf16.msra.mxu1 %v18251_v28  ;;  %v18264_v23 = vld [vmem:[%s28450_s2 + $0x5f0] ss:$12 sps:$4 sm:$0xff]  }
 0x17e   :  { %16284 = vmatprep.subr.bf16.mxu1 %v18253_v4 }
 0x17f   :  { %16239 = vmatpush3.bf16.msra.mxu0 %v18252_v30  ;;  %v18257_v30 = vld [vmem:[%s28451_s0 + $0x2f0] ss:$84 sps:$4 sm:$0xff]  }
 0x180   :  { %16240 = vmatprep.subr.bf16.mxu0 %v18255_v45 }
 0x181   :  { %16285 = vmatpush3.bf16.msra.mxu1 %v18254_v52  ;;  %v18268_v52 = vld [vmem:[%s28450_s2 + $0x770] ss:$12 sps:$4 sm:$0xff]  }
 0x182   :  { %v4419_v61 = vpop.f32.mrf.mxu0  ;;  %4946 = vmatmul.mubr.bf16.gmra.mxu0 %v18248_v46  ;;  %16286 = vmatprep.subr.bf16.mxu1 %v18258_v51 }
 0x183   :  { %5023 = vmatmul.mubr.bf16.gmra.mxu1 %v19368_v60  ;;  %v4502_v7 = vpop.f32.mrf.mxu1  ;;  %v4420_v11 = vadd.f32 %v4419_v61, %v21465_v43  ;;  %4955 = vmatprep.mubr.bf16.mxu0 %v28461_v13  ;;  %v19371_v60 = vld [vmem:[%s28451_s0 + $0xc] ss:$84 sps:$4 sm:$0xff]  }
 0x184   :  { %v4421_v29 = vpop.f32.mrf.mxu0  ;;  %5030 = vmatprep.mubr.bf16.mxu1 %v19369_v21  ;;  %16241 = vmatpush3.bf16.msra.mxu0 %v18256_v48 }
 0x185   :  { %v4504_v16 = vpop.f32.mrf.mxu1  ;;  %v21775_v43 = vadd.f32 %v4502_v7, %v4420_v11  ;;  %v4422_v27 = vadd.f32 %v4421_v29, %v21477_v50  ;;  %16242 = vmatprep.subr.bf16.mxu0 %v18260_v56  ;;  %16287 = vmatpush3.bf16.msra.mxu1 %v18259_v10  ;;  %v18263_v50 = vld [vmem:[%s28450_s2 + $0x308] ss:$12 sps:$4 sm:$0xff]  }
 0x186   :  { %v4423_v28 = vpop.f32.mrf.mxu0  ;;  %16288 = vmatprep.subr.bf16.mxu1 %v18262_v26  ;;  %v19372_v11 = vld [vmem:[%s28451_s0 + $0x14] ss:$84 sps:$4 sm:$0xff]  }
 0x187   :  { %v4506_v39 = vpop.f32.mrf.mxu1  ;;  %v21784_v4 = vadd.f32 %v4504_v16, %v4422_v27  ;;  %v4424_v40 = vadd.f32 %v4423_v28, %v21490_v57  ;;  %v19370_v57 = vld [vmem:[%s28451_s0 + $0x2a0] ss:$84 sps:$4 sm:$0xff]   ;;  %v18265_v27 = vld [vmem:[%s28450_s2 + $0x530] ss:$12 sps:$4 sm:$0xff]  }
 0x188   :  { %v21790_v45 = vpop.f32.mrf.mxu0  ;;  %16243 = vmatpush3.bf16.msra.mxu0 %v18261_v14 }
 0x189   :  { %v21792_v46 = vpop.f32.mrf.mxu1  ;;  %v21797_v48 = vadd.f32 %v4506_v39, %v4424_v40  ;;  %16320 = vmatprep.subr.bf16.mxu0 %v18264_v23  ;;  %16289 = vmatpush3.bf16.msra.mxu1 %v18263_v50  ;;  %v19373_v40 = vld [vmem:[%s28451_s0 + $0x8] ss:$84 sps:$4 sm:$0xff]   ;;  %v19374_v50 = vld [vmem:[%s28451_s0 + $0x10] ss:$84 sps:$4 sm:$0xff]  }
 0x18a   :  { %v4429_v51 = vpop.f32.mrf.mxu0  ;;  %4956 = vmatmul.mubr.bf16.gmra.mxu0 %v18257_v30  ;;  %16366 = vmatprep.subr.bf16.mxu1 %v18268_v52 }
 0x18b   :  { %5031 = vmatmul.mubr.bf16.gmra.mxu1 %v19370_v57  ;;  %v4512_v56 = vpop.f32.mrf.mxu1  ;;  %v4430_v61 = vadd.f32 %v4429_v51, %v21515_v20  ;;  %5071 = vmatprep.mubr.bf16.mxu0 %v19371_v60  ;;  %v18272_v51 = vld [vmem:[%s28450_s2 + $0x758] ss:$12 sps:$4 sm:$0xff]  }
 0x18c   :  { %v4431_v7 = vpop.f32.mrf.mxu0  ;;  %5144 = vmatprep.mubr.bf16.mxu1 %v19372_v11 }
 0x18d   :  { %v4514_v10 = vpop.f32.mrf.mxu1  ;;  %v4432_v14 = vadd.f32 %v4431_v7, %v21527_v36  ;;  %v21810_v29 = vadd.f32 %v4512_v56, %v4430_v61  ;;  %v18266_v36 = vld [vmem:[%s28450_s2 + $0x5d8] ss:$12 sps:$4 sm:$0xff]   ;;  %v19375_v61 = vld [vmem:[%s28451_s0 + $0xb4] ss:$84 sps:$4 sm:$0xff]  }
 0x18e   :  { %v4433_v16 = vpop.f32.mrf.mxu0  ;;  %v18267_v56 = vld [vmem:[%s28450_s2 + $0x518] ss:$12 sps:$4 sm:$0xff]  }
 0x18f   :  { %v4516_v20 = vpop.f32.mrf.mxu1  ;;  %v4434_v21 = vadd.f32 %v4433_v16, %v21539_v44  ;;  %v21813_v26 = vadd.f32 %v4514_v10, %v4432_v14  ;;  %v18269_v44 = vld [vmem:[%s28450_s2 + $0x6b0] ss:$12 sps:$4 sm:$0xff]   ;;  %v18273_v16 = vld [vmem:[%s28450_s2 + $0x698] ss:$12 sps:$4 sm:$0xff]  }
 0x190   :  { %v21818_v23 = vpop.f32.mrf.mxu0  ;;  %v19376_v10 = vld [vmem:[%s28451_s0 + $0xbc] ss:$84 sps:$4 sm:$0xff]  }
 0x191   :  { %v21820_v28 = vpop.f32.mrf.mxu1  ;;  %v21825_v39 = vadd.f32 %v4516_v20, %v4434_v21 }
 0x192   :  { %v4439_v30 = vpop.f32.mrf.mxu0  ;;  %5072 = vmatmul.mubr.bf16.vlgmr.msra.gmra.mxu0 %v19373_v40 }
 0x193   :  { %5145 = vmatmul.mubr.bf16.vlgmr.msra.gmra.mxu1 %v19374_v50  ;;  %v4522_v52 = vpop.f32.mrf.mxu1  ;;  %v4440_v57 = vadd.f32 %v4439_v30, %v21564_v5  ;;  %16321 = vmatpush3.bf16.msra.mxu0 %v18265_v27  ;;  %v18270_v5 = vld [vmem:[%s28450_s2 + $0x5c0] ss:$12 sps:$4 sm:$0xff]  }
 0x194   :  { %5079 = vmatprep.mubr.bf16.mxu0 %v19375_v61  ;;  %v4441_v60 = vpop.f32.mrf.mxu0  ;;  %16322 = vmatprep.subr.bf16.mxu0 %v18266_v36  ;;  %v18271_v30 = vld [vmem:[%s28450_s2 + $0x500] ss:$12 sps:$4 sm:$0xff]  }
 0x195   :  { %v4524_v7 = vpop.f32.mrf.mxu1  ;;  %5152 = vmatprep.mubr.bf16.mxu1 %v19376_v10  ;;  %v4442_v11 = vadd.f32 %v4441_v60, %v21576_v15  ;;  %v21853_v14 = vadd.f32 %v4522_v52, %v4440_v57  ;;  %16367 = vmatpush3.bf16.msra.mxu1 %v18269_v44  ;;  %v18274_v44 = vld [vmem:[%s28450_s2 + $0x5a8] ss:$12 sps:$4 sm:$0xff]   ;;  %v18276_v52 = vld [vmem:[%s28450_s2 + $0x740] ss:$12 sps:$4 sm:$0xff]   ;;  %v19377_v57 = vld [vmem:[%s28451_s0 + $0xb0] ss:$84 sps:$4 sm:$0xff]  }
 0x196   :  { %v4443_v20 = vpop.f32.mrf.mxu0  ;;  %16368 = vmatprep.subr.bf16.mxu1 %v18272_v51  ;;  %v18277_v60 = vld [vmem:[%s28450_s2 + $0x680] ss:$12 sps:$4 sm:$0xff]   ;;  %v19379_v10 = vld [vmem:[%s28451_s0 + $0x15c] ss:$84 sps:$4 sm:$0xff]  }
 0x197   :  { %v4526_v21 = vpop.f32.mrf.mxu1  ;;  %v4444_v27 = vadd.f32 %v4443_v20, %v21588_v25  ;;  %v21859_v36 = vadd.f32 %v4524_v7, %v4442_v11  ;;  %16323 = vmatpush3.bf16.msra.mxu0 %v18267_v56  ;;  %v18275_v25 = vld [vmem:[%s28450_s2 + $0x4e8] ss:$12 sps:$4 sm:$0xff]   ;;  %v19378_v56 = vld [vmem:[%s28451_s0 + $0xb8] ss:$84 sps:$4 sm:$0xff]  }
 0x198   :  { %v21864_v15 = vpop.f32.mrf.mxu0  ;;  %16324 = vmatprep.subr.bf16.mxu0 %v18270_v5  ;;  %v18279_v5 = vld [vmem:[%s28450_s2 + $0x728] ss:$12 sps:$4 sm:$0xff]   ;;  %v19380_v20 = vld [vmem:[%s28451_s0 + $0x164] ss:$84 sps:$4 sm:$0xff]  }
 0x199   :  { %v21866_v40 = vpop.f32.mrf.mxu1  ;;  %v21871_v50 = vadd.f32 %v4526_v21, %v4444_v27  ;;  %16369 = vmatpush3.bf16.msra.mxu1 %v18273_v16 }
 0x19a   :  { %v4449_v51 = vpop.f32.mrf.mxu0  ;;  %5080 = vmatmul.mubr.bf16.gmra.mxu0 %v19377_v57  ;;  %16370 = vmatprep.subr.bf16.mxu1 %v18276_v52 }
 0x19b   :  { %5153 = vmatmul.mubr.bf16.gmra.mxu1 %v19378_v56  ;;  %v4532_v61 = vpop.f32.mrf.mxu1  ;;  %v4450_v7 = vadd.f32 %v4449_v51, %v21607_v47  ;;  %16325 = vmatpush3.bf16.msra.mxu0 %v18271_v30  ;;  %v18278_v47 = vld [vmem:[%s28450_s2 + $0x590] ss:$12 sps:$4 sm:$0xff]  }
 0x19c   :  { %5087 = vmatprep.mubr.bf16.mxu0 %v19379_v10  ;;  %v4451_v11 = vpop.f32.mrf.mxu0  ;;  %5160 = vmatprep.mubr.bf16.mxu1 %v19380_v20  ;;  %v18280_v30 = vld [vmem:[%s28450_s2 + $0x4d0] ss:$12 sps:$4 sm:$0xff]   ;;  %v18285_v20 = vld [vmem:[%s28450_s2 + $0x4b8] ss:$12 sps:$4 sm:$0xff]  }
 0x19d   :  { %v4534_v16 = vpop.f32.mrf.mxu1  ;;  %16326 = vmatprep.subr.bf16.mxu0 %v18274_v44  ;;  %v4452_v21 = vadd.f32 %v4451_v11, %v21616_v38  ;;  %v21902_v27 = vadd.f32 %v4532_v61, %v4450_v7  ;;  %16371 = vmatpush3.bf16.msra.mxu1 %v18277_v60  ;;  %v18281_v44 = vld [vmem:[%s28450_s2 + $0x668] ss:$12 sps:$4 sm:$0xff]   ;;  %v18282_v38 = vld [vmem:[%s28450_s2 + $0x710] ss:$12 sps:$4 sm:$0xff]   ;;  %v18283_v60 = vld [vmem:[%s28450_s2 + $0x578] ss:$12 sps:$4 sm:$0xff]  }
 0x19e   :  { %v4453_v51 = vpop.f32.mrf.mxu0  ;;  %16372 = vmatprep.subr.bf16.mxu1 %v18279_v5  ;;  %v19381_v5 = vld [vmem:[%s28451_s0 + $0x158] ss:$84 sps:$4 sm:$0xff]   ;;  %v19382_v11 = vld [vmem:[%s28451_s0 + $0x160] ss:$84 sps:$4 sm:$0xff]  }
 0x19f   :  { %v4536_v57 = vpop.f32.mrf.mxu1  ;;  %v4454_v56 = vadd.f32 %v4453_v51, %v21628_v9  ;;  %v21911_v10 = vadd.f32 %v4534_v16, %v4452_v21  ;;  %16327 = vmatpush3.bf16.msra.mxu0 %v18275_v25  ;;  %v18284_v9 = vld [vmem:[%s28450_s2 + $0x650] ss:$12 sps:$4 sm:$0xff]   ;;  %v18286_v21 = vld [vmem:[%s28450_s2 + $0x6f8] ss:$12 sps:$4 sm:$0xff]  }
 0x1a0   :  { %v21916_v52 = vpop.f32.mrf.mxu0  ;;  %16328 = vmatprep.subr.bf16.mxu0 %v18278_v47 }
 0x1a1   :  { %v21918_v61 = vpop.f32.mrf.mxu1  ;;  %v21923_v7 = vadd.f32 %v4536_v57, %v4454_v56  ;;  %16373 = vmatpush3.bf16.msra.mxu1 %v18281_v44  ;;  %v19383_v56 = vld [vmem:[%s28451_s0 + $0x204] ss:$84 sps:$4 sm:$0xff]  }
 0x1a2   :  { %v4459_v25 = vpop.f32.mrf.mxu0  ;;  %5088 = vmatmul.mubr.bf16.gmra.mxu0 %v19381_v5  ;;  %v19384_v5 = vld [vmem:[%s28451_s0 + $0x20c] ss:$84 sps:$4 sm:$0xff]   ;;  %16374 = vmatprep.subr.bf16.mxu1 %v18282_v38 }
 0x1a3   :  { %5161 = vmatmul.mubr.bf16.gmra.mxu1 %v19382_v11  ;;  %v4542_v16 = vpop.f32.mrf.mxu1  ;;  %v4460_v47 = vadd.f32 %v4459_v25, %v21636_v37  ;;  %16329 = vmatpush3.bf16.msra.mxu0 %v18280_v30  ;;  %v18288_v37 = vld [vmem:[%s28450_s2 + $0x560] ss:$12 sps:$4 sm:$0xff]  }
 0x1a4   :  { %v4461_v51 = vpop.f32.mrf.mxu0  ;;  %5095 = vmatprep.mubr.bf16.mxu0 %v19383_v56  ;;  %5168 = vmatprep.mubr.bf16.mxu1 %v19384_v5  ;;  %v18287_v56 = vld [vmem:[%s28450_s2 + $0x638] ss:$12 sps:$4 sm:$0xff]   ;;  %v18290_v38 = vld [vmem:[%s28450_s2 + $0x6e0] ss:$12 sps:$4 sm:$0xff]   ;;  %v18295_v5 = vld [vmem:[%s28450_s2 + $0x608] ss:$12 sps:$4 sm:$0xff]  }
 0x1a5   :  { %v4544_v57 = vpop.f32.mrf.mxu1  ;;  %v4462_v30 = vadd.f32 %v4461_v51, %v21642_v62  ;;  %v21951_v44 = vadd.f32 %v4542_v16, %v4460_v47  ;;  %16330 = vmatprep.subr.bf16.mxu0 %v18283_v60  ;;  %16375 = vmatpush3.bf16.msra.mxu1 %v18284_v9  ;;  %v18289_v62 = vld [vmem:[%s28450_s2 + $0x4a0] ss:$12 sps:$4 sm:$0xff]   ;;  %v19386_v16 = vld [vmem:[%s28451_s0 + $0x208] ss:$84 sps:$4 sm:$0xff]  }
 0x1a6   :  { %v4463_v25 = vpop.f32.mrf.mxu0  ;;  %16376 = vmatprep.subr.bf16.mxu1 %v18286_v21  ;;  %v19385_v9 = vld [vmem:[%s28451_s0 + $0x200] ss:$84 sps:$4 sm:$0xff]  }
 0x1a7   :  { %v4546_v11 = vpop.f32.mrf.mxu1  ;;  %v4464_v13 = vadd.f32 %v4463_v25, %v21650_v24  ;;  %v21957_v6 = vadd.f32 %v4544_v57, %v4462_v30  ;;  %16331 = vmatpush3.bf16.msra.mxu0 %v18285_v20  ;;  %v18292_v24 = vld [vmem:[%s28450_s2 + $0x548] ss:$12 sps:$4 sm:$0xff]   ;;  %v18291_v20 = vld [vmem:[%s28450_s2 + $0x620] ss:$12 sps:$4 sm:$0xff]   ;;  %v18296_v57 = vld [vmem:[%s28450_s2 + $0x8f0] ss:$12 sps:$4 sm:$0xff]  }
 0x1a8   :  { %16332 = vmatprep.subr.bf16.mxu0 %v18288_v37  ;;  %v18293_v47 = vld [vmem:[%s28450_s2 + $0x488] ss:$12 sps:$4 sm:$0xff]   ;;  %v18300_v37 = vld [vmem:[%s28450_s2 + $0xa70] ss:$12 sps:$4 sm:$0xff]  }
 0x1a9   :  { %v21965_v60 = vadd.f32 %v4546_v11, %v4464_v13  ;;  %16377 = vmatpush3.bf16.msra.mxu1 %v18287_v56  ;;  %v19387_v13 = vld [vmem:[%s28451_s0 + $0x2ac] ss:$84 sps:$4 sm:$0xff]   ;;  %v19388_v21 = vld [vmem:[%s28451_s0 + $0x2b4] ss:$84 sps:$4 sm:$0xff]   ;;  %v19390_v25 = vld [vmem:[%s28451_s0 + $0x2b0] ss:$84 sps:$4 sm:$0xff]  }
 0x1aa   :  { %5096 = vmatmul.mubr.bf16.gmra.mxu0 %v19385_v9  ;;  %v18294_v51 = vld [vmem:[%s28450_s2 + $0x6c8] ss:$12 sps:$4 sm:$0xff]   ;;  %16378 = vmatprep.subr.bf16.mxu1 %v18290_v38  ;;  %v19391_v11 = vld [vmem:[%s28451_s0 + $0x1c] ss:$84 sps:$4 sm:$0xff]   ;;  %v19392_v56 = vld [vmem:[%s28451_s0 + $0x24] ss:$84 sps:$4 sm:$0xff]  }
 0x1ab   :  { %5169 = vmatmul.mubr.bf16.gmra.mxu1 %v19386_v16  ;;  %5103 = vmatprep.mubr.bf16.mxu0 %v19387_v13  ;;  %v19389_v30 = vld [vmem:[%s28451_s0 + $0x2a8] ss:$84 sps:$4 sm:$0xff]   ;;  %v19393_v16 = vld [vmem:[%s28451_s0 + $0x18] ss:$84 sps:$4 sm:$0xff]  }
 0x1ac   :  { %5176 = vmatprep.mubr.bf16.mxu1 %v19388_v21  ;;  %16333 = vmatpush3.bf16.msra.mxu0 %v18289_v62  ;;  %v4094_v62 = vadd.f32 %v21166_v34, %v21127_v12  ;;  %v18297_v38 = vld [vmem:[%s28450_s2 + $0x830] ss:$12 sps:$4 sm:$0xff]   ;;  %v19394_v34 = vld [vmem:[%s28451_s0 + $0x20] ss:$84 sps:$4 sm:$0xff]   ;;  %v19395_v21 = vld [vmem:[%s28451_s0 + $0xc4] ss:$84 sps:$4 sm:$0xff]  }
 0x1ad   :  { %16334 = vmatprep.subr.bf16.mxu0 %v18292_v24  ;;  %16379 = vmatpush3.bf16.msra.mxu1 %v18291_v20  ;;  %v18298_v24 = vld [vmem:[%s28450_s2 + $0x8d8] ss:$12 sps:$4 sm:$0xff]   ;;  %v18301_v9 = vld [vmem:[%s28450_s2 + $0x9b0] ss:$12 sps:$4 sm:$0xff]  }
 0x1ae   :  { %16380 = vmatprep.subr.bf16.mxu1 %v18294_v51  ;;  %v18304_v20 = vld [vmem:[%s28450_s2 + $0xa58] ss:$12 sps:$4 sm:$0xff]   ;;  %v4177_v13 = vadd.f32 %v21168_v35, %v4094_v62  ;;  %v19396_v51 = vld [vmem:[%s28451_s0 + $0xcc] ss:$84 sps:$4 sm:$0xff]  }
 0x1af   :  { %v18302_v35 = vld [vmem:[%s28450_s2 + $0x8c0] ss:$12 sps:$4 sm:$0xff]  }
 0x1b0   :  { %16335 = vmatpush3.bf16.msra.mxu0 %v18293_v47  ;;  %v18299_v47 = vld [vmem:[%s28450_s2 + $0x818] ss:$12 sps:$4 sm:$0xff]   ;;  %v18308_v62 = vld [vmem:[%s28450_s2 + $0xa40] ss:$12 sps:$4 sm:$0xff]  }
 0x1b1   :  { %16412 = vmatprep.subr.bf16.mxu0 %v18296_v57  ;;  %16381 = vmatpush3.bf16.msra.mxu1 %v18295_v5  ;;  %v4260_v57 = vadd.f32 %v21483_v53, %v4177_v13  ;;  %v18305_v5 = vld [vmem:[%s28450_s2 + $0x998] ss:$12 sps:$4 sm:$0xff]   ;;  %v18306_v53 = vld [vmem:[%s28450_s2 + $0x8a8] ss:$12 sps:$4 sm:$0xff]  }
 0x1b2   :  { %5104 = vmatmul.mubr.bf16.gmra.mxu0 %v19389_v30  ;;  %16458 = vmatprep.subr.bf16.mxu1 %v18300_v37  ;;  %v4104_v37 = vadd.f32 %v21224_v0, %v21127_v12  ;;  %v18303_v30 = vld [vmem:[%s28450_s2 + $0x800] ss:$12 sps:$4 sm:$0xff]   ;;  %v18307_v0 = vld [vmem:[%s28450_s2 + $0x7e8] ss:$12 sps:$4 sm:$0xff]  }
 0x1b3   :  { %5177 = vmatmul.mubr.bf16.gmra.mxu1 %v19390_v25  ;;  %5217 = vmatprep.mubr.bf16.mxu0 %v19391_v11  ;;  %v22054_v25 = vpop.f32.mrf.mxu0  ;;  %v22056_v11 = vpop.f32.mrf.mxu1 }
 0x1b4   :  { %5290 = vmatprep.mubr.bf16.mxu1 %v19392_v56  ;;  %v4343_v56 = vadd.f32 %v21485_v54, %v4260_v57 }
 0x1ba   :  { %5218 = vmatmul.mubr.bf16.vlgmr.msra.gmra.mxu0 %v19393_v16  ;;  %v18309_v16 = vld [vmem:[%s28450_s2 + $0x980] ss:$12 sps:$4 sm:$0xff]  }
 0x1bb   :  { %5291 = vmatmul.mubr.bf16.vlgmr.msra.gmra.mxu1 %v19394_v34  ;;  %16413 = vmatpush3.bf16.msra.mxu0 %v18297_v38  ;;  %v4187_v34 = vadd.f32 %v21226_v2, %v4104_v37  ;;  %v19400_v2 = vld [vmem:[%s28451_s0 + $0x174] ss:$84 sps:$4 sm:$0xff]   ;;  %v18312_v37 = vld [vmem:[%s28450_s2 + $0x7d0] ss:$12 sps:$4 sm:$0xff]  }
 0x1bc   :  { %5225 = vmatprep.mubr.bf16.mxu0 %v19395_v21  ;;  %16414 = vmatprep.subr.bf16.mxu0 %v18298_v24  ;;  %v19397_v24 = vld [vmem:[%s28451_s0 + $0xc0] ss:$84 sps:$4 sm:$0xff]  }
 0x1bd   :  { %5298 = vmatprep.mubr.bf16.mxu1 %v19396_v51  ;;  %16459 = vmatpush3.bf16.msra.mxu1 %v18301_v9  ;;  %v19398_v9 = vld [vmem:[%s28451_s0 + $0xc8] ss:$84 sps:$4 sm:$0xff]  }
 0x1be   :  { %16460 = vmatprep.subr.bf16.mxu1 %v18304_v20  ;;  %v4426_v20 = vadd.f32 %v21790_v45, %v4343_v56  ;;  %v18311_v21 = vld [vmem:[%s28450_s2 + $0xa28] ss:$12 sps:$4 sm:$0xff]   ;;  %v4270_v45 = vadd.f32 %v21532_v41, %v4187_v34 }
 0x1bf   :  { %16415 = vmatpush3.bf16.msra.mxu0 %v18299_v47  ;;  %v19399_v47 = vld [vmem:[%s28451_s0 + $0x16c] ss:$84 sps:$4 sm:$0xff]  }
 0x1c0   :  { %16416 = vmatprep.subr.bf16.mxu0 %v18302_v35  ;;  %v4509_v41 = vadd.f32 %v21792_v46, %v4426_v20 }
 0x1c1   :  { %16461 = vmatpush3.bf16.msra.mxu1 %v18305_v5 }
 0x1c2   :  { %v4585_v38 = vpop.f32.mrf.mxu0  ;;  %5226 = vmatmul.mubr.bf16.gmra.mxu0 %v19397_v24  ;;  %16462 = vmatprep.subr.bf16.mxu1 %v18308_v62  ;;  %v18314_v62 = vld [vmem:[%s28450_s2 + $0xa10] ss:$12 sps:$4 sm:$0xff]  }
 0x1c3   :  { %5299 = vmatmul.mubr.bf16.gmra.mxu1 %v19398_v9  ;;  %v4668_v54 = vpop.f32.mrf.mxu1  ;;  %v4586_v13 = vadd.f32 %v4585_v38, %v21775_v43  ;;  %16417 = vmatpush3.bf16.msra.mxu0 %v18303_v30  ;;  %v18310_v43 = vld [vmem:[%s28450_s2 + $0x890] ss:$12 sps:$4 sm:$0xff]   ;;  %v4114_v30 = vadd.f32 %v21273_v32, %v21127_v12  ;;  %v18313_v38 = vld [vmem:[%s28450_s2 + $0x968] ss:$12 sps:$4 sm:$0xff]  }
 0x1c4   :  { %5233 = vmatprep.mubr.bf16.mxu0 %v19399_v47  ;;  %v4587_v51 = vpop.f32.mrf.mxu0  ;;  %5306 = vmatprep.mubr.bf16.mxu1 %v19400_v2  ;;  %v19402_v47 = vld [vmem:[%s28451_s0 + $0x170] ss:$84 sps:$4 sm:$0xff]  }
 0x1c5   :  { %v4670_v35 = vpop.f32.mrf.mxu1  ;;  %16418 = vmatprep.subr.bf16.mxu0 %v18306_v53  ;;  %v22093_v57 = vadd.f32 %v4668_v54, %v4586_v13  ;;  %v4588_v5 = vadd.f32 %v4587_v51, %v21784_v4  ;;  %16463 = vmatpush3.bf16.msra.mxu1 %v18309_v16  ;;  %v18315_v54 = vld [vmem:[%s28450_s2 + $0x878] ss:$12 sps:$4 sm:$0xff]   ;;  %v4353_v16 = vadd.f32 %v21534_v42, %v4270_v45  ;;  %v19401_v13 = vld [vmem:[%s28451_s0 + $0x168] ss:$84 sps:$4 sm:$0xff]  }
 0x1c6   :  { %v4589_v56 = vpop.f32.mrf.mxu0  ;;  %16464 = vmatprep.subr.bf16.mxu1 %v18311_v21  ;;  %v18317_v21 = vld [vmem:[%s28450_s2 + $0x7b8] ss:$12 sps:$4 sm:$0xff]  }
 0x1c7   :  { %v4672_v53 = vpop.f32.mrf.mxu1  ;;  %v22105_v24 = vadd.f32 %v4670_v35, %v4588_v5  ;;  %v4590_v4 = vadd.f32 %v4589_v56, %v21797_v48  ;;  %16419 = vmatpush3.bf16.msra.mxu0 %v18307_v0  ;;  %v18316_v48 = vld [vmem:[%s28450_s2 + $0x950] ss:$12 sps:$4 sm:$0xff]   ;;  %v4197_v0 = vadd.f32 %v21275_v33, %v4114_v30  ;;  %v4436_v51 = vadd.f32 %v21818_v23, %v4353_v16  ;;  %v18318_v2 = vld [vmem:[%s28450_s2 + $0x9f8] ss:$12 sps:$4 sm:$0xff]   ;;  %v19403_v5 = vld [vmem:[%s28451_s0 + $0x214] ss:$84 sps:$4 sm:$0xff]  }
 0x1c8   :  { %v4591_v32 = vpop.f32.mrf.mxu0  ;;  %16420 = vmatprep.subr.bf16.mxu0 %v18310_v43  ;;  %v19404_v23 = vld [vmem:[%s28451_s0 + $0x21c] ss:$84 sps:$4 sm:$0xff]   ;;  %v18322_v16 = vld [vmem:[%s28450_s2 + $0x9e0] ss:$12 sps:$4 sm:$0xff]  }
 0x1c9   :  { %v4674_v9 = vpop.f32.mrf.mxu1  ;;  %v22115_v46 = vadd.f32 %v4672_v53, %v4590_v4  ;;  %v4592_v34 = vadd.f32 %v4591_v32, %v4509_v41  ;;  %16465 = vmatpush3.bf16.msra.mxu1 %v18313_v38  ;;  %v4124_v53 = vadd.f32 %v21319_v63, %v21127_v12  ;;  %v4519_v4 = vadd.f32 %v21820_v28, %v4436_v51  ;;  %v18321_v63 = vld [vmem:[%s28450_s2 + $0x7a0] ss:$12 sps:$4 sm:$0xff]  }
 0x1ca   :  { %v4595_v20 = vpop.f32.mrf.mxu0  ;;  %5234 = vmatmul.mubr.bf16.gmra.mxu0 %v19401_v13  ;;  %16466 = vmatprep.subr.bf16.mxu1 %v18314_v62  ;;  %v18323_v51 = vld [vmem:[%s28450_s2 + $0x920] ss:$12 sps:$4 sm:$0xff]  }
 0x1cb   :  { %5307 = vmatmul.mubr.bf16.gmra.mxu1 %v19402_v47  ;;  %v4678_v42 = vpop.f32.mrf.mxu1  ;;  %v22131_v35 = vadd.f32 %v4674_v9, %v4592_v34  ;;  %v4596_v33 = vadd.f32 %v4595_v20, %v21810_v29  ;;  %16421 = vmatpush3.bf16.msra.mxu0 %v18312_v37  ;;  %v18320_v29 = vld [vmem:[%s28450_s2 + $0x860] ss:$12 sps:$4 sm:$0xff]   ;;  %v4280_v37 = vadd.f32 %v21581_v55, %v4197_v0  ;;  %v18319_v55 = vld [vmem:[%s28450_s2 + $0x938] ss:$12 sps:$4 sm:$0xff]   ;;  %v18324_v34 = vld [vmem:[%s28450_s2 + $0x848] ss:$12 sps:$4 sm:$0xff]  }
 0x1cc   :  { %v4597_v43 = vpop.f32.mrf.mxu0  ;;  %5241 = vmatprep.mubr.bf16.mxu0 %v19403_v5  ;;  %5314 = vmatprep.mubr.bf16.mxu1 %v19404_v23  ;;  %v19405_v20 = vld [vmem:[%s28451_s0 + $0x210] ss:$84 sps:$4 sm:$0xff]  }
 0x1cd   :  { %v4680_v45 = vpop.f32.mrf.mxu1  ;;  %v4598_v30 = vadd.f32 %v4597_v43, %v21813_v26  ;;  %v22148_v56 = vadd.f32 %v4678_v42, %v4596_v33  ;;  %16422 = vmatprep.subr.bf16.mxu0 %v18315_v54  ;;  %16467 = vmatpush3.bf16.msra.mxu1 %v18316_v48  ;;  %v4363_v28 = vadd.f32 %v21583_v19, %v4280_v37  ;;  %v19406_v19 = vld [vmem:[%s28451_s0 + $0x218] ss:$84 sps:$4 sm:$0xff]   ;;  %v18326_v43 = vld [vmem:[%s28450_s2 + $0x9c8] ss:$12 sps:$4 sm:$0xff]  }
 0x1ce   :  { %v4599_v38 = vpop.f32.mrf.mxu0  ;;  %16468 = vmatprep.subr.bf16.mxu1 %v18318_v2  ;;  %v4207_v48 = vadd.f32 %v21321_v3, %v4124_v53  ;;  %v19407_v3 = vld [vmem:[%s28451_s0 + $0x2bc] ss:$84 sps:$4 sm:$0xff]   ;;  %v4134_v37 = vadd.f32 %v21439_v17, %v21127_v12 }
 0x1cf   :  { %v4682_v41 = vpop.f32.mrf.mxu1  ;;  %v4600_v32 = vadd.f32 %v4599_v38, %v21825_v39  ;;  %v22154_v9 = vadd.f32 %v4680_v45, %v4598_v30  ;;  %16423 = vmatpush3.bf16.msra.mxu0 %v18317_v21  ;;  %v4446_v47 = vadd.f32 %v21864_v15, %v4363_v28  ;;  %v19408_v15 = vld [vmem:[%s28451_s0 + $0x2c4] ss:$84 sps:$4 sm:$0xff]   ;;  %v18332_v17 = vld [vmem:[%s28450_s2 + $0xd70] ss:$12 sps:$4 sm:$0xff]   ;;  %v19410_v28 = vld [vmem:[%s28451_s0 + $0x2c0] ss:$84 sps:$4 sm:$0xff]  }
 0x1d0   :  { %v4601_v26 = vpop.f32.mrf.mxu0  ;;  %16424 = vmatprep.subr.bf16.mxu0 %v18320_v29  ;;  %v4290_v45 = vadd.f32 %v21621_v58, %v4207_v48  ;;  %v18328_v29 = vld [vmem:[%s28450_s2 + $0xbf0] ss:$12 sps:$4 sm:$0xff]  }
 0x1d1   :  { %v4684_v62 = vpop.f32.mrf.mxu1  ;;  %v4602_v54 = vadd.f32 %v4601_v26, %v4519_v4  ;;  %v22163_v39 = vadd.f32 %v4682_v41, %v4600_v32  ;;  %16469 = vmatpush3.bf16.msra.mxu1 %v18319_v55  ;;  %v4529_v38 = vadd.f32 %v21866_v40, %v4446_v47 }
 0x1d2   :  { %v4605_v0 = vpop.f32.mrf.mxu0  ;;  %5242 = vmatmul.mubr.bf16.gmra.mxu0 %v19405_v20  ;;  %16470 = vmatprep.subr.bf16.mxu1 %v18322_v16  ;;  %v4373_v55 = vadd.f32 %v21623_v22, %v4290_v45  ;;  %v19412_v20 = vld [vmem:[%s28451_s0 + $0x34] ss:$84 sps:$4 sm:$0xff]  }
 0x1d3   :  { %5315 = vmatmul.mubr.bf16.gmra.mxu1 %v19406_v19  ;;  %v4688_v13 = vpop.f32.mrf.mxu1  ;;  %v4606_v42 = vadd.f32 %v4605_v0, %v21853_v14  ;;  %v22180_v21 = vadd.f32 %v4684_v62, %v4602_v54  ;;  %5249 = vmatprep.mubr.bf16.mxu0 %v19407_v3  ;;  %v18325_v14 = vld [vmem:[%s28450_s2 + $0x788] ss:$12 sps:$4 sm:$0xff]  }
 0x1d4   :  { %v4607_v33 = vpop.f32.mrf.mxu0  ;;  %5322 = vmatprep.mubr.bf16.mxu1 %v19408_v15  ;;  %16425 = vmatpush3.bf16.msra.mxu0 %v18321_v63  ;;  %v19409_v63 = vld [vmem:[%s28451_s0 + $0x2b8] ss:$84 sps:$4 sm:$0xff]   ;;  %v4456_v22 = vadd.f32 %v21916_v52, %v4373_v55  ;;  %v19413_v45 = vld [vmem:[%s28451_s0 + $0x28] ss:$84 sps:$4 sm:$0xff]  }
 0x1d5   :  { %v4690_v2 = vpop.f32.mrf.mxu1  ;;  %v4608_v5 = vadd.f32 %v4607_v33, %v21859_v36  ;;  %v22199_v23 = vadd.f32 %v4688_v13, %v4606_v42  ;;  %16426 = vmatprep.subr.bf16.mxu0 %v18324_v34  ;;  %16471 = vmatpush3.bf16.msra.mxu1 %v18323_v51  ;;  %v18327_v36 = vld [vmem:[%s28450_s2 + $0x908] ss:$12 sps:$4 sm:$0xff]   ;;  %v18329_v33 = vld [vmem:[%s28450_s2 + $0xb30] ss:$12 sps:$4 sm:$0xff]   ;;  %v18337_v55 = vld [vmem:[%s28450_s2 + $0xc98] ss:$12 sps:$4 sm:$0xff]  }
 0x1d6   :  { %v4609_v30 = vpop.f32.mrf.mxu0  ;;  %16472 = vmatprep.subr.bf16.mxu1 %v18326_v43  ;;  %v4539_v42 = vadd.f32 %v21918_v61, %v4456_v22  ;;  %v18333_v61 = vld [vmem:[%s28450_s2 + $0xcb0] ss:$12 sps:$4 sm:$0xff]  }
 0x1d7   :  { %v4692_v53 = vpop.f32.mrf.mxu1  ;;  %v4610_v41 = vadd.f32 %v4609_v30, %v21871_v50  ;;  %v22208_v58 = vadd.f32 %v4690_v2, %v4608_v5  ;;  %v4217_v50 = vadd.f32 %v21441_v18, %v4134_v37  ;;  %v19411_v18 = vld [vmem:[%s28451_s0 + $0x2c] ss:$84 sps:$4 sm:$0xff]   ;;  %v19414_v5 = vld [vmem:[%s28451_s0 + $0x30] ss:$84 sps:$4 sm:$0xff]  }
 0x1d8   :  { %v4611_v4 = vpop.f32.mrf.mxu0  ;;  %16427 = vmatpush3.bf16.msra.mxu0 %v18325_v14 }
 0x1d9   :  { %v4694_v32 = vpop.f32.mrf.mxu1  ;;  %v4612_v40 = vadd.f32 %v4611_v4, %v4529_v38  ;;  %v22217_v26 = vadd.f32 %v4692_v53, %v4610_v41  ;;  %16504 = vmatprep.subr.bf16.mxu0 %v18328_v29  ;;  %16473 = vmatpush3.bf16.msra.mxu1 %v18327_v36  ;;  %v4300_v52 = vadd.f32 %v21748_v49, %v4217_v50  ;;  %v18330_v49 = vld [vmem:[%s28450_s2 + $0xbd8] ss:$12 sps:$4 sm:$0xff]   ;;  %v19415_v41 = vld [vmem:[%s28451_s0 + $0xd4] ss:$84 sps:$4 sm:$0xff]  }
 0x1da   :  { %v4615_v62 = vpop.f32.mrf.mxu0  ;;  %5250 = vmatmul.mubr.bf16.gmra.mxu0 %v19409_v63  ;;  %16550 = vmatprep.subr.bf16.mxu1 %v18332_v17  ;;  %v18331_v38 = vld [vmem:[%s28450_s2 + $0xb18] ss:$12 sps:$4 sm:$0xff]  }
 0x1db   :  { %5323 = vmatmul.mubr.bf16.gmra.mxu1 %v19410_v28  ;;  %v4698_v54 = vpop.f32.mrf.mxu1  ;;  %v4616_v16 = vadd.f32 %v4615_v62, %v21902_v27  ;;  %v22228_v34 = vadd.f32 %v4694_v32, %v4612_v40  ;;  %5363 = vmatprep.mubr.bf16.mxu0 %v19411_v18 }
 0x1dc   :  { %v4617_v48 = vpop.f32.mrf.mxu0  ;;  %5436 = vmatprep.mubr.bf16.mxu1 %v19412_v20  ;;  %v18341_v20 = vld [vmem:[%s28450_s2 + $0xc80] ss:$12 sps:$4 sm:$0xff]  }
 0x1dd   :  { %v4700_v0 = vpop.f32.mrf.mxu1  ;;  %v4618_v27 = vadd.f32 %v4617_v48, %v21911_v10  ;;  %v22238_v19 = vadd.f32 %v4698_v54, %v4616_v16  ;;  %v4383_v10 = vadd.f32 %v21750_v31, %v4300_v52  ;;  %v18336_v31 = vld [vmem:[%s28450_s2 + $0xd58] ss:$12 sps:$4 sm:$0xff]   ;;  %v18338_v16 = vld [vmem:[%s28450_s2 + $0xba8] ss:$12 sps:$4 sm:$0xff]  }
 0x1de   :  { %v4619_v13 = vpop.f32.mrf.mxu0 }
 0x1df   :  { %v4702_v47 = vpop.f32.mrf.mxu1  ;;  %v4620_v3 = vadd.f32 %v4619_v13, %v21923_v7  ;;  %v22242_v51 = vadd.f32 %v4700_v0, %v4618_v27  ;;  %v4466_v37 = vadd.f32 %v22054_v25, %v4383_v10  ;;  %v19416_v25 = vld [vmem:[%s28451_s0 + $0xdc] ss:$84 sps:$4 sm:$0xff]   ;;  %v19418_v0 = vld [vmem:[%s28451_s0 + $0xd8] ss:$84 sps:$4 sm:$0xff]   ;;  %v18339_v13 = vld [vmem:[%s28450_s2 + $0xae8] ss:$12 sps:$4 sm:$0xff]  }
 0x1e0   :  { %v4621_v2 = vpop.f32.mrf.mxu0  ;;  %v19419_v27 = vld [vmem:[%s28451_s0 + $0x17c] ss:$84 sps:$4 sm:$0xff]  }
 0x1e1   :  { %v4704_v15 = vpop.f32.mrf.mxu1  ;;  %v4622_v14 = vadd.f32 %v4621_v2, %v4539_v42  ;;  %v22251_v43 = vadd.f32 %v4702_v47, %v4620_v3  ;;  %v4549_v62 = vadd.f32 %v22056_v11, %v4466_v37  ;;  %v19417_v11 = vld [vmem:[%s28451_s0 + $0xd0] ss:$84 sps:$4 sm:$0xff]   ;;  %v18343_v47 = vld [vmem:[%s28450_s2 + $0xd28] ss:$12 sps:$4 sm:$0xff]  }
 0x1e2   :  { %v4625_v7 = vpop.f32.mrf.mxu0  ;;  %5364 = vmatmul.mubr.bf16.vlgmr.msra.gmra.mxu0 %v19413_v45  ;;  %v19420_v42 = vld [vmem:[%s28451_s0 + $0x184] ss:$84 sps:$4 sm:$0xff]   ;;  %v18342_v3 = vld [vmem:[%s28450_s2 + $0xb90] ss:$12 sps:$4 sm:$0xff]   ;;  %v18345_v2 = vld [vmem:[%s28450_s2 + $0xc68] ss:$12 sps:$4 sm:$0xff]  }
 0x1e3   :  { %5437 = vmatmul.mubr.bf16.vlgmr.msra.gmra.mxu1 %v19414_v5  ;;  %v4708_v29 = vpop.f32.mrf.mxu1  ;;  %v4626_v30 = vadd.f32 %v4625_v7, %v21951_v44  ;;  %v22267_v53 = vadd.f32 %v4704_v15, %v4622_v14  ;;  %16505 = vmatpush3.bf16.msra.mxu0 %v18329_v33  ;;  %v18334_v44 = vld [vmem:[%s28450_s2 + $0xbc0] ss:$12 sps:$4 sm:$0xff]   ;;  %v18344_v33 = vld [vmem:[%s28450_s2 + $0xad0] ss:$12 sps:$4 sm:$0xff]   ;;  %v18349_v14 = vld [vmem:[%s28450_s2 + $0xab8] ss:$12 sps:$4 sm:$0xff]  }
 0x1e4   :  { %5371 = vmatprep.mubr.bf16.mxu0 %v19415_v41  ;;  %v4627_v36 = vpop.f32.mrf.mxu0  ;;  %16506 = vmatprep.subr.bf16.mxu0 %v18330_v49  ;;  %v18346_v15 = vld [vmem:[%s28450_s2 + $0xd10] ss:$12 sps:$4 sm:$0xff]   ;;  %v18347_v49 = vld [vmem:[%s28450_s2 + $0xb78] ss:$12 sps:$4 sm:$0xff]   ;;  %v19422_v7 = vld [vmem:[%s28451_s0 + $0x180] ss:$84 sps:$4 sm:$0xff]  }
 0x1e5   :  { %v4710_v4 = vpop.f32.mrf.mxu1  ;;  %5444 = vmatprep.mubr.bf16.mxu1 %v19416_v25  ;;  %v4628_v32 = vadd.f32 %v4627_v36, %v21957_v6  ;;  %v22282_v17 = vadd.f32 %v4708_v29, %v4626_v30  ;;  %16551 = vmatpush3.bf16.msra.mxu1 %v18333_v61  ;;  %v18335_v6 = vld [vmem:[%s28450_s2 + $0xb00] ss:$12 sps:$4 sm:$0xff]   ;;  %v18348_v10 = vld [vmem:[%s28450_s2 + $0xc50] ss:$12 sps:$4 sm:$0xff]   ;;  %v18350_v45 = vld [vmem:[%s28450_s2 + $0xcf8] ss:$12 sps:$4 sm:$0xff]  }
 0x1e6   :  { %v4629_v40 = vpop.f32.mrf.mxu0  ;;  %16552 = vmatprep.subr.bf16.mxu1 %v18336_v31  ;;  %v19421_v61 = vld [vmem:[%s28451_s0 + $0x178] ss:$84 sps:$4 sm:$0xff]   ;;  %v18356_v41 = vld [vmem:[%s28450_s2 + $0xb48] ss:$12 sps:$4 sm:$0xff]  }
 0x1e7   :  { %v4712_v50 = vpop.f32.mrf.mxu1  ;;  %v4630_v63 = vadd.f32 %v4629_v40, %v21965_v60  ;;  %v22289_v28 = vadd.f32 %v4710_v4, %v4628_v32  ;;  %16507 = vmatpush3.bf16.msra.mxu0 %v18331_v38  ;;  %v18340_v60 = vld [vmem:[%s28450_s2 + $0xd40] ss:$12 sps:$4 sm:$0xff]   ;;  %v19423_v29 = vld [vmem:[%s28451_s0 + $0x224] ss:$84 sps:$4 sm:$0xff]   ;;  %v19426_v25 = vld [vmem:[%s28451_s0 + $0x228] ss:$84 sps:$4 sm:$0xff]  }
 0x1e8   :  { %v4631_v54 = vpop.f32.mrf.mxu0  ;;  %16508 = vmatprep.subr.bf16.mxu0 %v18334_v44  ;;  %v18352_v5 = vld [vmem:[%s28450_s2 + $0xb60] ss:$12 sps:$4 sm:$0xff]   ;;  %v18351_v37 = vld [vmem:[%s28450_s2 + $0xc38] ss:$12 sps:$4 sm:$0xff]   ;;  %v18357_v44 = vld [vmem:[%s28450_s2 + $0xa88] ss:$12 sps:$4 sm:$0xff]  }
 0x1e9   :  { %v4714_v22 = vpop.f32.mrf.mxu1  ;;  %v4632_v18 = vadd.f32 %v4631_v54, %v4549_v62  ;;  %v22297_v48 = vadd.f32 %v4712_v50, %v4630_v63  ;;  %16553 = vmatpush3.bf16.msra.mxu1 %v18337_v55  ;;  %v19424_v31 = vld [vmem:[%s28451_s0 + $0x22c] ss:$84 sps:$4 sm:$0xff]   ;;  %v18358_v32 = vld [vmem:[%s28450_s2 + $0xcc8] ss:$12 sps:$4 sm:$0xff]   ;;  %v18360_v40 = vld [vmem:[%s28450_s2 + $0xef0] ss:$12 sps:$4 sm:$0xff]  }
 0x1ea   :  { %5372 = vmatmul.mubr.bf16.gmra.mxu0 %v19417_v11  ;;  %16554 = vmatprep.subr.bf16.mxu1 %v18340_v60  ;;  %v18353_v30 = vld [vmem:[%s28450_s2 + $0xaa0] ss:$12 sps:$4 sm:$0xff]   ;;  %v19428_v50 = vld [vmem:[%s28451_s0 + $0x2d4] ss:$84 sps:$4 sm:$0xff]  }
 0x1eb   :  { %5445 = vmatmul.mubr.bf16.gmra.mxu1 %v19418_v0  ;;  %v22311_v52 = vadd.f32 %v4714_v22, %v4632_v18  ;;  %16509 = vmatpush3.bf16.msra.mxu0 %v18335_v6  ;;  %v18354_v38 = vld [vmem:[%s28450_s2 + $0xce0] ss:$12 sps:$4 sm:$0xff]   ;;  %v18359_v62 = vld [vmem:[%s28450_s2 + $0xc08] ss:$12 sps:$4 sm:$0xff]   ;;  %v19430_v22 = vld [vmem:[%s28451_s0 + $0x2d0] ss:$84 sps:$4 sm:$0xff]  }
 0x1ec   :  { %5379 = vmatprep.mubr.bf16.mxu0 %v19419_v27  ;;  %5452 = vmatprep.mubr.bf16.mxu1 %v19420_v42  ;;  %v18355_v36 = vld [vmem:[%s28450_s2 + $0xc20] ss:$12 sps:$4 sm:$0xff]   ;;  %v19429_v54 = vld [vmem:[%s28451_s0 + $0x2c8] ss:$84 sps:$4 sm:$0xff]   ;;  %v19432_v0 = vld [vmem:[%s28451_s0 + $0x44] ss:$84 sps:$4 sm:$0xff]  }
 0x1ed   :  { %16510 = vmatprep.subr.bf16.mxu0 %v18338_v16  ;;  %16555 = vmatpush3.bf16.msra.mxu1 %v18341_v20  ;;  %v19425_v4 = vld [vmem:[%s28451_s0 + $0x220] ss:$84 sps:$4 sm:$0xff]   ;;  %v19431_v18 = vld [vmem:[%s28451_s0 + $0x3c] ss:$84 sps:$4 sm:$0xff]   ;;  %v28468_v20 = vmov 0.0  }
 0x1ee   :  { %16556 = vmatprep.subr.bf16.mxu1 %v18343_v47  ;;  %v19427_v55 = vld [vmem:[%s28451_s0 + $0x2cc] ss:$84 sps:$4 sm:$0xff]  }
 0x1ef   :  { %16511 = vmatpush3.bf16.msra.mxu0 %v18339_v13  ;;  %v18361_v13 = vld [vmem:[%s28450_s2 + $0xe30] ss:$12 sps:$4 sm:$0xff]  }
 0x1f0   :  { %16512 = vmatprep.subr.bf16.mxu0 %v18342_v3  ;;  %v18362_v3 = vld [vmem:[%s28450_s2 + $0xed8] ss:$12 sps:$4 sm:$0xff]  }
 0x1f1   :  { %16557 = vmatpush3.bf16.msra.mxu1 %v18345_v2 }
 0x1f2   :  { %5380 = vmatmul.mubr.bf16.gmra.mxu0 %v19421_v61  ;;  %16558 = vmatprep.subr.bf16.mxu1 %v18346_v15  ;;  %v18364_v15 = vld [vmem:[%s28450_s2 + $0xfb0] ss:$12 sps:$4 sm:$0xff]  }
 0x1f3   :  { %5453 = vmatmul.mubr.bf16.gmra.mxu1 %v19422_v7  ;;  %16513 = vmatpush3.bf16.msra.mxu0 %v18344_v33 }
 0x1f4   :  { %5387 = vmatprep.mubr.bf16.mxu0 %v19423_v29  ;;  %5460 = vmatprep.mubr.bf16.mxu1 %v19424_v31  ;;  %v19435_v31 = vld [vmem:[%s28451_s0 + $0xe4] ss:$84 sps:$4 sm:$0xff]  }
 0x1f5   :  { %16514 = vmatprep.subr.bf16.mxu0 %v18347_v49  ;;  %16559 = vmatpush3.bf16.msra.mxu1 %v18348_v10 }
 0x1f6   :  { %16560 = vmatprep.subr.bf16.mxu1 %v18350_v45  ;;  %v19433_v45 = vld [vmem:[%s28451_s0 + $0x38] ss:$84 sps:$4 sm:$0xff]  }
 0x1f7   :  { %16515 = vmatpush3.bf16.msra.mxu0 %v18349_v14 }
 0x1f8   :  { %16516 = vmatprep.subr.bf16.mxu0 %v18352_v5 }
 0x1f9   :  { %16561 = vmatpush3.bf16.msra.mxu1 %v18351_v37 }
 0x1fa   :  { %5388 = vmatmul.mubr.bf16.gmra.mxu0 %v19425_v4  ;;  %16562 = vmatprep.subr.bf16.mxu1 %v18354_v38  ;;  %v19436_v38 = vld [vmem:[%s28451_s0 + $0xec] ss:$84 sps:$4 sm:$0xff]  }
 0x1fb   :  { %5461 = vmatmul.mubr.bf16.gmra.mxu1 %v19426_v25  ;;  %5395 = vmatprep.mubr.bf16.mxu0 %v19427_v55  ;;  %v18366_v4 = vld [vmem:[%s28450_s2 + $0xe00] ss:$12 sps:$4 sm:$0xff]   ;;  %v18367_v25 = vld [vmem:[%s28450_s2 + $0xf98] ss:$12 sps:$4 sm:$0xff]   ;;  %v18368_v55 = vld [vmem:[%s28450_s2 + $0xea8] ss:$12 sps:$4 sm:$0xff]  }
 0x1fc   :  { %5468 = vmatprep.mubr.bf16.mxu1 %v19428_v50  ;;  %16517 = vmatpush3.bf16.msra.mxu0 %v18353_v30 }
 0x1fd   :  { %16518 = vmatprep.subr.bf16.mxu0 %v18356_v41  ;;  %16563 = vmatpush3.bf16.msra.mxu1 %v18355_v36 }
 0x1fe   :  { %16564 = vmatprep.subr.bf16.mxu1 %v18358_v32 }
 0x200   :  { %16519 = vmatpush3.bf16.msra.mxu0 %v18357_v44 }
 0x201   :  { %16596 = vmatprep.subr.bf16.mxu0 %v18360_v40  ;;  %16565 = vmatpush3.bf16.msra.mxu1 %v18359_v62 }
 0x202   :  { %v4751_v63 = vpop.f32.mrf.mxu0  ;;  %5396 = vmatmul.mubr.bf16.gmra.mxu0 %v19429_v54  ;;  %17370 = vmatprep.subr.bf16.mxu1 %v28468_v20 }
 0x203   :  { %v4834_v6 = vpop.f32.mrf.mxu1  ;;  %5469 = vmatmul.mubr.bf16.gmra.mxu1 %v19430_v22  ;;  %v4752_v16 = vadd.f32 %v4751_v63, %v22093_v57  ;;  %5509 = vmatprep.mubr.bf16.mxu0 %v19431_v18  ;;  %v18370_v18 = vld [vmem:[%s28450_s2 + $0xf80] ss:$12 sps:$4 sm:$0xff]  }
 0x204   :  { %v4753_v60 = vpop.f32.mrf.mxu0  ;;  %5582 = vmatprep.mubr.bf16.mxu1 %v19432_v0  ;;  %v18369_v0 = vld [vmem:[%s28450_s2 + $0xde8] ss:$12 sps:$4 sm:$0xff]  }
 0x205   :  { %v4836_v11 = vpop.f32.mrf.mxu1  ;;  %v22417_v27 = vadd.f32 %v4834_v6, %v4752_v16  ;;  %v4754_v57 = vadd.f32 %v4753_v60, %v22105_v24  ;;  %v19437_v16 = vld [vmem:[%s28451_s0 + $0xe0] ss:$84 sps:$4 sm:$0xff]  }
 0x206   :  { %v4755_v47 = vpop.f32.mrf.mxu0 }
 0x207   :  { %v4838_v42 = vpop.f32.mrf.mxu1  ;;  %v22426_v33 = vadd.f32 %v4836_v11, %v4754_v57  ;;  %v4756_v2 = vadd.f32 %v4755_v47, %v22115_v46  ;;  %v19434_v46 = vld [vmem:[%s28451_s0 + $0x40] ss:$84 sps:$4 sm:$0xff]  }
 0x208   :  { %v4757_v49 = vpop.f32.mrf.mxu0  ;;  %v19439_v11 = vld [vmem:[%s28451_s0 + $0x18c] ss:$84 sps:$4 sm:$0xff]   ;;  %v19440_v47 = vld [vmem:[%s28451_s0 + $0x194] ss:$84 sps:$4 sm:$0xff]  }
 0x209   :  { %v4840_v24 = vpop.f32.mrf.mxu1  ;;  %v22432_v10 = vadd.f32 %v4838_v42, %v4756_v2  ;;  %v4758_v14 = vadd.f32 %v4757_v49, %v22131_v35  ;;  %v18363_v35 = vld [vmem:[%s28450_s2 + $0xe18] ss:$12 sps:$4 sm:$0xff]   ;;  %v18372_v2 = vld [vmem:[%s28450_s2 + $0xf68] ss:$12 sps:$4 sm:$0xff]  }
 0x20a   :  { %v4761_v61 = vpop.f32.mrf.mxu0  ;;  %5510 = vmatmul.mubr.bf16.vlgmr.msra.gmra.mxu0 %v19433_v45 }
 0x20b   :  { %v4844_v7 = vpop.f32.mrf.mxu1  ;;  %5583 = vmatmul.mubr.bf16.vlgmr.msra.gmra.mxu1 %v19434_v46  ;;  %v22441_v5 = vadd.f32 %v4840_v24, %v4758_v14  ;;  %v4762_v29 = vadd.f32 %v4761_v61, %v22148_v56  ;;  %16597 = vmatpush3.bf16.msra.mxu0 %v18361_v13  ;;  %v18365_v56 = vld [vmem:[%s28450_s2 + $0xec0] ss:$12 sps:$4 sm:$0xff]  }
 0x20c   :  { %5517 = vmatprep.mubr.bf16.mxu0 %v19435_v31  ;;  %v4763_v37 = vpop.f32.mrf.mxu0  ;;  %16598 = vmatprep.subr.bf16.mxu0 %v18362_v3  ;;  %v19441_v31 = vld [vmem:[%s28451_s0 + $0x188] ss:$84 sps:$4 sm:$0xff]  }
 0x20d   :  { %v4846_v30 = vpop.f32.mrf.mxu1  ;;  %5590 = vmatprep.mubr.bf16.mxu1 %v19436_v38  ;;  %v22456_v41 = vadd.f32 %v4844_v7, %v4762_v29  ;;  %v4764_v36 = vadd.f32 %v4763_v37, %v22154_v9  ;;  %17371 = vmatpush3.bf16.msra.mxu1 %v18364_v15  ;;  %v18375_v29 = vld [vmem:[%s28450_s2 + $0xe78] ss:$12 sps:$4 sm:$0xff]   ;;  %v18374_v38 = vld [vmem:[%s28450_s2 + $0xf50] ss:$12 sps:$4 sm:$0xff]  }
 0x20e   :  { %v4765_v44 = vpop.f32.mrf.mxu0  ;;  %17372 = vmatprep.subr.bf16.mxu1 %v28468_v20  ;;  %v19442_v37 = vld [vmem:[%s28451_s0 + $0x190] ss:$84 sps:$4 sm:$0xff]  }
 0x20f   :  { %v4848_v32 = vpop.f32.mrf.mxu1  ;;  %v22469_v40 = vadd.f32 %v4846_v30, %v4764_v36  ;;  %v4766_v9 = vadd.f32 %v4765_v44, %v22163_v39  ;;  %16599 = vmatpush3.bf16.msra.mxu0 %v18363_v35  ;;  %v19438_v39 = vld [vmem:[%s28451_s0 + $0xe8] ss:$84 sps:$4 sm:$0xff]   ;;  %v18378_v44 = vld [vmem:[%s28450_s2 + $0xe60] ss:$12 sps:$4 sm:$0xff]  }
 0x210   :  { %v4767_v50 = vpop.f32.mrf.mxu0  ;;  %16600 = vmatprep.subr.bf16.mxu0 %v18365_v56  ;;  %v18376_v56 = vld [vmem:[%s28450_s2 + $0xdb8] ss:$12 sps:$4 sm:$0xff]  }
 0x211   :  { %v4850_v62 = vpop.f32.mrf.mxu1  ;;  %v22472_v63 = vadd.f32 %v4848_v32, %v4766_v9  ;;  %v4768_v6 = vadd.f32 %v4767_v50, %v22180_v21  ;;  %17373 = vmatpush3.bf16.msra.mxu1 %v18367_v25  ;;  %v19443_v25 = vld [vmem:[%s28451_s0 + $0x234] ss:$84 sps:$4 sm:$0xff]  }
 0x212   :  { %v4771_v54 = vpop.f32.mrf.mxu0  ;;  %5518 = vmatmul.mubr.bf16.gmra.mxu0 %v19437_v16  ;;  %17374 = vmatprep.subr.bf16.mxu1 %v28468_v20 }
 0x213   :  { %v4854_v22 = vpop.f32.mrf.mxu1  ;;  %5591 = vmatmul.mubr.bf16.gmra.mxu1 %v19438_v39  ;;  %v22484_v60 = vadd.f32 %v4850_v62, %v4768_v6  ;;  %v4772_v21 = vadd.f32 %v4771_v54, %v22199_v23  ;;  %16601 = vmatpush3.bf16.msra.mxu0 %v18366_v4  ;;  %v18371_v23 = vld [vmem:[%s28450_s2 + $0xe90] ss:$12 sps:$4 sm:$0xff]   ;;  %v18377_v54 = vld [vmem:[%s28450_s2 + $0xf38] ss:$12 sps:$4 sm:$0xff]  }
 0x214   :  { %5525 = vmatprep.mubr.bf16.mxu0 %v19439_v11  ;;  %v4773_v57 = vpop.f32.mrf.mxu0  ;;  %5598 = vmatprep.mubr.bf16.mxu1 %v19440_v47  ;;  %v19447_v47 = vld [vmem:[%s28451_s0 + $0x2dc] ss:$84 sps:$4 sm:$0xff]  }
 0x215   :  { %v4856_v13 = vpop.f32.mrf.mxu1  ;;  %16602 = vmatprep.subr.bf16.mxu0 %v18368_v55  ;;  %v22499_v42 = vadd.f32 %v4854_v22, %v4772_v21  ;;  %v4774_v3 = vadd.f32 %v4773_v57, %v22208_v58  ;;  %17375 = vmatpush3.bf16.msra.mxu1 %v18370_v18  ;;  %v18373_v58 = vld [vmem:[%s28450_s2 + $0xdd0] ss:$12 sps:$4 sm:$0xff]   ;;  %v19446_v57 = vld [vmem:[%s28451_s0 + $0x238] ss:$84 sps:$4 sm:$0xff]  }
 0x216   :  { %v4775_v15 = vpop.f32.mrf.mxu0  ;;  %17376 = vmatprep.subr.bf16.mxu1 %v28468_v20 }
 0x217   :  { %v4858_v49 = vpop.f32.mrf.mxu1  ;;  %v22506_v24 = vadd.f32 %v4856_v13, %v4774_v3  ;;  %v4776_v14 = vadd.f32 %v4775_v15, %v22217_v26  ;;  %16603 = vmatpush3.bf16.msra.mxu0 %v18369_v0  ;;  %v19445_v0 = vld [vmem:[%s28451_s0 + $0x230] ss:$84 sps:$4 sm:$0xff]  }
 0x218   :  { %v4777_v61 = vpop.f32.mrf.mxu0  ;;  %16604 = vmatprep.subr.bf16.mxu0 %v18371_v23  ;;  %v18380_v23 = vld [vmem:[%s28450_s2 + $0xf20] ss:$12 sps:$4 sm:$0xff]   ;;  %v19448_v15 = vld [vmem:[%s28451_s0 + $0x2e4] ss:$84 sps:$4 sm:$0xff]  }
 0x219   :  { %v4860_v7 = vpop.f32.mrf.mxu1  ;;  %v22513_v45 = vadd.f32 %v4858_v49, %v4776_v14  ;;  %v4778_v46 = vadd.f32 %v4777_v61, %v22228_v34  ;;  %17377 = vmatpush3.bf16.msra.mxu1 %v18372_v2 }
 0x21a   :  { %v4781_v35 = vpop.f32.mrf.mxu0  ;;  %5526 = vmatmul.mubr.bf16.gmra.mxu0 %v19441_v31  ;;  %17378 = vmatprep.subr.bf16.mxu1 %v28468_v20 }
 0x21b   :  { %v4864_v26 = vpop.f32.mrf.mxu1  ;;  %5599 = vmatmul.mubr.bf16.gmra.mxu1 %v19442_v37  ;;  %v22525_v30 = vadd.f32 %v4860_v7, %v4778_v46  ;;  %v4782_v34 = vadd.f32 %v4781_v35, %v22238_v19  ;;  %16605 = vmatpush3.bf16.msra.mxu0 %v18373_v58  ;;  %v19444_v19 = vld [vmem:[%s28451_s0 + $0x23c] ss:$84 sps:$4 sm:$0xff]   ;;  %v19449_v37 = vld [vmem:[%s28450_s2 + $0xac] ss:$12 sps:$4 sm:$0xff]  }
 0x21c   :  { %v4783_v36 = vpop.f32.mrf.mxu0  ;;  %5533 = vmatprep.mubr.bf16.mxu0 %v19443_v25  ;;  %5606 = vmatprep.mubr.bf16.mxu1 %v19444_v19 }
 0x21d   :  { %v4866_v4 = vpop.f32.mrf.mxu1  ;;  %v22543_v32 = vadd.f32 %v4864_v26, %v4782_v34  ;;  %v4784_v55 = vadd.f32 %v4783_v36, %v22242_v51  ;;  %16606 = vmatprep.subr.bf16.mxu0 %v18375_v29  ;;  %17379 = vmatpush3.bf16.msra.mxu1 %v18374_v38  ;;  %v18379_v51 = vld [vmem:[%s28450_s2 + $0xda0] ss:$12 sps:$4 sm:$0xff]   ;;  %v18383_v29 = vld [vmem:[%s28450_s2 + $0xf08] ss:$12 sps:$4 sm:$0xff]  }
 0x21e   :  { %v4785_v9 = vpop.f32.mrf.mxu0  ;;  %17380 = vmatprep.subr.bf16.mxu1 %v28468_v20  ;;  %v19450_v38 = vld [vmem:[%s28451_s0 + $0x2d8] ss:$84 sps:$4 sm:$0xff]  }
 0x21f   :  { %v4868_v50 = vpop.f32.mrf.mxu1  ;;  %v22547_v62 = vadd.f32 %v4866_v4, %v4784_v55  ;;  %v4786_v6 = vadd.f32 %v4785_v9, %v22251_v43  ;;  %16607 = vmatpush3.bf16.msra.mxu0 %v18376_v56  ;;  %v18381_v43 = vld [vmem:[%s28450_s2 + $0xe48] ss:$12 sps:$4 sm:$0xff]   ;;  %v19452_v4 = vld [vmem:[%s28451_s0 + $0x4c] ss:$84 sps:$4 sm:$0xff]  }
 0x220   :  { %v4787_v22 = vpop.f32.mrf.mxu0  ;;  %16608 = vmatprep.subr.bf16.mxu0 %v18378_v44  ;;  %v19451_v56 = vld [vmem:[%s28451_s0 + $0x2e0] ss:$84 sps:$4 sm:$0xff]   ;;  %v19453_v44 = vld [vmem:[%s28450_s2 + $0x22c] ss:$12 sps:$4 sm:$0xff]  }
 0x221   :  { %v4870_v16 = vpop.f32.mrf.mxu1  ;;  %v22557_v39 = vadd.f32 %v4868_v50, %v4786_v6  ;;  %v4788_v18 = vadd.f32 %v4787_v22, %v22267_v53  ;;  %17381 = vmatpush3.bf16.msra.mxu1 %v18377_v54 }
 0x222   :  { %v4791_v21 = vpop.f32.mrf.mxu0  ;;  %5534 = vmatmul.mubr.bf16.gmra.mxu0 %v19445_v0  ;;  %17382 = vmatprep.subr.bf16.mxu1 %v28468_v20  ;;  %v19455_v0 = vld [vmem:[%s28451_s0 + $0x50] ss:$84 sps:$4 sm:$0xff]  }
 0x223   :  { %v4874_v11 = vpop.f32.mrf.mxu1  ;;  %5607 = vmatmul.mubr.bf16.gmra.mxu1 %v19446_v57  ;;  %v22569_v13 = vadd.f32 %v4870_v16, %v4788_v18  ;;  %v4792_v53 = vadd.f32 %v4791_v21, %v22282_v17  ;;  %5541 = vmatprep.mubr.bf16.mxu0 %v19447_v47  ;;  %v18382_v17 = vld [vmem:[%s28450_s2 + $0xd88] ss:$12 sps:$4 sm:$0xff]  }
 0x224   :  { %v4793_v3 = vpop.f32.mrf.mxu0  ;;  %5614 = vmatprep.mubr.bf16.mxu1 %v19448_v15  ;;  %16609 = vmatpush3.bf16.msra.mxu0 %v18379_v51  ;;  %v19457_v47 = vld [vmem:[%s28450_s2 + $0x228] ss:$12 sps:$4 sm:$0xff]  }
 0x225   :  { %v4876_v2 = vpop.f32.mrf.mxu1  ;;  %v22584_v49 = vadd.f32 %v4874_v11, %v4792_v53  ;;  %v4794_v14 = vadd.f32 %v4793_v3, %v22289_v28  ;;  %16610 = vmatprep.subr.bf16.mxu0 %v18381_v43  ;;  %17383 = vmatpush3.bf16.msra.mxu1 %v18380_v23  ;;  %v19458_v15 = vld [vmem:[%s28450_s2 + $0x94] ss:$12 sps:$4 sm:$0xff]  }
 0x226   :  { %v4795_v58 = vpop.f32.mrf.mxu0  ;;  %17384 = vmatprep.subr.bf16.mxu1 %v28468_v20 }
 0x227   :  { %v4878_v61 = vpop.f32.mrf.mxu1  ;;  %v22588_v7 = vadd.f32 %v4876_v2, %v4794_v14  ;;  %v4796_v46 = vadd.f32 %v4795_v58, %v22297_v48  ;;  %v19460_v58 = vld [vmem:[%s28451_s0 + $0xf4] ss:$84 sps:$4 sm:$0xff]  }
 0x228   :  { %v4797_v35 = vpop.f32.mrf.mxu0  ;;  %16611 = vmatpush3.bf16.msra.mxu0 %v18382_v17 }
 0x229   :  { %v4880_v26 = vpop.f32.mrf.mxu1  ;;  %v22595_v28 = vadd.f32 %v4878_v61, %v4796_v46  ;;  %v4798_v31 = vadd.f32 %v4797_v35, %v22311_v52  ;;  %6439 = vmatprep.subr.bf16.mxu0 %v19449_v37  ;;  %17385 = vmatpush3.bf16.msra.mxu1 %v18383_v29 }
 0x22a   :  { %v4917_v48 = vpop.f32.mrf.mxu0  ;;  %5542 = vmatmul.mubr.bf16.gmra.mxu0 %v19450_v38  ;;  %6522 = vmatprep.subr.bf16.mxu1 %v19453_v44  ;;  %v19466_v44 = vld [vmem:[%s28451_s0 + $0xf8] ss:$84 sps:$4 sm:$0xff]  }
 0x22b   :  { %v16198_v34 = vpop.f32.mrf.mxu1  ;;  %5615 = vmatmul.mubr.bf16.gmra.mxu1 %v19451_v56  ;;  %v22607_v36 = vadd.f32 %v4880_v26, %v4798_v31  ;;  %v4918_v52 = vadd.f32 %v4917_v48, %v22417_v27  ;;  %5655 = vmatprep.mubr.bf16.mxu0 %v19452_v4  ;;  %v19462_v26 = vld [vmem:[%s28450_s2 + $0x210] ss:$12 sps:$4 sm:$0xff]  }
 0x22c   :  { %v4919_v25 = vpop.f32.mrf.mxu0  ;;  %17386 = vmatprep.mubr.msk.bf16.mxu1 %vm20078_vm0, %v28468_v20  ;;  %v19463_v48 = vld [vmem:[%s28450_s2 + $0x7c] ss:$12 sps:$4 sm:$0xff]  }
 0x22d   :  { %v16199_v19 = vpop.f32.mrf.mxu1  ;;  %v4920_v55 = vadd.f32 %v4919_v25, %v22426_v33  ;;  %v5769_v16 = vmax.f32 %v4918_v52, 0.0  ;;  %v19454_v33 = vld [vmem:[%s28451_s0 + $0x48] ss:$84 sps:$4 sm:$0xff]  }
 0x22e   :  { %v22619_v27 = vadd.f32 %v16199_v19, %v16198_v34  ;;  %v4921_v9 = vpop.f32.mrf.mxu0  ;;  %v19465_v19 = vld [vmem:[%s28451_s0 + $0xf0] ss:$84 sps:$4 sm:$0xff]  }
 0x22f   :  { %v16201_v50 = vpop.f32.mrf.mxu1  ;;  %v4922_v6 = vadd.f32 %v4921_v9, %v22432_v10  ;;  %v5770_v23 = vmax.f32 %v4920_v55, 0.0 }
 0x230   :  { %v4923_v54 = vpop.f32.mrf.mxu0 }
 0x231   :  { %v16202_v22 = vpop.f32.mrf.mxu1  ;;  %v5772_v51 = vmax.f32 %v4922_v6, 0.0  ;;  %v4924_v18 = vadd.f32 %v4923_v54, %v22441_v5  ;;  %v19456_v5 = vld [vmem:[%s28450_s2 + $0xa8] ss:$12 sps:$4 sm:$0xff]   ;;  %v19468_v6 = vld [vmem:[%s28450_s2 + $0x1f8] ss:$12 sps:$4 sm:$0xff]  }
 0x232   :  { %v22623_v43 = vadd.f32 %v16202_v22, %v16201_v50  ;;  %v4927_v21 = vpop.f32.mrf.mxu0  ;;  %5656 = vmatmul.mubr.bf16.vlgmr.msra.gmra.mxu0 %v19454_v33 }
 0x233   :  { %v16204_v11 = vpop.f32.mrf.mxu1  ;;  %17387 = vmatmul.mubr.bf16.vlgmr.msra.gmra.mxu1 %v19455_v0  ;;  %v22631_v10 = vpack.c.bf16 %v5772_v51, %v5769_v16  ;;  %v5773_v57 = vmax.f32 %v4924_v18, 0.0  ;;  %v4928_v53 = vadd.f32 %v4927_v21, %v22456_v41  ;;  %6440 = vmatpush1.bf16.msra.mxu0 %v19456_v5  ;;  %v19459_v41 = vld [vmem:[%s28450_s2 + $0x214] ss:$12 sps:$4 sm:$0xff]   ;;  %v19469_v51 = vld [vmem:[%s28450_s2 + $0x64] ss:$12 sps:$4 sm:$0xff]  }
 0x234   :  { %6523 = vmatpush1.bf16.msra.mxu1 %v19457_v47  ;;  %v4929_v3 = vpop.f32.mrf.mxu0  ;;  %6441 = vmatprep.subr.bf16.mxu0 %v19458_v15  ;;  %v19471_v0 = vld [vmem:[%s28451_s0 + $0x19c] ss:$84 sps:$4 sm:$0xff]  }
 0x235   :  { %28528 = vst [vmem:[#allocation5_spill] sm:$0xff] %v22631_v10  ;;  %v16205_v2 = vpop.f32.mrf.mxu1  ;;  %6524 = vmatprep.subr.bf16.mxu1 %v19459_v41  ;;  %v4930_v17 = vadd.f32 %v4929_v3, %v22469_v40  ;;  %5663 = vmatprep.mubr.bf16.mxu0 %v19460_v58  ;;  %v22654_v29 = vpack.c.bf16 %v5773_v57, %v5770_v23  ;;  %v19461_v40 = vld [vmem:[%s28450_s2 + $0x90] ss:$12 sps:$4 sm:$0xff]   ;;  %v5775_v34 = vmax.f32 %v4928_v53, 0.0  ;;  %v9756_v18 = vrot.slane %v22631_v10, 4 }
 0x236   :  { %v22647_v14 = vadd.f32 %v16205_v2, %v16204_v11  ;;  %17390 = vmatprep.mubr.msk.bf16.mxu1 %vm20078_vm0, %v28468_v20  ;;  %v4931_v61 = vpop.f32.mrf.mxu0  ;;  %v19473_v23 = vld [vmem:[%s28450_s2 + $0x1e0] ss:$12 sps:$4 sm:$0xff]  }
 0x237   :  { %v16207_v46 = vpop.f32.mrf.mxu1  ;;  %28529 = vst [vmem:[#allocation6_spill] sm:$0xff] %v22654_v29  ;;  %v4932_v35 = vadd.f32 %v4931_v61, %v22472_v63  ;;  %6442 = vmatpush1.bf16.msra.mxu0 %v19461_v40  ;;  %v19464_v63 = vld [vmem:[%s28450_s2 + $0x1fc] ss:$12 sps:$4 sm:$0xff]   ;;  %v5776_v54 = vmax.f32 %v4930_v17, 0.0  ;;  %v19475_v41 = vld [vmem:[%s28450_s2 + $0x1cc] ss:$12 sps:$4 sm:$0xff]  }
 0x238   :  { %6525 = vmatpush1.bf16.msra.mxu1 %v19462_v26  ;;  %v4933_v31 = vpop.f32.mrf.mxu0  ;;  %6443 = vmatprep.subr.bf16.mxu0 %v19463_v48  ;;  %v9759_v17 = vrot.slane %v22654_v29, 4  ;;  %v19477_v48 = vld [vmem:[%s28451_s0 + $0x1a0] ss:$84 sps:$4 sm:$0xff]  }
 0x239   :  { %v16208_v37 = vpop.f32.mrf.mxu1  ;;  %6526 = vmatprep.subr.bf16.mxu1 %v19464_v63  ;;  %v5778_v38 = vmax.f32 %v4932_v35, 0.0  ;;  %v4934_v56 = vadd.f32 %v4933_v31, %v22484_v60  ;;  %v19467_v60 = vld [vmem:[%s28450_s2 + $0x78] ss:$12 sps:$4 sm:$0xff]  }
 0x23a   :  { %v22670_v52 = vadd.f32 %v16208_v37, %v16207_v46  ;;  %v4937_v4 = vpop.f32.mrf.mxu0  ;;  %5664 = vmatmul.mubr.bf16.gmra.mxu0 %v19465_v19  ;;  %v19476_v37 = vld [vmem:[%s28451_s0 + $0x198] ss:$84 sps:$4 sm:$0xff]  }
 0x23b   :  { %v16210_v25 = vpop.f32.mrf.mxu1  ;;  %17391 = vmatmul.mubr.bf16.gmra.mxu1 %v19466_v44  ;;  %v22678_v55 = vpack.c.bf16 %v5778_v38, %v5775_v34  ;;  %v5779_v9 = vmax.f32 %v4934_v56, 0.0  ;;  %v4938_v50 = vadd.f32 %v4937_v4, %v22499_v42  ;;  %6444 = vmatpush1.bf16.msra.mxu0 %v19467_v60  ;;  %v19470_v42 = vld [vmem:[%s28450_s2 + $0x1e4] ss:$12 sps:$4 sm:$0xff]   ;;  %v19478_v56 = vld [vmem:[%s28450_s2 + $0x48] ss:$12 sps:$4 sm:$0xff]  }
 0x23c   :  { %6527 = vmatpush1.bf16.msra.mxu1 %v19468_v6  ;;  %v4939_v22 = vpop.f32.mrf.mxu0  ;;  %6445 = vmatprep.subr.bf16.mxu0 %v19469_v51  ;;  %v19479_v4 = vld [vmem:[%s28450_s2 + $0x1c8] ss:$12 sps:$4 sm:$0xff]  }
 0x23d   :  { %28530 = vst [vmem:[#allocation7_spill] sm:$0xff] %v22678_v55  ;;  %v16211_v16 = vpop.f32.mrf.mxu1  ;;  %6528 = vmatprep.subr.bf16.mxu1 %v19470_v42  ;;  %v9757_v21 = vrot.slane %v22678_v55, 4  ;;  %v4940_v11 = vadd.f32 %v4939_v22, %v22506_v24  ;;  %5671 = vmatprep.mubr.bf16.mxu0 %v19471_v0  ;;  %v22703_v5 = vpack.c.bf16 %v5779_v9, %v5776_v54  ;;  %v19472_v24 = vld [vmem:[%s28450_s2 + $0x60] ss:$12 sps:$4 sm:$0xff]   ;;  %v5781_v61 = vmax.f32 %v4938_v50, 0.0 }
 0x23e   :  { %v22696_v33 = vadd.f32 %v16211_v16, %v16210_v25  ;;  %17394 = vmatprep.mubr.msk.bf16.mxu1 %vm20078_vm0, %v28468_v20  ;;  %v4941_v57 = vpop.f32.mrf.mxu0  ;;  %v19480_v9 = vld [vmem:[%s28450_s2 + $0x34] ss:$12 sps:$4 sm:$0xff]   ;;  %v19482_v54 = vld [vmem:[%s28451_s0 + $0x244] ss:$84 sps:$4 sm:$0xff]  }
 0x23f   :  { %v16213_v53 = vpop.f32.mrf.mxu1  ;;  %28531 = vst [vmem:[#allocation8_spill] sm:$0xff] %v22703_v5  ;;  %v4942_v47 = vadd.f32 %v4941_v57, %v22513_v45  ;;  %6446 = vmatpush1.bf16.msra.mxu0 %v19472_v24  ;;  %v22715_v3 = vsel %vm9755_vm1, %v9756_v18, %v9757_v21  ;;  %v19474_v45 = vld [vmem:[%s28450_s2 + $0x4c] ss:$12 sps:$4 sm:$0xff]   ;;  %v9760_v58 = vrot.slane %v22703_v5, 4  ;;  %v5782_v25 = vmax.f32 %v4940_v11, 0.0 }
 0x240   :  { %6529 = vmatpush1.bf16.msra.mxu1 %v19473_v23  ;;  %28532 = vst [vmem:[#allocation9_spill] sm:$0xff] %v22715_v3  ;;  %v4943_v2 = vpop.f32.mrf.mxu0  ;;  %6447 = vmatprep.subr.bf16.mxu0 %v19474_v45  ;;  %v19484_v18 = vld [vmem:[%s28450_s2 + $0x1b0] ss:$12 sps:$4 sm:$0xff]  }
 0x241   :  { %v16214_v15 = vpop.f32.mrf.mxu1  ;;  %6530 = vmatprep.subr.bf16.mxu1 %v19475_v41  ;;  %v5784_v46 = vmax.f32 %v4942_v47, 0.0  ;;  %v4944_v35 = vadd.f32 %v4943_v2, %v22525_v30  ;;  %v22735_v63 = vsel %vm9755_vm1, %v9759_v17, %v9760_v58  ;;  %v19487_v41 = vld [vmem:[%s28451_s0 + $0x240] ss:$84 sps:$4 sm:$0xff]   ;;  %v19488_v17 = vld [vmem:[%s28451_s0 + $0x248] ss:$84 sps:$4 sm:$0xff]  }
 0x242   :  { %v22726_v40 = vadd.f32 %v16214_v15, %v16213_v53  ;;  %v4947_v26 = vpop.f32.mrf.mxu0  ;;  %5672 = vmatmul.mubr.bf16.gmra.mxu0 %v19476_v37  ;;  %28533 = vst [vmem:[#allocation10_spill] sm:$0xff] %v22735_v63  ;;  %v19486_v53 = vld [vmem:[%s28450_s2 + $0x19c] ss:$12 sps:$4 sm:$0xff]   ;;  %v28465_v37 = vsub.s32 2, %v21076_v59 }
 0x243   :  { %v16216_v31 = vpop.f32.mrf.mxu1  ;;  %17395 = vmatmul.mubr.bf16.gmra.mxu1 %v19477_v48  ;;  %v22737_v34 = vpack.c.bf16 %v5784_v46, %v5781_v61  ;;  %v5785_v30 = vmax.f32 %v4944_v35, 0.0  ;;  %v4948_v38 = vadd.f32 %v4947_v26, %v22543_v32  ;;  %6448 = vmatpush1.bf16.msra.mxu0 %v19478_v56  ;;  %v19481_v32 = vld [vmem:[%s28450_s2 + $0x1b4] ss:$12 sps:$4 sm:$0xff]   ;;  %v19489_v26 = vld [vmem:[%s28450_s2 + $0x18] ss:$12 sps:$4 sm:$0xff]  }
 0x244   :  { %6531 = vmatpush1.bf16.msra.mxu1 %v19479_v4  ;;  %v4949_v19 = vpop.f32.mrf.mxu0  ;;  %6449 = vmatprep.subr.bf16.mxu0 %v19480_v9  ;;  %v19804_v59 = vld [vmem:[%s28450_s2 + $0x68] ss:$12 sps:$4 sm:$0xff]  }
 0x245   :  { %28534 = vst [vmem:[#allocation11_spill] sm:$0xff] %v22737_v34  ;;  %v16217_v44 = vpop.f32.mrf.mxu1  ;;  %6532 = vmatprep.subr.bf16.mxu1 %v19481_v32  ;;  %v9765_v50 = vrot.slane %v22737_v34, 4  ;;  %v4950_v60 = vadd.f32 %v4949_v19, %v22547_v62  ;;  %5679 = vmatprep.mubr.bf16.mxu0 %v19482_v54  ;;  %v22761_v51 = vpack.c.bf16 %v5785_v30, %v5782_v25  ;;  %v19483_v62 = vld [vmem:[%s28450_s2 + $0x30] ss:$12 sps:$4 sm:$0xff]   ;;  %v5787_v24 = vmax.f32 %v4948_v38, 0.0 }
 0x246   :  { %v22754_v6 = vadd.f32 %v16217_v44, %v16216_v31  ;;  %17398 = vmatprep.mubr.msk.bf16.mxu1 %vm20078_vm0, %v28468_v20  ;;  %v4951_v22 = vpop.f32.mrf.mxu0  ;;  %v19490_v31 = vld [vmem:[%s28450_s2 + $0x198] ss:$12 sps:$4 sm:$0xff]   ;;  %v19493_v19 = vld [vmem:[%s28451_s0 + $0x2ec] ss:$84 sps:$4 sm:$0xff]  }
 0x247   :  { %v16219_v16 = vpop.f32.mrf.mxu1  ;;  %28535 = vst [vmem:[#allocation12_spill] sm:$0xff] %v22761_v51  ;;  %v4952_v42 = vadd.f32 %v4951_v22, %v22557_v39  ;;  %6450 = vmatpush1.bf16.msra.mxu0 %v19483_v62  ;;  %v22775_v11 = vsel %vm9755_vm1, %v9757_v21, %v9765_v50  ;;  %v19485_v39 = vld [vmem:[%s28450_s2 + $0x1c] ss:$12 sps:$4 sm:$0xff]   ;;  %v9767_v47 = vrot.slane %v22761_v51, 4  ;;  %v5788_v48 = vmax.f32 %v4950_v60, 0.0 }
 0x248   :  { %6533 = vmatpush1.bf16.msra.mxu1 %v19484_v18  ;;  %28536 = vst [vmem:[#allocation13_spill] sm:$0xff] %v22775_v11  ;;  %v4953_v0 = vpop.f32.mrf.mxu0  ;;  %6451 = vmatprep.subr.bf16.mxu0 %v19485_v39  ;;  %v19491_v38 = vld [vmem:[%s28450_s2 + $0x4] ss:$12 sps:$4 sm:$0xff]   ;;  %v19495_v54 = vld [vmem:[%s28450_s2 + $0x180] ss:$12 sps:$4 sm:$0xff]   ;;  %v28549_v11 = vmov 0  }
 0x249   :  { %v16220_v57 = vpop.f32.mrf.mxu1  ;;  %6534 = vmatprep.subr.bf16.mxu1 %v19486_v53  ;;  %v5790_v23 = vmax.f32 %v4952_v42, 0.0  ;;  %v4954_v2 = vadd.f32 %v4953_v0, %v22569_v13  ;;  %v22796_v61 = vsel %vm9755_vm1, %v9760_v58, %v9767_v47  ;;  %v19497_v18 = vld [vmem:[%s28450_s2 + $0x16c] ss:$12 sps:$4 sm:$0xff]  }
 0x24a   :  { %v22785_v21 = vadd.f32 %v16220_v57, %v16219_v16  ;;  %v4957_v15 = vpop.f32.mrf.mxu0  ;;  %5680 = vmatmul.mubr.bf16.gmra.mxu0 %v19487_v41  ;;  %28537 = vst [vmem:[#allocation14_spill] sm:$0xff] %v22796_v61  ;;  %v19499_v41 = vld [vmem:[%s28451_s0 + $0x2e8] ss:$84 sps:$4 sm:$0xff]  }
 0x24b   :  { %v16222_v45 = vpop.f32.mrf.mxu1  ;;  %17399 = vmatmul.mubr.bf16.gmra.mxu1 %v19488_v17  ;;  %v22798_v13 = vpack.c.bf16 %v5790_v23, %v5787_v24  ;;  %v5791_v46 = vmax.f32 %v4954_v2, 0.0  ;;  %v4958_v35 = vadd.f32 %v4957_v15, %v22584_v49  ;;  %6452 = vmatpush1.bf16.msra.mxu0 %v19489_v26  ;;  %v19492_v49 = vld [vmem:[%s28450_s2 + $0x184] ss:$12 sps:$4 sm:$0xff]   ;;  %v18389_v2 = vld [vmem:[%s28453_s1 + $0xc] ss:$84 sps:$4 sm:$0xff]  }
 0x24c   :  { %6535 = vmatpush1.bf16.msra.mxu1 %v19490_v31  ;;  %v4959_v58 = vpop.f32.mrf.mxu0  ;;  %6453 = vmatprep.subr.bf16.mxu0 %v19491_v38  ;;  %v18386_v23 = vld [vmem:[%s28453_s1 + $0x4] ss:$84 sps:$4 sm:$0xff]   ;;  %v19501_v31 = vld [vmem:[%s28450_s2 + $0x168] ss:$12 sps:$4 sm:$0xff]  }
 0x24d   :  { %28538 = vst [vmem:[#allocation15_spill] sm:$0xff] %v22798_v13  ;;  %v16223_v30 = vpop.f32.mrf.mxu1  ;;  %6536 = vmatprep.subr.bf16.mxu1 %v19492_v49  ;;  %v28466_v56 = vrot.slane %v22798_v13, 4  ;;  %v4960_v4 = vadd.f32 %v4959_v58, %v22588_v7  ;;  %5687 = vmatprep.mubr.bf16.mxu0 %v19493_v19  ;;  %v22823_v32 = vpack.c.bf16 %v5791_v46, %v5788_v48  ;;  %v19494_v7 = vld [vmem:[%s28450_s2] ss:$12 sps:$4 sm:$0xff]   ;;  %v5793_v57 = vmax.f32 %v4958_v35, 0.0 }
 0x24e   :  { %v22816_v25 = vadd.f32 %v16223_v30, %v16222_v45  ;;  %17402 = vmatprep.mubr.msk.bf16.mxu1 %vm20078_vm0, %v28468_v20  ;;  %v4961_v44 = vpop.f32.mrf.mxu0  ;;  %v19502_v48 = vld [vmem:[%s28450_s2 + $0x2e8] ss:$12 sps:$4 sm:$0xff]  }
 0x24f   :  { %v16225_v9 = vpop.f32.mrf.mxu1  ;;  %28539 = vst [vmem:[#allocation16_spill] sm:$0xff] %v22823_v32  ;;  %v4962_v60 = vadd.f32 %v4961_v44, %v22595_v28  ;;  %6454 = vmatpush1.bf16.msra.mxu0 %v19494_v7  ;;  %v22837_v22 = vsel %vm9755_vm1, %v9765_v50, %v28466_v56  ;;  %v19496_v28 = vld [vmem:[%s28452_s3] sm:$0x7]  ;;  %v19498_v50 = vld [vmem:[%s28450_s2 + $0x2ec] ss:$12 sps:$4 sm:$0xff]   ;;  %v28467_v0 = vrot.slane %v22823_v32, 4 }
 0x250   :  { %6537 = vmatpush1.bf16.msra.mxu1 %v19495_v54  ;;  %28540 = vst [vmem:[#allocation17_spill] sm:$0xff] %v22837_v22  ;;  %v22844_v16 = vrot.slane %v19496_v28, %v28465_v37  ;;  %v4963_v42 = vpop.f32.mrf.mxu0  ;;  %6455 = vmatprep.subr.bf16.mxu0 %v19497_v18  ;;  %v5794_v46 = vmax.f32 %v4960_v4, 0.0  ;;  %v19503_v38 = vld [vmem:[%s28450_s2 + $0x154] ss:$12 sps:$4 sm:$0xff]   ;;  %v19505_v7 = vld [vmem:[%s28450_s2 + $0x150] ss:$12 sps:$4 sm:$0xff]  }
 0x251   :  { %v16226_v62 = vpop.f32.mrf.mxu1  ;;  %6538 = vmatprep.subr.bf16.mxu1 %v19498_v50  ;;  %v5796_v39 = vmax.f32 %v4962_v60, 0.0  ;;  %v4964_v53 = vadd.f32 %v4963_v42, %v22607_v36  ;;  %v19500_v36 = vld [vmem:[%s28451_s0 + $0x2f0] ss:$84 sps:$4 sm:$0xff]   ;;  %v22873_v17 = vsel %vm9755_vm1, %v9767_v47, %v28467_v0  ;;  %v19504_v49 = vld [vmem:[%s28450_s2 + $0x2d4] ss:$12 sps:$4 sm:$0xff]  }
 0x252   :  { %v22854_v24 = vadd.f32 %v16226_v62, %v16225_v9  ;;  %v16244_v15 = vpop.f32.mrf.mxu0  ;;  %5688 = vmatmul.mubr.bf16.gmra.mxu0 %v19499_v41  ;;  %28541 = vst [vmem:[#allocation18_spill] sm:$0xff] %v22873_v17  ;;  %v5001_v58 = vadd.f32 %v22619_v27, %v22844_v16  ;;  %v19506_v54 = vld [vmem:[%s28450_s2 + $0x2d0] ss:$12 sps:$4 sm:$0xff]   ;;  %v5004_v50 = vadd.f32 %v22623_v43, %v22844_v16  ;;  %v19510_v41 = vld [vmem:[%s28450_s2 + $0x2b8] ss:$12 sps:$4 sm:$0xff]  }
 0x253   :  { %v16290_v45 = vpop.f32.mrf.mxu1  ;;  %17403 = vmatmul.mubr.bf16.gmra.mxu1 %v19500_v36  ;;  %v22875_v35 = vpack.c.bf16 %v5796_v39, %v5793_v57  ;;  %v5797_v26 = vmax.f32 %v4964_v53, 0.0  ;;  %6456 = vmatpush2.bf16.msra.mxu0 %v19501_v31  ;;  %v19507_v62 = vld [vmem:[%s28450_s2 + $0x13c] ss:$12 sps:$4 sm:$0xff]   ;;  %v19511_v43 = vld [vmem:[%s28450_s2 + $0x124] ss:$12 sps:$4 sm:$0xff]   ;;  %v5009_v31 = vadd.f32 %v22647_v14, %v22844_v16 }
 0x254   :  { %6539 = vmatpush2.bf16.msra.mxu1 %v19502_v48  ;;  %v16245_v30 = vpop.f32.mrf.mxu0  ;;  %6457 = vmatprep.subr.bf16.mxu0 %v19503_v38  ;;  %v19508_v18 = vld [vmem:[%s28450_s2 + $0x2bc] ss:$12 sps:$4 sm:$0xff]   ;;  %v19515_v14 = vld [vmem:[%s28450_s2 + $0x10c] ss:$12 sps:$4 sm:$0xff]  }
 0x255   :  { %28542 = vst [vmem:[#allocation19_spill] sm:$0xff] %v22875_v35  ;;  %v16291_v47 = vpop.f32.mrf.mxu1  ;;  %6540 = vmatprep.subr.bf16.mxu1 %v19504_v49  ;;  %v16246_v4 = vadd.f32 %v16245_v30, %v16244_v15  ;;  %6471 = vmatprep.mubr.bf16.mxu0 %v18386_v23  ;;  %v22891_v44 = vpack.c.bf16 %v5797_v26, %v5794_v46  ;;  %v19512_v26 = vld [vmem:[%s28450_s2 + $0x2a4] ss:$12 sps:$4 sm:$0xff]  }
 0x256   :  { %v16292_v19 = vadd.f32 %v16291_v47, %v16290_v45  ;;  %6554 = vmatprep.mubr.bf16.mxu1 %v18389_v2  ;;  %v16247_v9 = vpop.f32.mrf.mxu0  ;;  %v19509_v45 = vld [vmem:[%s28450_s2 + $0x138] ss:$12 sps:$4 sm:$0xff]  }
 0x257   :  { %28543 = vst [vmem:[#allocation20_spill] sm:$0xff] %v22891_v44  ;;  %v16293_v27 = vpop.f32.mrf.mxu1  ;;  %v5074_v60 = vadd.f32 %v16246_v4, %v5001_v58  ;;  %6458 = vmatpush2.bf16.msra.mxu0 %v19505_v7  ;;  %v19513_v4 = vld [vmem:[%s28450_s2 + $0x120] ss:$12 sps:$4 sm:$0xff]   ;;  %v5012_v7 = vadd.f32 %v22670_v52, %v22844_v16 }
 0x258   :  { %6541 = vmatpush2.bf16.msra.mxu1 %v19506_v54  ;;  %v16248_v28 = vpop.f32.mrf.mxu0  ;;  %6459 = vmatprep.subr.bf16.mxu0 %v19507_v62  ;;  %v19519_v52 = vld [vmem:[%s28450_s2 + $0xf4] ss:$12 sps:$4 sm:$0xff]  }
 0x259   :  { %v16294_v42 = vpop.f32.mrf.mxu1  ;;  %6542 = vmatprep.subr.bf16.mxu1 %v19508_v18  ;;  %v22907_v57 = vadd.f32 %v16292_v19, %v5074_v60  ;;  %v16249_v39 = vadd.f32 %v16248_v28, %v16247_v9  ;;  %v19514_v19 = vld [vmem:[%s28450_s2 + $0x2a0] ss:$12 sps:$4 sm:$0xff]  }
 0x25a   :  { %v16295_v53 = vadd.f32 %v16294_v42, %v16293_v27  ;;  %v16250_v23 = vpop.f32.mrf.mxu0  ;;  %v19516_v60 = vld [vmem:[%s28450_s2 + $0x28c] ss:$12 sps:$4 sm:$0xff]  }
 0x25b   :  { %v16296_v2 = vpop.f32.mrf.mxu1  ;;  %v5077_v15 = vadd.f32 %v16249_v39, %v5004_v50  ;;  %6460 = vmatpush2.bf16.msra.mxu0 %v19509_v45  ;;  %v19517_v39 = vld [vmem:[%s28450_s2 + $0x108] ss:$12 sps:$4 sm:$0xff]   ;;  %v5017_v45 = vadd.f32 %v22696_v33, %v22844_v16 }
 0x25c   :  { %6543 = vmatpush2.bf16.msra.mxu1 %v19510_v41  ;;  %v16251_v36 = vpop.f32.mrf.mxu0  ;;  %6461 = vmatprep.subr.bf16.mxu0 %v19511_v43  ;;  %v19523_v33 = vld [vmem:[%s28450_s2 + $0xdc] ss:$12 sps:$4 sm:$0xff]  }
 0x25d   :  { %v16297_v46 = vpop.f32.mrf.mxu1  ;;  %6544 = vmatprep.subr.bf16.mxu1 %v19512_v26  ;;  %v22923_v48 = vadd.f32 %v16295_v53, %v5077_v15  ;;  %v16252_v58 = vadd.f32 %v16251_v36, %v16250_v23  ;;  %v19518_v53 = vld [vmem:[%s28450_s2 + $0x288] ss:$12 sps:$4 sm:$0xff]  }
 0x25e   :  { %v16298_v30 = vadd.f32 %v16297_v46, %v16296_v2  ;;  %v16253_v47 = vpop.f32.mrf.mxu0  ;;  %v19520_v15 = vld [vmem:[%s28450_s2 + $0x274] ss:$12 sps:$4 sm:$0xff]  }
 0x25f   :  { %v16299_v38 = vpop.f32.mrf.mxu1  ;;  %v5082_v49 = vadd.f32 %v16252_v58, %v5009_v31  ;;  %6462 = vmatpush2.bf16.msra.mxu0 %v19513_v4  ;;  %v19521_v58 = vld [vmem:[%s28450_s2 + $0xf0] ss:$12 sps:$4 sm:$0xff]   ;;  %v5020_v4 = vadd.f32 %v22726_v40, %v22844_v16 }
 0x260   :  { %6545 = vmatpush2.bf16.msra.mxu1 %v19514_v19  ;;  %v16254_v9 = vpop.f32.mrf.mxu0  ;;  %6463 = vmatprep.subr.bf16.mxu0 %v19515_v14  ;;  %v19527_v40 = vld [vmem:[%s28450_s2 + $0xc4] ss:$12 sps:$4 sm:$0xff]  }
 0x261   :  { %v16300_v27 = vpop.f32.mrf.mxu1  ;;  %6546 = vmatprep.subr.bf16.mxu1 %v19516_v60  ;;  %v22939_v54 = vadd.f32 %v16298_v30, %v5082_v49  ;;  %v16255_v28 = vadd.f32 %v16254_v9, %v16253_v47  ;;  %v19522_v30 = vld [vmem:[%s28450_s2 + $0x270] ss:$12 sps:$4 sm:$0xff]  }
 0x262   :  { %v16301_v42 = vadd.f32 %v16300_v27, %v16299_v38  ;;  %v16256_v62 = vpop.f32.mrf.mxu0  ;;  %v19524_v49 = vld [vmem:[%s28450_s2 + $0x25c] ss:$12 sps:$4 sm:$0xff]  }
 0x263   :  { %v16302_v18 = vpop.f32.mrf.mxu1  ;;  %v5085_v50 = vadd.f32 %v16255_v28, %v5012_v7  ;;  %6464 = vmatpush2.bf16.msra.mxu0 %v19517_v39  ;;  %v19525_v28 = vld [vmem:[%s28450_s2 + $0xd8] ss:$12 sps:$4 sm:$0xff]   ;;  %v5025_v39 = vadd.f32 %v22754_v6, %v22844_v16  ;;  %v19530_v6 = vld [vmem:[%s28450_s2 + $0x240] ss:$12 sps:$4 sm:$0xff]  }
 0x264   :  { %6547 = vmatpush2.bf16.msra.mxu1 %v19518_v53  ;;  %v16257_v23 = vpop.f32.mrf.mxu0  ;;  %6465 = vmatprep.subr.bf16.mxu0 %v19519_v52 }
 0x265   :  { %v16303_v2 = vpop.f32.mrf.mxu1  ;;  %6548 = vmatprep.subr.bf16.mxu1 %v19520_v15  ;;  %v22955_v41 = vadd.f32 %v16301_v42, %v5085_v50  ;;  %v16258_v36 = vadd.f32 %v16257_v23, %v16256_v62  ;;  %v19526_v42 = vld [vmem:[%s28450_s2 + $0x258] ss:$12 sps:$4 sm:$0xff]  }
 0x266   :  { %v16304_v46 = vadd.f32 %v16303_v2, %v16302_v18  ;;  %v16259_v43 = vpop.f32.mrf.mxu0  ;;  %v19528_v50 = vld [vmem:[%s28450_s2 + $0x244] ss:$12 sps:$4 sm:$0xff]  }
 0x267   :  { %v16305_v26 = vpop.f32.mrf.mxu1  ;;  %v5090_v31 = vadd.f32 %v16258_v36, %v5017_v45  ;;  %6466 = vmatpush2.bf16.msra.mxu0 %v19521_v58  ;;  %v18384_v45 = vld [vmem:[%s28453_s1] ss:$84 sps:$4 sm:$0xff]   ;;  %v18387_v36 = vld [vmem:[%s28453_s1 + $0x8] ss:$84 sps:$4 sm:$0xff]   ;;  %v19531_v58 = vld [vmem:[%s28450_s2 + $0x3ac] ss:$12 sps:$4 sm:$0xff]  }
 0x268   :  { %6549 = vmatpush2.bf16.msra.mxu1 %v19522_v30  ;;  %v16260_v47 = vpop.f32.mrf.mxu0  ;;  %6467 = vmatprep.subr.bf16.mxu0 %v19523_v33  ;;  %v19532_v30 = vld [vmem:[%s28450_s2 + $0x52c] ss:$12 sps:$4 sm:$0xff]  }
 0x269   :  { %v16306_v38 = vpop.f32.mrf.mxu1  ;;  %6550 = vmatprep.subr.bf16.mxu1 %v19524_v49  ;;  %v22971_v19 = vadd.f32 %v16304_v46, %v5090_v31  ;;  %v16261_v9 = vadd.f32 %v16260_v47, %v16259_v43  ;;  %v19529_v43 = vld [vmem:[%s28450_s2 + $0xc0] ss:$12 sps:$4 sm:$0xff]   ;;  %v5028_v47 = vadd.f32 %v22785_v21, %v22844_v16  ;;  %v19533_v21 = vld [vmem:[%s28450_s2 + $0x3a8] ss:$12 sps:$4 sm:$0xff]  }
 0x26a   :  { %v16262_v27 = vpop.f32.mrf.mxu0  ;;  %v16307_v7 = vadd.f32 %v16306_v38, %v16305_v26  ;;  %v18392_v49 = vld [vmem:[%s28453_s1 + $0xac] ss:$84 sps:$4 sm:$0xff]  }
 0x26b   :  { %v16308_v14 = vpop.f32.mrf.mxu1  ;;  %v5093_v60 = vadd.f32 %v16261_v9, %v5020_v4  ;;  %6468 = vmatpush2.bf16.msra.mxu0 %v19525_v28  ;;  %v18395_v4 = vld [vmem:[%s28453_s1 + $0xb4] ss:$84 sps:$4 sm:$0xff]   ;;  %v5033_v28 = vadd.f32 %v22816_v25, %v22844_v16 }
 0x26c   :  { %6551 = vmatpush2.bf16.msra.mxu1 %v19526_v42  ;;  %v16263_v62 = vpop.f32.mrf.mxu0  ;;  %6469 = vmatprep.subr.bf16.mxu0 %v19527_v40  ;;  %v19536_v40 = vld [vmem:[%s28450_s2 + $0x514] ss:$12 sps:$4 sm:$0xff]  }
 0x26d   :  { %v16309_v18 = vpop.f32.mrf.mxu1  ;;  %6552 = vmatprep.subr.bf16.mxu1 %v19528_v50  ;;  %v22987_v53 = vadd.f32 %v16307_v7, %v5093_v60  ;;  %v16264_v23 = vadd.f32 %v16263_v62, %v16262_v27  ;;  %v19534_v7 = vld [vmem:[%s28450_s2 + $0x528] ss:$12 sps:$4 sm:$0xff]  }
 0x26e   :  { %v16310_v2 = vadd.f32 %v16309_v18, %v16308_v14  ;;  %v16265_v52 = vpop.f32.mrf.mxu0  ;;  %v19535_v18 = vld [vmem:[%s28450_s2 + $0x394] ss:$12 sps:$4 sm:$0xff]  }
 0x26f   :  { %v16311_v15 = vpop.f32.mrf.mxu1  ;;  %v5098_v46 = vadd.f32 %v16264_v23, %v5025_v39  ;;  %6470 = vmatpush2.bf16.msra.mxu0 %v19529_v43 }
 0x270   :  { %6553 = vmatpush2.bf16.msra.mxu1 %v19530_v6  ;;  %v16266_v26 = vpop.f32.mrf.mxu0  ;;  %6605 = vmatprep.subr.bf16.mxu0 %v19531_v58  ;;  %v5036_v58 = vadd.f32 %v22854_v24, %v22844_v16  ;;  %v19541_v24 = vld [vmem:[%s28450_s2 + $0x378] ss:$12 sps:$4 sm:$0xff]  }
 0x271   :  { %v16312_v31 = vpop.f32.mrf.mxu1  ;;  %6688 = vmatprep.subr.bf16.mxu1 %v19532_v30  ;;  %v23009_v38 = vadd.f32 %v16310_v2, %v5098_v46  ;;  %v16267_v33 = vadd.f32 %v16266_v26, %v16265_v52  ;;  %v18390_v52 = vld [vmem:[%s28453_s1 + $0xa8] ss:$84 sps:$4 sm:$0xff]  }
 0x272   :  { %6472 = vmatmul.mubr.bf16.vlgmr.msra.gmra.mxu0 %v18384_v45  ;;  %v16268_v9 = vpop.f32.mrf.mxu0  ;;  %v16313_v60 = vadd.f32 %v16312_v31, %v16311_v15  ;;  %v18393_v15 = vld [vmem:[%s28453_s1 + $0xb0] ss:$84 sps:$4 sm:$0xff]   ;;  %v19539_v26 = vld [vmem:[%s28450_s2 + $0x37c] ss:$12 sps:$4 sm:$0xff]  }
 0x273   :  { %v16314_v27 = vpop.f32.mrf.mxu1  ;;  %6555 = vmatmul.mubr.bf16.vlgmr.msra.gmra.mxu1 %v18387_v36  ;;  %v5101_v14 = vadd.f32 %v16267_v33, %v5028_v47  ;;  %6606 = vmatpush1.bf16.msra.mxu0 %v19533_v21  ;;  %v19537_v36 = vld [vmem:[%s28450_s2 + $0x390] ss:$12 sps:$4 sm:$0xff]   ;;  %v18398_v33 = vld [vmem:[%s28453_s1 + $0x154] ss:$84 sps:$4 sm:$0xff]  }
 0x274   :  { %6689 = vmatpush1.bf16.msra.mxu1 %v19534_v7  ;;  %v16269_v42 = vpop.f32.mrf.mxu0  ;;  %6607 = vmatprep.subr.bf16.mxu0 %v19535_v18  ;;  %v19538_v46 = vld [vmem:[%s28450_s2 + $0x510] ss:$12 sps:$4 sm:$0xff]  }
 0x275   :  { %v16315_v62 = vpop.f32.mrf.mxu1  ;;  %6690 = vmatprep.subr.bf16.mxu1 %v19536_v40  ;;  %v23031_v50 = vadd.f32 %v16313_v60, %v5101_v14  ;;  %v16270_v39 = vadd.f32 %v16269_v42, %v16268_v9  ;;  %6481 = vmatprep.mubr.bf16.mxu0 %v18392_v49  ;;  %v19540_v31 = vld [vmem:[%s28450_s2 + $0x4fc] ss:$12 sps:$4 sm:$0xff]   ;;  %v19542_v60 = vld [vmem:[%s28450_s2 + $0x4f8] ss:$12 sps:$4 sm:$0xff]  }
 0x276   :  { %v16316_v23 = vadd.f32 %v16315_v62, %v16314_v27  ;;  %6564 = vmatprep.mubr.bf16.mxu1 %v18395_v4  ;;  %v16271_v2 = vpop.f32.mrf.mxu0  ;;  %v18401_v49 = vld [vmem:[%s28453_s1 + $0x15c] ss:$84 sps:$4 sm:$0xff]  }
 0x277   :  { %v16317_v25 = vpop.f32.mrf.mxu1  ;;  %v5106_v45 = vadd.f32 %v16270_v39, %v5033_v28  ;;  %6608 = vmatpush1.bf16.msra.mxu0 %v19537_v36  ;;  %v19543_v28 = vld [vmem:[%s28450_s2 + $0x364] ss:$12 sps:$4 sm:$0xff]  }
 0x278   :  { %6691 = vmatpush1.bf16.msra.mxu1 %v19538_v46  ;;  %v16272_v43 = vpop.f32.mrf.mxu0  ;;  %6609 = vmatprep.subr.bf16.mxu0 %v19539_v26  ;;  %v19544_v42 = vld [vmem:[%s28450_s2 + $0x4e4] ss:$12 sps:$4 sm:$0xff]  }
 0x279   :  { %v16318_v6 = vpop.f32.mrf.mxu1  ;;  %6692 = vmatprep.subr.bf16.mxu1 %v19540_v31  ;;  %v23053_v30 = vadd.f32 %v16316_v23, %v5106_v45  ;;  %v16273_v47 = vadd.f32 %v16272_v43, %v16271_v2  ;;  %v18396_v2 = vld [vmem:[%s28453_s1 + $0x150] ss:$84 sps:$4 sm:$0xff]   ;;  %v19546_v45 = vld [vmem:[%s28450_s2 + $0x4e0] ss:$12 sps:$4 sm:$0xff]  }
 0x27a   :  { %v16336_v4 = vpop.f32.mrf.mxu0  ;;  %6482 = vmatmul.mubr.bf16.gmra.mxu0 %v18390_v52  ;;  %v16319_v14 = vadd.f32 %v16318_v6, %v16317_v25  ;;  %v18399_v25 = vld [vmem:[%s28453_s1 + $0x158] ss:$84 sps:$4 sm:$0xff]   ;;  %v18404_v31 = vld [vmem:[%s28453_s1 + $0x1fc] ss:$84 sps:$4 sm:$0xff]  }
 0x27b   :  { %v16382_v9 = vpop.f32.mrf.mxu1  ;;  %6565 = vmatmul.mubr.bf16.gmra.mxu1 %v18393_v15  ;;  %v5109_v27 = vadd.f32 %v16273_v47, %v5036_v58  ;;  %6610 = vmatpush1.bf16.msra.mxu0 %v19541_v24  ;;  %v19545_v15 = vld [vmem:[%s28450_s2 + $0x360] ss:$12 sps:$4 sm:$0xff]   ;;  %v18407_v58 = vld [vmem:[%s28453_s1 + $0x204] ss:$84 sps:$4 sm:$0xff]  }
 0x27c   :  { %6693 = vmatpush1.bf16.msra.mxu1 %v19542_v60  ;;  %v16337_v21 = vpop.f32.mrf.mxu0  ;;  %6611 = vmatprep.subr.bf16.mxu0 %v19543_v28  ;;  %v19547_v43 = vld [vmem:[%s28450_s2 + $0x34c] ss:$12 sps:$4 sm:$0xff]   ;;  %v19551_v60 = vld [vmem:[%s28450_s2 + $0x334] ss:$12 sps:$4 sm:$0xff]  }
 0x27d   :  { %v16383_v7 = vpop.f32.mrf.mxu1  ;;  %6694 = vmatprep.subr.bf16.mxu1 %v19544_v42  ;;  %v23073_v62 = vadd.f32 %v16319_v14, %v5109_v27  ;;  %v16338_v18 = vadd.f32 %v16337_v21, %v16336_v4  ;;  %6491 = vmatprep.mubr.bf16.mxu0 %v18398_v33  ;;  %v19550_v27 = vld [vmem:[%s28450_s2 + $0x4c8] ss:$12 sps:$4 sm:$0xff]  }
 0x27e   :  { %v16384_v40 = vadd.f32 %v16383_v7, %v16382_v9  ;;  %6574 = vmatprep.mubr.bf16.mxu1 %v18401_v49  ;;  %v16339_v39 = vpop.f32.mrf.mxu0  ;;  %v19549_v9 = vld [vmem:[%s28450_s2 + $0x348] ss:$12 sps:$4 sm:$0xff]  }
 0x27f   :  { %v16385_v23 = vpop.f32.mrf.mxu1  ;;  %v5220_v52 = vadd.f32 %v16338_v18, %v22907_v57  ;;  %6612 = vmatpush1.bf16.msra.mxu0 %v19545_v15  ;;  %v19548_v57 = vld [vmem:[%s28450_s2 + $0x4cc] ss:$12 sps:$4 sm:$0xff]  }
 0x280   :  { %6695 = vmatpush1.bf16.msra.mxu1 %v19546_v45  ;;  %v16340_v36 = vpop.f32.mrf.mxu0  ;;  %6613 = vmatprep.subr.bf16.mxu0 %v19547_v43  ;;  %v19555_v45 = vld [vmem:[%s28450_s2 + $0x31c] ss:$12 sps:$4 sm:$0xff]   ;;  %v18410_v43 = vld [vmem:[%s28453_s1 + $0x2a4] ss:$84 sps:$4 sm:$0xff]  }
 0x281   :  { %v16386_v46 = vpop.f32.mrf.mxu1  ;;  %6696 = vmatprep.subr.bf16.mxu1 %v19548_v57  ;;  %v23094_v6 = vadd.f32 %v16384_v40, %v5220_v52  ;;  %v16341_v26 = vadd.f32 %v16340_v36, %v16339_v39  ;;  %v18402_v40 = vld [vmem:[%s28453_s1 + $0x1f8] ss:$84 sps:$4 sm:$0xff]   ;;  %v18405_v39 = vld [vmem:[%s28453_s1 + $0x200] ss:$84 sps:$4 sm:$0xff]  }
 0x282   :  { %v16342_v47 = vpop.f32.mrf.mxu0  ;;  %6492 = vmatmul.mubr.bf16.gmra.mxu0 %v18396_v2  ;;  %v16387_v4 = vadd.f32 %v16386_v46, %v16385_v23  ;;  %v19553_v2 = vld [vmem:[%s28450_s2 + $0x330] ss:$12 sps:$4 sm:$0xff]   ;;  %v18413_v57 = vld [vmem:[%s28453_s1 + $0x2ac] ss:$84 sps:$4 sm:$0xff]  }
 0x283   :  { %v16388_v33 = vpop.f32.mrf.mxu1  ;;  %6575 = vmatmul.mubr.bf16.gmra.mxu1 %v18399_v25  ;;  %v5223_v49 = vadd.f32 %v16341_v26, %v22923_v48  ;;  %6614 = vmatpush1.bf16.msra.mxu0 %v19549_v9  ;;  %v19552_v48 = vld [vmem:[%s28450_s2 + $0x4b4] ss:$12 sps:$4 sm:$0xff]   ;;  %v19554_v25 = vld [vmem:[%s28450_s2 + $0x4b0] ss:$12 sps:$4 sm:$0xff]  }
 0x284   :  { %6697 = vmatpush1.bf16.msra.mxu1 %v19550_v27  ;;  %v16343_v14 = vpop.f32.mrf.mxu0  ;;  %6615 = vmatprep.subr.bf16.mxu0 %v19551_v60  ;;  %v19559_v27 = vld [vmem:[%s28450_s2 + $0x304] ss:$12 sps:$4 sm:$0xff]  }
 0x285   :  { %v16389_v24 = vpop.f32.mrf.mxu1  ;;  %6698 = vmatprep.subr.bf16.mxu1 %v19552_v48  ;;  %v23115_v21 = vadd.f32 %v16387_v4, %v5223_v49  ;;  %v16344_v7 = vadd.f32 %v16343_v14, %v16342_v47  ;;  %6501 = vmatprep.mubr.bf16.mxu0 %v18404_v31  ;;  %v19558_v49 = vld [vmem:[%s28450_s2 + $0x498] ss:$12 sps:$4 sm:$0xff]  }
 0x286   :  { %v16390_v28 = vadd.f32 %v16389_v24, %v16388_v33  ;;  %6584 = vmatprep.mubr.bf16.mxu1 %v18407_v58  ;;  %v16345_v42 = vpop.f32.mrf.mxu0  ;;  %v19557_v33 = vld [vmem:[%s28450_s2 + $0x318] ss:$12 sps:$4 sm:$0xff]  }
 0x287   :  { %v16391_v18 = vpop.f32.mrf.mxu1  ;;  %v5228_v23 = vadd.f32 %v16344_v7, %v22939_v54  ;;  %6616 = vmatpush1.bf16.msra.mxu0 %v19553_v2  ;;  %v19556_v54 = vld [vmem:[%s28450_s2 + $0x49c] ss:$12 sps:$4 sm:$0xff]  }
 0x288   :  { %6699 = vmatpush1.bf16.msra.mxu1 %v19554_v25  ;;  %v16346_v52 = vpop.f32.mrf.mxu0  ;;  %6617 = vmatprep.subr.bf16.mxu0 %v19555_v45  ;;  %v19563_v25 = vld [vmem:[%s28450_s2 + $0x46c] ss:$12 sps:$4 sm:$0xff]   ;;  %v18416_v45 = vld [vmem:[%s28453_s1 + $0x14] ss:$84 sps:$4 sm:$0xff]  }
 0x289   :  { %v16392_v15 = vpop.f32.mrf.mxu1  ;;  %6700 = vmatprep.subr.bf16.mxu1 %v19556_v54  ;;  %v23136_v36 = vadd.f32 %v16390_v28, %v5228_v23  ;;  %v16347_v46 = vadd.f32 %v16346_v52, %v16345_v42  ;;  %v18408_v28 = vld [vmem:[%s28453_s1 + $0x2a0] ss:$84 sps:$4 sm:$0xff]   ;;  %v18411_v42 = vld [vmem:[%s28453_s1 + $0x2a8] ss:$84 sps:$4 sm:$0xff]  }
 0x28a   :  { %v16348_v26 = vpop.f32.mrf.mxu0  ;;  %6502 = vmatmul.mubr.bf16.gmra.mxu0 %v18402_v40  ;;  %v16393_v47 = vadd.f32 %v16392_v15, %v16391_v18  ;;  %v19561_v40 = vld [vmem:[%s28450_s2 + $0x300] ss:$12 sps:$4 sm:$0xff]   ;;  %v18419_v54 = vld [vmem:[%s28453_s1 + $0x1c] ss:$84 sps:$4 sm:$0xff]  }
 0x28b   :  { %v16394_v31 = vpop.f32.mrf.mxu1  ;;  %6585 = vmatmul.mubr.bf16.gmra.mxu1 %v18405_v39  ;;  %v5231_v58 = vadd.f32 %v16347_v46, %v22955_v41  ;;  %6618 = vmatpush1.bf16.msra.mxu0 %v19557_v33  ;;  %v19560_v41 = vld [vmem:[%s28450_s2 + $0x484] ss:$12 sps:$4 sm:$0xff]   ;;  %v19562_v39 = vld [vmem:[%s28450_s2 + $0x480] ss:$12 sps:$4 sm:$0xff]  }
 0x28c   :  { %6701 = vmatpush1.bf16.msra.mxu1 %v19558_v49  ;;  %v16349_v4 = vpop.f32.mrf.mxu0  ;;  %6619 = vmatprep.subr.bf16.mxu0 %v19559_v27  ;;  %v19567_v49 = vld [vmem:[%s28450_s2 + $0x454] ss:$12 sps:$4 sm:$0xff]  }
 0x28d   :  { %v16395_v9 = vpop.f32.mrf.mxu1  ;;  %6702 = vmatprep.subr.bf16.mxu1 %v19560_v41  ;;  %v23157_v14 = vadd.f32 %v16393_v47, %v5231_v58  ;;  %v16350_v24 = vadd.f32 %v16349_v4, %v16348_v26  ;;  %6511 = vmatprep.mubr.bf16.mxu0 %v18410_v43  ;;  %v19566_v58 = vld [vmem:[%s28450_s2 + $0x5e8] ss:$12 sps:$4 sm:$0xff]  }
 0x28e   :  { %v16396_v60 = vadd.f32 %v16395_v9, %v16394_v31  ;;  %6594 = vmatprep.mubr.bf16.mxu1 %v18413_v57  ;;  %v16351_v48 = vpop.f32.mrf.mxu0  ;;  %v19565_v31 = vld [vmem:[%s28450_s2 + $0x468] ss:$12 sps:$4 sm:$0xff]  }
 0x28f   :  { %v16397_v7 = vpop.f32.mrf.mxu1  ;;  %v5236_v18 = vadd.f32 %v16350_v24, %v22971_v19  ;;  %6620 = vmatpush1.bf16.msra.mxu0 %v19561_v40  ;;  %v19564_v19 = vld [vmem:[%s28450_s2 + $0x5ec] ss:$12 sps:$4 sm:$0xff]  }
 0x290   :  { %6703 = vmatpush1.bf16.msra.mxu1 %v19562_v39  ;;  %v16352_v23 = vpop.f32.mrf.mxu0  ;;  %6621 = vmatprep.subr.bf16.mxu0 %v19563_v25 }
 0x291   :  { %v16398_v2 = vpop.f32.mrf.mxu1  ;;  %6704 = vmatprep.subr.bf16.mxu1 %v19564_v19  ;;  %v23178_v52 = vadd.f32 %v16396_v60, %v5236_v18  ;;  %v16353_v15 = vadd.f32 %v16352_v23, %v16351_v48  ;;  %v19569_v48 = vld [vmem:[%s28450_s2 + $0x450] ss:$12 sps:$4 sm:$0xff]  }
 0x292   :  { %v16354_v46 = vpop.f32.mrf.mxu0  ;;  %6512 = vmatmul.mubr.bf16.gmra.mxu0 %v18408_v28  ;;  %v16399_v26 = vadd.f32 %v16398_v2, %v16397_v7  ;;  %v19570_v7 = vld [vmem:[%s28450_s2 + $0x5d0] ss:$12 sps:$4 sm:$0xff]  }
 0x293   :  { %v16400_v43 = vpop.f32.mrf.mxu1  ;;  %6595 = vmatmul.mubr.bf16.gmra.mxu1 %v18411_v42  ;;  %v5239_v57 = vadd.f32 %v16353_v15, %v22987_v53  ;;  %6622 = vmatpush2.bf16.msra.mxu0 %v19565_v31  ;;  %v19568_v53 = vld [vmem:[%s28450_s2 + $0x5d4] ss:$12 sps:$4 sm:$0xff]   ;;  %v19571_v18 = vld [vmem:[%s28450_s2 + $0x43c] ss:$12 sps:$4 sm:$0xff]   ;;  %v19573_v15 = vld [vmem:[%s28450_s2 + $0x438] ss:$12 sps:$4 sm:$0xff]  }
 0x294   :  { %6705 = vmatpush2.bf16.msra.mxu1 %v19566_v58  ;;  %v16355_v47 = vpop.f32.mrf.mxu0  ;;  %6623 = vmatprep.subr.bf16.mxu0 %v19567_v49  ;;  %v19577_v49 = vld [vmem:[%s28450_s2 + $0x420] ss:$12 sps:$4 sm:$0xff]  }
 0x295   :  { %v16401_v33 = vpop.f32.mrf.mxu1  ;;  %6706 = vmatprep.subr.bf16.mxu1 %v19568_v53  ;;  %v23199_v4 = vadd.f32 %v16399_v26, %v5239_v57  ;;  %v16356_v9 = vadd.f32 %v16355_v47, %v16354_v46  ;;  %6637 = vmatprep.mubr.bf16.mxu0 %v18416_v45  ;;  %v19574_v45 = vld [vmem:[%s28450_s2 + $0x5b8] ss:$12 sps:$4 sm:$0xff]   ;;  %v19578_v53 = vld [vmem:[%s28450_s2 + $0x5a0] ss:$12 sps:$4 sm:$0xff]  }
 0x296   :  { %v16402_v27 = vadd.f32 %v16401_v33, %v16400_v43  ;;  %6720 = vmatprep.mubr.bf16.mxu1 %v18419_v54  ;;  %v16357_v41 = vpop.f32.mrf.mxu0  ;;  %v19575_v43 = vld [vmem:[%s28450_s2 + $0x424] ss:$12 sps:$4 sm:$0xff]  }
 0x297   :  { %v16403_v24 = vpop.f32.mrf.mxu1  ;;  %v5244_v60 = vadd.f32 %v16356_v9, %v23009_v38  ;;  %6624 = vmatpush2.bf16.msra.mxu0 %v19569_v48  ;;  %v19572_v38 = vld [vmem:[%s28450_s2 + $0x5bc] ss:$12 sps:$4 sm:$0xff]  }
 0x298   :  { %6707 = vmatpush2.bf16.msra.mxu1 %v19570_v7  ;;  %v16358_v28 = vpop.f32.mrf.mxu0  ;;  %6625 = vmatprep.subr.bf16.mxu0 %v19571_v18  ;;  %v19581_v18 = vld [vmem:[%s28450_s2 + $0x408] ss:$12 sps:$4 sm:$0xff]  }
 0x299   :  { %v16404_v42 = vpop.f32.mrf.mxu1  ;;  %6708 = vmatprep.subr.bf16.mxu1 %v19572_v38  ;;  %v23214_v40 = vadd.f32 %v16402_v27, %v5244_v60  ;;  %v16359_v39 = vadd.f32 %v16358_v28, %v16357_v41  ;;  %v19579_v41 = vld [vmem:[%s28450_s2 + $0x40c] ss:$12 sps:$4 sm:$0xff]   ;;  %v19582_v38 = vld [vmem:[%s28450_s2 + $0x588] ss:$12 sps:$4 sm:$0xff]  }
 0x29a   :  { %v16360_v23 = vpop.f32.mrf.mxu0  ;;  %v16405_v19 = vadd.f32 %v16404_v42, %v16403_v24 }
 0x29b   :  { %v16406_v2 = vpop.f32.mrf.mxu1  ;;  %v5247_v25 = vadd.f32 %v16359_v39, %v23031_v50  ;;  %6626 = vmatpush2.bf16.msra.mxu0 %v19573_v15  ;;  %v19576_v50 = vld [vmem:[%s28450_s2 + $0x5a4] ss:$12 sps:$4 sm:$0xff]  }
 0x29c   :  { %6709 = vmatpush2.bf16.msra.mxu1 %v19574_v45  ;;  %v16361_v54 = vpop.f32.mrf.mxu0  ;;  %6627 = vmatprep.subr.bf16.mxu0 %v19575_v43  ;;  %v19585_v43 = vld [vmem:[%s28450_s2 + $0x3f0] ss:$12 sps:$4 sm:$0xff]  }
 0x29d   :  { %v16407_v46 = vpop.f32.mrf.mxu1  ;;  %6710 = vmatprep.subr.bf16.mxu1 %v19576_v50  ;;  %v23229_v57 = vadd.f32 %v16405_v19, %v5247_v25  ;;  %v16362_v26 = vadd.f32 %v16361_v54, %v16360_v23  ;;  %v19586_v50 = vld [vmem:[%s28450_s2 + $0x570] ss:$12 sps:$4 sm:$0xff]  }
 0x29e   :  { %v16408_v31 = vadd.f32 %v16407_v46, %v16406_v2  ;;  %v16363_v58 = vpop.f32.mrf.mxu0  ;;  %v19583_v2 = vld [vmem:[%s28450_s2 + $0x3f4] ss:$12 sps:$4 sm:$0xff]  }
 0x29f   :  { %v16409_v47 = vpop.f32.mrf.mxu1  ;;  %v5252_v33 = vadd.f32 %v16362_v26, %v23053_v30  ;;  %6628 = vmatpush2.bf16.msra.mxu0 %v19577_v49  ;;  %v19580_v30 = vld [vmem:[%s28450_s2 + $0x58c] ss:$12 sps:$4 sm:$0xff]  }
 0x2a0   :  { %6711 = vmatpush2.bf16.msra.mxu1 %v19578_v53  ;;  %v16364_v9 = vpop.f32.mrf.mxu0  ;;  %6629 = vmatprep.subr.bf16.mxu0 %v19579_v41  ;;  %v19589_v41 = vld [vmem:[%s28450_s2 + $0x3d8] ss:$12 sps:$4 sm:$0xff]  }
 0x2a1   :  { %v16410_v27 = vpop.f32.mrf.mxu1  ;;  %6712 = vmatprep.subr.bf16.mxu1 %v19580_v30  ;;  %v23244_v24 = vadd.f32 %v16408_v31, %v5252_v33  ;;  %v16365_v60 = vadd.f32 %v16364_v9, %v16363_v58  ;;  %v19587_v58 = vld [vmem:[%s28450_s2 + $0x3dc] ss:$12 sps:$4 sm:$0xff]   ;;  %v19590_v30 = vld [vmem:[%s28450_s2 + $0x558] ss:$12 sps:$4 sm:$0xff]  }
 0x2a2   :  { %v16428_v48 = vpop.f32.mrf.mxu0  ;;  %v16411_v42 = vadd.f32 %v16410_v27, %v16409_v47 }
 0x2a3   :  { %v16474_v7 = vpop.f32.mrf.mxu1  ;;  %v5255_v28 = vadd.f32 %v16365_v60, %v23073_v62  ;;  %6630 = vmatpush2.bf16.msra.mxu0 %v19581_v18  ;;  %v19584_v62 = vld [vmem:[%s28450_s2 + $0x574] ss:$12 sps:$4 sm:$0xff]  }
 0x2a4   :  { %6713 = vmatpush2.bf16.msra.mxu1 %v19582_v38  ;;  %v16429_v39 = vpop.f32.mrf.mxu0  ;;  %6631 = vmatprep.subr.bf16.mxu0 %v19583_v2  ;;  %v18417_v2 = vld [vmem:[%s28453_s1 + $0x18] ss:$84 sps:$4 sm:$0xff]  }
 0x2a5   :  { %v16475_v23 = vpop.f32.mrf.mxu1  ;;  %6714 = vmatprep.subr.bf16.mxu1 %v19584_v62  ;;  %v23259_v25 = vadd.f32 %v16411_v42, %v5255_v28  ;;  %v16430_v19 = vadd.f32 %v16429_v39, %v16428_v48 }
 0x2a6   :  { %v16476_v15 = vadd.f32 %v16475_v23, %v16474_v7  ;;  %v16431_v45 = vpop.f32.mrf.mxu0  ;;  %v19591_v7 = vld [vmem:[%s28450_s2 + $0x3c4] ss:$12 sps:$4 sm:$0xff]  }
 0x2a7   :  { %v16477_v54 = vpop.f32.mrf.mxu1  ;;  %v5366_v46 = vadd.f32 %v16430_v19, %v23094_v6  ;;  %6632 = vmatpush2.bf16.msra.mxu0 %v19585_v43  ;;  %v19588_v6 = vld [vmem:[%s28450_s2 + $0x55c] ss:$12 sps:$4 sm:$0xff]   ;;  %v18414_v23 = vld [vmem:[%s28453_s1 + $0x10] ss:$84 sps:$4 sm:$0xff]   ;;  %v19593_v19 = vld [vmem:[%s28450_s2 + $0x3c0] ss:$12 sps:$4 sm:$0xff]  }
 0x2a8   :  { %6715 = vmatpush2.bf16.msra.mxu1 %v19586_v50  ;;  %v16432_v26 = vpop.f32.mrf.mxu0  ;;  %6633 = vmatprep.subr.bf16.mxu0 %v19587_v58 }
 0x2a9   :  { %v16478_v31 = vpop.f32.mrf.mxu1  ;;  %6716 = vmatprep.subr.bf16.mxu1 %v19588_v6  ;;  %v23274_v47 = vadd.f32 %v16476_v15, %v5366_v46  ;;  %v16433_v33 = vadd.f32 %v16432_v26, %v16431_v45  ;;  %v19594_v15 = vld [vmem:[%s28450_s2 + $0x540] ss:$12 sps:$4 sm:$0xff]   ;;  %v18422_v26 = vld [vmem:[%s28453_s1 + $0xbc] ss:$84 sps:$4 sm:$0xff]  }
 0x2aa   :  { %v16434_v49 = vpop.f32.mrf.mxu0  ;;  %v16479_v27 = vadd.f32 %v16478_v31, %v16477_v54  ;;  %v19595_v46 = vld [vmem:[%s28450_s2 + $0x6ac] ss:$12 sps:$4 sm:$0xff]  }
 0x2ab   :  { %v16480_v53 = vpop.f32.mrf.mxu1  ;;  %v5369_v9 = vadd.f32 %v16433_v33, %v23115_v21  ;;  %6634 = vmatpush2.bf16.msra.mxu0 %v19589_v41  ;;  %v19592_v21 = vld [vmem:[%s28450_s2 + $0x544] ss:$12 sps:$4 sm:$0xff]  }
 0x2ac   :  { %6717 = vmatpush2.bf16.msra.mxu1 %v19590_v30  ;;  %v16435_v60 = vpop.f32.mrf.mxu0  ;;  %6635 = vmatprep.subr.bf16.mxu0 %v19591_v7  ;;  %v18425_v31 = vld [vmem:[%s28453_s1 + $0xc4] ss:$84 sps:$4 sm:$0xff]   ;;  %v19599_v30 = vld [vmem:[%s28450_s2 + $0x694] ss:$12 sps:$4 sm:$0xff]  }
 0x2ad   :  { %v16481_v48 = vpop.f32.mrf.mxu1  ;;  %6718 = vmatprep.subr.bf16.mxu1 %v19592_v21  ;;  %v23289_v28 = vadd.f32 %v16479_v27, %v5369_v9  ;;  %v16436_v42 = vadd.f32 %v16435_v60, %v16434_v49  ;;  %v19598_v9 = vld [vmem:[%s28450_s2 + $0x828] ss:$12 sps:$4 sm:$0xff]  }
 0x2ae   :  { %v16482_v18 = vadd.f32 %v16481_v48, %v16480_v53  ;;  %v16437_v38 = vpop.f32.mrf.mxu0  ;;  %v19597_v53 = vld [vmem:[%s28450_s2 + $0x6a8] ss:$12 sps:$4 sm:$0xff]  }
 0x2af   :  { %v16483_v39 = vpop.f32.mrf.mxu1  ;;  %v5374_v62 = vadd.f32 %v16436_v42, %v23136_v36  ;;  %6636 = vmatpush2.bf16.msra.mxu0 %v19593_v19  ;;  %v19596_v36 = vld [vmem:[%s28450_s2 + $0x82c] ss:$12 sps:$4 sm:$0xff]  }
 0x2b0   :  { %6719 = vmatpush2.bf16.msra.mxu1 %v19594_v15  ;;  %v16438_v45 = vpop.f32.mrf.mxu0  ;;  %6771 = vmatprep.subr.bf16.mxu0 %v19595_v46  ;;  %v19603_v15 = vld [vmem:[%s28450_s2 + $0x67c] ss:$12 sps:$4 sm:$0xff]   ;;  %v18428_v46 = vld [vmem:[%s28453_s1 + $0x164] ss:$84 sps:$4 sm:$0xff]  }
 0x2b1   :  { %v16484_v54 = vpop.f32.mrf.mxu1  ;;  %6854 = vmatprep.subr.bf16.mxu1 %v19596_v36  ;;  %v23310_v43 = vadd.f32 %v16482_v18, %v5374_v62  ;;  %v16439_v50 = vadd.f32 %v16438_v45, %v16437_v38  ;;  %v18420_v18 = vld [vmem:[%s28453_s1 + $0xb8] ss:$84 sps:$4 sm:$0xff]   ;;  %v18423_v38 = vld [vmem:[%s28453_s1 + $0xc0] ss:$84 sps:$4 sm:$0xff]  }
 0x2b2   :  { %6638 = vmatmul.mubr.bf16.vlgmr.msra.gmra.mxu0 %v18414_v23  ;;  %v16440_v58 = vpop.f32.mrf.mxu0  ;;  %v16485_v49 = vadd.f32 %v16484_v54, %v16483_v39  ;;  %v19601_v23 = vld [vmem:[%s28450_s2 + $0x690] ss:$12 sps:$4 sm:$0xff]   ;;  %v18431_v36 = vld [vmem:[%s28453_s1 + $0x16c] ss:$84 sps:$4 sm:$0xff]  }
 0x2b3   :  { %v16486_v6 = vpop.f32.mrf.mxu1  ;;  %6721 = vmatmul.mubr.bf16.vlgmr.msra.gmra.mxu1 %v18417_v2  ;;  %v5377_v33 = vadd.f32 %v16439_v50, %v23157_v14  ;;  %6772 = vmatpush1.bf16.msra.mxu0 %v19597_v53  ;;  %v19600_v14 = vld [vmem:[%s28450_s2 + $0x814] ss:$12 sps:$4 sm:$0xff]   ;;  %v19602_v2 = vld [vmem:[%s28450_s2 + $0x810] ss:$12 sps:$4 sm:$0xff]  }
 0x2b4   :  { %6855 = vmatpush1.bf16.msra.mxu1 %v19598_v9  ;;  %v16441_v27 = vpop.f32.mrf.mxu0  ;;  %6773 = vmatprep.subr.bf16.mxu0 %v19599_v30  ;;  %v19607_v9 = vld [vmem:[%s28450_s2 + $0x664] ss:$12 sps:$4 sm:$0xff]  }
 0x2b5   :  { %v16487_v41 = vpop.f32.mrf.mxu1  ;;  %6856 = vmatprep.subr.bf16.mxu1 %v19600_v14  ;;  %v23331_v60 = vadd.f32 %v16485_v49, %v5377_v33  ;;  %v16442_v48 = vadd.f32 %v16441_v27, %v16440_v58  ;;  %6647 = vmatprep.mubr.bf16.mxu0 %v18422_v26  ;;  %v19606_v33 = vld [vmem:[%s28450_s2 + $0x7f8] ss:$12 sps:$4 sm:$0xff]  }
 0x2b6   :  { %v16488_v7 = vadd.f32 %v16487_v41, %v16486_v6  ;;  %6730 = vmatprep.mubr.bf16.mxu1 %v18425_v31  ;;  %v16443_v21 = vpop.f32.mrf.mxu0  ;;  %v19605_v6 = vld [vmem:[%s28450_s2 + $0x678] ss:$12 sps:$4 sm:$0xff]  }
 0x2b7   :  { %v16489_v42 = vpop.f32.mrf.mxu1  ;;  %v5382_v39 = vadd.f32 %v16442_v48, %v23178_v52  ;;  %6774 = vmatpush1.bf16.msra.mxu0 %v19601_v23  ;;  %v19604_v52 = vld [vmem:[%s28450_s2 + $0x7fc] ss:$12 sps:$4 sm:$0xff]  }
 0x2b8   :  { %6857 = vmatpush1.bf16.msra.mxu1 %v19602_v2  ;;  %v16444_v62 = vpop.f32.mrf.mxu0  ;;  %6775 = vmatprep.subr.bf16.mxu0 %v19603_v15  ;;  %v19611_v2 = vld [vmem:[%s28450_s2 + $0x64c] ss:$12 sps:$4 sm:$0xff]  }
 0x2b9   :  { %v16490_v19 = vpop.f32.mrf.mxu1  ;;  %6858 = vmatprep.subr.bf16.mxu1 %v19604_v52  ;;  %v23352_v45 = vadd.f32 %v16488_v7, %v5382_v39  ;;  %v16445_v54 = vadd.f32 %v16444_v62, %v16443_v21  ;;  %v18426_v7 = vld [vmem:[%s28453_s1 + $0x160] ss:$84 sps:$4 sm:$0xff]   ;;  %v18429_v21 = vld [vmem:[%s28453_s1 + $0x168] ss:$84 sps:$4 sm:$0xff]  }
 0x2ba   :  { %6648 = vmatmul.mubr.bf16.gmra.mxu0 %v18420_v18  ;;  %v16446_v50 = vpop.f32.mrf.mxu0  ;;  %v16491_v58 = vadd.f32 %v16490_v19, %v16489_v42  ;;  %v19609_v18 = vld [vmem:[%s28450_s2 + $0x660] ss:$12 sps:$4 sm:$0xff]   ;;  %v18437_v52 = vld [vmem:[%s28453_s1 + $0x214] ss:$84 sps:$4 sm:$0xff]  }
 0x2bb   :  { %v16492_v26 = vpop.f32.mrf.mxu1  ;;  %6731 = vmatmul.mubr.bf16.gmra.mxu1 %v18423_v38  ;;  %v5385_v31 = vadd.f32 %v16445_v54, %v23199_v4  ;;  %6776 = vmatpush1.bf16.msra.mxu0 %v19605_v6  ;;  %v19608_v4 = vld [vmem:[%s28450_s2 + $0x7e4] ss:$12 sps:$4 sm:$0xff]   ;;  %v19610_v38 = vld [vmem:[%s28450_s2 + $0x7e0] ss:$12 sps:$4 sm:$0xff]  }
 0x2bc   :  { %6859 = vmatpush1.bf16.msra.mxu1 %v19606_v33  ;;  %v16447_v49 = vpop.f32.mrf.mxu0  ;;  %6777 = vmatprep.subr.bf16.mxu0 %v19607_v9  ;;  %v18434_v15 = vld [vmem:[%s28453_s1 + $0x20c] ss:$84 sps:$4 sm:$0xff]  }
 0x2bd   :  { %v16493_v53 = vpop.f32.mrf.mxu1  ;;  %6860 = vmatprep.subr.bf16.mxu1 %v19608_v4  ;;  %v23373_v27 = vadd.f32 %v16491_v58, %v5385_v31  ;;  %v16448_v41 = vadd.f32 %v16447_v49, %v16446_v50  ;;  %6657 = vmatprep.mubr.bf16.mxu0 %v18428_v46  ;;  %v19614_v31 = vld [vmem:[%s28450_s2 + $0x7c8] ss:$12 sps:$4 sm:$0xff]  }
 0x2be   :  { %v16494_v30 = vadd.f32 %v16493_v53, %v16492_v26  ;;  %6740 = vmatprep.mubr.bf16.mxu1 %v18431_v36  ;;  %v16449_v14 = vpop.f32.mrf.mxu0  ;;  %v19613_v26 = vld [vmem:[%s28450_s2 + $0x648] ss:$12 sps:$4 sm:$0xff]  }
 0x2bf   :  { %v16495_v48 = vpop.f32.mrf.mxu1  ;;  %v5390_v42 = vadd.f32 %v16448_v41, %v23214_v40  ;;  %6778 = vmatpush1.bf16.msra.mxu0 %v19609_v18  ;;  %v19612_v40 = vld [vmem:[%s28450_s2 + $0x7cc] ss:$12 sps:$4 sm:$0xff]   ;;  %v19615_v33 = vld [vmem:[%s28450_s2 + $0x634] ss:$12 sps:$4 sm:$0xff]  }
 0x2c0   :  { %6861 = vmatpush1.bf16.msra.mxu1 %v19610_v38  ;;  %v16450_v39 = vpop.f32.mrf.mxu0  ;;  %6779 = vmatprep.subr.bf16.mxu0 %v19611_v2  ;;  %v19619_v38 = vld [vmem:[%s28450_s2 + $0x61c] ss:$12 sps:$4 sm:$0xff]  }
 0x2c1   :  { %v16496_v23 = vpop.f32.mrf.mxu1  ;;  %6862 = vmatprep.subr.bf16.mxu1 %v19612_v40  ;;  %v23394_v62 = vadd.f32 %v16494_v30, %v5390_v42  ;;  %v16451_v19 = vadd.f32 %v16450_v39, %v16449_v14  ;;  %v18432_v30 = vld [vmem:[%s28453_s1 + $0x208] ss:$84 sps:$4 sm:$0xff]   ;;  %v18435_v14 = vld [vmem:[%s28453_s1 + $0x210] ss:$84 sps:$4 sm:$0xff]  }
 0x2c2   :  { %6658 = vmatmul.mubr.bf16.gmra.mxu0 %v18426_v7  ;;  %v16452_v54 = vpop.f32.mrf.mxu0  ;;  %v16497_v50 = vadd.f32 %v16496_v23, %v16495_v48  ;;  %v19617_v7 = vld [vmem:[%s28450_s2 + $0x630] ss:$12 sps:$4 sm:$0xff]   ;;  %v18440_v2 = vld [vmem:[%s28453_s1 + $0x2b4] ss:$84 sps:$4 sm:$0xff]  }
 0x2c3   :  { %v16498_v46 = vpop.f32.mrf.mxu1  ;;  %6741 = vmatmul.mubr.bf16.gmra.mxu1 %v18429_v21  ;;  %v5393_v36 = vadd.f32 %v16451_v19, %v23229_v57  ;;  %6780 = vmatpush1.bf16.msra.mxu0 %v19613_v26  ;;  %v19616_v57 = vld [vmem:[%s28450_s2 + $0x7b4] ss:$12 sps:$4 sm:$0xff]   ;;  %v19618_v21 = vld [vmem:[%s28450_s2 + $0x7b0] ss:$12 sps:$4 sm:$0xff]  }
 0x2c4   :  { %6863 = vmatpush1.bf16.msra.mxu1 %v19614_v31  ;;  %v16453_v58 = vpop.f32.mrf.mxu0  ;;  %6781 = vmatprep.subr.bf16.mxu0 %v19615_v33  ;;  %v18443_v40 = vld [vmem:[%s28453_s1 + $0x2bc] ss:$84 sps:$4 sm:$0xff]  }
 0x2c5   :  { %v16499_v6 = vpop.f32.mrf.mxu1  ;;  %6864 = vmatprep.subr.bf16.mxu1 %v19616_v57  ;;  %v23415_v49 = vadd.f32 %v16497_v50, %v5393_v36  ;;  %v16454_v53 = vadd.f32 %v16453_v58, %v16452_v54  ;;  %6667 = vmatprep.mubr.bf16.mxu0 %v18434_v15  ;;  %v19622_v36 = vld [vmem:[%s28450_s2 + $0x798] ss:$12 sps:$4 sm:$0xff]  }
 0x2c6   :  { %v16500_v9 = vadd.f32 %v16499_v6, %v16498_v46  ;;  %6750 = vmatprep.mubr.bf16.mxu1 %v18437_v52  ;;  %v16455_v4 = vpop.f32.mrf.mxu0  ;;  %v19621_v46 = vld [vmem:[%s28450_s2 + $0x618] ss:$12 sps:$4 sm:$0xff]  }
 0x2c7   :  { %v16501_v41 = vpop.f32.mrf.mxu1  ;;  %v5398_v48 = vadd.f32 %v16454_v53, %v23244_v24  ;;  %6782 = vmatpush1.bf16.msra.mxu0 %v19617_v7  ;;  %v19620_v24 = vld [vmem:[%s28450_s2 + $0x79c] ss:$12 sps:$4 sm:$0xff]   ;;  %v19623_v31 = vld [vmem:[%s28450_s2 + $0x604] ss:$12 sps:$4 sm:$0xff]  }
 0x2c8   :  { %6865 = vmatpush1.bf16.msra.mxu1 %v19618_v21  ;;  %v16456_v42 = vpop.f32.mrf.mxu0  ;;  %6783 = vmatprep.subr.bf16.mxu0 %v19619_v38  ;;  %v19627_v21 = vld [vmem:[%s28450_s2 + $0x76c] ss:$12 sps:$4 sm:$0xff]  }
 0x2c9   :  { %v16502_v18 = vpop.f32.mrf.mxu1  ;;  %6866 = vmatprep.subr.bf16.mxu1 %v19620_v24  ;;  %v23436_v39 = vadd.f32 %v16500_v9, %v5398_v48  ;;  %v16457_v23 = vadd.f32 %v16456_v42, %v16455_v4  ;;  %v18438_v9 = vld [vmem:[%s28453_s1 + $0x2b0] ss:$84 sps:$4 sm:$0xff]   ;;  %v18441_v4 = vld [vmem:[%s28453_s1 + $0x2b8] ss:$84 sps:$4 sm:$0xff]  }
 0x2ca   :  { %6668 = vmatmul.mubr.bf16.gmra.mxu0 %v18432_v30  ;;  %v16520_v19 = vpop.f32.mrf.mxu0  ;;  %v16503_v54 = vadd.f32 %v16502_v18, %v16501_v41  ;;  %v19625_v30 = vld [vmem:[%s28450_s2 + $0x600] ss:$12 sps:$4 sm:$0xff]   ;;  %v18446_v38 = vld [vmem:[%s28453_s1 + $0x24] ss:$84 sps:$4 sm:$0xff]  }
 0x2cb   :  { %v16566_v15 = vpop.f32.mrf.mxu1  ;;  %6751 = vmatmul.mubr.bf16.gmra.mxu1 %v18435_v14  ;;  %v5401_v52 = vadd.f32 %v16457_v23, %v23259_v25  ;;  %6784 = vmatpush1.bf16.msra.mxu0 %v19621_v46  ;;  %v19624_v25 = vld [vmem:[%s28450_s2 + $0x784] ss:$12 sps:$4 sm:$0xff]   ;;  %v19626_v14 = vld [vmem:[%s28450_s2 + $0x780] ss:$12 sps:$4 sm:$0xff]  }
 0x2cc   :  { %6867 = vmatpush1.bf16.msra.mxu1 %v19622_v36  ;;  %v16521_v50 = vpop.f32.mrf.mxu0  ;;  %6785 = vmatprep.subr.bf16.mxu0 %v19623_v31  ;;  %v18449_v24 = vld [vmem:[%s28453_s1 + $0x2c] ss:$84 sps:$4 sm:$0xff]  }
 0x2cd   :  { %v16567_v26 = vpop.f32.mrf.mxu1  ;;  %6868 = vmatprep.subr.bf16.mxu1 %v19624_v25  ;;  %v23457_v58 = vadd.f32 %v16503_v54, %v5401_v52  ;;  %v16522_v6 = vadd.f32 %v16521_v50, %v16520_v19  ;;  %6677 = vmatprep.mubr.bf16.mxu0 %v18440_v2  ;;  %v19630_v52 = vld [vmem:[%s28450_s2 + $0x8e8] ss:$12 sps:$4 sm:$0xff]  }
 0x2ce   :  { %v16568_v33 = vadd.f32 %v16567_v26, %v16566_v15  ;;  %6760 = vmatprep.mubr.bf16.mxu1 %v18443_v40  ;;  %v16523_v57 = vpop.f32.mrf.mxu0  ;;  %v19629_v15 = vld [vmem:[%s28450_s2 + $0x768] ss:$12 sps:$4 sm:$0xff]  }
 0x2cf   :  { %v16569_v53 = vpop.f32.mrf.mxu1  ;;  %v5512_v41 = vadd.f32 %v16522_v6, %v23274_v47  ;;  %6786 = vmatpush1.bf16.msra.mxu0 %v19625_v30  ;;  %v19628_v47 = vld [vmem:[%s28450_s2 + $0x8ec] ss:$12 sps:$4 sm:$0xff]   ;;  %v19631_v36 = vld [vmem:[%s28450_s2 + $0x754] ss:$12 sps:$4 sm:$0xff]  }
 0x2d0   :  { %6869 = vmatpush1.bf16.msra.mxu1 %v19626_v14  ;;  %v16524_v48 = vpop.f32.mrf.mxu0  ;;  %6787 = vmatprep.subr.bf16.mxu0 %v19627_v21 }
 0x2d1   :  { %v16570_v7 = vpop.f32.mrf.mxu1  ;;  %6870 = vmatprep.subr.bf16.mxu1 %v19628_v47  ;;  %v23478_v42 = vadd.f32 %v16568_v33, %v5512_v41  ;;  %v16525_v18 = vadd.f32 %v16524_v48, %v16523_v57  ;;  %v19633_v57 = vld [vmem:[%s28450_s2 + $0x750] ss:$12 sps:$4 sm:$0xff]  }
 0x2d2   :  { %6678 = vmatmul.mubr.bf16.gmra.mxu0 %v18438_v9  ;;  %v16526_v23 = vpop.f32.mrf.mxu0  ;;  %v16571_v19 = vadd.f32 %v16570_v7, %v16569_v53  ;;  %v19634_v53 = vld [vmem:[%s28450_s2 + $0x8d0] ss:$12 sps:$4 sm:$0xff]  }
 0x2d3   :  { %v16572_v2 = vpop.f32.mrf.mxu1  ;;  %6761 = vmatmul.mubr.bf16.gmra.mxu1 %v18441_v4  ;;  %v5515_v40 = vadd.f32 %v16525_v18, %v23289_v28  ;;  %6788 = vmatpush2.bf16.msra.mxu0 %v19629_v15  ;;  %v19632_v28 = vld [vmem:[%s28450_s2 + $0x8d4] ss:$12 sps:$4 sm:$0xff]   ;;  %v19635_v41 = vld [vmem:[%s28450_s2 + $0x73c] ss:$12 sps:$4 sm:$0xff]   ;;  %v19637_v18 = vld [vmem:[%s28450_s2 + $0x738] ss:$12 sps:$4 sm:$0xff]  }
 0x2d4   :  { %6871 = vmatpush2.bf16.msra.mxu1 %v19630_v52  ;;  %v16527_v54 = vpop.f32.mrf.mxu0  ;;  %6789 = vmatprep.subr.bf16.mxu0 %v19631_v36  ;;  %v19641_v36 = vld [vmem:[%s28450_s2 + $0x720] ss:$12 sps:$4 sm:$0xff]  }
 0x2d5   :  { %v16573_v46 = vpop.f32.mrf.mxu1  ;;  %6872 = vmatprep.subr.bf16.mxu1 %v19632_v28  ;;  %v23499_v50 = vadd.f32 %v16571_v19, %v5515_v40  ;;  %v16528_v26 = vadd.f32 %v16527_v54, %v16526_v23  ;;  %6803 = vmatprep.mubr.bf16.mxu0 %v18446_v38  ;;  %v19638_v38 = vld [vmem:[%s28450_s2 + $0x8b8] ss:$12 sps:$4 sm:$0xff]   ;;  %v19642_v28 = vld [vmem:[%s28450_s2 + $0x8a0] ss:$12 sps:$4 sm:$0xff]  }
 0x2d6   :  { %v16574_v31 = vadd.f32 %v16573_v46, %v16572_v2  ;;  %6886 = vmatprep.mubr.bf16.mxu1 %v18449_v24  ;;  %v16529_v25 = vpop.f32.mrf.mxu0  ;;  %v19639_v2 = vld [vmem:[%s28450_s2 + $0x724] ss:$12 sps:$4 sm:$0xff]  }
 0x2d7   :  { %v16575_v6 = vpop.f32.mrf.mxu1  ;;  %v5520_v33 = vadd.f32 %v16528_v26, %v23310_v43  ;;  %6790 = vmatpush2.bf16.msra.mxu0 %v19633_v57  ;;  %v19636_v43 = vld [vmem:[%s28450_s2 + $0x8bc] ss:$12 sps:$4 sm:$0xff]  }
 0x2d8   :  { %6873 = vmatpush2.bf16.msra.mxu1 %v19634_v53  ;;  %v16530_v9 = vpop.f32.mrf.mxu0  ;;  %6791 = vmatprep.subr.bf16.mxu0 %v19635_v41  ;;  %v19645_v41 = vld [vmem:[%s28450_s2 + $0x708] ss:$12 sps:$4 sm:$0xff]  }
 0x2d9   :  { %v16576_v4 = vpop.f32.mrf.mxu1  ;;  %6874 = vmatprep.subr.bf16.mxu1 %v19636_v43  ;;  %v23514_v30 = vadd.f32 %v16574_v31, %v5520_v33  ;;  %v16531_v14 = vadd.f32 %v16530_v9, %v16529_v25  ;;  %v19643_v25 = vld [vmem:[%s28450_s2 + $0x70c] ss:$12 sps:$4 sm:$0xff]   ;;  %v19646_v43 = vld [vmem:[%s28450_s2 + $0x888] ss:$12 sps:$4 sm:$0xff]  }
 0x2da   :  { %v16532_v48 = vpop.f32.mrf.mxu0  ;;  %v16577_v47 = vadd.f32 %v16576_v4, %v16575_v6 }
 0x2db   :  { %v16578_v7 = vpop.f32.mrf.mxu1  ;;  %v5523_v21 = vadd.f32 %v16531_v14, %v23331_v60  ;;  %6792 = vmatpush2.bf16.msra.mxu0 %v19637_v18  ;;  %v19640_v60 = vld [vmem:[%s28450_s2 + $0x8a4] ss:$12 sps:$4 sm:$0xff]  }
 0x2dc   :  { %6875 = vmatpush2.bf16.msra.mxu1 %v19638_v38  ;;  %v16533_v24 = vpop.f32.mrf.mxu0  ;;  %6793 = vmatprep.subr.bf16.mxu0 %v19639_v2  ;;  %v19649_v2 = vld [vmem:[%s28450_s2 + $0x6f0] ss:$12 sps:$4 sm:$0xff]  }
 0x2dd   :  { %v16579_v23 = vpop.f32.mrf.mxu1  ;;  %6876 = vmatprep.subr.bf16.mxu1 %v19640_v60  ;;  %v23529_v40 = vadd.f32 %v16577_v47, %v5523_v21  ;;  %v16534_v19 = vadd.f32 %v16533_v24, %v16532_v48  ;;  %v19650_v60 = vld [vmem:[%s28450_s2 + $0x870] ss:$12 sps:$4 sm:$0xff]  }
 0x2de   :  { %v16580_v15 = vadd.f32 %v16579_v23, %v16578_v7  ;;  %v16535_v52 = vpop.f32.mrf.mxu0  ;;  %v19647_v7 = vld [vmem:[%s28450_s2 + $0x6f4] ss:$12 sps:$4 sm:$0xff]  }
 0x2df   :  { %v16581_v54 = vpop.f32.mrf.mxu1  ;;  %v5528_v46 = vadd.f32 %v16534_v19, %v23352_v45  ;;  %6794 = vmatpush2.bf16.msra.mxu0 %v19641_v36  ;;  %v19644_v45 = vld [vmem:[%s28450_s2 + $0x88c] ss:$12 sps:$4 sm:$0xff]  }
 0x2e0   :  { %6877 = vmatpush2.bf16.msra.mxu1 %v19642_v28  ;;  %v16536_v26 = vpop.f32.mrf.mxu0  ;;  %6795 = vmatprep.subr.bf16.mxu0 %v19643_v25  ;;  %v19653_v25 = vld [vmem:[%s28450_s2 + $0x6d8] ss:$12 sps:$4 sm:$0xff]  }
 0x2e1   :  { %v16582_v31 = vpop.f32.mrf.mxu1  ;;  %6878 = vmatprep.subr.bf16.mxu1 %v19644_v45  ;;  %v23544_v6 = vadd.f32 %v16580_v15, %v5528_v46  ;;  %v16537_v33 = vadd.f32 %v16536_v26, %v16535_v52  ;;  %v19651_v52 = vld [vmem:[%s28450_s2 + $0x6dc] ss:$12 sps:$4 sm:$0xff]   ;;  %v19654_v45 = vld [vmem:[%s28450_s2 + $0x858] ss:$12 sps:$4 sm:$0xff]  }
 0x2e2   :  { %v16538_v57 = vpop.f32.mrf.mxu0  ;;  %v16583_v4 = vadd.f32 %v16582_v31, %v16581_v54 }
 0x2e3   :  { %v16584_v53 = vpop.f32.mrf.mxu1  ;;  %v5531_v9 = vadd.f32 %v16537_v33, %v23373_v27  ;;  %6796 = vmatpush2.bf16.msra.mxu0 %v19645_v41  ;;  %v19648_v27 = vld [vmem:[%s28450_s2 + $0x874] ss:$12 sps:$4 sm:$0xff]  }
 0x2e4   :  { %6879 = vmatpush2.bf16.msra.mxu1 %v19646_v43  ;;  %v16539_v14 = vpop.f32.mrf.mxu0  ;;  %6797 = vmatprep.subr.bf16.mxu0 %v19647_v7  ;;  %v18447_v7 = vld [vmem:[%s28453_s1 + $0x28] ss:$84 sps:$4 sm:$0xff]  }
 0x2e5   :  { %v16585_v48 = vpop.f32.mrf.mxu1  ;;  %6880 = vmatprep.subr.bf16.mxu1 %v19648_v27  ;;  %v23559_v21 = vadd.f32 %v16583_v4, %v5531_v9  ;;  %v16540_v47 = vadd.f32 %v16539_v14, %v16538_v57 }
 0x2e6   :  { %v16586_v18 = vadd.f32 %v16585_v48, %v16584_v53  ;;  %v16541_v38 = vpop.f32.mrf.mxu0  ;;  %v19655_v53 = vld [vmem:[%s28450_s2 + $0x6c4] ss:$12 sps:$4 sm:$0xff]   ;;  %v18444_v48 = vld [vmem:[%s28453_s1 + $0x20] ss:$84 sps:$4 sm:$0xff]  }
 0x2e7   :  { %v16587_v24 = vpop.f32.mrf.mxu1  ;;  %v5536_v23 = vadd.f32 %v16540_v47, %v23394_v62  ;;  %6798 = vmatpush2.bf16.msra.mxu0 %v19649_v2  ;;  %v19652_v62 = vld [vmem:[%s28450_s2 + $0x85c] ss:$12 sps:$4 sm:$0xff]   ;;  %v19657_v47 = vld [vmem:[%s28450_s2 + $0x6c0] ss:$12 sps:$4 sm:$0xff]  }
 0x2e8   :  { %6881 = vmatpush2.bf16.msra.mxu1 %v19650_v60  ;;  %v16542_v19 = vpop.f32.mrf.mxu0  ;;  %6799 = vmatprep.subr.bf16.mxu0 %v19651_v52 }
 0x2e9   :  { %v16588_v15 = vpop.f32.mrf.mxu1  ;;  %6882 = vmatprep.subr.bf16.mxu1 %v19652_v62  ;;  %v23574_v54 = vadd.f32 %v16586_v18, %v5536_v23  ;;  %v16543_v46 = vadd.f32 %v16542_v19, %v16541_v38  ;;  %v19658_v18 = vld [vmem:[%s28450_s2 + $0x840] ss:$12 sps:$4 sm:$0xff]  }
 0x2ea   :  { %v16544_v36 = vpop.f32.mrf.mxu0  ;;  %v16589_v31 = vadd.f32 %v16588_v15, %v16587_v24  ;;  %v19659_v23 = vld [vmem:[%s28450_s2 + $0x9ac] ss:$12 sps:$4 sm:$0xff]   ;;  %v18455_v15 = vld [vmem:[%s28453_s1 + $0xd4] ss:$84 sps:$4 sm:$0xff]  }
 0x2eb   :  { %v16590_v28 = vpop.f32.mrf.mxu1  ;;  %v5539_v26 = vadd.f32 %v16543_v46, %v23415_v49  ;;  %6800 = vmatpush2.bf16.msra.mxu0 %v19653_v25  ;;  %v19656_v49 = vld [vmem:[%s28450_s2 + $0x844] ss:$12 sps:$4 sm:$0xff]   ;;  %v18452_v19 = vld [vmem:[%s28453_s1 + $0xcc] ss:$84 sps:$4 sm:$0xff]  }
 0x2ec   :  { %6883 = vmatpush2.bf16.msra.mxu1 %v19654_v45  ;;  %v16545_v33 = vpop.f32.mrf.mxu0  ;;  %6801 = vmatprep.subr.bf16.mxu0 %v19655_v53  ;;  %v19663_v45 = vld [vmem:[%s28450_s2 + $0x994] ss:$12 sps:$4 sm:$0xff]  }
 0x2ed   :  { %v16591_v57 = vpop.f32.mrf.mxu1  ;;  %6884 = vmatprep.subr.bf16.mxu1 %v19656_v49  ;;  %v23589_v9 = vadd.f32 %v16589_v31, %v5539_v26  ;;  %v16546_v4 = vadd.f32 %v16545_v33, %v16544_v36  ;;  %v19662_v26 = vld [vmem:[%s28450_s2 + $0xb28] ss:$12 sps:$4 sm:$0xff]  }
 0x2ee   :  { %v16592_v41 = vadd.f32 %v16591_v57, %v16590_v28  ;;  %v16547_v43 = vpop.f32.mrf.mxu0  ;;  %v19661_v28 = vld [vmem:[%s28450_s2 + $0x9a8] ss:$12 sps:$4 sm:$0xff]  }
 0x2ef   :  { %v16593_v14 = vpop.f32.mrf.mxu1  ;;  %v5544_v27 = vadd.f32 %v16546_v4, %v23436_v39  ;;  %6802 = vmatpush2.bf16.msra.mxu0 %v19657_v47  ;;  %v19660_v39 = vld [vmem:[%s28450_s2 + $0xb2c] ss:$12 sps:$4 sm:$0xff]   ;;  %v18450_v4 = vld [vmem:[%s28453_s1 + $0xc8] ss:$84 sps:$4 sm:$0xff]  }
 0x2f0   :  { %6885 = vmatpush2.bf16.msra.mxu1 %v19658_v18  ;;  %v16548_v38 = vpop.f32.mrf.mxu0  ;;  %6937 = vmatprep.subr.bf16.mxu0 %v19659_v23  ;;  %v19667_v47 = vld [vmem:[%s28450_s2 + $0x97c] ss:$12 sps:$4 sm:$0xff]  }
 0x2f1   :  { %v16594_v24 = vpop.f32.mrf.mxu1  ;;  %7020 = vmatprep.subr.bf16.mxu1 %v19660_v39  ;;  %v23610_v2 = vadd.f32 %v16592_v41, %v5544_v27  ;;  %v16549_v60 = vadd.f32 %v16548_v38, %v16547_v43  ;;  %v18453_v41 = vld [vmem:[%s28453_s1 + $0xd0] ss:$84 sps:$4 sm:$0xff]  }
 0x2f2   :  { %6804 = vmatmul.mubr.bf16.vlgmr.msra.gmra.mxu0 %v18444_v48  ;;  %v16612_v52 = vpop.f32.mrf.mxu0  ;;  %v16595_v36 = vadd.f32 %v16594_v24, %v16593_v14  ;;  %v19665_v14 = vld [vmem:[%s28450_s2 + $0x990] ss:$12 sps:$4 sm:$0xff]   ;;  %v18458_v24 = vld [vmem:[%s28453_s1 + $0x174] ss:$84 sps:$4 sm:$0xff]  }
 0x2f3   :  { %v5730_v62 = vpop.f32.mrf.mxu1  ;;  %6887 = vmatmul.mubr.bf16.vlgmr.msra.gmra.mxu1 %v18447_v7  ;;  %v5547_v46 = vadd.f32 %v16549_v60, %v23457_v58  ;;  %6938 = vmatpush1.bf16.msra.mxu0 %v19661_v28  ;;  %v19664_v58 = vld [vmem:[%s28450_s2 + $0xb14] ss:$12 sps:$4 sm:$0xff]   ;;  %v19666_v48 = vld [vmem:[%s28450_s2 + $0xb10] ss:$12 sps:$4 sm:$0xff]  }
 0x2f4   :  { %7021 = vmatpush1.bf16.msra.mxu1 %v19662_v26  ;;  %v16613_v31 = vpop.f32.mrf.mxu0  ;;  %6939 = vmatprep.subr.bf16.mxu0 %v19663_v45  ;;  %v18461_v23 = vld [vmem:[%s28453_s1 + $0x17c] ss:$84 sps:$4 sm:$0xff]   ;;  %v18459_v45 = vld [vmem:[%s28453_s1 + $0x178] ss:$84 sps:$4 sm:$0xff]  }
 0x2f5   :  { %v17388_v25 = vpop.f32.mrf.mxu1  ;;  %7022 = vmatprep.subr.bf16.mxu1 %v19664_v58  ;;  %v23631_v33 = vadd.f32 %v16595_v36, %v5547_v46  ;;  %v16614_v57 = vadd.f32 %v16613_v31, %v16612_v52  ;;  %6813 = vmatprep.mubr.bf16.mxu0 %v18452_v19  ;;  %v19670_v52 = vld [vmem:[%s28450_s2 + $0xaf8] ss:$12 sps:$4 sm:$0xff]  }
 0x2f6   :  { %6896 = vmatprep.mubr.bf16.mxu1 %v18455_v15  ;;  %v16615_v53 = vpop.f32.mrf.mxu0  ;;  %v19669_v15 = vld [vmem:[%s28450_s2 + $0x978] ss:$12 sps:$4 sm:$0xff]  }
 0x2f7   :  { %v5733_v49 = vpop.f32.mrf.mxu1  ;;  %v5658_v43 = vadd.f32 %v16614_v57, %v23478_v42  ;;  %6940 = vmatpush1.bf16.msra.mxu0 %v19665_v14  ;;  %v19668_v42 = vld [vmem:[%s28450_s2 + $0xafc] ss:$12 sps:$4 sm:$0xff]   ;;  %v19671_v46 = vld [vmem:[%s28450_s2 + $0x964] ss:$12 sps:$4 sm:$0xff]   ;;  %v19675_v14 = vld [vmem:[%s28450_s2 + $0x94c] ss:$12 sps:$4 sm:$0xff]  }
 0x2f8   :  { %7023 = vmatpush1.bf16.msra.mxu1 %v19666_v48  ;;  %v16616_v7 = vpop.f32.mrf.mxu0  ;;  %6941 = vmatprep.subr.bf16.mxu0 %v19667_v47  ;;  %v18456_v25 = vld [vmem:[%s28453_s1 + $0x170] ss:$84 sps:$4 sm:$0xff]   ;;  %v19676_v48 = vld [vmem:[%s28450_s2 + $0xacc] ss:$12 sps:$4 sm:$0xff]  }
 0x2f9   :  { %v17389_v27 = vpop.f32.mrf.mxu1  ;;  %7024 = vmatprep.subr.bf16.mxu1 %v19668_v42  ;;  %v5731_v18 = vadd.f32 %v5730_v62, %v5658_v43  ;;  %v16617_v38 = vadd.f32 %v16616_v7, %v16615_v53 }
 0x2fa   :  { %6814 = vmatmul.mubr.bf16.gmra.mxu0 %v18450_v4  ;;  %v16618_v39 = vpop.f32.mrf.mxu0  ;;  %v19673_v4 = vld [vmem:[%s28450_s2 + $0x960] ss:$12 sps:$4 sm:$0xff]  }
 0x2fb   :  { %6897 = vmatmul.mubr.bf16.gmra.mxu1 %v18453_v41  ;;  %v5738_v60 = vpop.f32.mrf.mxu1  ;;  %v5661_v19 = vadd.f32 %v16617_v38, %v23499_v50  ;;  %6942 = vmatpush1.bf16.msra.mxu0 %v19669_v15  ;;  %v19672_v50 = vld [vmem:[%s28450_s2 + $0xae4] ss:$12 sps:$4 sm:$0xff]   ;;  %v5771_v57 = vmax.f32 %v5731_v18, 0.0  ;;  %v19679_v15 = vld [vmem:[%s28450_s2 + $0x934] ss:$12 sps:$4 sm:$0xff]  }
 0x2fc   :  { %7025 = vmatpush1.bf16.msra.mxu1 %v19670_v52  ;;  %v16619_v62 = vpop.f32.mrf.mxu0  ;;  %6943 = vmatprep.subr.bf16.mxu0 %v19671_v46  ;;  %v18467_v18 = vld [vmem:[%s28453_s1 + $0x224] ss:$84 sps:$4 sm:$0xff]   ;;  %v19680_v52 = vld [vmem:[%s28450_s2 + $0xab4] ss:$12 sps:$4 sm:$0xff]  }
 0x2fd   :  { %7026 = vmatprep.subr.bf16.mxu1 %v19672_v50  ;;  %v17392_v36 = vpop.f32.mrf.mxu1  ;;  %v5734_v28 = vadd.f32 %v5733_v49, %v5661_v19  ;;  %v16620_v26 = vadd.f32 %v16619_v62, %v16618_v39  ;;  %6823 = vmatprep.mubr.bf16.mxu0 %v18458_v24  ;;  %v19674_v49 = vld [vmem:[%s28450_s2 + $0xae0] ss:$12 sps:$4 sm:$0xff]   ;;  %v19678_v39 = vld [vmem:[%s28450_s2 + $0xac8] ss:$12 sps:$4 sm:$0xff]  }
 0x2fe   :  { %6906 = vmatprep.mubr.bf16.mxu1 %v18461_v23  ;;  %v16621_v31 = vpop.f32.mrf.mxu0  ;;  %v19677_v23 = vld [vmem:[%s28450_s2 + $0x948] ss:$12 sps:$4 sm:$0xff]  }
 0x2ff   :  { %v5741_v58 = vpop.f32.mrf.mxu1  ;;  %v5774_v53 = vmax.f32 %v5734_v28, 0.0  ;;  %6944 = vmatpush1.bf16.msra.mxu0 %v19673_v4  ;;  %v5666_v41 = vadd.f32 %v16620_v26, %v23514_v30  ;;  %v18464_v30 = vld [vmem:[%s28453_s1 + $0x21c] ss:$84 sps:$4 sm:$0xff]   ;;  %v18465_v28 = vld [vmem:[%s28453_s1 + $0x220] ss:$84 sps:$4 sm:$0xff]  }
 0x300   :  { %7027 = vmatpush1.bf16.msra.mxu1 %v19674_v49  ;;  %v16622_v43 = vpop.f32.mrf.mxu0  ;;  %6945 = vmatprep.subr.bf16.mxu0 %v19675_v14  ;;  %v19683_v4 = vld [vmem:[%s28450_s2 + $0x91c] ss:$12 sps:$4 sm:$0xff]  }
 0x301   :  { %7028 = vmatprep.subr.bf16.mxu1 %v19676_v48  ;;  %v17393_v7 = vpop.f32.mrf.mxu1  ;;  %v23690_v27 = vpack.c.bf16 %v5774_v53, %v5771_v57  ;;  %v16623_v47 = vadd.f32 %v16622_v43, %v16621_v31  ;;  %v5739_v42 = vadd.f32 %v5738_v60, %v5666_v41  ;;  %v19684_v49 = vld [vmem:[%s28450_s2 + $0xa9c] ss:$12 sps:$4 sm:$0xff]  }
 0x302   :  { %6824 = vmatmul.mubr.bf16.gmra.mxu0 %v18456_v25  ;;  %v16624_v38 = vpop.f32.mrf.mxu0  ;;  %v18473_v7 = vld [vmem:[%s28453_s1 + $0x2cc] ss:$84 sps:$4 sm:$0xff]  }
 0x303   :  { %28544 = vst [vmem:[#allocation21_spill] sm:$0xff] %v23690_v27  ;;  %6907 = vmatmul.mubr.bf16.gmra.mxu1 %v18459_v45  ;;  %v5746_v24 = vpop.f32.mrf.mxu1  ;;  %6946 = vmatpush1.bf16.msra.mxu0 %v19677_v23  ;;  %v5669_v60 = vadd.f32 %v16623_v47, %v23529_v40  ;;  %v18462_v40 = vld [vmem:[%s28453_s1 + $0x218] ss:$84 sps:$4 sm:$0xff]   ;;  %v5777_v31 = vmax.f32 %v5739_v42, 0.0  ;;  %v19681_v45 = vld [vmem:[%s28450_s2 + $0x930] ss:$12 sps:$4 sm:$0xff]  }
 0x304   :  { %7029 = vmatpush1.bf16.msra.mxu1 %v19678_v39  ;;  %v16625_v19 = vpop.f32.mrf.mxu0  ;;  %6947 = vmatprep.subr.bf16.mxu0 %v19679_v15  ;;  %v19687_v23 = vld [vmem:[%s28450_s2 + $0x904] ss:$12 sps:$4 sm:$0xff]  }
 0x305   :  { %7030 = vmatprep.subr.bf16.mxu1 %v19680_v52  ;;  %v17396_v62 = vpop.f32.mrf.mxu1  ;;  %v16626_v46 = vadd.f32 %v16625_v19, %v16624_v38  ;;  %v5742_v50 = vadd.f32 %v5741_v58, %v5669_v60  ;;  %6833 = vmatprep.mubr.bf16.mxu0 %v18464_v30  ;;  %v19682_v58 = vld [vmem:[%s28450_s2 + $0xab0] ss:$12 sps:$4 sm:$0xff]   ;;  %v19685_v30 = vld [vmem:[%s28450_s2 + $0x918] ss:$12 sps:$4 sm:$0xff]  }
 0x306   :  { %6916 = vmatprep.mubr.bf16.mxu1 %v18467_v18  ;;  %v16627_v36 = vpop.f32.mrf.mxu0  ;;  %v19686_v18 = vld [vmem:[%s28450_s2 + $0xa98] ss:$12 sps:$4 sm:$0xff]   ;;  %v18471_v62 = vld [vmem:[%s28453_s1 + $0x2c8] ss:$84 sps:$4 sm:$0xff]  }
 0x307   :  { %v5749_v26 = vpop.f32.mrf.mxu1  ;;  %v5780_v25 = vmax.f32 %v5742_v50, 0.0  ;;  %6948 = vmatpush1.bf16.msra.mxu0 %v19681_v45  ;;  %v5674_v57 = vadd.f32 %v16626_v46, %v23544_v6  ;;  %v18470_v6 = vld [vmem:[%s28453_s1 + $0x2c4] ss:$84 sps:$4 sm:$0xff]  }
 0x308   :  { %7031 = vmatpush1.bf16.msra.mxu1 %v19682_v58  ;;  %v16628_v53 = vpop.f32.mrf.mxu0  ;;  %6949 = vmatprep.subr.bf16.mxu0 %v19683_v4  ;;  %v19688_v39 = vld [vmem:[%s28450_s2 + $0xa84] ss:$12 sps:$4 sm:$0xff]   ;;  %v19692_v45 = vld [vmem:[%s28450_s2 + $0xbec] ss:$12 sps:$4 sm:$0xff]  }
 0x309   :  { %7032 = vmatprep.subr.bf16.mxu1 %v19684_v49  ;;  %v17397_v41 = vpop.f32.mrf.mxu1  ;;  %v23730_v43 = vpack.c.bf16 %v5780_v25, %v5777_v31  ;;  %v16629_v14 = vadd.f32 %v16628_v53, %v16627_v36  ;;  %v5747_v48 = vadd.f32 %v5746_v24, %v5674_v57  ;;  %v19691_v25 = vld [vmem:[%s28450_s2 + $0xa6c] ss:$12 sps:$4 sm:$0xff]   ;;  %v18479_v49 = vld [vmem:[%s28453_s1 + $0x3c] ss:$84 sps:$4 sm:$0xff]  }
 0x30a   :  { %6834 = vmatmul.mubr.bf16.gmra.mxu0 %v18462_v40  ;;  %v16630_v47 = vpop.f32.mrf.mxu0  ;;  %v19689_v40 = vld [vmem:[%s28450_s2 + $0x900] ss:$12 sps:$4 sm:$0xff]  }
 0x30b   :  { %28545 = vst [vmem:[#allocation22_spill] sm:$0xff] %v23730_v43  ;;  %6917 = vmatmul.mubr.bf16.gmra.mxu1 %v18465_v28  ;;  %v5754_v42 = vpop.f32.mrf.mxu1  ;;  %6950 = vmatpush1.bf16.msra.mxu0 %v19685_v30  ;;  %v5677_v38 = vadd.f32 %v16629_v14, %v23559_v21  ;;  %v18468_v21 = vld [vmem:[%s28453_s1 + $0x2c0] ss:$84 sps:$4 sm:$0xff]   ;;  %v5783_v50 = vmax.f32 %v5747_v48, 0.0 }
 0x30c   :  { %7033 = vmatpush1.bf16.msra.mxu1 %v19686_v18  ;;  %v16631_v24 = vpop.f32.mrf.mxu0  ;;  %6951 = vmatprep.subr.bf16.mxu0 %v19687_v23  ;;  %v19690_v28 = vld [vmem:[%s28450_s2 + $0xa80] ss:$12 sps:$4 sm:$0xff]   ;;  %v19693_v48 = vld [vmem:[%s28450_s2 + $0xa68] ss:$12 sps:$4 sm:$0xff]  }
 0x30d   :  { %7034 = vmatprep.subr.bf16.mxu1 %v19688_v39  ;;  %v17400_v60 = vpop.f32.mrf.mxu1  ;;  %v16632_v19 = vadd.f32 %v16631_v24, %v16630_v47  ;;  %v5750_v15 = vadd.f32 %v5749_v26, %v5677_v38  ;;  %6843 = vmatprep.mubr.bf16.mxu0 %v18470_v6  ;;  %v19694_v6 = vld [vmem:[%s28450_s2 + $0xbe8] ss:$12 sps:$4 sm:$0xff]  }
 0x30e   :  { %6926 = vmatprep.mubr.bf16.mxu1 %v18473_v7  ;;  %v16633_v52 = vpop.f32.mrf.mxu0  ;;  %v19696_v30 = vld [vmem:[%s28450_s2 + $0xbd4] ss:$12 sps:$4 sm:$0xff]  }
 0x30f   :  { %v5757_v46 = vpop.f32.mrf.mxu1  ;;  %v5786_v36 = vmax.f32 %v5750_v15, 0.0  ;;  %6952 = vmatpush1.bf16.msra.mxu0 %v19689_v40  ;;  %v5682_v26 = vadd.f32 %v16632_v19, %v23574_v54  ;;  %v18476_v54 = vld [vmem:[%s28453_s1 + $0x34] ss:$84 sps:$4 sm:$0xff]   ;;  %v19697_v19 = vld [vmem:[%s28450_s2 + $0xa50] ss:$12 sps:$4 sm:$0xff]  }
 0x310   :  { %7035 = vmatpush1.bf16.msra.mxu1 %v19690_v28  ;;  %v16634_v31 = vpop.f32.mrf.mxu0  ;;  %6953 = vmatprep.subr.bf16.mxu0 %v19691_v25  ;;  %v19698_v15 = vld [vmem:[%s28450_s2 + $0xbd0] ss:$12 sps:$4 sm:$0xff]  }
 0x311   :  { %7036 = vmatprep.subr.bf16.mxu1 %v19692_v45  ;;  %v17401_v58 = vpop.f32.mrf.mxu1  ;;  %v23770_v57 = vpack.c.bf16 %v5786_v36, %v5783_v50  ;;  %v16635_v53 = vadd.f32 %v16634_v31, %v16633_v52  ;;  %v5755_v4 = vadd.f32 %v5754_v42, %v5682_v26  ;;  %v19695_v42 = vld [vmem:[%s28450_s2 + $0xa54] ss:$12 sps:$4 sm:$0xff]   ;;  %v19702_v26 = vld [vmem:[%s28450_s2 + $0xbb8] ss:$12 sps:$4 sm:$0xff]  }
 0x312   :  { %6844 = vmatmul.mubr.bf16.gmra.mxu0 %v18468_v21  ;;  %v16636_v41 = vpop.f32.mrf.mxu0  ;;  %v19703_v25 = vld [vmem:[%s28450_s2 + $0xa24] ss:$12 sps:$4 sm:$0xff]  }
 0x313   :  { %28546 = vst [vmem:[#allocation23_spill] sm:$0xff] %v23770_v57  ;;  %6927 = vmatmul.mubr.bf16.gmra.mxu1 %v18471_v62  ;;  %v5762_v14 = vpop.f32.mrf.mxu1  ;;  %6954 = vmatpush2.bf16.msra.mxu0 %v19693_v48  ;;  %v5685_v7 = vadd.f32 %v16635_v53, %v23589_v9  ;;  %v5789_v60 = vmax.f32 %v5755_v4, 0.0  ;;  %v19699_v62 = vld [vmem:[%s28450_s2 + $0xa3c] ss:$12 sps:$4 sm:$0xff]   ;;  %v19704_v45 = vld [vmem:[%s28450_s2 + $0xba4] ss:$12 sps:$4 sm:$0xff]  }
 0x314   :  { %7037 = vmatpush2.bf16.msra.mxu1 %v19694_v6  ;;  %v16637_v47 = vpop.f32.mrf.mxu0  ;;  %6955 = vmatprep.subr.bf16.mxu0 %v19695_v42  ;;  %v19709_v48 = vld [vmem:[%s28450_s2 + $0xa08] ss:$12 sps:$4 sm:$0xff]   ;;  %v19713_v42 = vld [vmem:[%s28450_s2 + $0x9f0] ss:$12 sps:$4 sm:$0xff]  }
 0x315   :  { %7038 = vmatprep.subr.bf16.mxu1 %v19696_v30  ;;  %v17404_v18 = vpop.f32.mrf.mxu1  ;;  %v16638_v38 = vadd.f32 %v16637_v47, %v16636_v41  ;;  %v5758_v24 = vadd.f32 %v5757_v46, %v5685_v7  ;;  %6969 = vmatprep.mubr.bf16.mxu0 %v18476_v54  ;;  %v19700_v46 = vld [vmem:[%s28450_s2 + $0xbbc] ss:$12 sps:$4 sm:$0xff]   ;;  %v19705_v54 = vld [vmem:[%s28450_s2 + $0xa20] ss:$12 sps:$4 sm:$0xff]  }
 0x316   :  { %7052 = vmatprep.mubr.bf16.mxu1 %v18479_v49  ;;  %v16639_v23 = vpop.f32.mrf.mxu0  ;;  %v19707_v49 = vld [vmem:[%s28450_s2 + $0xa0c] ss:$12 sps:$4 sm:$0xff]   ;;  %v19710_v6 = vld [vmem:[%s28450_s2 + $0xb88] ss:$12 sps:$4 sm:$0xff]   ;;  %v19714_v30 = vld [vmem:[%s28450_s2 + $0xb70] ss:$12 sps:$4 sm:$0xff]  }
 0x317   :  { %v5765_v39 = vpop.f32.mrf.mxu1  ;;  %v5792_v9 = vmax.f32 %v5758_v24, 0.0  ;;  %6956 = vmatpush2.bf16.msra.mxu0 %v19697_v19  ;;  %v5690_v52 = vadd.f32 %v16638_v38, %v23610_v2  ;;  %v19701_v2 = vld [vmem:[%s28450_s2 + $0xa38] ss:$12 sps:$4 sm:$0xff]   ;;  %v19711_v7 = vld [vmem:[%s28450_s2 + $0x9f4] ss:$12 sps:$4 sm:$0xff]  }
 0x318   :  { %7039 = vmatpush2.bf16.msra.mxu1 %v19698_v15  ;;  %v16640_v21 = vpop.f32.mrf.mxu0  ;;  %6957 = vmatprep.subr.bf16.mxu0 %v19699_v62  ;;  %v19708_v41 = vld [vmem:[%s28450_s2 + $0xb8c] ss:$12 sps:$4 sm:$0xff]   ;;  %v19712_v47 = vld [vmem:[%s28450_s2 + $0xb74] ss:$12 sps:$4 sm:$0xff]   ;;  %v19715_v18 = vld [vmem:[%s28450_s2 + $0x9dc] ss:$12 sps:$4 sm:$0xff]  }
 0x319   :  { %7040 = vmatprep.subr.bf16.mxu1 %v19700_v46  ;;  %v17405_v50 = vpop.f32.mrf.mxu1  ;;  %v23804_v36 = vpack.c.bf16 %v5792_v9, %v5789_v60  ;;  %v16641_v40 = vadd.f32 %v16640_v21, %v16639_v23  ;;  %v5763_v28 = vadd.f32 %v5762_v14, %v5690_v52  ;;  %v19716_v38 = vld [vmem:[%s28450_s2 + $0xb5c] ss:$12 sps:$4 sm:$0xff]   ;;  %v19717_v24 = vld [vmem:[%s28450_s2 + $0x9d8] ss:$12 sps:$4 sm:$0xff]   ;;  %v19721_v15 = vld [vmem:[%s28450_s2 + $0x9c0] ss:$12 sps:$4 sm:$0xff]  }
 0x31a   :  { %v19718_v23 = vld [vmem:[%s28450_s2 + $0xb58] ss:$12 sps:$4 sm:$0xff]   ;;  %v19722_v52 = vld [vmem:[%s28450_s2 + $0xb40] ss:$12 sps:$4 sm:$0xff]   ;;  %v18482_v46 = vld [vmem:[%s28453_s1 + $0xdc] ss:$84 sps:$4 sm:$0xff]  }
 0x31b   :  { %28547 = vst [vmem:[#allocation24_spill] sm:$0xff] %v23804_v36  ;;  %6958 = vmatpush2.bf16.msra.mxu0 %v19701_v2  ;;  %v5693_v31 = vadd.f32 %v16641_v40, %v23631_v33  ;;  %v5795_v53 = vmax.f32 %v5763_v28, 0.0  ;;  %v19706_v33 = vld [vmem:[%s28450_s2 + $0xba0] ss:$12 sps:$4 sm:$0xff]   ;;  %v19720_v60 = vld [vmem:[%s28450_s2 + $0xb44] ss:$12 sps:$4 sm:$0xff]  }
 0x31c   :  { %7041 = vmatpush2.bf16.msra.mxu1 %v19702_v26  ;;  %6959 = vmatprep.subr.bf16.mxu0 %v19703_v25  ;;  %v18474_v9 = vld [vmem:[%s28453_s1 + $0x30] ss:$84 sps:$4 sm:$0xff]   ;;  %v18477_v19 = vld [vmem:[%s28453_s1 + $0x38] ss:$84 sps:$4 sm:$0xff]   ;;  %v19725_v26 = vld [vmem:[%s28450_s2 + $0xca8] ss:$12 sps:$4 sm:$0xff]  }
 0x31d   :  { %7042 = vmatprep.subr.bf16.mxu1 %v19704_v45  ;;  %v5766_v58 = vadd.f32 %v5765_v39, %v5693_v31  ;;  %v19719_v39 = vld [vmem:[%s28450_s2 + $0x9c4] ss:$12 sps:$4 sm:$0xff]   ;;  %v19723_v21 = vld [vmem:[%s28450_s2 + $0xcac] ss:$12 sps:$4 sm:$0xff]   ;;  %v19726_v31 = vld [vmem:[%s28450_s2 + $0xe28] ss:$12 sps:$4 sm:$0xff]  }
 0x31e   :  { %v19724_v62 = vld [vmem:[%s28450_s2 + $0xe2c] ss:$12 sps:$4 sm:$0xff]  }
 0x31f   :  { %v5798_v4 = vmax.f32 %v5766_v58, 0.0  ;;  %6960 = vmatpush2.bf16.msra.mxu0 %v19705_v54  ;;  %v18485_v50 = vld [vmem:[%s28453_s1 + $0xe4] ss:$84 sps:$4 sm:$0xff]   ;;  %v19727_v58 = vld [vmem:[%s28450_s2 + $0xc94] ss:$12 sps:$4 sm:$0xff]  }
 0x320   :  { %7043 = vmatpush2.bf16.msra.mxu1 %v19706_v33  ;;  %6961 = vmatprep.subr.bf16.mxu0 %v19707_v49 }
 0x321   :  { %7044 = vmatprep.subr.bf16.mxu1 %v19708_v41  ;;  %v23831_v14 = vpack.c.bf16 %v5798_v4, %v5795_v53  ;;  %v19728_v53 = vld [vmem:[%s28450_s2 + $0xe14] ss:$12 sps:$4 sm:$0xff]   ;;  %v18480_v41 = vld [vmem:[%s28453_s1 + $0xd8] ss:$84 sps:$4 sm:$0xff]  }
 0x323   :  { %28548 = vst [vmem:[#allocation25_spill] sm:$0xff] %v23831_v14  ;;  %6962 = vmatpush2.bf16.msra.mxu0 %v19709_v48  ;;  %v18483_v48 = vld [vmem:[%s28453_s1 + $0xe0] ss:$84 sps:$4 sm:$0xff]  }
 0x324   :  { %7045 = vmatpush2.bf16.msra.mxu1 %v19710_v6  ;;  %6963 = vmatprep.subr.bf16.mxu0 %v19711_v7 }
 0x325   :  { %7046 = vmatprep.subr.bf16.mxu1 %v19712_v47  ;;  %v19729_v47 = vld [vmem:[%s28450_s2 + $0xc90] ss:$12 sps:$4 sm:$0xff]  }
 0x327   :  { %6964 = vmatpush2.bf16.msra.mxu0 %v19713_v42  ;;  %v19730_v42 = vld [vmem:[%s28450_s2 + $0xe10] ss:$12 sps:$4 sm:$0xff]  }
 0x328   :  { %7047 = vmatpush2.bf16.msra.mxu1 %v19714_v30  ;;  %6965 = vmatprep.subr.bf16.mxu0 %v19715_v18 }
 0x329   :  { %7048 = vmatprep.subr.bf16.mxu1 %v19716_v38  ;;  %v19731_v38 = vld [vmem:[%s28450_s2 + $0xc7c] ss:$12 sps:$4 sm:$0xff]  }
 0x32b   :  { %6966 = vmatpush2.bf16.msra.mxu0 %v19717_v24  ;;  %v19732_v24 = vld [vmem:[%s28450_s2 + $0xdfc] ss:$12 sps:$4 sm:$0xff]  }
 0x32c   :  { %7049 = vmatpush2.bf16.msra.mxu1 %v19718_v23  ;;  %6967 = vmatprep.subr.bf16.mxu0 %v19719_v39  ;;  %v18488_v39 = vld [vmem:[%s28453_s1 + $0x184] ss:$84 sps:$4 sm:$0xff]  }
 0x32d   :  { %7050 = vmatprep.subr.bf16.mxu1 %v19720_v60  ;;  %v18491_v60 = vld [vmem:[%s28453_s1 + $0x18c] ss:$84 sps:$4 sm:$0xff]  }
 0x32f   :  { %6968 = vmatpush2.bf16.msra.mxu0 %v19721_v15  ;;  %v19733_v15 = vld [vmem:[%s28450_s2 + $0xc78] ss:$12 sps:$4 sm:$0xff]  }
 0x330   :  { %7051 = vmatpush2.bf16.msra.mxu1 %v19722_v52  ;;  %7103 = vmatprep.subr.bf16.mxu0 %v19723_v21  ;;  %v19734_v52 = vld [vmem:[%s28450_s2 + $0xdf8] ss:$12 sps:$4 sm:$0xff]  }
 0x331   :  { %7186 = vmatprep.subr.bf16.mxu1 %v19724_v62  ;;  %v19735_v62 = vld [vmem:[%s28450_s2 + $0xc64] ss:$12 sps:$4 sm:$0xff]  }
 0x332   :  { %v6473_v40 = vpop.f32.mrf.mxu0  ;;  %6970 = vmatmul.mubr.bf16.vlgmr.msra.gmra.mxu0 %v18474_v9 }
 0x333   :  { %v6556_v28 = vpop.f32.mrf.mxu1  ;;  %7053 = vmatmul.mubr.bf16.vlgmr.msra.gmra.mxu1 %v18477_v19  ;;  %v6474_v2 = vadd.f32 %v6473_v40, %v21115_v8  ;;  %7104 = vmatpush1.bf16.msra.mxu0 %v19725_v26  ;;  %v18486_v26 = vld [vmem:[%s28453_s1 + $0x180] ss:$84 sps:$4 sm:$0xff]  }
 0x334   :  { %7187 = vmatpush1.bf16.msra.mxu1 %v19726_v31  ;;  %v6475_v25 = vpop.f32.mrf.mxu0  ;;  %7105 = vmatprep.subr.bf16.mxu0 %v19727_v58  ;;  %v18489_v31 = vld [vmem:[%s28453_s1 + $0x188] ss:$84 sps:$4 sm:$0xff]   ;;  %v19737_v58 = vld [vmem:[%s28450_s2 + $0xc60] ss:$12 sps:$4 sm:$0xff]  }
 0x335   :  { %v6558_v45 = vpop.f32.mrf.mxu1  ;;  %7188 = vmatprep.subr.bf16.mxu1 %v19728_v53  ;;  %v23906_v4 = vadd.f32 %v6556_v28, %v6474_v2  ;;  %v6476_v54 = vadd.f32 %v6475_v25, %v21127_v12  ;;  %6979 = vmatprep.mubr.bf16.mxu0 %v18482_v46  ;;  %v19736_v46 = vld [vmem:[%s28450_s2 + $0xde4] ss:$12 sps:$4 sm:$0xff]   ;;  %v19738_v53 = vld [vmem:[%s28450_s2 + $0xde0] ss:$12 sps:$4 sm:$0xff]  }
 0x336   :  { %7062 = vmatprep.mubr.bf16.mxu1 %v18485_v50  ;;  %v6477_v33 = vpop.f32.mrf.mxu0 }
 0x337   :  { %v6560_v49 = vpop.f32.mrf.mxu1  ;;  %v23915_v6 = vadd.f32 %v6558_v45, %v6476_v54  ;;  %v6478_v7 = vadd.f32 %v6477_v33, %v21115_v8  ;;  %7106 = vmatpush1.bf16.msra.mxu0 %v19729_v47  ;;  %v18494_v47 = vld [vmem:[%s28453_s1 + $0x22c] ss:$84 sps:$4 sm:$0xff]  }
 0x338   :  { %7189 = vmatpush1.bf16.msra.mxu1 %v19730_v42  ;;  %v23924_v30 = vpop.f32.mrf.mxu0  ;;  %7107 = vmatprep.subr.bf16.mxu0 %v19731_v38  ;;  %v18497_v42 = vld [vmem:[%s28453_s1 + $0x234] ss:$84 sps:$4 sm:$0xff]  }
 0x339   :  { %v23926_v18 = vpop.f32.mrf.mxu1  ;;  %7190 = vmatprep.subr.bf16.mxu1 %v19732_v24  ;;  %v23934_v23 = vadd.f32 %v6560_v49, %v6478_v7  ;;  %v19739_v49 = vld [vmem:[%s28450_s2 + $0xc4c] ss:$12 sps:$4 sm:$0xff]  }
 0x33a   :  { %6980 = vmatmul.mubr.bf16.gmra.mxu0 %v18480_v41  ;;  %v6483_v9 = vpop.f32.mrf.mxu0  ;;  %v19740_v41 = vld [vmem:[%s28450_s2 + $0xdcc] ss:$12 sps:$4 sm:$0xff]  }
 0x33b   :  { %7063 = vmatmul.mubr.bf16.gmra.mxu1 %v18483_v48  ;;  %v6566_v19 = vpop.f32.mrf.mxu1  ;;  %7108 = vmatpush1.bf16.msra.mxu0 %v19733_v15  ;;  %v6484_v21 = vadd.f32 %v6483_v9, %v21115_v8  ;;  %v19742_v9 = vld [vmem:[%s28450_s2 + $0xdc8] ss:$12 sps:$4 sm:$0xff]  }
 0x33c   :  { %7191 = vmatpush1.bf16.msra.mxu1 %v19734_v52  ;;  %7109 = vmatprep.subr.bf16.mxu0 %v19735_v62  ;;  %v6485_v50 = vpop.f32.mrf.mxu0  ;;  %v19743_v15 = vld [vmem:[%s28450_s2 + $0xc34] ss:$12 sps:$4 sm:$0xff]  }
 0x33d   :  { %7192 = vmatprep.subr.bf16.mxu1 %v19736_v46  ;;  %v6568_v40 = vpop.f32.mrf.mxu1  ;;  %6989 = vmatprep.mubr.bf16.mxu0 %v18488_v39  ;;  %v6486_v28 = vadd.f32 %v6485_v50, %v21127_v12  ;;  %v23956_v2 = vadd.f32 %v6566_v19, %v6484_v21  ;;  %v19744_v52 = vld [vmem:[%s28450_s2 + $0xdb4] ss:$12 sps:$4 sm:$0xff]  }
 0x33e   :  { %7072 = vmatprep.mubr.bf16.mxu1 %v18491_v60  ;;  %v6487_v25 = vpop.f32.mrf.mxu0  ;;  %v19741_v60 = vld [vmem:[%s28450_s2 + $0xc48] ss:$12 sps:$4 sm:$0xff]  }
 0x33f   :  { %v6570_v45 = vpop.f32.mrf.mxu1  ;;  %7110 = vmatpush1.bf16.msra.mxu0 %v19737_v58  ;;  %v6488_v54 = vadd.f32 %v6487_v25, %v21115_v8  ;;  %v23971_v33 = vadd.f32 %v6568_v40, %v6486_v28  ;;  %v18492_v40 = vld [vmem:[%s28453_s1 + $0x228] ss:$84 sps:$4 sm:$0xff]   ;;  %v18495_v28 = vld [vmem:[%s28453_s1 + $0x230] ss:$84 sps:$4 sm:$0xff]  }
 0x340   :  { %7193 = vmatpush1.bf16.msra.mxu1 %v19738_v53  ;;  %7111 = vmatprep.subr.bf16.mxu0 %v19739_v49  ;;  %v23979_v48 = vpop.f32.mrf.mxu0  ;;  %v19745_v25 = vld [vmem:[%s28450_s2 + $0xc30] ss:$12 sps:$4 sm:$0xff]  }
 0x341   :  { %7194 = vmatprep.subr.bf16.mxu1 %v19740_v41  ;;  %v23981_v7 = vpop.f32.mrf.mxu1  ;;  %v23989_v38 = vadd.f32 %v6570_v45, %v6488_v54  ;;  %v19746_v45 = vld [vmem:[%s28450_s2 + $0xdb0] ss:$12 sps:$4 sm:$0xff]  }
 0x342   :  { %6990 = vmatmul.mubr.bf16.gmra.mxu0 %v18486_v26  ;;  %v6493_v24 = vpop.f32.mrf.mxu0  ;;  %v19747_v54 = vld [vmem:[%s28450_s2 + $0xc1c] ss:$12 sps:$4 sm:$0xff]  }
 0x343   :  { %7073 = vmatmul.mubr.bf16.gmra.mxu1 %v18489_v31  ;;  %v6576_v39 = vpop.f32.mrf.mxu1  ;;  %7112 = vmatpush1.bf16.msra.mxu0 %v19741_v60  ;;  %v6494_v19 = vadd.f32 %v6493_v24, %v21115_v8  ;;  %v19748_v49 = vld [vmem:[%s28450_s2 + $0xd9c] ss:$12 sps:$4 sm:$0xff]  }
 0x344   :  { %7195 = vmatpush1.bf16.msra.mxu1 %v19742_v9  ;;  %7113 = vmatprep.subr.bf16.mxu0 %v19743_v15  ;;  %v6495_v21 = vpop.f32.mrf.mxu0  ;;  %v18503_v24 = vld [vmem:[%s28453_s1 + $0x2dc] ss:$84 sps:$4 sm:$0xff]   ;;  %v19750_v15 = vld [vmem:[%s28450_s2 + $0xd98] ss:$12 sps:$4 sm:$0xff]  }
 0x345   :  { %7196 = vmatprep.subr.bf16.mxu1 %v19744_v52  ;;  %v6578_v62 = vpop.f32.mrf.mxu1  ;;  %6999 = vmatprep.mubr.bf16.mxu0 %v18494_v47  ;;  %v6496_v46 = vadd.f32 %v6495_v21, %v21127_v12  ;;  %v24005_v50 = vadd.f32 %v6576_v39, %v6494_v19  ;;  %v19749_v19 = vld [vmem:[%s28450_s2 + $0xc18] ss:$12 sps:$4 sm:$0xff]  }
 0x346   :  { %7082 = vmatprep.mubr.bf16.mxu1 %v18497_v42  ;;  %v6497_v26 = vpop.f32.mrf.mxu0  ;;  %v18500_v42 = vld [vmem:[%s28453_s1 + $0x2d4] ss:$84 sps:$4 sm:$0xff]   ;;  %v19751_v21 = vld [vmem:[%s28450_s2 + $0xc04] ss:$12 sps:$4 sm:$0xff]  }
 0x347   :  { %v6580_v31 = vpop.f32.mrf.mxu1  ;;  %7114 = vmatpush1.bf16.msra.mxu0 %v19745_v25  ;;  %v6498_v58 = vadd.f32 %v6497_v26, %v21115_v8  ;;  %v24020_v53 = vadd.f32 %v6578_v62, %v6496_v46  ;;  %v19752_v62 = vld [vmem:[%s28450_s2 + $0xd84] ss:$12 sps:$4 sm:$0xff]   ;;  %v18501_v25 = vld [vmem:[%s28453_s1 + $0x2d8] ss:$84 sps:$4 sm:$0xff]  }
 0x348   :  { %7197 = vmatpush1.bf16.msra.mxu1 %v19746_v45  ;;  %7115 = vmatprep.subr.bf16.mxu0 %v19747_v54  ;;  %v24028_v41 = vpop.f32.mrf.mxu0  ;;  %v19753_v54 = vld [vmem:[%s28450_s2 + $0xc00] ss:$12 sps:$4 sm:$0xff]  }
 0x349   :  { %7198 = vmatprep.subr.bf16.mxu1 %v19748_v49  ;;  %v24030_v47 = vpop.f32.mrf.mxu1  ;;  %v24038_v39 = vadd.f32 %v6580_v31, %v6498_v58  ;;  %v18498_v31 = vld [vmem:[%s28453_s1 + $0x2d0] ss:$84 sps:$4 sm:$0xff]   ;;  %v19754_v49 = vld [vmem:[%s28450_s2 + $0xd80] ss:$12 sps:$4 sm:$0xff]  }
 0x34a   :  { %7000 = vmatmul.mubr.bf16.gmra.mxu0 %v18492_v40  ;;  %v6503_v60 = vpop.f32.mrf.mxu0 }
 0x34b   :  { %7083 = vmatmul.mubr.bf16.gmra.mxu1 %v18495_v28  ;;  %v6586_v9 = vpop.f32.mrf.mxu1  ;;  %7116 = vmatpush1.bf16.msra.mxu0 %v19749_v19  ;;  %v6504_v52 = vadd.f32 %v6503_v60, %v21115_v8  ;;  %v19755_v60 = vld [vmem:[%s28450_s2 + $0xd6c] ss:$12 sps:$4 sm:$0xff]  }
 0x34c   :  { %7199 = vmatpush1.bf16.msra.mxu1 %v19750_v15  ;;  %7117 = vmatprep.subr.bf16.mxu0 %v19751_v21  ;;  %v6505_v46 = vpop.f32.mrf.mxu0  ;;  %v18506_v21 = vld [vmem:[%s28453_s1 + $0x44] ss:$84 sps:$4 sm:$0xff]  }
 0x34d   :  { %7200 = vmatprep.subr.bf16.mxu1 %v19752_v62  ;;  %v6588_v40 = vpop.f32.mrf.mxu1  ;;  %7009 = vmatprep.mubr.bf16.mxu0 %v18500_v42  ;;  %v6506_v28 = vadd.f32 %v6505_v46, %v21127_v12  ;;  %v24054_v26 = vadd.f32 %v6586_v9, %v6504_v52  ;;  %v19756_v9 = vld [vmem:[%s28450_s2 + $0xeec] ss:$12 sps:$4 sm:$0xff]  }
 0x34e   :  { %7092 = vmatprep.mubr.bf16.mxu1 %v18503_v24  ;;  %v6507_v45 = vpop.f32.mrf.mxu0  ;;  %v18509_v62 = vld [vmem:[%s28453_s1 + $0x4c] ss:$84 sps:$4 sm:$0xff]  }
 0x34f   :  { %v6590_v58 = vpop.f32.mrf.mxu1  ;;  %7118 = vmatpush1.bf16.msra.mxu0 %v19753_v54  ;;  %v6508_v42 = vadd.f32 %v6507_v45, %v21115_v8  ;;  %v24069_v24 = vadd.f32 %v6588_v40, %v6506_v28  ;;  %v19757_v28 = vld [vmem:[%s28450_s2 + $0xd68] ss:$12 sps:$4 sm:$0xff]  }
 0x350   :  { %7201 = vmatpush1.bf16.msra.mxu1 %v19754_v49  ;;  %7119 = vmatprep.subr.bf16.mxu0 %v19755_v60  ;;  %v24077_v19 = vpop.f32.mrf.mxu0  ;;  %v19758_v45 = vld [vmem:[%s28450_s2 + $0xee8] ss:$12 sps:$4 sm:$0xff]  }
 0x351   :  { %7202 = vmatprep.subr.bf16.mxu1 %v19756_v9  ;;  %v24079_v15 = vpop.f32.mrf.mxu1  ;;  %v24081_v52 = vadd.f32 %v6590_v58, %v6508_v42  ;;  %v19759_v54 = vld [vmem:[%s28450_s2 + $0xd54] ss:$12 sps:$4 sm:$0xff]  }
 0x352   :  { %7010 = vmatmul.mubr.bf16.gmra.mxu0 %v18498_v31  ;;  %v6513_v46 = vpop.f32.mrf.mxu0  ;;  %v19760_v31 = vld [vmem:[%s28450_s2 + $0xed4] ss:$12 sps:$4 sm:$0xff]  }
 0x353   :  { %7093 = vmatmul.mubr.bf16.gmra.mxu1 %v18501_v25  ;;  %v6596_v40 = vpop.f32.mrf.mxu1  ;;  %7120 = vmatpush2.bf16.msra.mxu0 %v19757_v28  ;;  %v6514_v58 = vadd.f32 %v6513_v46, %v21115_v8  ;;  %v19761_v46 = vld [vmem:[%s28450_s2 + $0xd50] ss:$12 sps:$4 sm:$0xff]  }
 0x354   :  { %7203 = vmatpush2.bf16.msra.mxu1 %v19758_v45  ;;  %7121 = vmatprep.subr.bf16.mxu0 %v19759_v54  ;;  %v6515_v25 = vpop.f32.mrf.mxu0  ;;  %v19762_v28 = vld [vmem:[%s28450_s2 + $0xed0] ss:$12 sps:$4 sm:$0xff]  }
 0x355   :  { %7204 = vmatprep.subr.bf16.mxu1 %v19760_v31  ;;  %v6598_v49 = vpop.f32.mrf.mxu1  ;;  %v6516_v42 = vadd.f32 %v6515_v25, %v21127_v12  ;;  %v24103_v60 = vadd.f32 %v6596_v40, %v6514_v58  ;;  %7135 = vmatprep.mubr.bf16.mxu0 %v18506_v21  ;;  %v19763_v21 = vld [vmem:[%s28450_s2 + $0xd3c] ss:$12 sps:$4 sm:$0xff]   ;;  %v19765_v31 = vld [vmem:[%s28450_s2 + $0xd38] ss:$12 sps:$4 sm:$0xff]  }
 0x356   :  { %7218 = vmatprep.mubr.bf16.mxu1 %v18509_v62  ;;  %v6517_v9 = vpop.f32.mrf.mxu0  ;;  %v19764_v62 = vld [vmem:[%s28450_s2 + $0xebc] ss:$12 sps:$4 sm:$0xff]   ;;  %v19767_v25 = vld [vmem:[%s28450_s2 + $0xd24] ss:$12 sps:$4 sm:$0xff]  }
 0x357   :  { %7122 = vmatpush2.bf16.msra.mxu0 %v19761_v46  ;;  %v6518_v45 = vadd.f32 %v6517_v9, %v21115_v8  ;;  %v24112_v54 = vadd.f32 %v6598_v49, %v6516_v42  ;;  %v6600_v40 = vpop.f32.mrf.mxu1  ;;  %v19766_v8 = vld [vmem:[%s28450_s2 + $0xeb8] ss:$12 sps:$4 sm:$0xff]   ;;  %v19769_v42 = vld [vmem:[%s28450_s2 + $0xd20] ss:$12 sps:$4 sm:$0xff]  }
 0x358   :  { %7205 = vmatpush2.bf16.msra.mxu1 %v19762_v28  ;;  %7123 = vmatprep.subr.bf16.mxu0 %v19763_v21  ;;  %v19768_v49 = vld [vmem:[%s28450_s2 + $0xea4] ss:$12 sps:$4 sm:$0xff]   ;;  %v19770_v9 = vld [vmem:[%s28450_s2 + $0xea0] ss:$12 sps:$4 sm:$0xff]   ;;  %v19774_v21 = vld [vmem:[%s28450_s2 + $0xe88] ss:$12 sps:$4 sm:$0xff]  }
 0x359   :  { %7206 = vmatprep.subr.bf16.mxu1 %v19764_v62  ;;  %v24120_v58 = vadd.f32 %v6600_v40, %v6518_v45  ;;  %v19771_v46 = vld [vmem:[%s28450_s2 + $0xd0c] ss:$12 sps:$4 sm:$0xff]   ;;  %v19773_v45 = vld [vmem:[%s28450_s2 + $0xd08] ss:$12 sps:$4 sm:$0xff]  }
 0x35a   :  { %v19772_v28 = vld [vmem:[%s28450_s2 + $0xe8c] ss:$12 sps:$4 sm:$0xff]   ;;  %v19775_v62 = vld [vmem:[%s28450_s2 + $0xcf4] ss:$12 sps:$4 sm:$0xff]  }
 0x35b   :  { %7124 = vmatpush2.bf16.msra.mxu0 %v19765_v31  ;;  %v19776_v40 = vld [vmem:[%s28450_s2 + $0xe74] ss:$12 sps:$4 sm:$0xff]   ;;  %v19777_v31 = vld [vmem:[%s28450_s2 + $0xcf0] ss:$12 sps:$4 sm:$0xff]  }
 0x35c   :  { %7207 = vmatpush2.bf16.msra.mxu1 %v19766_v8  ;;  %7125 = vmatprep.subr.bf16.mxu0 %v19767_v25  ;;  %v19778_v8 = vld [vmem:[%s28450_s2 + $0xe70] ss:$12 sps:$4 sm:$0xff]  }
 0x35d   :  { %7208 = vmatprep.subr.bf16.mxu1 %v19768_v49  ;;  %v19779_v25 = vld [vmem:[%s28450_s2 + $0xcdc] ss:$12 sps:$4 sm:$0xff]  }
 0x35e   :  { %v19780_v49 = vld [vmem:[%s28450_s2 + $0xe5c] ss:$12 sps:$4 sm:$0xff]  }
 0x35f   :  { %7126 = vmatpush2.bf16.msra.mxu0 %v19769_v42  ;;  %v19781_v42 = vld [vmem:[%s28450_s2 + $0xcd8] ss:$12 sps:$4 sm:$0xff]  }
 0x360   :  { %7209 = vmatpush2.bf16.msra.mxu1 %v19770_v9  ;;  %7127 = vmatprep.subr.bf16.mxu0 %v19771_v46  ;;  %v19782_v9 = vld [vmem:[%s28450_s2 + $0xe58] ss:$12 sps:$4 sm:$0xff]  }
 0x361   :  { %7210 = vmatprep.subr.bf16.mxu1 %v19772_v28  ;;  %v19783_v46 = vld [vmem:[%s28450_s2 + $0xcc4] ss:$12 sps:$4 sm:$0xff]  }
 0x362   :  { %v19784_v28 = vld [vmem:[%s28450_s2 + $0xe44] ss:$12 sps:$4 sm:$0xff]  }
 0x363   :  { %7128 = vmatpush2.bf16.msra.mxu0 %v19773_v45  ;;  %v18504_v45 = vld [vmem:[%s28453_s1 + $0x40] ss:$84 sps:$4 sm:$0xff]  }
 0x364   :  { %7211 = vmatpush2.bf16.msra.mxu1 %v19774_v21  ;;  %7129 = vmatprep.subr.bf16.mxu0 %v19775_v62  ;;  %v18507_v21 = vld [vmem:[%s28453_s1 + $0x48] ss:$84 sps:$4 sm:$0xff]   ;;  %v19785_v62 = vld [vmem:[%s28450_s2 + $0xcc0] ss:$12 sps:$4 sm:$0xff]  }
 0x365   :  { %7212 = vmatprep.subr.bf16.mxu1 %v19776_v40  ;;  %v19786_v40 = vld [vmem:[%s28450_s2 + $0xe40] ss:$12 sps:$4 sm:$0xff]  }
 0x367   :  { %7130 = vmatpush2.bf16.msra.mxu0 %v19777_v31  ;;  %v18512_v31 = vld [vmem:[%s28453_s1 + $0xec] ss:$84 sps:$4 sm:$0xff]  }
 0x368   :  { %7213 = vmatpush2.bf16.msra.mxu1 %v19778_v8  ;;  %7131 = vmatprep.subr.bf16.mxu0 %v19779_v25  ;;  %v24197_v8 = vpop.f32.mrf.mxu0  ;;  %v24199_v25 = vpop.f32.mrf.mxu1 }
 0x369   :  { %7214 = vmatprep.subr.bf16.mxu1 %v19780_v49  ;;  %v19787_v49 = vld [vmem:[%s28450_s2 + $0xfac] ss:$12 sps:$4 sm:$0xff]  }
 0x36b   :  { %7132 = vmatpush2.bf16.msra.mxu0 %v19781_v42  ;;  %v19788_v42 = vld [vmem:[%s28450_s2 + $0x170] ss:$12 sps:$4 sm:$0xff]  }
 0x36c   :  { %7215 = vmatpush2.bf16.msra.mxu1 %v19782_v9  ;;  %7133 = vmatprep.subr.bf16.mxu0 %v19783_v46  ;;  %v18515_v9 = vld [vmem:[%s28453_s1 + $0xf4] ss:$84 sps:$4 sm:$0xff]  }
 0x36d   :  { %7216 = vmatprep.subr.bf16.mxu1 %v19784_v28 }
 0x36f   :  { %7134 = vmatpush2.bf16.msra.mxu0 %v19785_v62 }
 0x370   :  { %7217 = vmatpush2.bf16.msra.mxu1 %v19786_v40  ;;  %7269 = vmatprep.subr.bf16.mxu0 %v19787_v49  ;;  %v19789_v40 = vld [vmem:[%s28450_s2 + $0xfa8] ss:$12 sps:$4 sm:$0xff]  }
 0x371   :  { %16655 = vmatprep.subr.bf16.mxu1 %v19788_v42  ;;  %v19790_v42 = vld [vmem:[%s28450_s2 + $0xf94] ss:$12 sps:$4 sm:$0xff]  }
 0x372   :  { %v6639_v46 = vpop.f32.mrf.mxu0  ;;  %7136 = vmatmul.mubr.bf16.vlgmr.msra.gmra.mxu0 %v18504_v45 }
 0x373   :  { %7219 = vmatmul.mubr.bf16.vlgmr.msra.gmra.mxu1 %v18507_v21  ;;  %v6722_v28 = vpop.f32.mrf.mxu1  ;;  %v6640_v62 = vadd.f32 %v6639_v46, %v23906_v4  ;;  %7270 = vmatpush1.bf16.msra.mxu0 %v19789_v40  ;;  %v19791_v4 = vld [vmem:[%s28450_s2 + $0xb0] ss:$12 sps:$4 sm:$0xff]  }
 0x374   :  { %7145 = vmatprep.mubr.bf16.mxu0 %v18512_v31  ;;  %v6641_v49 = vpop.f32.mrf.mxu0  ;;  %7271 = vmatprep.subr.bf16.mxu0 %v19790_v42  ;;  %v18510_v31 = vld [vmem:[%s28453_s1 + $0xe8] ss:$84 sps:$4 sm:$0xff]   ;;  %v18513_v40 = vld [vmem:[%s28453_s1 + $0xf0] ss:$84 sps:$4 sm:$0xff]  }
 0x375   :  { %v6724_v37 = vpop.f32.mrf.mxu1  ;;  %7228 = vmatprep.mubr.bf16.mxu1 %v18515_v9  ;;  %v24217_v56 = vadd.f32 %v6722_v28, %v6640_v62  ;;  %v6642_v45 = vadd.f32 %v6641_v49, %v23915_v6  ;;  %16656 = vmatpush3.bf16.msra.mxu1 %v19791_v4  ;;  %v19792_v9 = vld [vmem:[%s28450_s2 + $0x158] ss:$12 sps:$4 sm:$0xff]   ;;  %v19793_v62 = vld [vmem:[%s28450_s2 + $0xf90] ss:$12 sps:$4 sm:$0xff]   ;;  %v18518_v49 = vld [vmem:[%s28453_s1 + $0x194] ss:$84 sps:$4 sm:$0xff]  }
 0x376   :  { %v6643_v21 = vpop.f32.mrf.mxu0  ;;  %16657 = vmatprep.subr.bf16.mxu1 %v19792_v9 }
 0x377   :  { %v6726_v46 = vpop.f32.mrf.mxu1  ;;  %v24232_v6 = vadd.f32 %v6724_v37, %v6642_v45  ;;  %v6644_v28 = vadd.f32 %v6643_v21, %v23934_v23  ;;  %7272 = vmatpush1.bf16.msra.mxu0 %v19793_v62  ;;  %v19794_v37 = vld [vmem:[%s28450_s2 + $0xf7c] ss:$12 sps:$4 sm:$0xff]   ;;  %v19795_v21 = vld [vmem:[%s28450_s2 + $0x98] ss:$12 sps:$4 sm:$0xff]  }
 0x378   :  { %v24241_v42 = vpop.f32.mrf.mxu0  ;;  %7273 = vmatprep.subr.bf16.mxu0 %v19794_v37  ;;  %v18521_v23 = vld [vmem:[%s28453_s1 + $0x19c] ss:$84 sps:$4 sm:$0xff]   ;;  %v19796_v37 = vld [vmem:[%s28450_s2 + $0xf78] ss:$12 sps:$4 sm:$0xff]  }
 0x379   :  { %v24243_v4 = vpop.f32.mrf.mxu1  ;;  %v24251_v45 = vadd.f32 %v6726_v46, %v6644_v28  ;;  %16658 = vmatpush3.bf16.msra.mxu1 %v19795_v21  ;;  %v19797_v28 = vld [vmem:[%s28450_s2 + $0xf64] ss:$12 sps:$4 sm:$0xff]  }
 0x37a   :  { %v6649_v9 = vpop.f32.mrf.mxu0  ;;  %7146 = vmatmul.mubr.bf16.gmra.mxu0 %v18510_v31 }
 0x37b   :  { %7229 = vmatmul.mubr.bf16.gmra.mxu1 %v18513_v40  ;;  %v6732_v62 = vpop.f32.mrf.mxu1  ;;  %v6650_v0 = vadd.f32 %v6649_v9, %v23956_v2  ;;  %7274 = vmatpush1.bf16.msra.mxu0 %v19796_v37  ;;  %v19798_v2 = vld [vmem:[%s28450_s2 + $0x140] ss:$12 sps:$4 sm:$0xff]   ;;  %v19801_v37 = vld [vmem:[%s28450_s2 + $0x128] ss:$12 sps:$4 sm:$0xff]  }
 0x37c   :  { %7155 = vmatprep.mubr.bf16.mxu0 %v18518_v49  ;;  %v6651_v20 = vpop.f32.mrf.mxu0  ;;  %7238 = vmatprep.mubr.bf16.mxu1 %v18521_v23  ;;  %v18516_v49 = vld [vmem:[%s28453_s1 + $0x190] ss:$84 sps:$4 sm:$0xff]   ;;  %v18519_v23 = vld [vmem:[%s28453_s1 + $0x198] ss:$84 sps:$4 sm:$0xff]  }
 0x37d   :  { %v6734_v46 = vpop.f32.mrf.mxu1  ;;  %7275 = vmatprep.subr.bf16.mxu0 %v19797_v28  ;;  %v6652_v31 = vadd.f32 %v6651_v20, %v23971_v33  ;;  %v24264_v40 = vadd.f32 %v6732_v62, %v6650_v0  ;;  %16659 = vmatprep.subr.bf16.mxu1 %v19798_v2  ;;  %v19799_v20 = vld [vmem:[%s28450_s2 + $0x80] ss:$12 sps:$4 sm:$0xff]  }
 0x37e   :  { %v6653_v21 = vpop.f32.mrf.mxu0  ;;  %16660 = vmatpush3.bf16.msra.mxu1 %v19799_v20  ;;  %v19800_v62 = vld [vmem:[%s28450_s2 + $0xf60] ss:$12 sps:$4 sm:$0xff]  }
 0x37f   :  { %v6736_v9 = vpop.f32.mrf.mxu1  ;;  %v6654_v0 = vadd.f32 %v6653_v21, %v23989_v38  ;;  %v24279_v33 = vadd.f32 %v6734_v46, %v6652_v31  ;;  %7276 = vmatpush1.bf16.msra.mxu0 %v19800_v62  ;;  %16661 = vmatprep.subr.bf16.mxu1 %v19801_v37  ;;  %v19802_v38 = vld [vmem:[%s28450_s2 + $0xf4c] ss:$12 sps:$4 sm:$0xff]   ;;  %v18524_v46 = vld [vmem:[%s28453_s1 + $0x23c] ss:$84 sps:$4 sm:$0xff]  }
 0x380   :  { %v24287_v28 = vpop.f32.mrf.mxu0  ;;  %7277 = vmatprep.subr.bf16.mxu0 %v19802_v38  ;;  %v18527_v31 = vld [vmem:[%s28453_s1 + $0x244] ss:$84 sps:$4 sm:$0xff]   ;;  %v19803_v38 = vld [vmem:[%s28450_s2 + $0xf48] ss:$12 sps:$4 sm:$0xff]  }
 0x381   :  { %v24289_v2 = vpop.f32.mrf.mxu1  ;;  %v24300_v21 = vadd.f32 %v6736_v9, %v6654_v0 }
 0x382   :  { %v6659_v20 = vpop.f32.mrf.mxu0  ;;  %7156 = vmatmul.mubr.bf16.gmra.mxu0 %v18516_v49  ;;  %16662 = vmatpush3.bf16.msra.mxu1 %v19804_v59 }
 0x383   :  { %7239 = vmatmul.mubr.bf16.gmra.mxu1 %v18519_v23  ;;  %v6742_v62 = vpop.f32.mrf.mxu1  ;;  %v6660_v37 = vadd.f32 %v6659_v20, %v24005_v50  ;;  %7278 = vmatpush1.bf16.msra.mxu0 %v19803_v38  ;;  %v19805_v50 = vld [vmem:[%s28450_s2 + $0x110] ss:$12 sps:$4 sm:$0xff]   ;;  %v19806_v23 = vld [vmem:[%s28450_s2 + $0xf34] ss:$12 sps:$4 sm:$0xff]  }
 0x384   :  { %v6661_v1 = vpop.f32.mrf.mxu0  ;;  %7165 = vmatprep.mubr.bf16.mxu0 %v18524_v46  ;;  %7248 = vmatprep.mubr.bf16.mxu1 %v18527_v31  ;;  %v18522_v46 = vld [vmem:[%s28453_s1 + $0x238] ss:$84 sps:$4 sm:$0xff]   ;;  %v19807_v20 = vld [vmem:[%s28450_s2 + $0x50] ss:$12 sps:$4 sm:$0xff]  }
 0x385   :  { %v6744_v22 = vpop.f32.mrf.mxu1  ;;  %v6662_v9 = vadd.f32 %v6661_v1, %v24020_v53  ;;  %v24310_v49 = vadd.f32 %v6742_v62, %v6660_v37  ;;  %16663 = vmatprep.subr.bf16.mxu1 %v19805_v50  ;;  %7279 = vmatprep.subr.bf16.mxu0 %v19806_v23  ;;  %v18525_v1 = vld [vmem:[%s28453_s1 + $0x240] ss:$84 sps:$4 sm:$0xff]   ;;  %v19808_v62 = vld [vmem:[%s28450_s2 + $0xf30] ss:$12 sps:$4 sm:$0xff]   ;;  %v18530_v37 = vld [vmem:[%s28453_s1 + $0x2e4] ss:$84 sps:$4 sm:$0xff]  }
 0x386   :  { %v6663_v0 = vpop.f32.mrf.mxu0  ;;  %16664 = vmatpush3.bf16.msra.mxu1 %v19807_v20 }
 0x387   :  { %v6746_v59 = vpop.f32.mrf.mxu1  ;;  %v6664_v53 = vadd.f32 %v6663_v0, %v24038_v39  ;;  %v24325_v31 = vadd.f32 %v6744_v22, %v6662_v9  ;;  %7280 = vmatpush1.bf16.msra.mxu0 %v19808_v62  ;;  %v19809_v22 = vld [vmem:[%s28450_s2 + $0xf8] ss:$12 sps:$4 sm:$0xff]   ;;  %v19810_v39 = vld [vmem:[%s28450_s2 + $0xf1c] ss:$12 sps:$4 sm:$0xff]   ;;  %v18533_v9 = vld [vmem:[%s28453_s1 + $0x2ec] ss:$84 sps:$4 sm:$0xff]  }
 0x388   :  { %v24336_v38 = vpop.f32.mrf.mxu0  ;;  %16665 = vmatprep.subr.bf16.mxu1 %v19809_v22  ;;  %7281 = vmatprep.subr.bf16.mxu0 %v19810_v39  ;;  %v19811_v22 = vld [vmem:[%s28450_s2 + $0x38] ss:$12 sps:$4 sm:$0xff]  }
 0x389   :  { %v24338_v50 = vpop.f32.mrf.mxu1  ;;  %v24349_v23 = vadd.f32 %v6746_v59, %v6664_v53  ;;  %v19812_v59 = vld [vmem:[%s28450_s2 + $0xf18] ss:$12 sps:$4 sm:$0xff]  }
 0x38a   :  { %v6669_v0 = vpop.f32.mrf.mxu0  ;;  %7166 = vmatmul.mubr.bf16.gmra.mxu0 %v18522_v46  ;;  %16666 = vmatpush3.bf16.msra.mxu1 %v19811_v22  ;;  %v19814_v53 = vld [vmem:[%s28450_s2 + $0xf04] ss:$12 sps:$4 sm:$0xff]  }
 0x38b   :  { %7249 = vmatmul.mubr.bf16.gmra.mxu1 %v18525_v1  ;;  %v6752_v20 = vpop.f32.mrf.mxu1  ;;  %v6670_v62 = vadd.f32 %v6669_v0, %v24054_v26  ;;  %7175 = vmatprep.mubr.bf16.mxu0 %v18530_v37  ;;  %v19813_v26 = vld [vmem:[%s28450_s2 + $0xe0] ss:$12 sps:$4 sm:$0xff]  }
 0x38c   :  { %v6671_v17 = vpop.f32.mrf.mxu0  ;;  %7258 = vmatprep.mubr.bf16.mxu1 %v18533_v9  ;;  %7282 = vmatpush1.bf16.msra.mxu0 %v19812_v59  ;;  %v18528_v0 = vld [vmem:[%s28453_s1 + $0x2e0] ss:$84 sps:$4 sm:$0xff]  }
 0x38d   :  { %v6754_v39 = vpop.f32.mrf.mxu1  ;;  %v6672_v46 = vadd.f32 %v6671_v17, %v24069_v24  ;;  %v24359_v1 = vadd.f32 %v6752_v20, %v6670_v62  ;;  %16667 = vmatprep.subr.bf16.mxu1 %v19813_v26  ;;  %7283 = vmatprep.subr.bf16.mxu0 %v19814_v53  ;;  %v18531_v17 = vld [vmem:[%s28453_s1 + $0x2e8] ss:$84 sps:$4 sm:$0xff]   ;;  %v19815_v62 = vld [vmem:[%s28450_s2 + $0x20] ss:$12 sps:$4 sm:$0xff]  }
 0x38e   :  { %v6673_v37 = vpop.f32.mrf.mxu0  ;;  %16668 = vmatpush3.bf16.msra.mxu1 %v19815_v62  ;;  %v19816_v26 = vld [vmem:[%s28450_s2 + $0xf00] ss:$12 sps:$4 sm:$0xff]  }
 0x38f   :  { %v6756_v9 = vpop.f32.mrf.mxu1  ;;  %v6674_v24 = vadd.f32 %v6673_v37, %v24081_v52  ;;  %v24374_v20 = vadd.f32 %v6754_v39, %v6672_v46  ;;  %v19817_v52 = vld [vmem:[%s28450_s2 + $0xc8] ss:$12 sps:$4 sm:$0xff]   ;;  %v19818_v46 = vld [vmem:[%s28450_s2 + $0x2f0] ss:$12 sps:$4 sm:$0xff]  }
 0x390   :  { %v24379_v22 = vpop.f32.mrf.mxu0  ;;  %7284 = vmatpush1.bf16.msra.mxu0 %v19816_v26  ;;  %16669 = vmatprep.subr.bf16.mxu1 %v19817_v52  ;;  %v19819_v26 = vld [vmem:[%s28450_s2 + $0x8] ss:$12 sps:$4 sm:$0xff]   ;;  %v19820_v52 = vld [vmem:[%s28453_s1 + $0x4] ss:$84 sps:$4 sm:$0xff]  }
 0x391   :  { %v24381_v59 = vpop.f32.mrf.mxu1  ;;  %v24389_v39 = vadd.f32 %v6756_v9, %v6674_v24  ;;  %16701 = vmatprep.subr.bf16.mxu0 %v19818_v46 }
 0x392   :  { %v6679_v53 = vpop.f32.mrf.mxu0  ;;  %7176 = vmatmul.mubr.bf16.gmra.mxu0 %v18528_v0  ;;  %16670 = vmatpush3.bf16.msra.mxu1 %v19819_v26  ;;  %v19821_v0 = vld [vmem:[%s28450_s2 + $0x470] ss:$12 sps:$4 sm:$0xff]  }
 0x393   :  { %7259 = vmatmul.mubr.bf16.gmra.mxu1 %v18531_v17  ;;  %v6762_v37 = vpop.f32.mrf.mxu1  ;;  %v6680_v62 = vadd.f32 %v6679_v53, %v24103_v60  ;;  %7301 = vmatprep.mubr.bf16.mxu0 %v28549_v11  ;;  %v18534_v26 = vld [vmem:[%s28453_s1 + $0x50] ss:$84 sps:$4 sm:$0xff]  }
 0x394   :  { %v6681_v9 = vpop.f32.mrf.mxu0  ;;  %7384 = vmatprep.mubr.bf16.mxu1 %v19820_v52  ;;  %16747 = vmatprep.subr.bf16.mxu1 %v19821_v0  ;;  %v19822_v0 = vld [vmem:[%s28453_s1] ss:$84 sps:$4 sm:$0xff]  }
 0x395   :  { %v6764_v24 = vpop.f32.mrf.mxu1  ;;  %v6682_v60 = vadd.f32 %v6681_v9, %v24112_v54  ;;  %v24406_v17 = vadd.f32 %v6762_v37, %v6680_v62  ;;  %v19823_v54 = vld [vmem:[%s28450_s2 + $0x230] ss:$12 sps:$4 sm:$0xff]   ;;  %v18535_v62 = vld [vmem:[%s28453_s1 + $0xf8] ss:$84 sps:$4 sm:$0xff]  }
 0x396   :  { %v6683_v46 = vpop.f32.mrf.mxu0  ;;  %v19826_v37 = vld [vmem:[%s28450_s2 + $0x3b0] ss:$12 sps:$4 sm:$0xff]   ;;  %v19827_v9 = vld [vmem:[%s28450_s2 + $0x458] ss:$12 sps:$4 sm:$0xff]  }
 0x397   :  { %v6766_v53 = vpop.f32.mrf.mxu1  ;;  %v6684_v61 = vadd.f32 %v6683_v46, %v24120_v58  ;;  %v24412_v3 = vadd.f32 %v6764_v24, %v6682_v60  ;;  %v19824_v58 = vld [vmem:[%s28450_s2 + $0x2d8] ss:$12 sps:$4 sm:$0xff]   ;;  %v19829_v60 = vld [vmem:[%s28450_s2 + $0x2c0] ss:$12 sps:$4 sm:$0xff]  }
 0x398   :  { %v19828_v24 = vld [vmem:[%s28450_s2 + $0x218] ss:$12 sps:$4 sm:$0xff]  }
 0x399   :  { %v24414_v52 = vadd.f32 %v6766_v53, %v6684_v61  ;;  %v19825_v61 = vld [vmem:[%s28453_s1 + $0xac] ss:$84 sps:$4 sm:$0xff]   ;;  %v19830_v46 = vld [vmem:[%s28450_s2 + $0x398] ss:$12 sps:$4 sm:$0xff]   ;;  %v19831_v53 = vld [vmem:[%s28453_s1 + $0xa8] ss:$84 sps:$4 sm:$0xff]  }
 0x39a   :  { %7302 = vmatmul.mubr.bf16.vlgmr.msra.gmra.mxu0 %v18534_v26  ;;  %v19832_v26 = vld [vmem:[%s28450_s2 + $0x200] ss:$12 sps:$4 sm:$0xff]  }
 0x39b   :  { %7385 = vmatmul.mubr.bf16.vlgmr.msra.gmra.mxu1 %v19822_v0  ;;  %16702 = vmatpush3.bf16.msra.mxu0 %v19823_v54  ;;  %v19833_v0 = vld [vmem:[%s28453_s1 + $0x154] ss:$84 sps:$4 sm:$0xff]  }
 0x39c   :  { %7311 = vmatprep.mubr.bf16.mxu0 %v28549_v11  ;;  %16703 = vmatprep.subr.bf16.mxu0 %v19824_v58  ;;  %v19834_v54 = vld [vmem:[%s28450_s2 + $0x2a8] ss:$12 sps:$4 sm:$0xff]   ;;  %v19835_v58 = vld [vmem:[%s28450_s2 + $0x440] ss:$12 sps:$4 sm:$0xff]  }
 0x39d   :  { %7392 = vmatprep.mubr.bf16.mxu1 %v19825_v61  ;;  %16748 = vmatpush3.bf16.msra.mxu1 %v19826_v37  ;;  %v18536_v61 = vld [vmem:[%s28453_s1 + $0x1a0] ss:$84 sps:$4 sm:$0xff]  }
 0x39e   :  { %16749 = vmatprep.subr.bf16.mxu1 %v19827_v9  ;;  %v19836_v37 = vld [vmem:[%s28450_s2 + $0x380] ss:$12 sps:$4 sm:$0xff]   ;;  %v19838_v9 = vld [vmem:[%s28450_s2 + $0x428] ss:$12 sps:$4 sm:$0xff]  }
 0x39f   :  { %16704 = vmatpush3.bf16.msra.mxu0 %v19828_v24  ;;  %v19839_v24 = vld [vmem:[%s28450_s2 + $0x290] ss:$12 sps:$4 sm:$0xff]  }
 0x3a0   :  { %16705 = vmatprep.subr.bf16.mxu0 %v19829_v60  ;;  %v19840_v60 = vld [vmem:[%s28453_s1 + $0x150] ss:$84 sps:$4 sm:$0xff]  }
 0x3a1   :  { %16750 = vmatpush3.bf16.msra.mxu1 %v19830_v46  ;;  %v19841_v46 = vld [vmem:[%s28450_s2 + $0x1d0] ss:$12 sps:$4 sm:$0xff]  }
 0x3a2   :  { %7312 = vmatmul.mubr.bf16.gmra.mxu0 %v18535_v62  ;;  %16751 = vmatprep.subr.bf16.mxu1 %v19835_v58  ;;  %v19837_v62 = vld [vmem:[%s28450_s2 + $0x1e8] ss:$12 sps:$4 sm:$0xff]  }
 0x3a3   :  { %7393 = vmatmul.mubr.bf16.gmra.mxu1 %v19831_v53  ;;  %16706 = vmatpush3.bf16.msra.mxu0 %v19832_v26  ;;  %v19842_v53 = vld [vmem:[%s28450_s2 + $0x368] ss:$12 sps:$4 sm:$0xff]   ;;  %v19843_v26 = vld [vmem:[%s28453_s1 + $0x1fc] ss:$84 sps:$4 sm:$0xff]  }
 0x3a4   :  { %7321 = vmatprep.mubr.bf16.mxu0 %v28549_v11  ;;  %7400 = vmatprep.mubr.bf16.mxu1 %v19833_v0  ;;  %v19844_v0 = vld [vmem:[%s28450_s2 + $0x410] ss:$12 sps:$4 sm:$0xff]  }
 0x3a5   :  { %16707 = vmatprep.subr.bf16.mxu0 %v19834_v54  ;;  %16752 = vmatpush3.bf16.msra.mxu1 %v19836_v37  ;;  %v19845_v54 = vld [vmem:[%s28450_s2 + $0x278] ss:$12 sps:$4 sm:$0xff]   ;;  %v18537_v58 = vld [vmem:[%s28453_s1 + $0x248] ss:$84 sps:$4 sm:$0xff]  }
 0x3a6   :  { %16753 = vmatprep.subr.bf16.mxu1 %v19838_v9  ;;  %v19847_v37 = vld [vmem:[%s28450_s2 + $0x1b8] ss:$12 sps:$4 sm:$0xff]   ;;  %v24508_v9 = vpop.f32.mrf.mxu1 }
 0x3a7   :  { %16708 = vmatpush3.bf16.msra.mxu0 %v19837_v62  ;;  %v24506_v62 = vpop.f32.mrf.mxu0 }
 0x3a8   :  { %16709 = vmatprep.subr.bf16.mxu0 %v19839_v24  ;;  %v19848_v24 = vld [vmem:[%s28450_s2 + $0x3f8] ss:$12 sps:$4 sm:$0xff]  }
 0x3a9   :  { %16754 = vmatpush3.bf16.msra.mxu1 %v19842_v53  ;;  %v19850_v53 = vld [vmem:[%s28453_s1 + $0x1f8] ss:$84 sps:$4 sm:$0xff]  }
 0x3aa   :  { %7322 = vmatmul.mubr.bf16.gmra.mxu0 %v18536_v61  ;;  %16755 = vmatprep.subr.bf16.mxu1 %v19844_v0  ;;  %v19846_v61 = vld [vmem:[%s28450_s2 + $0x350] ss:$12 sps:$4 sm:$0xff]  }
 0x3ab   :  { %7401 = vmatmul.mubr.bf16.gmra.mxu1 %v19840_v60  ;;  %16710 = vmatpush3.bf16.msra.mxu0 %v19841_v46  ;;  %v19849_v60 = vld [vmem:[%s28450_s2 + $0x260] ss:$12 sps:$4 sm:$0xff]  }
 0x3ac   :  { %7331 = vmatprep.mubr.bf16.mxu0 %v28549_v11  ;;  %7408 = vmatprep.mubr.bf16.mxu1 %v19843_v26 }
 0x3ad   :  { %16711 = vmatprep.subr.bf16.mxu0 %v19845_v54  ;;  %16756 = vmatpush3.bf16.msra.mxu1 %v19846_v61  ;;  %v19851_v54 = vld [vmem:[%s28450_s2 + $0x338] ss:$12 sps:$4 sm:$0xff]  }
 0x3ae   :  { %16757 = vmatprep.subr.bf16.mxu1 %v19848_v24  ;;  %v19853_v24 = vld [vmem:[%s28450_s2 + $0x1a0] ss:$12 sps:$4 sm:$0xff]  }
 0x3af   :  { %16712 = vmatpush3.bf16.msra.mxu0 %v19847_v37 }
 0x3b0   :  { %16713 = vmatprep.subr.bf16.mxu0 %v19849_v60 }
 0x3b1   :  { %16758 = vmatpush3.bf16.msra.mxu1 %v19851_v54 }
 0x3b2   :  { %v6805_v46 = vpop.f32.mrf.mxu0  ;;  %7332 = vmatmul.mubr.bf16.gmra.mxu0 %v18537_v58  ;;  %v19852_v58 = vld [vmem:[%s28453_s1 + $0x2a4] ss:$84 sps:$4 sm:$0xff]  }
 0x3b3   :  { %7409 = vmatmul.mubr.bf16.gmra.mxu1 %v19850_v53  ;;  %v6888_v26 = vpop.f32.mrf.mxu1  ;;  %v6806_v0 = vadd.f32 %v6805_v46, %v24217_v56  ;;  %7341 = vmatprep.mubr.bf16.mxu0 %v28549_v11  ;;  %v19854_v46 = vld [vmem:[%s28450_s2 + $0x3e0] ss:$12 sps:$4 sm:$0xff]   ;;  %v19855_v53 = vld [vmem:[%s28450_s2 + $0x248] ss:$12 sps:$4 sm:$0xff]  }
 0x3b4   :  { %v6807_v61 = vpop.f32.mrf.mxu0  ;;  %7416 = vmatprep.mubr.bf16.mxu1 %v19852_v58  ;;  %16714 = vmatpush3.bf16.msra.mxu0 %v19853_v24  ;;  %v18538_v24 = vld [vmem:[%s28453_s1 + $0x2f0] ss:$84 sps:$4 sm:$0xff]  }
 0x3b5   :  { %v6890_v37 = vpop.f32.mrf.mxu1  ;;  %v24530_v56 = vadd.f32 %v6888_v26, %v6806_v0  ;;  %v6808_v60 = vadd.f32 %v6807_v61, %v24232_v6  ;;  %16759 = vmatprep.subr.bf16.mxu1 %v19854_v46  ;;  %16715 = vmatprep.subr.bf16.mxu0 %v19855_v53  ;;  %v19856_v0 = vld [vmem:[%s28450_s2 + $0x320] ss:$12 sps:$4 sm:$0xff]   ;;  %v19857_v53 = vld [vmem:[%s28450_s2 + $0x188] ss:$12 sps:$4 sm:$0xff]  }
 0x3b6   :  { %v6809_v54 = vpop.f32.mrf.mxu0  ;;  %16760 = vmatpush3.bf16.msra.mxu1 %v19856_v0  ;;  %v19860_v0 = vld [vmem:[%s28453_s1 + $0x2a0] ss:$84 sps:$4 sm:$0xff]  }
 0x3b7   :  { %v6892_v58 = vpop.f32.mrf.mxu1  ;;  %v24542_v26 = vadd.f32 %v6890_v37, %v6808_v60  ;;  %v6810_v6 = vadd.f32 %v6809_v54, %v24251_v45  ;;  %v19858_v37 = vld [vmem:[%s28450_s2 + $0x3c8] ss:$12 sps:$4 sm:$0xff]   ;;  %v19859_v60 = vld [vmem:[%s28450_s2 + $0x5f0] ss:$12 sps:$4 sm:$0xff]  }
 0x3b8   :  { %v24548_v61 = vpop.f32.mrf.mxu0  ;;  %16716 = vmatpush3.bf16.msra.mxu0 %v19857_v53  ;;  %16761 = vmatprep.subr.bf16.mxu1 %v19858_v37 }
 0x3b9   :  { %v24550_v46 = vpop.f32.mrf.mxu1  ;;  %v24558_v45 = vadd.f32 %v6892_v58, %v6810_v6  ;;  %16793 = vmatprep.subr.bf16.mxu0 %v19859_v60  ;;  %v19861_v58 = vld [vmem:[%s28450_s2 + $0x308] ss:$12 sps:$4 sm:$0xff]   ;;  %v19862_v6 = vld [vmem:[%s28453_s1 + $0xc] ss:$84 sps:$4 sm:$0xff]  }
 0x3ba   :  { %v6815_v54 = vpop.f32.mrf.mxu0  ;;  %7342 = vmatmul.mubr.bf16.gmra.mxu0 %v18538_v24  ;;  %16762 = vmatpush3.bf16.msra.mxu1 %v19861_v58  ;;  %v19863_v60 = vld [vmem:[%s28453_s1 + $0x14] ss:$84 sps:$4 sm:$0xff]  }
 0x3bb   :  { %7417 = vmatmul.mubr.bf16.gmra.mxu1 %v19860_v0  ;;  %v6898_v53 = vpop.f32.mrf.mxu1  ;;  %v6816_v63 = vadd.f32 %v6815_v54, %v24264_v40  ;;  %7457 = vmatprep.mubr.bf16.mxu0 %v19862_v6  ;;  %v19864_v40 = vld [vmem:[%s28450_s2 + $0x770] ss:$12 sps:$4 sm:$0xff]  }
 0x3bc   :  { %v6817_v37 = vpop.f32.mrf.mxu0  ;;  %7530 = vmatprep.mubr.bf16.mxu1 %v19863_v60  ;;  %16839 = vmatprep.subr.bf16.mxu1 %v19864_v40  ;;  %v19865_v40 = vld [vmem:[%s28453_s1 + $0x8] ss:$84 sps:$4 sm:$0xff]  }
 0x3bd   :  { %v6900_v24 = vpop.f32.mrf.mxu1  ;;  %v6818_v54 = vadd.f32 %v6817_v37, %v24279_v33  ;;  %v24580_v0 = vadd.f32 %v6898_v53, %v6816_v63  ;;  %v19866_v63 = vld [vmem:[%s28453_s1 + $0x10] ss:$84 sps:$4 sm:$0xff]  }
 0x3be   :  { %v6819_v58 = vpop.f32.mrf.mxu0  ;;  %v19867_v53 = vld [vmem:[%s28450_s2 + $0x530] ss:$12 sps:$4 sm:$0xff]  }
 0x3bf   :  { %v6902_v35 = vpop.f32.mrf.mxu1  ;;  %v6820_v6 = vadd.f32 %v6819_v58, %v24300_v21  ;;  %v24583_v44 = vadd.f32 %v6900_v24, %v6818_v54  ;;  %v19869_v54 = vld [vmem:[%s28450_s2 + $0x5d8] ss:$12 sps:$4 sm:$0xff]  }
 0x3c0   :  { %v24585_v13 = vpop.f32.mrf.mxu0 }
 0x3c1   :  { %v24587_v32 = vpop.f32.mrf.mxu1  ;;  %v24589_v60 = vadd.f32 %v6902_v35, %v6820_v6  ;;  %v19868_v35 = vld [vmem:[%s28453_s1 + $0xb4] ss:$84 sps:$4 sm:$0xff]   ;;  %v19871_v6 = vld [vmem:[%s28450_s2 + $0x6b0] ss:$12 sps:$4 sm:$0xff]  }
 0x3c2   :  { %v6825_v34 = vpop.f32.mrf.mxu0  ;;  %7458 = vmatmul.mubr.bf16.vlgmr.msra.gmra.mxu0 %v19865_v40 }
 0x3c3   :  { %7531 = vmatmul.mubr.bf16.vlgmr.msra.gmra.mxu1 %v19866_v63  ;;  %v6908_v33 = vpop.f32.mrf.mxu1  ;;  %v6826_v21 = vadd.f32 %v6825_v34, %v24310_v49  ;;  %16794 = vmatpush3.bf16.msra.mxu0 %v19867_v53  ;;  %v19870_v34 = vld [vmem:[%s28453_s1 + $0xbc] ss:$84 sps:$4 sm:$0xff]   ;;  %v19872_v53 = vld [vmem:[%s28450_s2 + $0x758] ss:$12 sps:$4 sm:$0xff]  }
 0x3c4   :  { %7465 = vmatprep.mubr.bf16.mxu0 %v19868_v35  ;;  %v6827_v37 = vpop.f32.mrf.mxu0  ;;  %16795 = vmatprep.subr.bf16.mxu0 %v19869_v54 }
 0x3c5   :  { %v6910_v24 = vpop.f32.mrf.mxu1  ;;  %7538 = vmatprep.mubr.bf16.mxu1 %v19870_v34  ;;  %v6828_v49 = vadd.f32 %v6827_v37, %v24325_v31  ;;  %v24611_v58 = vadd.f32 %v6908_v33, %v6826_v21  ;;  %16840 = vmatpush3.bf16.msra.mxu1 %v19871_v6  ;;  %v19873_v31 = vld [vmem:[%s28450_s2 + $0x518] ss:$12 sps:$4 sm:$0xff]   ;;  %v19874_v37 = vld [vmem:[%s28450_s2 + $0x5c0] ss:$12 sps:$4 sm:$0xff]  }
 0x3c6   :  { %v6829_v40 = vpop.f32.mrf.mxu0  ;;  %16841 = vmatprep.subr.bf16.mxu1 %v19872_v53  ;;  %v19877_v6 = vld [vmem:[%s28453_s1 + $0xb8] ss:$84 sps:$4 sm:$0xff]  }
 0x3c7   :  { %v6912_v63 = vpop.f32.mrf.mxu1  ;;  %v6830_v35 = vadd.f32 %v6829_v40, %v24349_v23  ;;  %v24620_v54 = vadd.f32 %v6910_v24, %v6828_v49  ;;  %16796 = vmatpush3.bf16.msra.mxu0 %v19873_v31  ;;  %v19875_v23 = vld [vmem:[%s28450_s2 + $0x698] ss:$12 sps:$4 sm:$0xff]   ;;  %v19878_v53 = vld [vmem:[%s28450_s2 + $0x500] ss:$12 sps:$4 sm:$0xff]  }
 0x3c8   :  { %v24625_v33 = vpop.f32.mrf.mxu0  ;;  %16797 = vmatprep.subr.bf16.mxu0 %v19874_v37  ;;  %v19876_v49 = vld [vmem:[%s28453_s1 + $0xb0] ss:$84 sps:$4 sm:$0xff]  }
 0x3c9   :  { %v24627_v21 = vpop.f32.mrf.mxu1  ;;  %v24632_v34 = vadd.f32 %v6912_v63, %v6830_v35  ;;  %16842 = vmatpush3.bf16.msra.mxu1 %v19875_v23  ;;  %v19879_v35 = vld [vmem:[%s28453_s1 + $0x15c] ss:$84 sps:$4 sm:$0xff]   ;;  %v19880_v23 = vld [vmem:[%s28453_s1 + $0x164] ss:$84 sps:$4 sm:$0xff]  }
 0x3ca   :  { %v6835_v24 = vpop.f32.mrf.mxu0  ;;  %7466 = vmatmul.mubr.bf16.gmra.mxu0 %v19876_v49 }
 0x3cb   :  { %7539 = vmatmul.mubr.bf16.gmra.mxu1 %v19877_v6  ;;  %v6918_v40 = vpop.f32.mrf.mxu1  ;;  %v6836_v63 = vadd.f32 %v6835_v24, %v24359_v1  ;;  %16798 = vmatpush3.bf16.msra.mxu0 %v19878_v53  ;;  %v19881_v1 = vld [vmem:[%s28450_s2 + $0x5a8] ss:$12 sps:$4 sm:$0xff]   ;;  %v19882_v6 = vld [vmem:[%s28450_s2 + $0x740] ss:$12 sps:$4 sm:$0xff]  }
 0x3cc   :  { %7473 = vmatprep.mubr.bf16.mxu0 %v19879_v35  ;;  %v6837_v31 = vpop.f32.mrf.mxu0  ;;  %7546 = vmatprep.mubr.bf16.mxu1 %v19880_v23  ;;  %v19883_v23 = vld [vmem:[%s28450_s2 + $0x680] ss:$12 sps:$4 sm:$0xff]  }
 0x3cd   :  { %v6920_v37 = vpop.f32.mrf.mxu1  ;;  %16799 = vmatprep.subr.bf16.mxu0 %v19881_v1  ;;  %v6838_v24 = vadd.f32 %v6837_v31, %v24374_v20  ;;  %v24657_v49 = vadd.f32 %v6918_v40, %v6836_v63  ;;  %16843 = vmatprep.subr.bf16.mxu1 %v19882_v6  ;;  %v19884_v20 = vld [vmem:[%s28450_s2 + $0x4e8] ss:$12 sps:$4 sm:$0xff]  }
 0x3ce   :  { %v6839_v53 = vpop.f32.mrf.mxu0  ;;  %16844 = vmatpush3.bf16.msra.mxu1 %v19883_v23  ;;  %v19885_v40 = vld [vmem:[%s28450_s2 + $0x728] ss:$12 sps:$4 sm:$0xff]  }
 0x3cf   :  { %v6922_v35 = vpop.f32.mrf.mxu1  ;;  %v6840_v51 = vadd.f32 %v6839_v53, %v24389_v39  ;;  %v24666_v55 = vadd.f32 %v6920_v37, %v6838_v24  ;;  %16800 = vmatpush3.bf16.msra.mxu0 %v19884_v20  ;;  %16845 = vmatprep.subr.bf16.mxu1 %v19885_v40  ;;  %v19886_v39 = vld [vmem:[%s28450_s2 + $0x590] ss:$12 sps:$4 sm:$0xff]   ;;  %v19887_v24 = vld [vmem:[%s28453_s1 + $0x158] ss:$84 sps:$4 sm:$0xff]   ;;  %v19888_v6 = vld [vmem:[%s28453_s1 + $0x160] ss:$84 sps:$4 sm:$0xff]  }
 0x3d0   :  { %v24674_v63 = vpop.f32.mrf.mxu0  ;;  %16801 = vmatprep.subr.bf16.mxu0 %v19886_v39  ;;  %v19889_v20 = vld [vmem:[%s28450_s2 + $0x4d0] ss:$12 sps:$4 sm:$0xff]   ;;  %v19891_v39 = vld [vmem:[%s28453_s1 + $0x204] ss:$84 sps:$4 sm:$0xff]  }
 0x3d1   :  { %v24676_v31 = vpop.f32.mrf.mxu1  ;;  %v24681_v37 = vadd.f32 %v6922_v35, %v6840_v51  ;;  %v19890_v51 = vld [vmem:[%s28450_s2 + $0x668] ss:$12 sps:$4 sm:$0xff]  }
 0x3d2   :  { %v6845_v1 = vpop.f32.mrf.mxu0  ;;  %7474 = vmatmul.mubr.bf16.gmra.mxu0 %v19887_v24  ;;  %16846 = vmatpush3.bf16.msra.mxu1 %v19890_v51 }
 0x3d3   :  { %7547 = vmatmul.mubr.bf16.gmra.mxu1 %v19888_v6  ;;  %v6928_v53 = vpop.f32.mrf.mxu1  ;;  %v6846_v23 = vadd.f32 %v6845_v1, %v24406_v17  ;;  %16802 = vmatpush3.bf16.msra.mxu0 %v19889_v20  ;;  %v19892_v17 = vld [vmem:[%s28453_s1 + $0x20c] ss:$84 sps:$4 sm:$0xff]   ;;  %v19893_v6 = vld [vmem:[%s28450_s2 + $0x710] ss:$12 sps:$4 sm:$0xff]   ;;  %v19894_v20 = vld [vmem:[%s28450_s2 + $0x578] ss:$12 sps:$4 sm:$0xff]  }
 0x3d4   :  { %v6847_v35 = vpop.f32.mrf.mxu0  ;;  %7481 = vmatprep.mubr.bf16.mxu0 %v19891_v39  ;;  %7554 = vmatprep.mubr.bf16.mxu1 %v19892_v17  ;;  %v19900_v17 = vld [vmem:[%s28453_s1 + $0x208] ss:$84 sps:$4 sm:$0xff]  }
 0x3d5   :  { %v6930_v40 = vpop.f32.mrf.mxu1  ;;  %v6848_v1 = vadd.f32 %v6847_v35, %v24412_v3  ;;  %v24703_v24 = vadd.f32 %v6928_v53, %v6846_v23  ;;  %16847 = vmatprep.subr.bf16.mxu1 %v19893_v6  ;;  %16803 = vmatprep.subr.bf16.mxu0 %v19894_v20  ;;  %v19895_v3 = vld [vmem:[%s28450_s2 + $0x650] ss:$12 sps:$4 sm:$0xff]   ;;  %v19896_v53 = vld [vmem:[%s28450_s2 + $0x4b8] ss:$12 sps:$4 sm:$0xff]   ;;  %v19903_v6 = vld [vmem:[%s28453_s1 + $0x2b4] ss:$84 sps:$4 sm:$0xff]  }
 0x3d6   :  { %v6849_v51 = vpop.f32.mrf.mxu0  ;;  %16848 = vmatpush3.bf16.msra.mxu1 %v19895_v3  ;;  %v19897_v23 = vld [vmem:[%s28450_s2 + $0x6f8] ss:$12 sps:$4 sm:$0xff]   ;;  %v19904_v20 = vld [vmem:[%s28450_s2 + $0x4a0] ss:$12 sps:$4 sm:$0xff]  }
 0x3d7   :  { %v6932_v39 = vpop.f32.mrf.mxu1  ;;  %v6850_v5 = vadd.f32 %v6849_v51, %v24414_v52  ;;  %v24712_v10 = vadd.f32 %v6930_v40, %v6848_v1  ;;  %16804 = vmatpush3.bf16.msra.mxu0 %v19896_v53  ;;  %16849 = vmatprep.subr.bf16.mxu1 %v19897_v23  ;;  %v19898_v52 = vld [vmem:[%s28450_s2 + $0x560] ss:$12 sps:$4 sm:$0xff]   ;;  %v19901_v1 = vld [vmem:[%s28450_s2 + $0x638] ss:$12 sps:$4 sm:$0xff]   ;;  %v19908_v53 = vld [vmem:[%s28450_s2 + $0x488] ss:$12 sps:$4 sm:$0xff]  }
 0x3d8   :  { %16805 = vmatprep.subr.bf16.mxu0 %v19898_v52  ;;  %v19899_v40 = vld [vmem:[%s28453_s1 + $0x200] ss:$84 sps:$4 sm:$0xff]   ;;  %v19910_v52 = vld [vmem:[%s28450_s2 + $0x8f0] ss:$12 sps:$4 sm:$0xff]  }
 0x3d9   :  { %v24726_v35 = vadd.f32 %v6932_v39, %v6850_v5  ;;  %v19902_v5 = vld [vmem:[%s28453_s1 + $0x2ac] ss:$84 sps:$4 sm:$0xff]   ;;  %v19906_v39 = vld [vmem:[%s28450_s2 + $0x548] ss:$12 sps:$4 sm:$0xff]  }
 0x3da   :  { %7482 = vmatmul.mubr.bf16.gmra.mxu0 %v19899_v40  ;;  %16850 = vmatpush3.bf16.msra.mxu1 %v19901_v1  ;;  %v19905_v51 = vld [vmem:[%s28450_s2 + $0x6e0] ss:$12 sps:$4 sm:$0xff]   ;;  %v19909_v23 = vld [vmem:[%s28450_s2 + $0x6c8] ss:$12 sps:$4 sm:$0xff]  }
 0x3db   :  { %7555 = vmatmul.mubr.bf16.gmra.mxu1 %v19900_v17  ;;  %7489 = vmatprep.mubr.bf16.mxu0 %v19902_v5  ;;  %v19907_v3 = vld [vmem:[%s28450_s2 + $0x620] ss:$12 sps:$4 sm:$0xff]   ;;  %v19911_v40 = vld [vmem:[%s28453_s1 + $0x2a8] ss:$84 sps:$4 sm:$0xff]   ;;  %v19912_v17 = vld [vmem:[%s28453_s1 + $0x2b0] ss:$84 sps:$4 sm:$0xff]  }
 0x3dc   :  { %7562 = vmatprep.mubr.bf16.mxu1 %v19903_v6  ;;  %16806 = vmatpush3.bf16.msra.mxu0 %v19904_v20  ;;  %v19913_v1 = vld [vmem:[%s28450_s2 + $0x608] ss:$12 sps:$4 sm:$0xff]   ;;  %v19914_v5 = vld [vmem:[%s28453_s1 + $0x1c] ss:$84 sps:$4 sm:$0xff]   ;;  %v19915_v6 = vld [vmem:[%s28453_s1 + $0x24] ss:$84 sps:$4 sm:$0xff]  }
 0x3dd   :  { %16851 = vmatprep.subr.bf16.mxu1 %v19905_v51  ;;  %16807 = vmatprep.subr.bf16.mxu0 %v19906_v39  ;;  %v19916_v20 = vld [vmem:[%s28450_s2 + $0xa70] ss:$12 sps:$4 sm:$0xff]   ;;  %v6480_v51 = vadd.f32 %v23924_v30, %v21127_v12  ;;  %v19917_v39 = vld [vmem:[%s28453_s1 + $0x18] ss:$84 sps:$4 sm:$0xff]  }
 0x3de   :  { %16852 = vmatpush3.bf16.msra.mxu1 %v19907_v3  ;;  %v19918_v3 = vld [vmem:[%s28453_s1 + $0x20] ss:$84 sps:$4 sm:$0xff]   ;;  %v19920_v30 = vld [vmem:[%s28453_s1 + $0xc4] ss:$84 sps:$4 sm:$0xff]  }
 0x3df   :  { %16853 = vmatprep.subr.bf16.mxu1 %v19909_v23  ;;  %v19919_v23 = vld [vmem:[%s28450_s2 + $0x830] ss:$12 sps:$4 sm:$0xff]  }
 0x3e0   :  { %16808 = vmatpush3.bf16.msra.mxu0 %v19908_v53  ;;  %v6563_v53 = vadd.f32 %v23926_v18, %v6480_v51  ;;  %v19926_v51 = vld [vmem:[%s28450_s2 + $0x8c0] ss:$12 sps:$4 sm:$0xff]  }
 0x3e1   :  { %16885 = vmatprep.subr.bf16.mxu0 %v19910_v52  ;;  %v19921_v52 = vld [vmem:[%s28450_s2 + $0x8d8] ss:$12 sps:$4 sm:$0xff]  }
 0x3e2   :  { %7490 = vmatmul.mubr.bf16.gmra.mxu0 %v19911_v40  ;;  %16854 = vmatpush3.bf16.msra.mxu1 %v19913_v1  ;;  %v19922_v40 = vld [vmem:[%s28453_s1 + $0xcc] ss:$84 sps:$4 sm:$0xff]   ;;  %v6646_v18 = vadd.f32 %v24241_v42, %v6563_v53  ;;  %v19924_v1 = vld [vmem:[%s28450_s2 + $0xa58] ss:$12 sps:$4 sm:$0xff]   ;;  %v24817_v42 = vpop.f32.mrf.mxu1 }
 0x3e3   :  { %7563 = vmatmul.mubr.bf16.gmra.mxu1 %v19912_v17  ;;  %7603 = vmatprep.mubr.bf16.mxu0 %v19914_v5  ;;  %v19923_v17 = vld [vmem:[%s28450_s2 + $0x9b0] ss:$12 sps:$4 sm:$0xff]   ;;  %v6490_v5 = vadd.f32 %v23979_v48, %v21127_v12  ;;  %v19927_v48 = vld [vmem:[%s28450_s2 + $0x998] ss:$12 sps:$4 sm:$0xff]   ;;  %v19928_v53 = vld [vmem:[%s28453_s1 + $0xc0] ss:$84 sps:$4 sm:$0xff]  }
 0x3e4   :  { %7676 = vmatprep.mubr.bf16.mxu1 %v19915_v6  ;;  %16931 = vmatprep.subr.bf16.mxu1 %v19916_v20  ;;  %v19925_v6 = vld [vmem:[%s28450_s2 + $0x818] ss:$12 sps:$4 sm:$0xff]   ;;  %v24815_v20 = vpop.f32.mrf.mxu0 }
 0x3ea   :  { %7604 = vmatmul.mubr.bf16.vlgmr.msra.gmra.mxu0 %v19917_v39  ;;  %v6729_v39 = vadd.f32 %v24243_v4, %v6646_v18  ;;  %v19930_v18 = vld [vmem:[%s28450_s2 + $0x800] ss:$12 sps:$4 sm:$0xff]  }
 0x3eb   :  { %7677 = vmatmul.mubr.bf16.vlgmr.msra.gmra.mxu1 %v19918_v3  ;;  %16886 = vmatpush3.bf16.msra.mxu0 %v19919_v23  ;;  %v19929_v23 = vld [vmem:[%s28453_s1 + $0xc8] ss:$84 sps:$4 sm:$0xff]  }
 0x3ec   :  { %7611 = vmatprep.mubr.bf16.mxu0 %v19920_v30  ;;  %16887 = vmatprep.subr.bf16.mxu0 %v19921_v52  ;;  %v6573_v52 = vadd.f32 %v23981_v7, %v6490_v5  ;;  %v6812_v4 = vadd.f32 %v24548_v61, %v6729_v39  ;;  %v19932_v7 = vld [vmem:[%s28453_s1 + $0x174] ss:$84 sps:$4 sm:$0xff]   ;;  %v19934_v39 = vld [vmem:[%s28450_s2 + $0xa40] ss:$12 sps:$4 sm:$0xff]  }
 0x3ed   :  { %7684 = vmatprep.mubr.bf16.mxu1 %v19922_v40  ;;  %16932 = vmatpush3.bf16.msra.mxu1 %v19923_v17  ;;  %v19931_v17 = vld [vmem:[%s28453_s1 + $0x16c] ss:$84 sps:$4 sm:$0xff]  }
 0x3ee   :  { %16933 = vmatprep.subr.bf16.mxu1 %v19924_v1  ;;  %v6656_v61 = vadd.f32 %v24287_v28, %v6573_v52  ;;  %v6895_v28 = vadd.f32 %v24550_v46, %v6812_v4  ;;  %v19936_v52 = vld [vmem:[%s28450_s2 + $0x7e8] ss:$12 sps:$4 sm:$0xff]   ;;  %v19938_v46 = vld [vmem:[%s28450_s2 + $0x890] ss:$12 sps:$4 sm:$0xff]  }
 0x3ef   :  { %16888 = vmatpush3.bf16.msra.mxu0 %v19925_v6 }
 0x3f0   :  { %16889 = vmatprep.subr.bf16.mxu0 %v19926_v51  ;;  %v6739_v4 = vadd.f32 %v24289_v2, %v6656_v61 }
 0x3f1   :  { %16934 = vmatpush3.bf16.msra.mxu1 %v19927_v48  ;;  %v6500_v48 = vadd.f32 %v24028_v41, %v21127_v12  ;;  %v19937_v41 = vld [vmem:[%s28450_s2 + $0xa28] ss:$12 sps:$4 sm:$0xff]  }
 0x3f2   :  { %v6971_v3 = vpop.f32.mrf.mxu0  ;;  %7612 = vmatmul.mubr.bf16.gmra.mxu0 %v19928_v53  ;;  %16935 = vmatprep.subr.bf16.mxu1 %v19934_v39  ;;  %v6822_v39 = vadd.f32 %v24585_v13, %v6739_v4  ;;  %v19943_v13 = vld [vmem:[%s28453_s1 + $0x214] ss:$84 sps:$4 sm:$0xff]  }
 0x3f3   :  { %7685 = vmatmul.mubr.bf16.gmra.mxu1 %v19929_v23  ;;  %v7054_v30 = vpop.f32.mrf.mxu1  ;;  %v6972_v40 = vadd.f32 %v6971_v3, %v24530_v56  ;;  %16890 = vmatpush3.bf16.msra.mxu0 %v19930_v18  ;;  %v19933_v56 = vld [vmem:[%s28450_s2 + $0x8a8] ss:$12 sps:$4 sm:$0xff]   ;;  %v19935_v23 = vld [vmem:[%s28450_s2 + $0x980] ss:$12 sps:$4 sm:$0xff]  }
 0x3f4   :  { %7619 = vmatprep.mubr.bf16.mxu0 %v19931_v17  ;;  %v6973_v1 = vpop.f32.mrf.mxu0  ;;  %7692 = vmatprep.mubr.bf16.mxu1 %v19932_v7  ;;  %v19939_v7 = vld [vmem:[%s28453_s1 + $0x168] ss:$84 sps:$4 sm:$0xff]  }
 0x3f5   :  { %v7056_v6 = vpop.f32.mrf.mxu1  ;;  %16891 = vmatprep.subr.bf16.mxu0 %v19933_v56  ;;  %v24848_v5 = vadd.f32 %v7054_v30, %v6972_v40  ;;  %v6974_v51 = vadd.f32 %v6973_v1, %v24542_v26  ;;  %16936 = vmatpush3.bf16.msra.mxu1 %v19935_v23  ;;  %v6583_v1 = vadd.f32 %v24030_v47, %v6500_v48  ;;  %v19940_v56 = vld [vmem:[%s28453_s1 + $0x170] ss:$84 sps:$4 sm:$0xff]   ;;  %v19942_v48 = vld [vmem:[%s28450_s2 + $0x968] ss:$12 sps:$4 sm:$0xff]  }
 0x3f6   :  { %v6975_v3 = vpop.f32.mrf.mxu0  ;;  %16937 = vmatprep.subr.bf16.mxu1 %v19937_v41  ;;  %v19941_v47 = vld [vmem:[%s28450_s2 + $0x7d0] ss:$12 sps:$4 sm:$0xff]   ;;  %v19946_v41 = vld [vmem:[%s28450_s2 + $0x878] ss:$12 sps:$4 sm:$0xff]  }
 0x3f7   :  { %v7058_v53 = vpop.f32.mrf.mxu1  ;;  %v24860_v30 = vadd.f32 %v7056_v6, %v6974_v51  ;;  %v6976_v26 = vadd.f32 %v6975_v3, %v24558_v45  ;;  %16892 = vmatpush3.bf16.msra.mxu0 %v19936_v52  ;;  %v6666_v23 = vadd.f32 %v24336_v38, %v6583_v1  ;;  %v19945_v52 = vld [vmem:[%s28450_s2 + $0xa10] ss:$12 sps:$4 sm:$0xff]   ;;  %v6905_v38 = vadd.f32 %v24587_v32, %v6822_v39  ;;  %v19948_v1 = vld [vmem:[%s28450_s2 + $0x7b8] ss:$12 sps:$4 sm:$0xff]  }
 0x3f8   :  { %v6977_v40 = vpop.f32.mrf.mxu0  ;;  %16893 = vmatprep.subr.bf16.mxu0 %v19938_v46  ;;  %v19949_v32 = vld [vmem:[%s28450_s2 + $0x9f8] ss:$12 sps:$4 sm:$0xff]  }
 0x3f9   :  { %v7060_v18 = vpop.f32.mrf.mxu1  ;;  %v24873_v45 = vadd.f32 %v7058_v53, %v6976_v26  ;;  %v6978_v17 = vadd.f32 %v6977_v40, %v6895_v28  ;;  %16938 = vmatpush3.bf16.msra.mxu1 %v19942_v48  ;;  %v6510_v40 = vadd.f32 %v24077_v19, %v21127_v12  ;;  %v19952_v48 = vld [vmem:[%s28453_s1 + $0x218] ss:$84 sps:$4 sm:$0xff]  }
 0x3fa   :  { %v6981_v6 = vpop.f32.mrf.mxu0  ;;  %7620 = vmatmul.mubr.bf16.gmra.mxu0 %v19939_v7  ;;  %16939 = vmatprep.subr.bf16.mxu1 %v19945_v52  ;;  %v6749_v7 = vadd.f32 %v24338_v50, %v6666_v23 }
 0x3fb   :  { %7693 = vmatmul.mubr.bf16.gmra.mxu1 %v19940_v56  ;;  %v7064_v51 = vpop.f32.mrf.mxu1  ;;  %v24883_v2 = vadd.f32 %v7060_v18, %v6978_v17  ;;  %v6982_v61 = vadd.f32 %v6981_v6, %v24580_v0  ;;  %16894 = vmatpush3.bf16.msra.mxu0 %v19941_v47  ;;  %v19944_v0 = vld [vmem:[%s28453_s1 + $0x21c] ss:$84 sps:$4 sm:$0xff]   ;;  %v6593_v39 = vadd.f32 %v24079_v15, %v6510_v40  ;;  %v19953_v15 = vld [vmem:[%s28450_s2 + $0x938] ss:$12 sps:$4 sm:$0xff]  }
 0x3fc   :  { %v6983_v3 = vpop.f32.mrf.mxu0  ;;  %7627 = vmatprep.mubr.bf16.mxu0 %v19943_v13  ;;  %7700 = vmatprep.mubr.bf16.mxu1 %v19944_v0  ;;  %v19947_v17 = vld [vmem:[%s28450_s2 + $0x950] ss:$12 sps:$4 sm:$0xff]  }
 0x3fd   :  { %v7066_v53 = vpop.f32.mrf.mxu1  ;;  %v6984_v28 = vadd.f32 %v6983_v3, %v24583_v44  ;;  %v24900_v26 = vadd.f32 %v7064_v51, %v6982_v61  ;;  %16895 = vmatprep.subr.bf16.mxu0 %v19946_v41  ;;  %16940 = vmatpush3.bf16.msra.mxu1 %v19947_v17  ;;  %v19951_v47 = vld [vmem:[%s28453_s1 + $0x210] ss:$84 sps:$4 sm:$0xff]   ;;  %v6676_v52 = vadd.f32 %v24379_v22, %v6593_v39 }
 0x3fe   :  { %v6985_v18 = vpop.f32.mrf.mxu0  ;;  %16941 = vmatprep.subr.bf16.mxu1 %v19949_v32  ;;  %v19954_v0 = vld [vmem:[%s28453_s1 + $0x2bc] ss:$84 sps:$4 sm:$0xff]  }
 0x3ff   :  { %v7068_v46 = vpop.f32.mrf.mxu1  ;;  %v6986_v44 = vadd.f32 %v6985_v18, %v24589_v60  ;;  %v24912_v4 = vadd.f32 %v7066_v53, %v6984_v28  ;;  %16896 = vmatpush3.bf16.msra.mxu0 %v19948_v1  ;;  %v19950_v60 = vld [vmem:[%s28450_s2 + $0x860] ss:$12 sps:$4 sm:$0xff]   ;;  %v6832_v53 = vadd.f32 %v24625_v33, %v6749_v7  ;;  %v19955_v33 = vld [vmem:[%s28453_s1 + $0x2c4] ss:$84 sps:$4 sm:$0xff]   ;;  %v19962_v7 = vld [vmem:[%s28450_s2 + $0xbf0] ss:$12 sps:$4 sm:$0xff]  }
 0x400   :  { %v6987_v6 = vpop.f32.mrf.mxu0  ;;  %16897 = vmatprep.subr.bf16.mxu0 %v19950_v60  ;;  %v19957_v18 = vld [vmem:[%s28450_s2 + $0x9e0] ss:$12 sps:$4 sm:$0xff]   ;;  %v19960_v60 = vld [vmem:[%s28450_s2 + $0x788] ss:$12 sps:$4 sm:$0xff]  }
 0x401   :  { %v7070_v19 = vpop.f32.mrf.mxu1  ;;  %v6988_v56 = vadd.f32 %v6987_v6, %v6905_v38  ;;  %v24927_v51 = vadd.f32 %v7068_v46, %v6986_v44  ;;  %16942 = vmatpush3.bf16.msra.mxu1 %v19953_v15  ;;  %v19958_v46 = vld [vmem:[%s28450_s2 + $0x848] ss:$12 sps:$4 sm:$0xff]   ;;  %v6520_v38 = vadd.f32 %v24197_v8, %v21127_v12  ;;  %v6915_v22 = vadd.f32 %v24627_v21, %v6832_v53  ;;  %v19959_v6 = vld [vmem:[%s28450_s2 + $0x920] ss:$12 sps:$4 sm:$0xff]  }
 0x402   :  { %v6991_v61 = vpop.f32.mrf.mxu0  ;;  %7628 = vmatmul.mubr.bf16.gmra.mxu0 %v19951_v47  ;;  %16943 = vmatprep.subr.bf16.mxu1 %v19957_v18  ;;  %v19961_v12 = vld [vmem:[%s28450_s2 + $0x9c8] ss:$12 sps:$4 sm:$0xff]   ;;  %v6759_v8 = vadd.f32 %v24381_v59, %v6676_v52 }
 0x403   :  { %7701 = vmatmul.mubr.bf16.gmra.mxu1 %v19952_v48  ;;  %v7074_v3 = vpop.f32.mrf.mxu1  ;;  %v6992_v50 = vadd.f32 %v6991_v61, %v24611_v58  ;;  %v24938_v13 = vadd.f32 %v7070_v19, %v6988_v56  ;;  %7635 = vmatprep.mubr.bf16.mxu0 %v19954_v0  ;;  %v19956_v58 = vld [vmem:[%s28450_s2 + $0x7a0] ss:$12 sps:$4 sm:$0xff]   ;;  %v6603_v56 = vadd.f32 %v24199_v25, %v6520_v38  ;;  %v19965_v25 = vld [vmem:[%s28450_s2 + $0x908] ss:$12 sps:$4 sm:$0xff]  }
 0x404   :  { %v6993_v23 = vpop.f32.mrf.mxu0  ;;  %7708 = vmatprep.mubr.bf16.mxu1 %v19955_v33  ;;  %16898 = vmatpush3.bf16.msra.mxu0 %v19956_v58  ;;  %v19963_v61 = vld [vmem:[%s28453_s1 + $0x2b8] ss:$84 sps:$4 sm:$0xff]   ;;  %v19964_v59 = vld [vmem:[%s28453_s1 + $0x2c0] ss:$84 sps:$4 sm:$0xff]   ;;  %v6842_v48 = vadd.f32 %v24674_v63, %v6759_v8 }
 0x405   :  { %v7076_v28 = vpop.f32.mrf.mxu1  ;;  %v6994_v41 = vadd.f32 %v6993_v23, %v24620_v54  ;;  %v24954_v40 = vadd.f32 %v7074_v3, %v6992_v50  ;;  %16899 = vmatprep.subr.bf16.mxu0 %v19958_v46  ;;  %16944 = vmatpush3.bf16.msra.mxu1 %v19959_v6  ;;  %v19966_v50 = vld [vmem:[%s28453_s1 + $0x2c] ss:$84 sps:$4 sm:$0xff]   ;;  %v19967_v63 = vld [vmem:[%s28453_s1 + $0x34] ss:$84 sps:$4 sm:$0xff]   ;;  %v6686_v23 = vadd.f32 %v24506_v62, %v6603_v56  ;;  %v19975_v56 = vld [vmem:[%s28450_s2 + $0xcb0] ss:$12 sps:$4 sm:$0xff]  }
 0x406   :  { %v6995_v44 = vpop.f32.mrf.mxu0  ;;  %16945 = vmatprep.subr.bf16.mxu1 %v19961_v12 }
 0x407   :  { %v7078_v17 = vpop.f32.mrf.mxu1  ;;  %v6996_v54 = vadd.f32 %v6995_v44, %v24632_v34  ;;  %v24966_v1 = vadd.f32 %v7076_v28, %v6994_v41  ;;  %v6925_v41 = vadd.f32 %v24676_v31, %v6842_v48  ;;  %v19970_v31 = vld [vmem:[%s28453_s1 + $0x30] ss:$84 sps:$4 sm:$0xff]  }
 0x408   :  { %v6997_v19 = vpop.f32.mrf.mxu0  ;;  %16900 = vmatpush3.bf16.msra.mxu0 %v19960_v60  ;;  %v19972_v60 = vld [vmem:[%s28453_s1 + $0xd4] ss:$84 sps:$4 sm:$0xff]  }
 0x409   :  { %v7080_v32 = vpop.f32.mrf.mxu1  ;;  %v6998_v21 = vadd.f32 %v6997_v19, %v6915_v22  ;;  %v24978_v34 = vadd.f32 %v7078_v17, %v6996_v54  ;;  %16977 = vmatprep.subr.bf16.mxu0 %v19962_v7  ;;  %16946 = vmatpush3.bf16.msra.mxu1 %v19965_v25  ;;  %v6769_v17 = vadd.f32 %v24508_v9, %v6686_v23 }
 0x40a   :  { %v7001_v39 = vpop.f32.mrf.mxu0  ;;  %7636 = vmatmul.mubr.bf16.gmra.mxu0 %v19963_v61 }
 0x40b   :  { %7709 = vmatmul.mubr.bf16.gmra.mxu1 %v19964_v59  ;;  %v7084_v47 = vpop.f32.mrf.mxu1  ;;  %v7002_v3 = vadd.f32 %v7001_v39, %v24657_v49  ;;  %v24992_v53 = vadd.f32 %v7080_v32, %v6998_v21  ;;  %7749 = vmatprep.mubr.bf16.mxu0 %v19966_v50  ;;  %v19968_v49 = vld [vmem:[%s28450_s2 + $0xd70] ss:$12 sps:$4 sm:$0xff]   ;;  %v6852_v6 = vadd.f32 %v24815_v20, %v6769_v17  ;;  %v19973_v20 = vld [vmem:[%s28450_s2 + $0xbd8] ss:$12 sps:$4 sm:$0xff]   ;;  %v19989_v17 = vld [vmem:[%s28450_s2 + $0xd28] ss:$12 sps:$4 sm:$0xff]  }
 0x40c   :  { %v7003_v15 = vpop.f32.mrf.mxu0  ;;  %7822 = vmatprep.mubr.bf16.mxu1 %v19967_v63  ;;  %17023 = vmatprep.subr.bf16.mxu1 %v19968_v49  ;;  %v19971_v32 = vld [vmem:[%s28450_s2 + $0xb30] ss:$12 sps:$4 sm:$0xff]   ;;  %v19976_v59 = vld [vmem:[%s28450_s2 + $0xd58] ss:$12 sps:$4 sm:$0xff]  }
 0x40d   :  { %v7086_v0 = vpop.f32.mrf.mxu1  ;;  %v7004_v28 = vadd.f32 %v7003_v15, %v24666_v55  ;;  %v25008_v33 = vadd.f32 %v7084_v47, %v7002_v3  ;;  %v19969_v55 = vld [vmem:[%s28453_s1 + $0x28] ss:$84 sps:$4 sm:$0xff]   ;;  %v6935_v47 = vadd.f32 %v24817_v42, %v6852_v6  ;;  %v19978_v15 = vld [vmem:[%s28450_s2 + $0xbc0] ss:$12 sps:$4 sm:$0xff]   ;;  %v19980_v42 = vld [vmem:[%s28453_s1 + $0xd0] ss:$84 sps:$4 sm:$0xff]  }
 0x40e   :  { %v7005_v58 = vpop.f32.mrf.mxu0  ;;  %v19981_v49 = vld [vmem:[%s28453_s1 + $0xd8] ss:$84 sps:$4 sm:$0xff]  }
 0x40f   :  { %v7088_v52 = vpop.f32.mrf.mxu1  ;;  %v7006_v18 = vadd.f32 %v7005_v58, %v24681_v37  ;;  %v25012_v46 = vadd.f32 %v7086_v0, %v7004_v28  ;;  %v19982_v28 = vld [vmem:[%s28450_s2 + $0xb00] ss:$12 sps:$4 sm:$0xff]   ;;  %v19983_v58 = vld [vmem:[%s28453_s1 + $0x17c] ss:$84 sps:$4 sm:$0xff]   ;;  %v19995_v6 = vld [vmem:[%s28453_s1 + $0x224] ss:$84 sps:$4 sm:$0xff]  }
 0x410   :  { %v7007_v38 = vpop.f32.mrf.mxu0 }
 0x411   :  { %v7090_v44 = vpop.f32.mrf.mxu1  ;;  %v7008_v22 = vadd.f32 %v7007_v38, %v6925_v41  ;;  %v25015_v54 = vadd.f32 %v7088_v52, %v7006_v18  ;;  %v19984_v52 = vld [vmem:[%s28453_s1 + $0x184] ss:$84 sps:$4 sm:$0xff]   ;;  %v19985_v41 = vld [vmem:[%s28450_s2 + $0xba8] ss:$12 sps:$4 sm:$0xff]   ;;  %v19986_v18 = vld [vmem:[%s28450_s2 + $0xd40] ss:$12 sps:$4 sm:$0xff]  }
 0x412   :  { %v7011_v62 = vpop.f32.mrf.mxu0  ;;  %7750 = vmatmul.mubr.bf16.vlgmr.msra.gmra.mxu0 %v19969_v55  ;;  %v19987_v38 = vld [vmem:[%s28450_s2 + $0xc80] ss:$12 sps:$4 sm:$0xff]  }
 0x413   :  { %7823 = vmatmul.mubr.bf16.vlgmr.msra.gmra.mxu1 %v19970_v31  ;;  %v7094_v37 = vpop.f32.mrf.mxu1  ;;  %v7012_v19 = vadd.f32 %v7011_v62, %v24703_v24  ;;  %v25025_v9 = vadd.f32 %v7090_v44, %v7008_v22  ;;  %16978 = vmatpush3.bf16.msra.mxu0 %v19971_v32  ;;  %v19974_v24 = vld [vmem:[%s28453_s1 + $0xdc] ss:$84 sps:$4 sm:$0xff]   ;;  %v19988_v44 = vld [vmem:[%s28450_s2 + $0xae8] ss:$12 sps:$4 sm:$0xff]   ;;  %v19991_v62 = vld [vmem:[%s28453_s1 + $0x178] ss:$84 sps:$4 sm:$0xff]  }
 0x414   :  { %7757 = vmatprep.mubr.bf16.mxu0 %v19972_v60  ;;  %v7013_v12 = vpop.f32.mrf.mxu0  ;;  %16979 = vmatprep.subr.bf16.mxu0 %v19973_v20  ;;  %v19990_v22 = vld [vmem:[%s28450_s2 + $0xb90] ss:$12 sps:$4 sm:$0xff]   ;;  %v19992_v55 = vld [vmem:[%s28453_s1 + $0x180] ss:$84 sps:$4 sm:$0xff]   ;;  %v19998_v60 = vld [vmem:[%s28450_s2 + $0xb78] ss:$12 sps:$4 sm:$0xff]  }
 0x415   :  { %v7096_v8 = vpop.f32.mrf.mxu1  ;;  %7830 = vmatprep.mubr.bf16.mxu1 %v19974_v24  ;;  %v7014_v21 = vadd.f32 %v7013_v12, %v24712_v10  ;;  %v25040_v7 = vadd.f32 %v7094_v37, %v7012_v19  ;;  %17024 = vmatpush3.bf16.msra.mxu1 %v19975_v56  ;;  %v19977_v10 = vld [vmem:[%s28450_s2 + $0xb18] ss:$12 sps:$4 sm:$0xff]   ;;  %v19993_v31 = vld [vmem:[%s28450_s2 + $0xad0] ss:$12 sps:$4 sm:$0xff]   ;;  %v19994_v37 = vld [vmem:[%s28450_s2 + $0xc68] ss:$12 sps:$4 sm:$0xff]  }
 0x416   :  { %v7015_v39 = vpop.f32.mrf.mxu0  ;;  %17025 = vmatprep.subr.bf16.mxu1 %v19976_v59  ;;  %v19996_v19 = vld [vmem:[%s28453_s1 + $0x22c] ss:$84 sps:$4 sm:$0xff]   ;;  %v19997_v32 = vld [vmem:[%s28450_s2 + $0xd10] ss:$12 sps:$4 sm:$0xff]   ;;  %v20001_v20 = vld [vmem:[%s28450_s2 + $0xcf8] ss:$12 sps:$4 sm:$0xff]  }
 0x417   :  { %v7098_v61 = vpop.f32.mrf.mxu1  ;;  %v7016_v48 = vadd.f32 %v7015_v39, %v24726_v35  ;;  %v25050_v3 = vadd.f32 %v7096_v8, %v7014_v21  ;;  %16980 = vmatpush3.bf16.msra.mxu0 %v19977_v10  ;;  %v19979_v35 = vld [vmem:[%s28450_s2 + $0xc98] ss:$12 sps:$4 sm:$0xff]   ;;  %v19999_v12 = vld [vmem:[%s28450_s2 + $0xc50] ss:$12 sps:$4 sm:$0xff]   ;;  %v20002_v24 = vld [vmem:[%s28450_s2 + $0xb60] ss:$12 sps:$4 sm:$0xff]  }
 0x418   :  { %v7017_v25 = vpop.f32.mrf.mxu0  ;;  %16981 = vmatprep.subr.bf16.mxu0 %v19978_v15  ;;  %v20000_v8 = vld [vmem:[%s28450_s2 + $0xab8] ss:$12 sps:$4 sm:$0xff]   ;;  %v20003_v21 = vld [vmem:[%s28453_s1 + $0x220] ss:$84 sps:$4 sm:$0xff]   ;;  %v20004_v56 = vld [vmem:[%s28453_s1 + $0x228] ss:$84 sps:$4 sm:$0xff]  }
 0x419   :  { %v7100_v50 = vpop.f32.mrf.mxu1  ;;  %v7018_v0 = vadd.f32 %v7017_v25, %v6935_v47  ;;  %v25058_v63 = vadd.f32 %v7098_v61, %v7016_v48  ;;  %17026 = vmatpush3.bf16.msra.mxu1 %v19979_v35  ;;  %v20005_v39 = vld [vmem:[%s28450_s2 + $0xc38] ss:$12 sps:$4 sm:$0xff]   ;;  %v20006_v61 = vld [vmem:[%s28453_s1 + $0x2cc] ss:$84 sps:$4 sm:$0xff]   ;;  %v20007_v59 = vld [vmem:[%s28453_s1 + $0x2d4] ss:$84 sps:$4 sm:$0xff]  }
 0x41a   :  { %7758 = vmatmul.mubr.bf16.gmra.mxu0 %v19980_v42  ;;  %17027 = vmatprep.subr.bf16.mxu1 %v19986_v18  ;;  %v20008_v47 = vld [vmem:[%s28450_s2 + $0xaa0] ss:$12 sps:$4 sm:$0xff]   ;;  %v20010_v10 = vld [vmem:[%s28450_s2 + $0xb48] ss:$12 sps:$4 sm:$0xff]  }
 0x41b   :  { %7831 = vmatmul.mubr.bf16.gmra.mxu1 %v19981_v49  ;;  %v25069_v23 = vadd.f32 %v7100_v50, %v7018_v0  ;;  %16982 = vmatpush3.bf16.msra.mxu0 %v19982_v28  ;;  %v20009_v48 = vld [vmem:[%s28450_s2 + $0xce0] ss:$12 sps:$4 sm:$0xff]   ;;  %v20012_v50 = vld [vmem:[%s28450_s2 + $0xa88] ss:$12 sps:$4 sm:$0xff]   ;;  %v20014_v0 = vld [vmem:[%s28450_s2 + $0xef0] ss:$12 sps:$4 sm:$0xff]  }
 0x41c   :  { %7765 = vmatprep.mubr.bf16.mxu0 %v19983_v58  ;;  %7838 = vmatprep.mubr.bf16.mxu1 %v19984_v52  ;;  %v20011_v25 = vld [vmem:[%s28450_s2 + $0xc20] ss:$12 sps:$4 sm:$0xff]   ;;  %v20013_v15 = vld [vmem:[%s28450_s2 + $0xcc8] ss:$12 sps:$4 sm:$0xff]   ;;  %v20016_v28 = vld [vmem:[%s28453_s1 + $0x2d0] ss:$84 sps:$4 sm:$0xff]  }
 0x41d   :  { %16983 = vmatprep.subr.bf16.mxu0 %v19985_v41  ;;  %17028 = vmatpush3.bf16.msra.mxu1 %v19987_v38  ;;  %v20015_v49 = vld [vmem:[%s28453_s1 + $0x2c8] ss:$84 sps:$4 sm:$0xff]  }
 0x41e   :  { %17029 = vmatprep.subr.bf16.mxu1 %v19989_v17  ;;  %v20017_v52 = vld [vmem:[%s28450_s2 + $0xc08] ss:$12 sps:$4 sm:$0xff]   ;;  %v20018_v41 = vld [vmem:[%s28453_s1 + $0x3c] ss:$84 sps:$4 sm:$0xff]   ;;  %v28550_v17 = vmov 0.0  }
 0x41f   :  { %16984 = vmatpush3.bf16.msra.mxu0 %v19988_v44  ;;  %v20019_v44 = vld [vmem:[%s28453_s1 + $0x44] ss:$84 sps:$4 sm:$0xff]  }
 0x420   :  { %16985 = vmatprep.subr.bf16.mxu0 %v19990_v22 }
 0x421   :  { %17030 = vmatpush3.bf16.msra.mxu1 %v19994_v37 }
 0x422   :  { %7766 = vmatmul.mubr.bf16.gmra.mxu0 %v19991_v62  ;;  %17031 = vmatprep.subr.bf16.mxu1 %v19997_v32 }
 0x423   :  { %7839 = vmatmul.mubr.bf16.gmra.mxu1 %v19992_v55  ;;  %16986 = vmatpush3.bf16.msra.mxu0 %v19993_v31 }
 0x424   :  { %7773 = vmatprep.mubr.bf16.mxu0 %v19995_v6  ;;  %7846 = vmatprep.mubr.bf16.mxu1 %v19996_v19 }
 0x425   :  { %16987 = vmatprep.subr.bf16.mxu0 %v19998_v60  ;;  %17032 = vmatpush3.bf16.msra.mxu1 %v19999_v12 }
 0x426   :  { %17033 = vmatprep.subr.bf16.mxu1 %v20001_v20  ;;  %v20020_v20 = vld [vmem:[%s28453_s1 + $0x38] ss:$84 sps:$4 sm:$0xff]  }
 0x427   :  { %16988 = vmatpush3.bf16.msra.mxu0 %v20000_v8 }
 0x428   :  { %16989 = vmatprep.subr.bf16.mxu0 %v20002_v24 }
 0x429   :  { %17034 = vmatpush3.bf16.msra.mxu1 %v20005_v39 }
 0x42a   :  { %7774 = vmatmul.mubr.bf16.gmra.mxu0 %v20003_v21  ;;  %17035 = vmatprep.subr.bf16.mxu1 %v20009_v48  ;;  %v20023_v21 = vld [vmem:[%s28453_s1 + $0xe4] ss:$84 sps:$4 sm:$0xff]   ;;  %v20026_v48 = vld [vmem:[%s28450_s2 + $0xfb0] ss:$12 sps:$4 sm:$0xff]  }
 0x42b   :  { %7847 = vmatmul.mubr.bf16.gmra.mxu1 %v20004_v56  ;;  %7781 = vmatprep.mubr.bf16.mxu0 %v20006_v61  ;;  %v20024_v61 = vld [vmem:[%s28450_s2 + $0xed8] ss:$12 sps:$4 sm:$0xff]  }
 0x42c   :  { %7854 = vmatprep.mubr.bf16.mxu1 %v20007_v59  ;;  %16990 = vmatpush3.bf16.msra.mxu0 %v20008_v47 }
 0x42d   :  { %16991 = vmatprep.subr.bf16.mxu0 %v20010_v10  ;;  %17036 = vmatpush3.bf16.msra.mxu1 %v20011_v25 }
 0x42e   :  { %17037 = vmatprep.subr.bf16.mxu1 %v20013_v15 }
 0x430   :  { %16992 = vmatpush3.bf16.msra.mxu0 %v20012_v50 }
 0x431   :  { %17069 = vmatprep.subr.bf16.mxu0 %v20014_v0  ;;  %17038 = vmatpush3.bf16.msra.mxu1 %v20017_v52  ;;  %v20027_v0 = vld [vmem:[%s28450_s2 + $0xe18] ss:$12 sps:$4 sm:$0xff]  }
 0x432   :  { %v7137_v35 = vpop.f32.mrf.mxu0  ;;  %7782 = vmatmul.mubr.bf16.gmra.mxu0 %v20015_v49  ;;  %17406 = vmatprep.subr.bf16.mxu1 %v28550_v17 }
 0x433   :  { %v7220_v42 = vpop.f32.mrf.mxu1  ;;  %7855 = vmatmul.mubr.bf16.gmra.mxu1 %v20016_v28  ;;  %v7138_v58 = vadd.f32 %v7137_v35, %v24848_v5  ;;  %7895 = vmatprep.mubr.bf16.mxu0 %v20018_v41  ;;  %v20030_v41 = vld [vmem:[%s28453_s1 + $0xe0] ss:$84 sps:$4 sm:$0xff]  }
 0x434   :  { %v7139_v18 = vpop.f32.mrf.mxu0  ;;  %7968 = vmatprep.mubr.bf16.mxu1 %v20019_v44  ;;  %v20032_v44 = vld [vmem:[%s28450_s2 + $0xe00] ss:$12 sps:$4 sm:$0xff]  }
 0x435   :  { %v7222_v38 = vpop.f32.mrf.mxu1  ;;  %v25187_v5 = vadd.f32 %v7220_v42, %v7138_v58  ;;  %v7140_v22 = vadd.f32 %v7139_v18, %v24860_v30  ;;  %v20021_v30 = vld [vmem:[%s28453_s1 + $0x40] ss:$84 sps:$4 sm:$0xff]   ;;  %v20031_v18 = vld [vmem:[%s28453_s1 + $0xe8] ss:$84 sps:$4 sm:$0xff]  }
 0x436   :  { %v7141_v62 = vpop.f32.mrf.mxu0  ;;  %v20028_v42 = vld [vmem:[%s28450_s2 + $0xec0] ss:$12 sps:$4 sm:$0xff]  }
 0x437   :  { %v7224_v55 = vpop.f32.mrf.mxu1  ;;  %v25190_v31 = vadd.f32 %v7222_v38, %v7140_v22  ;;  %v7142_v37 = vadd.f32 %v7141_v62, %v24873_v45  ;;  %v20033_v22 = vld [vmem:[%s28453_s1 + $0x18c] ss:$84 sps:$4 sm:$0xff]  }
 0x438   :  { %v7143_v6 = vpop.f32.mrf.mxu0 }
 0x439   :  { %v7226_v19 = vpop.f32.mrf.mxu1  ;;  %v25193_v32 = vadd.f32 %v7224_v55, %v7142_v37  ;;  %v7144_v60 = vadd.f32 %v7143_v6, %v24883_v2  ;;  %v20022_v2 = vld [vmem:[%s28450_s2 + $0xe30] ss:$12 sps:$4 sm:$0xff]   ;;  %v20034_v37 = vld [vmem:[%s28453_s1 + $0x194] ss:$84 sps:$4 sm:$0xff]  }
 0x43a   :  { %v7147_v12 = vpop.f32.mrf.mxu0  ;;  %7896 = vmatmul.mubr.bf16.vlgmr.msra.gmra.mxu0 %v20020_v20 }
 0x43b   :  { %v7230_v8 = vpop.f32.mrf.mxu1  ;;  %7969 = vmatmul.mubr.bf16.vlgmr.msra.gmra.mxu1 %v20021_v30  ;;  %v25202_v24 = vadd.f32 %v7226_v19, %v7144_v60  ;;  %v7148_v45 = vadd.f32 %v7147_v12, %v24900_v26  ;;  %17070 = vmatpush3.bf16.msra.mxu0 %v20022_v2  ;;  %v20025_v26 = vld [vmem:[%s28453_s1 + $0xec] ss:$84 sps:$4 sm:$0xff]  }
 0x43c   :  { %7903 = vmatprep.mubr.bf16.mxu0 %v20023_v21  ;;  %v7149_v56 = vpop.f32.mrf.mxu0  ;;  %17071 = vmatprep.subr.bf16.mxu0 %v20024_v61  ;;  %v20038_v21 = vld [vmem:[%s28450_s2 + $0xe90] ss:$12 sps:$4 sm:$0xff]  }
 0x43d   :  { %v7232_v39 = vpop.f32.mrf.mxu1  ;;  %7976 = vmatprep.mubr.bf16.mxu1 %v20025_v26  ;;  %v25217_v59 = vadd.f32 %v7230_v8, %v7148_v45  ;;  %v7150_v47 = vadd.f32 %v7149_v56, %v24912_v4  ;;  %17407 = vmatpush3.bf16.msra.mxu1 %v20026_v48  ;;  %v20036_v8 = vld [vmem:[%s28450_s2 + $0xf80] ss:$12 sps:$4 sm:$0xff]   ;;  %v20037_v45 = vld [vmem:[%s28450_s2 + $0xde8] ss:$12 sps:$4 sm:$0xff]  }
 0x43e   :  { %v7151_v10 = vpop.f32.mrf.mxu0  ;;  %17408 = vmatprep.subr.bf16.mxu1 %v28550_v17  ;;  %v20039_v26 = vld [vmem:[%s28453_s1 + $0x188] ss:$84 sps:$4 sm:$0xff]  }
 0x43f   :  { %v7234_v25 = vpop.f32.mrf.mxu1  ;;  %v25224_v50 = vadd.f32 %v7232_v39, %v7150_v47  ;;  %v7152_v15 = vadd.f32 %v7151_v10, %v24927_v51  ;;  %17072 = vmatpush3.bf16.msra.mxu0 %v20027_v0  ;;  %v20029_v51 = vld [vmem:[%s28450_s2 + $0xf98] ss:$12 sps:$4 sm:$0xff]  }
 0x440   :  { %v7153_v35 = vpop.f32.mrf.mxu0  ;;  %17073 = vmatprep.subr.bf16.mxu0 %v20028_v42  ;;  %v20040_v47 = vld [vmem:[%s28453_s1 + $0x190] ss:$84 sps:$4 sm:$0xff]  }
 0x441   :  { %v7236_v4 = vpop.f32.mrf.mxu1  ;;  %v25233_v49 = vadd.f32 %v7234_v25, %v7152_v15  ;;  %v7154_v28 = vadd.f32 %v7153_v35, %v24938_v13  ;;  %17409 = vmatpush3.bf16.msra.mxu1 %v20029_v51  ;;  %v20042_v25 = vld [vmem:[%s28450_s2 + $0xf68] ss:$12 sps:$4 sm:$0xff]  }
 0x442   :  { %v7157_v58 = vpop.f32.mrf.mxu0  ;;  %7904 = vmatmul.mubr.bf16.gmra.mxu0 %v20030_v41  ;;  %17410 = vmatprep.subr.bf16.mxu1 %v28550_v17  ;;  %v20043_v35 = vld [vmem:[%s28453_s1 + $0x234] ss:$84 sps:$4 sm:$0xff]  }
 0x443   :  { %v7240_v52 = vpop.f32.mrf.mxu1  ;;  %7977 = vmatmul.mubr.bf16.gmra.mxu1 %v20031_v18  ;;  %v25245_v38 = vadd.f32 %v7236_v4, %v7154_v28  ;;  %v7158_v13 = vadd.f32 %v7157_v58, %v24954_v40  ;;  %17074 = vmatpush3.bf16.msra.mxu0 %v20032_v44  ;;  %v20035_v40 = vld [vmem:[%s28450_s2 + $0xea8] ss:$12 sps:$4 sm:$0xff]   ;;  %v20045_v28 = vld [vmem:[%s28450_s2 + $0xe78] ss:$12 sps:$4 sm:$0xff]   ;;  %v20046_v18 = vld [vmem:[%s28450_s2 + $0xf50] ss:$12 sps:$4 sm:$0xff]  }
 0x444   :  { %7911 = vmatprep.mubr.bf16.mxu0 %v20033_v22  ;;  %v7159_v62 = vpop.f32.mrf.mxu0  ;;  %7984 = vmatprep.mubr.bf16.mxu1 %v20034_v37  ;;  %v20048_v22 = vld [vmem:[%s28450_s2 + $0xe60] ss:$12 sps:$4 sm:$0xff]  }
 0x445   :  { %v7242_v55 = vpop.f32.mrf.mxu1  ;;  %17075 = vmatprep.subr.bf16.mxu0 %v20035_v40  ;;  %v25260_v6 = vadd.f32 %v7240_v52, %v7158_v13  ;;  %v7160_v19 = vadd.f32 %v7159_v62, %v24966_v1  ;;  %17411 = vmatpush3.bf16.msra.mxu1 %v20036_v8  ;;  %v20049_v40 = vld [vmem:[%s28453_s1 + $0x230] ss:$84 sps:$4 sm:$0xff]  }
 0x446   :  { %v7161_v60 = vpop.f32.mrf.mxu0  ;;  %17412 = vmatprep.subr.bf16.mxu1 %v28550_v17  ;;  %v20052_v8 = vld [vmem:[%s28453_s1 + $0x2dc] ss:$84 sps:$4 sm:$0xff]  }
 0x447   :  { %v7244_v12 = vpop.f32.mrf.mxu1  ;;  %v25267_v20 = vadd.f32 %v7242_v55, %v7160_v19  ;;  %v7162_v30 = vadd.f32 %v7161_v60, %v24978_v34  ;;  %17076 = vmatpush3.bf16.msra.mxu0 %v20037_v45  ;;  %v20050_v19 = vld [vmem:[%s28453_s1 + $0x238] ss:$84 sps:$4 sm:$0xff]  }
 0x448   :  { %v7163_v1 = vpop.f32.mrf.mxu0  ;;  %17077 = vmatprep.subr.bf16.mxu0 %v20038_v21 }
 0x449   :  { %v7246_v2 = vpop.f32.mrf.mxu1  ;;  %v25277_v56 = vadd.f32 %v7244_v12, %v7162_v30  ;;  %v7164_v39 = vadd.f32 %v7163_v1, %v24992_v53  ;;  %v20041_v53 = vld [vmem:[%s28450_s2 + $0xdd0] ss:$12 sps:$4 sm:$0xff]   ;;  %17413 = vmatpush3.bf16.msra.mxu1 %v20042_v25  ;;  %v20053_v1 = vld [vmem:[%s28453_s1 + $0x2e4] ss:$84 sps:$4 sm:$0xff]  }
 0x44a   :  { %v7167_v61 = vpop.f32.mrf.mxu0  ;;  %7912 = vmatmul.mubr.bf16.gmra.mxu0 %v20039_v26  ;;  %17414 = vmatprep.subr.bf16.mxu1 %v28550_v17 }
 0x44b   :  { %v7250_v34 = vpop.f32.mrf.mxu1  ;;  %7985 = vmatmul.mubr.bf16.gmra.mxu1 %v20040_v47  ;;  %v25286_v48 = vadd.f32 %v7246_v2, %v7164_v39  ;;  %v7168_v10 = vadd.f32 %v7167_v61, %v25008_v33  ;;  %17078 = vmatpush3.bf16.msra.mxu0 %v20041_v53  ;;  %v20044_v33 = vld [vmem:[%s28453_s1 + $0x23c] ss:$84 sps:$4 sm:$0xff]   ;;  %v20055_v39 = vld [vmem:[%s28450_s2 + $0xe48] ss:$12 sps:$4 sm:$0xff]   ;;  %v18541_v61 = vld [vmem:[%s28454_s4 + $0x28c] ss:$12 sps:$4 sm:$0xff]  }
 0x44c   :  { %v7169_v15 = vpop.f32.mrf.mxu0  ;;  %7919 = vmatprep.mubr.bf16.mxu0 %v20043_v35  ;;  %7992 = vmatprep.mubr.bf16.mxu1 %v20044_v33 }
 0x44d   :  { %v7252_v0 = vpop.f32.mrf.mxu1  ;;  %v25301_v4 = vadd.f32 %v7250_v34, %v7168_v10  ;;  %v7170_v42 = vadd.f32 %v7169_v15, %v25012_v46  ;;  %17079 = vmatprep.subr.bf16.mxu0 %v20045_v28  ;;  %17415 = vmatpush3.bf16.msra.mxu1 %v20046_v18  ;;  %v20047_v46 = vld [vmem:[%s28450_s2 + $0xdb8] ss:$12 sps:$4 sm:$0xff]   ;;  %v20057_v15 = vld [vmem:[%s28450_s2 + $0xd88] ss:$12 sps:$4 sm:$0xff]  }
 0x44e   :  { %v7171_v51 = vpop.f32.mrf.mxu0  ;;  %17416 = vmatprep.subr.bf16.mxu1 %v28550_v17  ;;  %v20059_v28 = vld [vmem:[%s28453_s1 + $0x2e0] ss:$84 sps:$4 sm:$0xff]  }
 0x44f   :  { %v7254_v58 = vpop.f32.mrf.mxu1  ;;  %v25308_v52 = vadd.f32 %v7252_v0, %v7170_v42  ;;  %v7172_v41 = vadd.f32 %v7171_v51, %v25015_v54  ;;  %17080 = vmatpush3.bf16.msra.mxu0 %v20047_v46  ;;  %v20058_v42 = vld [vmem:[%s28453_s1 + $0x2d8] ss:$84 sps:$4 sm:$0xff]  }
 0x450   :  { %v7173_v13 = vpop.f32.mrf.mxu0  ;;  %17081 = vmatprep.subr.bf16.mxu0 %v20048_v22 }
 0x451   :  { %v7256_v44 = vpop.f32.mrf.mxu1  ;;  %v25321_v54 = vadd.f32 %v7254_v58, %v7172_v41  ;;  %v7174_v62 = vadd.f32 %v7173_v13, %v25025_v9  ;;  %v20051_v9 = vld [vmem:[%s28450_s2 + $0xf38] ss:$12 sps:$4 sm:$0xff]   ;;  %v20061_v41 = vld [vmem:[%s28453_s1 + $0x4c] ss:$84 sps:$4 sm:$0xff]  }
 0x452   :  { %v7177_v55 = vpop.f32.mrf.mxu0  ;;  %7920 = vmatmul.mubr.bf16.gmra.mxu0 %v20049_v40  ;;  %17417 = vmatpush3.bf16.msra.mxu1 %v20051_v9 }
 0x453   :  { %v7260_v37 = vpop.f32.mrf.mxu1  ;;  %7993 = vmatmul.mubr.bf16.gmra.mxu1 %v20050_v19  ;;  %v25330_v60 = vadd.f32 %v7256_v44, %v7174_v62  ;;  %v7178_v12 = vadd.f32 %v7177_v55, %v25040_v7  ;;  %7927 = vmatprep.mubr.bf16.mxu0 %v20052_v8  ;;  %v20054_v7 = vld [vmem:[%s28450_s2 + $0xda0] ss:$12 sps:$4 sm:$0xff]   ;;  %v18539_v62 = vld [vmem:[%s28454_s4 + $0x288] ss:$12 sps:$4 sm:$0xff]  }
 0x454   :  { %v7179_v30 = vpop.f32.mrf.mxu0  ;;  %8000 = vmatprep.mubr.bf16.mxu1 %v20053_v1  ;;  %17082 = vmatpush3.bf16.msra.mxu0 %v20054_v7  ;;  %v18544_v19 = vld [vmem:[%s28454_s4 + $0x274] ss:$12 sps:$4 sm:$0xff]   ;;  %v20062_v1 = vld [vmem:[%s28453_s1 + $0x48] ss:$84 sps:$4 sm:$0xff]  }
 0x455   :  { %v7262_v45 = vpop.f32.mrf.mxu1  ;;  %v25345_v2 = vadd.f32 %v7260_v37, %v7178_v12  ;;  %v7180_v21 = vadd.f32 %v7179_v30, %v25050_v3  ;;  %17418 = vmatprep.subr.bf16.mxu1 %v28550_v17  ;;  %17083 = vmatprep.subr.bf16.mxu0 %v20055_v39  ;;  %v20056_v3 = vld [vmem:[%s28450_s2 + $0xf20] ss:$12 sps:$4 sm:$0xff]  }
 0x456   :  { %v7181_v34 = vpop.f32.mrf.mxu0  ;;  %17419 = vmatpush3.bf16.msra.mxu1 %v20056_v3 }
 0x457   :  { %v7264_v26 = vpop.f32.mrf.mxu1  ;;  %v25355_v47 = vadd.f32 %v7262_v45, %v7180_v21  ;;  %v7182_v10 = vadd.f32 %v7181_v34, %v25058_v63  ;;  %17420 = vmatprep.subr.bf16.mxu1 %v28550_v17 }
 0x458   :  { %v7183_v53 = vpop.f32.mrf.mxu0  ;;  %17084 = vmatpush3.bf16.msra.mxu0 %v20057_v15 }
 0x459   :  { %v7266_v25 = vpop.f32.mrf.mxu1  ;;  %v25365_v0 = vadd.f32 %v7264_v26, %v7182_v10  ;;  %v7184_v35 = vadd.f32 %v7183_v53, %v25069_v23  ;;  %8712 = vmatprep.subr.bf16.mxu0 %v18541_v61  ;;  %v20060_v23 = vld [vmem:[%s28450_s2 + $0xf08] ss:$12 sps:$4 sm:$0xff]  }
 0x45a   :  { %v7303_v63 = vpop.f32.mrf.mxu0  ;;  %7928 = vmatmul.mubr.bf16.gmra.mxu0 %v20058_v42  ;;  %17421 = vmatpush3.bf16.msra.mxu1 %v20060_v23  ;;  %v20064_v61 = vld [vmem:[%s28453_s1 + $0xf4] ss:$84 sps:$4 sm:$0xff]  }
 0x45b   :  { %v16671_v33 = vpop.f32.mrf.mxu1  ;;  %8001 = vmatmul.mubr.bf16.gmra.mxu1 %v20059_v28  ;;  %v25374_v51 = vadd.f32 %v7266_v25, %v7184_v35  ;;  %v7304_v58 = vadd.f32 %v7303_v63, %v25187_v5  ;;  %8041 = vmatprep.mubr.bf16.mxu0 %v20061_v41  ;;  %v18545_v63 = vld [vmem:[%s28454_s4 + $0x258] ss:$12 sps:$4 sm:$0xff]  }
 0x45c   :  { %v7305_v18 = vpop.f32.mrf.mxu0  ;;  %17422 = vmatprep.mubr.msk.bf16.mxu1 %vm20078_vm0, %v28550_v17 }
 0x45d   :  { %v16672_v46 = vpop.f32.mrf.mxu1  ;;  %v7306_v55 = vadd.f32 %v7305_v18, %v25190_v31  ;;  %v8155_v12 = vmax.f32 %v7304_v58, 0.0  ;;  %v20063_v31 = vld [vmem:[%s28453_s1 + $0x50] ss:$84 sps:$4 sm:$0xff]  }
 0x45e   :  { %v25385_v13 = vadd.f32 %v16672_v46, %v16671_v33  ;;  %v7307_v44 = vpop.f32.mrf.mxu0  ;;  %v18550_v58 = vld [vmem:[%s28454_s4 + $0x244] ss:$12 sps:$4 sm:$0xff]  }
 0x45f   :  { %v16674_v22 = vpop.f32.mrf.mxu1  ;;  %v7308_v5 = vadd.f32 %v7307_v44, %v25193_v32  ;;  %v8156_v34 = vmax.f32 %v7306_v55, 0.0 }
 0x460   :  { %v7309_v37 = vpop.f32.mrf.mxu0 }
 0x461   :  { %v16675_v40 = vpop.f32.mrf.mxu1  ;;  %v8158_v9 = vmax.f32 %v7308_v5, 0.0  ;;  %v7310_v8 = vadd.f32 %v7309_v37, %v25202_v24  ;;  %v18542_v24 = vld [vmem:[%s28454_s4 + $0x270] ss:$12 sps:$4 sm:$0xff]  }
 0x462   :  { %v25396_v30 = vadd.f32 %v16675_v40, %v16674_v22  ;;  %v7313_v45 = vpop.f32.mrf.mxu0  ;;  %8042 = vmatmul.mubr.bf16.vlgmr.msra.gmra.mxu0 %v20062_v1  ;;  %v20065_v22 = vld [vmem:[%s28453_s1 + $0xf0] ss:$84 sps:$4 sm:$0xff]  }
 0x463   :  { %v16677_v32 = vpop.f32.mrf.mxu1  ;;  %17423 = vmatmul.mubr.bf16.vlgmr.msra.gmra.mxu1 %v20063_v31  ;;  %v25404_v7 = vpack.c.bf16 %v8158_v9, %v8155_v12  ;;  %v8159_v21 = vmax.f32 %v7310_v8, 0.0  ;;  %v7314_v39 = vadd.f32 %v7313_v45, %v25217_v59  ;;  %8713 = vmatpush1.bf16.msra.mxu0 %v18539_v62  ;;  %v18547_v59 = vld [vmem:[%s28454_s4 + $0x25c] ss:$12 sps:$4 sm:$0xff]  }
 0x464   :  { %8049 = vmatprep.mubr.bf16.mxu0 %v20064_v61  ;;  %v7315_v26 = vpop.f32.mrf.mxu0  ;;  %8714 = vmatprep.subr.bf16.mxu0 %v18544_v19  ;;  %v20067_v37 = vld [vmem:[%s28453_s1 + $0x19c] ss:$84 sps:$4 sm:$0xff]   ;;  %v18551_v31 = vld [vmem:[%s28454_s4 + $0x228] ss:$12 sps:$4 sm:$0xff]  }
 0x465   :  { %28551 = vst [vmem:[#allocation26_spill] sm:$0xff] %v25404_v7  ;;  %v16678_v10 = vpop.f32.mrf.mxu1  ;;  %17426 = vmatprep.mubr.msk.bf16.mxu1 %vm20078_vm0, %v28550_v17  ;;  %v25420_v15 = vpack.c.bf16 %v8159_v21, %v8156_v34  ;;  %v7316_v33 = vadd.f32 %v7315_v26, %v25224_v50  ;;  %v8161_v23 = vmax.f32 %v7314_v39, 0.0  ;;  %v20066_v50 = vld [vmem:[%s28453_s1 + $0xf8] ss:$84 sps:$4 sm:$0xff]   ;;  %v18556_v61 = vld [vmem:[%s28454_s4 + $0x214] ss:$12 sps:$4 sm:$0xff]  }
 0x466   :  { %v25418_v3 = vadd.f32 %v16678_v10, %v16677_v32  ;;  %v7317_v53 = vpop.f32.mrf.mxu0 }
 0x467   :  { %v16680_v25 = vpop.f32.mrf.mxu1  ;;  %28552 = vst [vmem:[#allocation27_spill] sm:$0xff] %v25420_v15  ;;  %v7318_v35 = vadd.f32 %v7317_v53, %v25233_v49  ;;  %8715 = vmatpush1.bf16.msra.mxu0 %v18542_v24  ;;  %v8162_v40 = vmax.f32 %v7316_v33, 0.0  ;;  %v20068_v53 = vld [vmem:[%s28453_s1 + $0x198] ss:$84 sps:$4 sm:$0xff]  }
 0x468   :  { %v7319_v42 = vpop.f32.mrf.mxu0  ;;  %8716 = vmatprep.subr.bf16.mxu0 %v18547_v59  ;;  %v20070_v33 = vld [vmem:[%s28453_s1 + $0x244] ss:$84 sps:$4 sm:$0xff]  }
 0x469   :  { %v16681_v28 = vpop.f32.mrf.mxu1  ;;  %v8164_v41 = vmax.f32 %v7318_v35, 0.0  ;;  %v7320_v18 = vadd.f32 %v7319_v42, %v25245_v38  ;;  %v18548_v38 = vld [vmem:[%s28454_s4 + $0x240] ss:$12 sps:$4 sm:$0xff]  }
 0x46a   :  { %v25431_v46 = vadd.f32 %v16681_v28, %v16680_v25  ;;  %v7323_v49 = vpop.f32.mrf.mxu0  ;;  %8050 = vmatmul.mubr.bf16.gmra.mxu0 %v20065_v22  ;;  %v18557_v22 = vld [vmem:[%s28454_s4 + $0x1f8] ss:$12 sps:$4 sm:$0xff]  }
 0x46b   :  { %v16683_v44 = vpop.f32.mrf.mxu1  ;;  %17427 = vmatmul.mubr.bf16.gmra.mxu1 %v20066_v50  ;;  %v25439_v5 = vpack.c.bf16 %v8164_v41, %v8161_v23  ;;  %v8165_v62 = vmax.f32 %v7320_v18, 0.0  ;;  %v7324_v55 = vadd.f32 %v7323_v49, %v25260_v6  ;;  %8717 = vmatpush1.bf16.msra.mxu0 %v18545_v63  ;;  %v18553_v6 = vld [vmem:[%s28454_s4 + $0x22c] ss:$12 sps:$4 sm:$0xff]  }
 0x46c   :  { %8057 = vmatprep.mubr.bf16.mxu0 %v20067_v37  ;;  %v7325_v19 = vpop.f32.mrf.mxu0  ;;  %8718 = vmatprep.subr.bf16.mxu0 %v18550_v58 }
 0x46d   :  { %28553 = vst [vmem:[#allocation28_spill] sm:$0xff] %v25439_v5  ;;  %v16684_v12 = vpop.f32.mrf.mxu1  ;;  %17430 = vmatprep.mubr.msk.bf16.mxu1 %vm20078_vm0, %v28550_v17  ;;  %v25457_v32 = vpack.c.bf16 %v8165_v62, %v8162_v40  ;;  %v7326_v21 = vadd.f32 %v7325_v19, %v25267_v20  ;;  %v8167_v34 = vmax.f32 %v7324_v55, 0.0  ;;  %v20069_v20 = vld [vmem:[%s28453_s1 + $0x1a0] ss:$84 sps:$4 sm:$0xff]  }
 0x46e   :  { %v25453_v9 = vadd.f32 %v16684_v12, %v16683_v44  ;;  %v7327_v8 = vpop.f32.mrf.mxu0 }
 0x46f   :  { %v25455_v45 = vpop.f32.mrf.mxu1  ;;  %28554 = vst [vmem:[#allocation29_spill] sm:$0xff] %v25457_v32  ;;  %v7328_v1 = vadd.f32 %v7327_v8, %v25277_v56  ;;  %8719 = vmatpush1.bf16.msra.mxu0 %v18548_v38  ;;  %v8168_v42 = vmax.f32 %v7326_v21, 0.0  ;;  %v18562_v38 = vld [vmem:[%s28454_s4 + $0x1e4] ss:$12 sps:$4 sm:$0xff]   ;;  %v20073_v21 = vld [vmem:[%s28453_s1 + $0x2ec] ss:$84 sps:$4 sm:$0xff]  }
 0x470   :  { %v7329_v39 = vpop.f32.mrf.mxu0  ;;  %8720 = vmatprep.subr.bf16.mxu0 %v18553_v6  ;;  %v20071_v6 = vld [vmem:[%s28453_s1 + $0x240] ss:$84 sps:$4 sm:$0xff]  }
 0x471   :  { %v25464_v24 = vpop.f32.mrf.mxu1  ;;  %v8170_v26 = vmax.f32 %v7328_v1, 0.0  ;;  %v7330_v10 = vadd.f32 %v7329_v39, %v25286_v48  ;;  %v18554_v48 = vld [vmem:[%s28454_s4 + $0x210] ss:$12 sps:$4 sm:$0xff]  }
 0x472   :  { %v7333_v56 = vpop.f32.mrf.mxu0  ;;  %8058 = vmatmul.mubr.bf16.gmra.mxu0 %v20068_v53 }
 0x473   :  { %v16689_v59 = vpop.f32.mrf.mxu1  ;;  %17431 = vmatmul.mubr.bf16.gmra.mxu1 %v20069_v20  ;;  %v25476_v25 = vpack.c.bf16 %v8170_v26, %v8167_v34  ;;  %v8171_v35 = vmax.f32 %v7330_v10, 0.0  ;;  %v7334_v63 = vadd.f32 %v7333_v56, %v25301_v4  ;;  %8721 = vmatpush1.bf16.msra.mxu0 %v18551_v31  ;;  %v18559_v4 = vld [vmem:[%s28454_s4 + $0x1fc] ss:$12 sps:$4 sm:$0xff]  }
 0x474   :  { %8065 = vmatprep.mubr.bf16.mxu0 %v20070_v33  ;;  %v7335_v28 = vpop.f32.mrf.mxu0  ;;  %8722 = vmatprep.subr.bf16.mxu0 %v18556_v61  ;;  %v18568_v33 = vld [vmem:[%s28454_s4 + $0x334] ss:$12 sps:$4 sm:$0xff]  }
 0x475   :  { %28555 = vst [vmem:[#allocation30_spill] sm:$0xff] %v25476_v25  ;;  %v16690_v58 = vpop.f32.mrf.mxu1  ;;  %17434 = vmatprep.mubr.msk.bf16.mxu1 %vm20078_vm0, %v28550_v17  ;;  %v25494_v49 = vpack.c.bf16 %v8171_v35, %v8168_v42  ;;  %v7336_v50 = vadd.f32 %v7335_v28, %v25308_v52  ;;  %v8173_v37 = vmax.f32 %v7334_v63, 0.0  ;;  %v20072_v52 = vld [vmem:[%s28453_s1 + $0x248] ss:$84 sps:$4 sm:$0xff]  }
 0x476   :  { %v25490_v23 = vadd.f32 %v16690_v58, %v16689_v59  ;;  %v7337_v41 = vpop.f32.mrf.mxu0  ;;  %v18563_v35 = vld [vmem:[%s28454_s4 + $0x348] ss:$12 sps:$4 sm:$0xff]  }
 0x477   :  { %v25492_v18 = vpop.f32.mrf.mxu1  ;;  %28556 = vst [vmem:[#allocation31_spill] sm:$0xff] %v25494_v49  ;;  %v7338_v44 = vadd.f32 %v7337_v41, %v25321_v54  ;;  %8723 = vmatpush1.bf16.msra.mxu0 %v18554_v48  ;;  %v8174_v39 = vmax.f32 %v7336_v50, 0.0  ;;  %v20075_v41 = vld [vmem:[%s28453_s1 + $0x2f0] ss:$84 sps:$4 sm:$0xff]  }
 0x478   :  { %v7339_v62 = vpop.f32.mrf.mxu0  ;;  %8724 = vmatprep.subr.bf16.mxu0 %v18559_v4 }
 0x479   :  { %v25501_v55 = vpop.f32.mrf.mxu1  ;;  %v8176_v40 = vmax.f32 %v7338_v44, 0.0  ;;  %v7340_v19 = vadd.f32 %v7339_v62, %v25330_v60  ;;  %v18560_v60 = vld [vmem:[%s28454_s4 + $0x1e0] ss:$12 sps:$4 sm:$0xff]  }
 0x47a   :  { %v7343_v54 = vpop.f32.mrf.mxu0  ;;  %8066 = vmatmul.mubr.bf16.gmra.mxu0 %v20071_v6 }
 0x47b   :  { %v16695_v12 = vpop.f32.mrf.mxu1  ;;  %17435 = vmatmul.mubr.bf16.gmra.mxu1 %v20072_v52  ;;  %v25513_v8 = vpack.c.bf16 %v8176_v40, %v8173_v37  ;;  %v8177_v1 = vmax.f32 %v7340_v19, 0.0  ;;  %v7344_v31 = vadd.f32 %v7343_v54, %v25345_v2  ;;  %8725 = vmatpush1.bf16.msra.mxu0 %v18557_v22  ;;  %v18565_v2 = vld [vmem:[%s28454_s4 + $0x34c] ss:$12 sps:$4 sm:$0xff]   ;;  %v18571_v37 = vld [vmem:[%s28454_s4 + $0x31c] ss:$12 sps:$4 sm:$0xff]   ;;  %v7387_v40 = vadd.f32 %v25385_v13, %v22844_v16 }
 0x47c   :  { %8073 = vmatprep.mubr.bf16.mxu0 %v20073_v21  ;;  %v7345_v61 = vpop.f32.mrf.mxu0  ;;  %8726 = vmatprep.subr.bf16.mxu0 %v18562_v38  ;;  %v7390_v13 = vadd.f32 %v25396_v30, %v22844_v16  ;;  %v7395_v30 = vadd.f32 %v25418_v3, %v22844_v16  ;;  %v18575_v3 = vld [vmem:[%s28454_s4 + $0x2e8] ss:$12 sps:$4 sm:$0xff]  }
 0x47d   :  { %28557 = vst [vmem:[#allocation32_spill] sm:$0xff] %v25513_v8  ;;  %v16696_v34 = vpop.f32.mrf.mxu1  ;;  %17438 = vmatprep.mubr.msk.bf16.mxu1 %vm20078_vm0, %v28550_v17  ;;  %v25531_v59 = vpack.c.bf16 %v8177_v1, %v8174_v39  ;;  %v7346_v53 = vadd.f32 %v7345_v61, %v25355_v47  ;;  %v8179_v42 = vmax.f32 %v7344_v31, 0.0  ;;  %v18569_v31 = vld [vmem:[%s28454_s4 + $0x318] ss:$12 sps:$4 sm:$0xff]  }
 0x47e   :  { %v25527_v26 = vadd.f32 %v16696_v34, %v16695_v12  ;;  %v7347_v10 = vpop.f32.mrf.mxu0  ;;  %v18574_v39 = vld [vmem:[%s28454_s4 + $0x304] ss:$12 sps:$4 sm:$0xff]  }
 0x47f   :  { %v25529_v56 = vpop.f32.mrf.mxu1  ;;  %28558 = vst [vmem:[#allocation33_spill] sm:$0xff] %v25531_v59  ;;  %v7348_v20 = vadd.f32 %v7347_v10, %v25365_v0  ;;  %8727 = vmatpush1.bf16.msra.mxu0 %v18560_v60  ;;  %v20074_v0 = vld [vmem:[%s28453_s1 + $0x2e8] ss:$84 sps:$4 sm:$0xff]   ;;  %v8180_v44 = vmax.f32 %v7346_v53, 0.0 }
 0x480   :  { %v7349_v63 = vpop.f32.mrf.mxu0  ;;  %8728 = vmatprep.subr.bf16.mxu0 %v18565_v2 }
 0x481   :  { %v25538_v48 = vpop.f32.mrf.mxu1  ;;  %v8182_v28 = vmax.f32 %v7348_v20, 0.0  ;;  %v7350_v58 = vadd.f32 %v7349_v63, %v25374_v51  ;;  %v18566_v51 = vld [vmem:[%s28454_s4 + $0x330] ss:$12 sps:$4 sm:$0xff]  }
 0x482   :  { %v16717_v47 = vpop.f32.mrf.mxu0  ;;  %8074 = vmatmul.mubr.bf16.gmra.mxu0 %v20074_v0  ;;  %v18589_v0 = vld [vmem:[%s28454_s4 + $0x3ac] ss:$12 sps:$4 sm:$0xff]  }
 0x483   :  { %v16763_v4 = vpop.f32.mrf.mxu1  ;;  %17439 = vmatmul.mubr.bf16.gmra.mxu1 %v20075_v41  ;;  %v25550_v22 = vpack.c.bf16 %v8182_v28, %v8179_v42  ;;  %v8183_v50 = vmax.f32 %v7350_v58, 0.0  ;;  %8729 = vmatpush2.bf16.msra.mxu0 %v18563_v35  ;;  %v18572_v35 = vld [vmem:[%s28454_s4 + $0x300] ss:$12 sps:$4 sm:$0xff]  }
 0x484   :  { %8744 = vmatprep.mubr.bf16.mxu0 %v25420_v15  ;;  %v16718_v62 = vpop.f32.mrf.mxu0  ;;  %8730 = vmatprep.subr.bf16.mxu0 %v18568_v33  ;;  %v18577_v42 = vld [vmem:[%s28454_s4 + $0x2ec] ss:$12 sps:$4 sm:$0xff]  }
 0x485   :  { %28559 = vst [vmem:[#allocation34_spill] sm:$0xff] %v25550_v22  ;;  %v16764_v38 = vpop.f32.mrf.mxu1  ;;  %8825 = vmatprep.mubr.bf16.mxu1 %v28549_v11  ;;  %v16719_v19 = vadd.f32 %v16718_v62, %v16717_v47  ;;  %v25562_v12 = vpack.c.bf16 %v8183_v50, %v8180_v44  ;;  %8801 = vmatprep.subr.bf16.mxu1 %v18589_v0 }
 0x486   :  { %v16765_v54 = vadd.f32 %v16764_v38, %v16763_v4  ;;  %v16720_v6 = vpop.f32.mrf.mxu0  ;;  %v18587_v4 = vld [vmem:[%s28454_s4 + $0x3a8] ss:$12 sps:$4 sm:$0xff]  }
 0x487   :  { %28560 = vst [vmem:[#allocation35_spill] sm:$0xff] %v25562_v12  ;;  %v16766_v52 = vpop.f32.mrf.mxu1  ;;  %v7460_v1 = vadd.f32 %v16719_v19, %v7387_v40  ;;  %8731 = vmatpush2.bf16.msra.mxu0 %v18566_v51  ;;  %v18580_v38 = vld [vmem:[%s28454_s4 + $0x2d4] ss:$12 sps:$4 sm:$0xff]   ;;  %8802 = vmatpush1.bf16.msra.mxu1 %v18587_v4 }
 0x488   :  { %v16721_v60 = vpop.f32.mrf.mxu0  ;;  %8732 = vmatprep.subr.bf16.mxu0 %v18571_v37  ;;  %v7398_v37 = vadd.f32 %v25431_v46, %v22844_v16  ;;  %v18583_v46 = vld [vmem:[%s28454_s4 + $0x2bc] ss:$12 sps:$4 sm:$0xff]  }
 0x489   :  { %v16767_v21 = vpop.f32.mrf.mxu1  ;;  %v25572_v61 = vadd.f32 %v16765_v54, %v7460_v1  ;;  %v16722_v34 = vadd.f32 %v16721_v60, %v16720_v6  ;;  %v7403_v60 = vadd.f32 %v25453_v9, %v22844_v16  ;;  %v18581_v9 = vld [vmem:[%s28454_s4 + $0x2b8] ss:$12 sps:$4 sm:$0xff]  }
 0x48a   :  { %v16723_v2 = vpop.f32.mrf.mxu0  ;;  %v16768_v20 = vadd.f32 %v16767_v21, %v16766_v52 }
 0x48b   :  { %v16769_v10 = vpop.f32.mrf.mxu1  ;;  %v7463_v53 = vadd.f32 %v16722_v34, %v7390_v13  ;;  %8733 = vmatpush2.bf16.msra.mxu0 %v18569_v31  ;;  %v18578_v31 = vld [vmem:[%s28454_s4 + $0x2d0] ss:$12 sps:$4 sm:$0xff]   ;;  %v16688_v13 = vadd.f32 %v25464_v24, %v25455_v45 }
 0x48c   :  { %v16724_v63 = vpop.f32.mrf.mxu0  ;;  %8734 = vmatprep.subr.bf16.mxu0 %v18574_v39 }
 0x48d   :  { %v16770_v33 = vpop.f32.mrf.mxu1  ;;  %v25582_v28 = vadd.f32 %v16768_v20, %v7463_v53  ;;  %v16725_v58 = vadd.f32 %v16724_v63, %v16723_v2  ;;  %v7406_v45 = vadd.f32 %v16688_v13, %v22844_v16 }
 0x48e   :  { %v16771_v47 = vadd.f32 %v16770_v33, %v16769_v10  ;;  %v16726_v41 = vpop.f32.mrf.mxu0 }
 0x48f   :  { %v16772_v44 = vpop.f32.mrf.mxu1  ;;  %v7468_v50 = vadd.f32 %v16725_v58, %v7395_v30  ;;  %8735 = vmatpush2.bf16.msra.mxu0 %v18572_v35  ;;  %v18590_v58 = vld [vmem:[%s28454_s4 + $0x390] ss:$12 sps:$4 sm:$0xff]  }
 0x490   :  { %v16727_v51 = vpop.f32.mrf.mxu0  ;;  %8736 = vmatprep.subr.bf16.mxu0 %v18577_v42  ;;  %v18586_v42 = vld [vmem:[%s28454_s4 + $0x2a4] ss:$12 sps:$4 sm:$0xff]  }
 0x491   :  { %v16773_v62 = vpop.f32.mrf.mxu1  ;;  %v25598_v40 = vadd.f32 %v16771_v47, %v7468_v50  ;;  %v16728_v19 = vadd.f32 %v16727_v51, %v16726_v41  ;;  %v18592_v47 = vld [vmem:[%s28454_s4 + $0x394] ss:$12 sps:$4 sm:$0xff]  }
 0x492   :  { %v16729_v54 = vpop.f32.mrf.mxu0  ;;  %v16774_v1 = vadd.f32 %v16773_v62, %v16772_v44  ;;  %v18584_v50 = vld [vmem:[%s28454_s4 + $0x2a0] ss:$12 sps:$4 sm:$0xff]   ;;  %8803 = vmatprep.subr.bf16.mxu1 %v18592_v47 }
 0x493   :  { %v16775_v6 = vpop.f32.mrf.mxu1  ;;  %v7471_v52 = vadd.f32 %v16728_v19, %v7398_v37  ;;  %8737 = vmatpush2.bf16.msra.mxu0 %v18575_v3  ;;  %v7411_v3 = vadd.f32 %v25490_v23, %v22844_v16  ;;  %8804 = vmatpush1.bf16.msra.mxu1 %v18590_v58 }
 0x494   :  { %v16730_v21 = vpop.f32.mrf.mxu0  ;;  %8738 = vmatprep.subr.bf16.mxu0 %v18580_v38  ;;  %v16694_v38 = vadd.f32 %v25501_v55, %v25492_v18  ;;  %v18593_v18 = vld [vmem:[%s28454_s4 + $0x378] ss:$12 sps:$4 sm:$0xff]   ;;  %v18595_v55 = vld [vmem:[%s28454_s4 + $0x37c] ss:$12 sps:$4 sm:$0xff]  }
 0x495   :  { %v16776_v39 = vpop.f32.mrf.mxu1  ;;  %v25610_v34 = vadd.f32 %v16774_v1, %v7471_v52  ;;  %v16731_v2 = vadd.f32 %v16730_v21, %v16729_v54  ;;  %8805 = vmatprep.subr.bf16.mxu1 %v18595_v55 }
 0x496   :  { %v16777_v10 = vadd.f32 %v16776_v39, %v16775_v6  ;;  %v16732_v53 = vpop.f32.mrf.mxu0  ;;  %v7414_v23 = vadd.f32 %v16694_v38, %v22844_v16 }
 0x497   :  { %v16778_v20 = vpop.f32.mrf.mxu1  ;;  %v7476_v35 = vadd.f32 %v16731_v2, %v7403_v60  ;;  %8739 = vmatpush2.bf16.msra.mxu0 %v18578_v31  ;;  %8806 = vmatpush1.bf16.msra.mxu1 %v18593_v18 }
 0x498   :  { %v16733_v63 = vpop.f32.mrf.mxu0  ;;  %8740 = vmatprep.subr.bf16.mxu0 %v18583_v46 }
 0x499   :  { %v16779_v33 = vpop.f32.mrf.mxu1  ;;  %v25619_v24 = vadd.f32 %v16777_v10, %v7476_v35  ;;  %v16734_v30 = vadd.f32 %v16733_v63, %v16732_v53  ;;  %v18596_v53 = vld [vmem:[%s28454_s4 + $0x3b0] ss:$12 sps:$4 sm:$0xff]   ;;  %v16700_v63 = vadd.f32 %v25538_v48, %v25529_v56 }
 0x49a   :  { %v16735_v4 = vpop.f32.mrf.mxu0  ;;  %v16780_v44 = vadd.f32 %v16779_v33, %v16778_v20  ;;  %v7419_v20 = vadd.f32 %v25527_v26, %v22844_v16  ;;  %v18597_v26 = vld [vmem:[%s28454_s4 + $0x398] ss:$12 sps:$4 sm:$0xff]  }
 0x49b   :  { %v16781_v0 = vpop.f32.mrf.mxu1  ;;  %v7479_v41 = vadd.f32 %v16734_v30, %v7406_v45  ;;  %8741 = vmatpush2.bf16.msra.mxu0 %v18581_v9 }
 0x49c   :  { %v16736_v51 = vpop.f32.mrf.mxu0  ;;  %8742 = vmatprep.subr.bf16.mxu0 %v18586_v42 }
 0x49d   :  { %v16782_v62 = vpop.f32.mrf.mxu1  ;;  %v25634_v37 = vadd.f32 %v16780_v44, %v7479_v41  ;;  %v16737_v19 = vadd.f32 %v16736_v51, %v16735_v4  ;;  %v7422_v41 = vadd.f32 %v16700_v63, %v22844_v16 }
 0x49e   :  { %v16783_v54 = vadd.f32 %v16782_v62, %v16781_v0  ;;  %v16738_v6 = vpop.f32.mrf.mxu0  ;;  %v18601_v62 = vld [vmem:[%s28454_s4 + $0x380] ss:$12 sps:$4 sm:$0xff]  }
 0x49f   :  { %v16784_v52 = vpop.f32.mrf.mxu1  ;;  %v7484_v1 = vadd.f32 %v16737_v19, %v7411_v3  ;;  %8743 = vmatpush2.bf16.msra.mxu0 %v18584_v50 }
 0x4a0   :  { %v16739_v31 = vpop.f32.mrf.mxu0  ;;  %17442 = vmatprep.subr.bf16.mxu0 %v28550_v17 }
 0x4a1   :  { %v16785_v60 = vpop.f32.mrf.mxu1  ;;  %v25638_v21 = vadd.f32 %v16783_v54, %v7484_v1  ;;  %v16740_v39 = vadd.f32 %v16739_v31, %v16738_v6  ;;  %v18600_v31 = vld [vmem:[%s28454_s4 + $0x364] ss:$12 sps:$4 sm:$0xff]  }
 0x4a2   :  { %8745 = vmatmul.mubr.bf16.vlgmr.msra.gmra.mxu0 %v25404_v7  ;;  %v16741_v46 = vpop.f32.mrf.mxu0  ;;  %v16786_v10 = vadd.f32 %v16785_v60, %v16784_v52  ;;  %8807 = vmatprep.subr.bf16.mxu1 %v18600_v31 }
 0x4a3   :  { %v16787_v13 = vpop.f32.mrf.mxu1  ;;  %v7487_v2 = vadd.f32 %v16740_v39, %v7414_v23  ;;  %8754 = vmatprep.mubr.bf16.mxu0 %v25457_v32  ;;  %17443 = vmatpush3.bf16.msra.mxu0 %v18596_v53  ;;  %v18598_v23 = vld [vmem:[%s28454_s4 + $0x360] ss:$12 sps:$4 sm:$0xff]   ;;  %v18602_v39 = vld [vmem:[%s28454_s4 + $0x368] ss:$12 sps:$4 sm:$0xff]  }
 0x4a4   :  { %v16742_v35 = vpop.f32.mrf.mxu0  ;;  %17444 = vmatprep.subr.bf16.mxu0 %v28550_v17  ;;  %8808 = vmatpush1.bf16.msra.mxu1 %v18598_v23 }
 0x4a5   :  { %v16788_v9 = vpop.f32.mrf.mxu1  ;;  %v25655_v33 = vadd.f32 %v16786_v10, %v7487_v2  ;;  %v16743_v42 = vadd.f32 %v16742_v35, %v16741_v46 }
 0x4a6   :  { %v16789_v45 = vadd.f32 %v16788_v9, %v16787_v13  ;;  %v16744_v30 = vpop.f32.mrf.mxu0 }
 0x4a7   :  { %v16790_v58 = vpop.f32.mrf.mxu1  ;;  %v7492_v47 = vadd.f32 %v16743_v42, %v7419_v20  ;;  %17445 = vmatpush3.bf16.msra.mxu0 %v18597_v26 }
 0x4a8   :  { %v16745_v4 = vpop.f32.mrf.mxu0  ;;  %17446 = vmatprep.subr.bf16.mxu0 %v28550_v17 }
 0x4a9   :  { %v16791_v0 = vpop.f32.mrf.mxu1  ;;  %v25662_v44 = vadd.f32 %v16789_v45, %v7492_v47  ;;  %v16746_v56 = vadd.f32 %v16745_v4, %v16744_v30 }
 0x4aa   :  { %8755 = vmatmul.mubr.bf16.gmra.mxu0 %v25439_v5  ;;  %v16809_v48 = vpop.f32.mrf.mxu0  ;;  %v16792_v51 = vadd.f32 %v16791_v0, %v16790_v58 }
 0x4ab   :  { %v16855_v50 = vpop.f32.mrf.mxu1  ;;  %v7495_v3 = vadd.f32 %v16746_v56, %v7422_v41  ;;  %8764 = vmatprep.mubr.bf16.mxu0 %v25494_v49  ;;  %17447 = vmatpush3.bf16.msra.mxu0 %v18601_v62 }
 0x4ac   :  { %v16810_v38 = vpop.f32.mrf.mxu0  ;;  %17448 = vmatprep.subr.bf16.mxu0 %v28550_v17 }
 0x4ad   :  { %v16856_v16 = vpop.f32.mrf.mxu1  ;;  %v25670_v19 = vadd.f32 %v16792_v51, %v7495_v3  ;;  %v16811_v54 = vadd.f32 %v16810_v38, %v16809_v48 }
 0x4ae   :  { %v16857_v6 = vadd.f32 %v16856_v16, %v16855_v50  ;;  %v16812_v52 = vpop.f32.mrf.mxu0 }
 0x4af   :  { %v16858_v1 = vpop.f32.mrf.mxu1  ;;  %v7606_v60 = vadd.f32 %v16811_v54, %v25572_v61  ;;  %17449 = vmatpush3.bf16.msra.mxu0 %v18602_v39 }
 0x4b0   :  { %v16813_v18 = vpop.f32.mrf.mxu0 }
 0x4b1   :  { %v16859_v55 = vpop.f32.mrf.mxu1  ;;  %v25683_v46 = vadd.f32 %v16857_v6, %v7606_v60  ;;  %v16814_v13 = vadd.f32 %v16813_v18, %v16812_v52 }
 0x4b2   :  { %8765 = vmatmul.mubr.bf16.gmra.mxu0 %v25476_v25  ;;  %v16815_v2 = vpop.f32.mrf.mxu0  ;;  %v16860_v53 = vadd.f32 %v16859_v55, %v16858_v1 }
 0x4b3   :  { %v16861_v61 = vpop.f32.mrf.mxu1  ;;  %v7609_v10 = vadd.f32 %v16814_v13, %v25582_v28  ;;  %8774 = vmatprep.mubr.bf16.mxu0 %v25531_v59  ;;  %v18603_v28 = vld [vmem:[%s28454_s4 + $0x350] ss:$12 sps:$4 sm:$0xff]  }
 0x4b4   :  { %v16816_v20 = vpop.f32.mrf.mxu0  ;;  %17128 = vmatprep.subr.bf16.mxu1 %v18603_v28 }
 0x4b5   :  { %v16862_v35 = vpop.f32.mrf.mxu1  ;;  %v25688_v9 = vadd.f32 %v16860_v53, %v7609_v10  ;;  %v16817_v63 = vadd.f32 %v16816_v20, %v16815_v2 }
 0x4b6   :  { %v16863_v42 = vadd.f32 %v16862_v35, %v16861_v61  ;;  %v16818_v45 = vpop.f32.mrf.mxu0 }
 0x4b7   :  { %v16864_v30 = vpop.f32.mrf.mxu1  ;;  %v7614_v58 = vadd.f32 %v16817_v63, %v25598_v40 }
 0x4b8   :  { %v16819_v47 = vpop.f32.mrf.mxu0 }
 0x4b9   :  { %v16865_v26 = vpop.f32.mrf.mxu1  ;;  %v25691_v4 = vadd.f32 %v16863_v42, %v7614_v58  ;;  %v16820_v0 = vadd.f32 %v16819_v47, %v16818_v45  ;;  %v18615_v58 = vld [vmem:[%s28454_s4 + $0x1cc] ss:$12 sps:$4 sm:$0xff]  }
 0x4ba   :  { %8775 = vmatmul.mubr.bf16.gmra.mxu0 %v25513_v8  ;;  %v16821_v41 = vpop.f32.mrf.mxu0  ;;  %v16866_v50 = vadd.f32 %v16865_v26, %v16864_v30  ;;  %9442 = vmatprep.subr.bf16.mxu0 %v18615_v58 }
 0x4bb   :  { %v16867_v56 = vpop.f32.mrf.mxu1  ;;  %v7617_v48 = vadd.f32 %v16820_v0, %v25610_v34  ;;  %8784 = vmatprep.mubr.bf16.mxu0 %v25562_v12 }
 0x4bc   :  { %v16822_v40 = vpop.f32.mrf.mxu0 }
 0x4bd   :  { %v16868_v3 = vpop.f32.mrf.mxu1  ;;  %v25699_v51 = vadd.f32 %v16866_v50, %v7617_v48  ;;  %v16823_v62 = vadd.f32 %v16822_v40, %v16821_v41 }
 0x4be   :  { %v16869_v38 = vadd.f32 %v16868_v3, %v16867_v56  ;;  %v16824_v16 = vpop.f32.mrf.mxu0 }
 0x4bf   :  { %v16870_v54 = vpop.f32.mrf.mxu1  ;;  %v7622_v6 = vadd.f32 %v16823_v62, %v25619_v24 }
 0x4c0   :  { %v16825_v52 = vpop.f32.mrf.mxu0 }
 0x4c1   :  { %v16871_v1 = vpop.f32.mrf.mxu1  ;;  %v25702_v31 = vadd.f32 %v16869_v38, %v7622_v6  ;;  %v16826_v60 = vadd.f32 %v16825_v52, %v16824_v16 }
 0x4c2   :  { %8785 = vmatmul.mubr.bf16.gmra.mxu0 %v25550_v22  ;;  %v16827_v34 = vpop.f32.mrf.mxu0  ;;  %v16872_v18 = vadd.f32 %v16871_v1, %v16870_v54 }
 0x4c3   :  { %v16873_v23 = vpop.f32.mrf.mxu1  ;;  %v7625_v39 = vadd.f32 %v16826_v60, %v25634_v37  ;;  %17450 = vmatprep.mubr.msk.bf16.mxu0 %vm20078_vm0, %v28550_v17 }
 0x4c4   :  { %v16828_v55 = vpop.f32.mrf.mxu0 }
 0x4c5   :  { %v16874_v13 = vpop.f32.mrf.mxu1  ;;  %v25708_v2 = vadd.f32 %v16872_v18, %v7625_v39  ;;  %v16829_v24 = vadd.f32 %v16828_v55, %v16827_v34 }
 0x4c6   :  { %v16875_v61 = vadd.f32 %v16874_v13, %v16873_v23  ;;  %v16830_v10 = vpop.f32.mrf.mxu0 }
 0x4c7   :  { %v16876_v53 = vpop.f32.mrf.mxu1  ;;  %v7630_v20 = vadd.f32 %v16829_v24, %v25638_v21 }
 0x4c8   :  { %v16831_v35 = vpop.f32.mrf.mxu0 }
 0x4c9   :  { %v16877_v63 = vpop.f32.mrf.mxu1  ;;  %v25711_v42 = vadd.f32 %v16875_v61, %v7630_v20  ;;  %v16832_v45 = vadd.f32 %v16831_v35, %v16830_v10 }
 0x4ca   :  { %v16833_v37 = vpop.f32.mrf.mxu0  ;;  %v16878_v26 = vadd.f32 %v16877_v63, %v16876_v53 }
 0x4cb   :  { %v16879_v30 = vpop.f32.mrf.mxu1  ;;  %v7633_v47 = vadd.f32 %v16832_v45, %v25655_v33 }
 0x4cc   :  { %v16834_v0 = vpop.f32.mrf.mxu0 }
 0x4cd   :  { %v16880_v28 = vpop.f32.mrf.mxu1  ;;  %v25717_v41 = vadd.f32 %v16878_v26, %v7633_v47  ;;  %v16835_v21 = vadd.f32 %v16834_v0, %v16833_v37 }
 0x4ce   :  { %v16881_v56 = vadd.f32 %v16880_v28, %v16879_v30  ;;  %v16836_v48 = vpop.f32.mrf.mxu0 }
 0x4cf   :  { %v16882_v50 = vpop.f32.mrf.mxu1  ;;  %v7638_v40 = vadd.f32 %v16835_v21, %v25662_v44 }
 0x4d0   :  { %v16837_v3 = vpop.f32.mrf.mxu0 }
 0x4d1   :  { %v16883_v62 = vpop.f32.mrf.mxu1  ;;  %v25720_v38 = vadd.f32 %v16881_v56, %v7638_v40  ;;  %v16838_v16 = vadd.f32 %v16837_v3, %v16836_v48 }
 0x4d2   :  { %v16901_v54 = vpop.f32.mrf.mxu0  ;;  %v16884_v52 = vadd.f32 %v16883_v62, %v16882_v50 }
 0x4d3   :  { %v16947_v6 = vpop.f32.mrf.mxu1  ;;  %v7641_v33 = vadd.f32 %v16838_v16, %v25670_v19 }
 0x4d4   :  { %v16902_v1 = vpop.f32.mrf.mxu0 }
 0x4d5   :  { %v16948_v60 = vpop.f32.mrf.mxu1  ;;  %v25723_v34 = vadd.f32 %v16884_v52, %v7641_v33  ;;  %v16903_v23 = vadd.f32 %v16902_v1, %v16901_v54 }
 0x4d6   :  { %v16949_v39 = vadd.f32 %v16948_v60, %v16947_v6  ;;  %v16904_v18 = vpop.f32.mrf.mxu0 }
 0x4d7   :  { %v16950_v55 = vpop.f32.mrf.mxu1  ;;  %v7752_v44 = vadd.f32 %v16903_v23, %v25683_v46 }
 0x4d8   :  { %v16905_v13 = vpop.f32.mrf.mxu0 }
 0x4d9   :  { %v16951_v24 = vpop.f32.mrf.mxu1  ;;  %v25726_v61 = vadd.f32 %v16949_v39, %v7752_v44  ;;  %v16906_v10 = vadd.f32 %v16905_v13, %v16904_v18 }
 0x4da   :  { %v16907_v53 = vpop.f32.mrf.mxu0  ;;  %v16952_v35 = vadd.f32 %v16951_v24, %v16950_v55 }
 0x4db   :  { %v16953_v20 = vpop.f32.mrf.mxu1  ;;  %v7755_v19 = vadd.f32 %v16906_v10, %v25688_v9 }
 0x4dc   :  { %v16908_v63 = vpop.f32.mrf.mxu0 }
 0x4dd   :  { %v16954_v45 = vpop.f32.mrf.mxu1  ;;  %v25729_v37 = vadd.f32 %v16952_v35, %v7755_v19  ;;  %v16909_v30 = vadd.f32 %v16908_v63, %v16907_v53 }
 0x4de   :  { %v16955_v58 = vadd.f32 %v16954_v45, %v16953_v20  ;;  %v16910_v47 = vpop.f32.mrf.mxu0 }
 0x4df   :  { %v16956_v26 = vpop.f32.mrf.mxu1  ;;  %v7760_v46 = vadd.f32 %v16909_v30, %v25691_v4 }
 0x4e0   :  { %v16911_v0 = vpop.f32.mrf.mxu0 }
 0x4e1   :  { %v16957_v28 = vpop.f32.mrf.mxu1  ;;  %v25732_v21 = vadd.f32 %v16955_v58, %v7760_v46  ;;  %v16912_v56 = vadd.f32 %v16911_v0, %v16910_v47 }
 0x4e2   :  { %v16913_v48 = vpop.f32.mrf.mxu0  ;;  %v16958_v40 = vadd.f32 %v16957_v28, %v16956_v26 }
 0x4e3   :  { %v16959_v50 = vpop.f32.mrf.mxu1  ;;  %v7763_v9 = vadd.f32 %v16912_v56, %v25699_v51 }
 0x4e4   :  { %v16914_v3 = vpop.f32.mrf.mxu0 }
 0x4e5   :  { %v16960_v62 = vpop.f32.mrf.mxu1  ;;  %v25735_v16 = vadd.f32 %v16958_v40, %v7763_v9  ;;  %v16915_v54 = vadd.f32 %v16914_v3, %v16913_v48 }
 0x4e6   :  { %v16961_v6 = vadd.f32 %v16960_v62, %v16959_v50  ;;  %v16916_v33 = vpop.f32.mrf.mxu0 }
 0x4e7   :  { %v16962_v52 = vpop.f32.mrf.mxu1  ;;  %v7768_v4 = vadd.f32 %v16915_v54, %v25702_v31 }
 0x4e8   :  { %v16917_v1 = vpop.f32.mrf.mxu0 }
 0x4e9   :  { %v16963_v60 = vpop.f32.mrf.mxu1  ;;  %v25738_v23 = vadd.f32 %v16961_v6, %v7768_v4  ;;  %v16918_v39 = vadd.f32 %v16917_v1, %v16916_v33 }
 0x4ea   :  { %v16919_v18 = vpop.f32.mrf.mxu0  ;;  %v16964_v44 = vadd.f32 %v16963_v60, %v16962_v52 }
 0x4eb   :  { %v16965_v55 = vpop.f32.mrf.mxu1  ;;  %v7771_v51 = vadd.f32 %v16918_v39, %v25708_v2 }
 0x4ec   :  { %v16920_v13 = vpop.f32.mrf.mxu0 }
 0x4ed   :  { %v16966_v24 = vpop.f32.mrf.mxu1  ;;  %v25741_v10 = vadd.f32 %v16964_v44, %v7771_v51  ;;  %v16921_v53 = vadd.f32 %v16920_v13, %v16919_v18 }
 0x4ee   :  { %v16967_v20 = vadd.f32 %v16966_v24, %v16965_v55  ;;  %v16922_v19 = vpop.f32.mrf.mxu0 }
 0x4ef   :  { %v16968_v35 = vpop.f32.mrf.mxu1  ;;  %v7776_v31 = vadd.f32 %v16921_v53, %v25711_v42 }
 0x4f0   :  { %v16923_v63 = vpop.f32.mrf.mxu0 }
 0x4f1   :  { %v16969_v45 = vpop.f32.mrf.mxu1  ;;  %v25744_v30 = vadd.f32 %v16967_v20, %v7776_v31  ;;  %v16924_v58 = vadd.f32 %v16923_v63, %v16922_v19 }
 0x4f2   :  { %v16925_v47 = vpop.f32.mrf.mxu0  ;;  %v16970_v46 = vadd.f32 %v16969_v45, %v16968_v35 }
 0x4f3   :  { %v16971_v26 = vpop.f32.mrf.mxu1  ;;  %v7779_v2 = vadd.f32 %v16924_v58, %v25717_v41 }
 0x4f4   :  { %v16926_v0 = vpop.f32.mrf.mxu0 }
 0x4f5   :  { %v16972_v28 = vpop.f32.mrf.mxu1  ;;  %v25747_v56 = vadd.f32 %v16970_v46, %v7779_v2  ;;  %v16927_v48 = vadd.f32 %v16926_v0, %v16925_v47 }
 0x4f6   :  { %v16973_v50 = vadd.f32 %v16972_v28, %v16971_v26  ;;  %v16928_v9 = vpop.f32.mrf.mxu0 }
 0x4f7   :  { %v16974_v40 = vpop.f32.mrf.mxu1  ;;  %v7784_v42 = vadd.f32 %v16927_v48, %v25720_v38 }
 0x4f8   :  { %v16929_v3 = vpop.f32.mrf.mxu0 }
 0x4f9   :  { %v16975_v62 = vpop.f32.mrf.mxu1  ;;  %v25750_v54 = vadd.f32 %v16973_v50, %v7784_v42  ;;  %v16930_v6 = vadd.f32 %v16929_v3, %v16928_v9 }
 0x4fa   :  { %v16993_v33 = vpop.f32.mrf.mxu0  ;;  %v16976_v4 = vadd.f32 %v16975_v62, %v16974_v40 }
 0x4fb   :  { %v17039_v52 = vpop.f32.mrf.mxu1  ;;  %v7787_v41 = vadd.f32 %v16930_v6, %v25723_v34 }
 0x4fc   :  { %v16994_v1 = vpop.f32.mrf.mxu0 }
 0x4fd   :  { %v17040_v60 = vpop.f32.mrf.mxu1  ;;  %v25753_v39 = vadd.f32 %v16976_v4, %v7787_v41  ;;  %v16995_v29 = vadd.f32 %v16994_v1, %v16993_v33 }
 0x4fe   :  { %v16996_v18 = vpop.f32.mrf.mxu0  ;;  %v17041_v57 = vadd.f32 %v17040_v60, %v17039_v52 }
 0x4ff   :  { %28561 = vst [vmem:[#allocation36_spill] sm:$0xff] %v25753_v39  ;;  %v17042_v55 = vpop.f32.mrf.mxu1  ;;  %v7898_v59 = vadd.f32 %v16995_v29, %v25726_v61 }
 0x500   :  { %v16997_v51 = vpop.f32.mrf.mxu0 }
 0x501   :  { %v17043_v44 = vpop.f32.mrf.mxu1  ;;  %v16998_v12 = vadd.f32 %v16997_v51, %v16996_v18  ;;  %v7971_v27 = vadd.f32 %v17041_v57, %v7898_v59 }
 0x502   :  { %v16999_v13 = vpop.f32.mrf.mxu0  ;;  %v17044_v7 = vadd.f32 %v17043_v44, %v17042_v55 }
 0x503   :  { %v17045_v38 = vpop.f32.mrf.mxu1  ;;  %v7901_v43 = vadd.f32 %v16998_v12, %v25729_v37 }
 0x504   :  { %v17000_v24 = vpop.f32.mrf.mxu0 }
 0x505   :  { %v17046_v53 = vpop.f32.mrf.mxu1  ;;  %v17001_v33 = vadd.f32 %v17000_v24, %v16999_v13  ;;  %v7974_v51 = vadd.f32 %v17044_v7, %v7901_v43 }
 0x506   :  { %v17002_v20 = vpop.f32.mrf.mxu0  ;;  %v17047_v29 = vadd.f32 %v17046_v53, %v17045_v38 }
 0x507   :  { %v25755_v19 = vpop.f32.mrf.mxu1 }
 0x508   :  { %v17003_v35 = vpop.f32.mrf.mxu0 }
 0x509   :  { %v17049_v31 = vpop.f32.mrf.mxu1  ;;  %v17004_v61 = vadd.f32 %v17003_v35, %v17002_v20  ;;  %v18613_v35 = vld [vmem:[%s28454_s4 + $0x1c8] ss:$12 sps:$4 sm:$0xff]  }
 0x50a   :  { %v17005_v63 = vpop.f32.mrf.mxu0 }
 0x50b   :  { %v25757_v34 = vpop.f32.mrf.mxu1 }
 0x50c   :  { %v17006_v45 = vpop.f32.mrf.mxu0 }
 0x50d   :  { %v17052_v58 = vpop.f32.mrf.mxu1 }
 0x50e   :  { %v25759_v47 = vpop.f32.mrf.mxu0 }
 0x50f   :  { %v25761_v26 = vpop.f32.mrf.mxu1 }
 0x510   :  { %v25763_v2 = vpop.f32.mrf.mxu0 }
 0x511   :  { %v25765_v46 = vpop.f32.mrf.mxu1 }
 0x512   :  { %v25767_v0 = vpop.f32.mrf.mxu0 }
 0x513   :  { %v25769_v28 = vpop.f32.mrf.mxu1 }
 0x514   :  { %v25771_v48 = vpop.f32.mrf.mxu0 }
 0x515   :  { %v25773_v50 = vpop.f32.mrf.mxu1 }
 0x516   :  { %v25775_v9 = vpop.f32.mrf.mxu0 }
 0x517   :  { %v25777_v40 = vpop.f32.mrf.mxu1 }
 0x518   :  { %v25779_v42 = vpop.f32.mrf.mxu0 }
 0x519   :  { %v25781_v3 = vpop.f32.mrf.mxu1 }
 0x51a   :  { %v25783_v62 = vpop.f32.mrf.mxu0 }
 0x51b   :  { %v25785_v6 = vpop.f32.mrf.mxu1 }
 0x51c   :  { %v25787_v41 = vpop.f32.mrf.mxu0 }
 0x51d   :  { %v25789_v4 = vpop.f32.mrf.mxu1 }
 0x51e   :  { %v25791_v14 = vpop.f32.mrf.mxu0 }
 0x51f   :  { %28562 = vst [vmem:[#allocation37_spill] sm:$0xff] %v25791_v14  ;;  %v25793_v22 = vpop.f32.mrf.mxu1 }
 0x520   :  { %28563 = vst [vmem:[#allocation38_spill] sm:$0xff] %v25793_v22  ;;  %v25795_v36 = vpop.f32.mrf.mxu0 }
 0x521   :  { %28564 = vst [vmem:[#allocation39_spill] sm:$0xff] %v25795_v36  ;;  %v25797_v8 = vpop.f32.mrf.mxu1 }
 0x522   :  { %28565 = vst [vmem:[#allocation40_spill] sm:$0xff] %v25797_v8  ;;  %v17085_v25 = vpop.f32.mrf.mxu0  ;;  %v7906_v8 = vadd.f32 %v17001_v33, %v25732_v21 }
 0x523   :  { %v8116_v49 = vpop.f32.mrf.mxu1 }
 0x524   :  { %v17086_v5 = vpop.f32.mrf.mxu0 }
 0x525   :  { %v17424_v32 = vpop.f32.mrf.mxu1  ;;  %v17087_v1 = vadd.f32 %v17086_v5, %v17085_v25  ;;  %v7979_v5 = vadd.f32 %v17047_v29, %v7906_v8  ;;  %v7909_v25 = vadd.f32 %v17004_v61, %v25735_v16  ;;  %v18604_v8 = vld [vmem:[%s28454_s4 + $0x290] ss:$12 sps:$4 sm:$0xff]   ;;  %v17010_v16 = vadd.f32 %v25763_v2, %v25759_v47 }
 0x526   :  { %v17088_v15 = vpop.f32.mrf.mxu0  ;;  %v17007_v32 = vadd.f32 %v17006_v45, %v17005_v63  ;;  %v18618_v29 = vld [vmem:[%s28454_s4 + $0x1b0] ss:$12 sps:$4 sm:$0xff]  }
 0x527   :  { %v8119_v22 = vpop.f32.mrf.mxu1  ;;  %v8044_v18 = vadd.f32 %v17087_v1, %v7971_v27  ;;  %v7917_v33 = vadd.f32 %v17010_v16, %v25741_v10  ;;  %v17056_v10 = vadd.f32 %v25765_v46, %v25761_v26  ;;  %v17062_v16 = vadd.f32 %v25781_v3, %v25777_v40 }
 0x528   :  { %v17089_v39 = vpop.f32.mrf.mxu0 }
 0x529   :  { %v17425_v36 = vpop.f32.mrf.mxu1  ;;  %v17090_v52 = vadd.f32 %v17089_v39, %v17088_v15  ;;  %v8117_v12 = vadd.f32 %v8116_v49, %v8044_v18  ;;  %v7914_v15 = vadd.f32 %v17007_v32, %v25738_v23  ;;  %v17053_v49 = vadd.f32 %v17052_v58, %v25757_v34  ;;  %v18605_v23 = vld [vmem:[%s28454_s4 + $0x338] ss:$12 sps:$4 sm:$0xff]   ;;  %v18620_v34 = vld [vmem:[%s28454_s4 + $0x1b4] ss:$12 sps:$4 sm:$0xff]  }
 0x52a   :  { %v17091_v60 = vpop.f32.mrf.mxu0  ;;  %v17050_v36 = vadd.f32 %v17049_v31, %v25755_v19  ;;  %v17013_v58 = vadd.f32 %v25771_v48, %v25767_v0  ;;  %v18607_v0 = vld [vmem:[%s28454_s4 + $0x320] ss:$12 sps:$4 sm:$0xff]   ;;  %v17016_v32 = vadd.f32 %v25779_v42, %v25775_v9  ;;  %v7990_v26 = vadd.f32 %v17056_v10, %v7917_v33  ;;  %v18625_v9 = vld [vmem:[%s28454_s4 + $0x19c] ss:$12 sps:$4 sm:$0xff]  }
 0x52b   :  { %v8124_v14 = vpop.f32.mrf.mxu1  ;;  %v8047_v37 = vadd.f32 %v17090_v52, %v7974_v51  ;;  %v8157_v21 = vmax.f32 %v8117_v12, 0.0  ;;  %v7987_v45 = vadd.f32 %v17053_v49, %v7914_v15  ;;  %v18610_v49 = vld [vmem:[%s28454_s4 + $0x248] ss:$12 sps:$4 sm:$0xff]  }
 0x52c   :  { %v17092_v57 = vpop.f32.mrf.mxu0  ;;  %v7922_v12 = vadd.f32 %v17013_v58, %v25744_v30  ;;  %v18609_v30 = vld [vmem:[%s28454_s4 + $0x308] ss:$12 sps:$4 sm:$0xff]   ;;  %v18612_v58 = vld [vmem:[%s28454_s4 + $0x230] ss:$12 sps:$4 sm:$0xff]  }
 0x52d   :  { %v17428_v59 = vpop.f32.mrf.mxu1  ;;  %v8120_v55 = vadd.f32 %v8119_v22, %v8047_v37  ;;  %v17093_v27 = vadd.f32 %v17092_v57, %v17091_v60  ;;  %v7982_v22 = vadd.f32 %v17050_v36, %v7909_v25  ;;  %v17059_v37 = vadd.f32 %v25773_v50, %v25769_v28 }
 0x52e   :  { %v17094_v43 = vpop.f32.mrf.mxu0 }
 0x52f   :  { %v8127_v7 = vpop.f32.mrf.mxu1  ;;  %v8160_v44 = vmax.f32 %v8120_v55, 0.0  ;;  %v8052_v13 = vadd.f32 %v17093_v27, %v7979_v5  ;;  %v18608_v5 = vld [vmem:[%s28454_s4 + $0x260] ss:$12 sps:$4 sm:$0xff]   ;;  %v7995_v36 = vadd.f32 %v17059_v37, %v7922_v12 }
 0x530   :  { %v17095_v39 = vpop.f32.mrf.mxu0  ;;  %v18621_v12 = vld [vmem:[%s28454_s4 + $0x2c0] ss:$12 sps:$4 sm:$0xff]  }
 0x531   :  { %v17429_v38 = vpop.f32.mrf.mxu1  ;;  %v25811_v24 = vpack.c.bf16 %v8160_v44, %v8157_v21  ;;  %v17096_v53 = vadd.f32 %v17095_v39, %v17094_v43  ;;  %v8125_v31 = vadd.f32 %v8124_v14, %v8052_v13  ;;  %v18606_v14 = vld [vmem:[%s28454_s4 + $0x278] ss:$12 sps:$4 sm:$0xff]   ;;  %v7925_v21 = vadd.f32 %v17016_v32, %v25747_v56  ;;  %v18611_v56 = vld [vmem:[%s28454_s4 + $0x2f0] ss:$12 sps:$4 sm:$0xff]  }
 0x532   :  { %v17097_v20 = vpop.f32.mrf.mxu0  ;;  %v17019_v44 = vadd.f32 %v25787_v41, %v25783_v62  ;;  %v18630_v39 = vld [vmem:[%s28454_s4 + $0x184] ss:$12 sps:$4 sm:$0xff]  }
 0x533   :  { %v8132_v19 = vpop.f32.mrf.mxu1  ;;  %v8055_v63 = vadd.f32 %v17096_v53, %v7982_v22  ;;  %15164 = vmatmul.mubr.msk.bf16.vlgmr.msra.gmra.mxu1 %vm8696_vm2, %v25811_v24  ;;  %17451 = vmatmul.mubr.msk.bf16.vlgmr.msra.gmra.mxu0 %vm8696_vm2, %v25811_v24  ;;  %v8163_v61 = vmax.f32 %v8125_v31, 0.0  ;;  %v10563_v42 = vrot.slane %v25811_v24, 4  ;;  %v28568_v31 = vld [vmem:[#allocation39_spill] sm:$0xff]  ;;  %v7998_v40 = vadd.f32 %v17062_v16, %v7925_v21  ;;  %v18641_v16 = vld [vmem:[%s28454_s4 + $0xb0] ss:$12 sps:$4 sm:$0xff]  }
 0x534   :  { %v17098_v47 = vpop.f32.mrf.mxu0  ;;  %17129 = vmatpush3.bf16.msra.mxu1 %v18604_v8  ;;  %8835 = vmatprep.mubr.bf16.mxu1 %v28549_v11 }
 0x535   :  { %v17432_v2 = vpop.f32.mrf.mxu1  ;;  %v8128_v1 = vadd.f32 %v8127_v7, %v8055_v63  ;;  %v17099_v18 = vadd.f32 %v17098_v47, %v17097_v20  ;;  %17130 = vmatprep.subr.bf16.mxu1 %v18605_v23  ;;  %17454 = vmatprep.mubr.msk.bf16.mxu0 %vm20078_vm0, %v28550_v17  ;;  %v18623_v7 = vld [vmem:[%s28454_s4 + $0x198] ss:$12 sps:$4 sm:$0xff]   ;;  %v7930_v20 = vadd.f32 %v17019_v44, %v25750_v54  ;;  %v18627_v44 = vld [vmem:[%s28454_s4 + $0x1e8] ss:$12 sps:$4 sm:$0xff]  }
 0x536   :  { %v17100_v48 = vpop.f32.mrf.mxu0  ;;  %9443 = vmatpush1.bf16.msra.mxu0 %v18613_v35  ;;  %v28567_v35 = vld [vmem:[#allocation37_spill] sm:$0xff]  ;;  %v18628_v2 = vld [vmem:[%s28454_s4 + $0x180] ss:$12 sps:$4 sm:$0xff]  }
 0x537   :  { %v8135_v51 = vpop.f32.mrf.mxu1  ;;  %v8166_v52 = vmax.f32 %v8128_v1, 0.0  ;;  %v8060_v60 = vadd.f32 %v17099_v18, %v7987_v45  ;;  %9444 = vmatprep.subr.bf16.mxu0 %v18620_v34  ;;  %v17022_v63 = vadd.f32 %v28568_v31, %v28567_v35  ;;  %v18616_v54 = vld [vmem:[%s28454_s4 + $0x2d8] ss:$12 sps:$4 sm:$0xff]   ;;  %v18640_v1 = vld [vmem:[%s28454_s4 + $0x170] ss:$12 sps:$4 sm:$0xff]  }
 0x538   :  { %v17101_v57 = vpop.f32.mrf.mxu0  ;;  %17131 = vmatpush3.bf16.msra.mxu1 %v18606_v14  ;;  %v18639_v35 = vld [vmem:[%s28454_s4 + $0x7c] ss:$12 sps:$4 sm:$0xff]   ;;  %v18646_v31 = vld [vmem:[%s28454_s4 + $0x98] ss:$12 sps:$4 sm:$0xff]  }
 0x539   :  { %v17433_v59 = vpop.f32.mrf.mxu1  ;;  %v25851_v46 = vpack.c.bf16 %v8166_v52, %v8163_v61  ;;  %v17102_v25 = vadd.f32 %v17101_v57, %v17100_v48  ;;  %17132 = vmatprep.subr.bf16.mxu1 %v18607_v0  ;;  %v8133_v27 = vadd.f32 %v8132_v19, %v8060_v60  ;;  %v17065_v19 = vadd.f32 %v25789_v4, %v25785_v6  ;;  %v28569_v48 = vld [vmem:[#allocation36_spill] sm:$0xff]  ;;  %v18617_v61 = vld [vmem:[%s28454_s4 + $0x218] ss:$12 sps:$4 sm:$0xff]  }
 0x53a   :  { %v17103_v28 = vpop.f32.mrf.mxu0  ;;  %9445 = vmatpush1.bf16.msra.mxu0 %v18618_v29  ;;  %v28570_v59 = vld [vmem:[#allocation38_spill] sm:$0xff] }
 0x53b   :  { %v8140_v50 = vpop.f32.mrf.mxu1  ;;  %v10564_v55 = vrot.slane %v25851_v46, 4  ;;  %v8063_v43 = vadd.f32 %v17102_v25, %v7990_v26  ;;  %15165 = vmatmul.mubr.msk.bf16.gmra.mxu1 %vm8696_vm2, %v25851_v46  ;;  %17455 = vmatmul.mubr.msk.bf16.gmra.mxu0 %vm8696_vm2, %v25851_v46  ;;  %v8169_v24 = vmax.f32 %v8133_v27, 0.0  ;;  %v8003_v0 = vadd.f32 %v17065_v19, %v7930_v20  ;;  %v18622_v46 = vld [vmem:[%s28454_s4 + $0x200] ss:$12 sps:$4 sm:$0xff]   ;;  %v28575_v20 = vld [vmem:[#allocation29_spill] sm:$0xff] }
 0x53c   :  { %v17104_v13 = vpop.f32.mrf.mxu0  ;;  %17133 = vmatpush3.bf16.msra.mxu1 %v18608_v5  ;;  %8845 = vmatprep.mubr.bf16.mxu1 %v28549_v11  ;;  %v28571_v5 = vld [vmem:[#allocation40_spill] sm:$0xff] }
 0x53d   :  { %v17436_v15 = vpop.f32.mrf.mxu1  ;;  %v8136_v38 = vadd.f32 %v8135_v51, %v8063_v43  ;;  %v17105_v8 = vadd.f32 %v17104_v13, %v17103_v28  ;;  %17134 = vmatprep.subr.bf16.mxu1 %v18609_v30  ;;  %17458 = vmatprep.mubr.msk.bf16.mxu0 %vm20078_vm0, %v28550_v17  ;;  %v25886_v62 = vsel %vm9755_vm1, %v10563_v42, %v10564_v55  ;;  %v18626_v43 = vld [vmem:[%s28454_s4 + $0x2a8] ss:$12 sps:$4 sm:$0xff]   ;;  %v18634_v19 = vld [vmem:[%s28454_s4 + $0x90] ss:$12 sps:$4 sm:$0xff]  }
 0x53e   :  { %28566 = vst [vmem:[#allocation41_spill] sm:$0xff] %v25886_v62  ;;  %v17106_v41 = vpop.f32.mrf.mxu0  ;;  %9446 = vmatprep.subr.bf16.mxu0 %v18625_v9  ;;  %v7933_v51 = vadd.f32 %v17022_v63, %v28569_v48  ;;  %v17068_v26 = vadd.f32 %v28571_v5, %v28570_v59  ;;  %v18633_v15 = vld [vmem:[%s28454_s4 + $0xac] ss:$12 sps:$4 sm:$0xff]   ;;  %v18656_v48 = vld [vmem:[%s28454_s4 + $0x68] ss:$12 sps:$4 sm:$0xff]  }
 0x53f   :  { %v8143_v22 = vpop.f32.mrf.mxu1  ;;  %v8172_v53 = vmax.f32 %v8136_v38, 0.0  ;;  %v8068_v23 = vadd.f32 %v17105_v8, %v7995_v36  ;;  %9447 = vmatpush1.bf16.msra.mxu0 %v18623_v7  ;;  %v18637_v63 = vld [vmem:[%s28454_s4 + $0x78] ss:$12 sps:$4 sm:$0xff]  }
 0x540   :  { %v17107_v34 = vpop.f32.mrf.mxu0  ;;  %17135 = vmatpush3.bf16.msra.mxu1 %v18610_v49  ;;  %9448 = vmatprep.subr.bf16.mxu0 %v18630_v39  ;;  %v8006_v42 = vadd.f32 %v17068_v26, %v7933_v51  ;;  %v18665_v5 = vld [vmem:[%s28454_s4 + $0xf8] ss:$12 sps:$4 sm:$0xff]  }
 0x541   :  { %v17437_v45 = vpop.f32.mrf.mxu1  ;;  %v8208_v3 = vpack.c.bf16 %v8172_v53, %v8169_v24  ;;  %v17108_v47 = vadd.f32 %v17107_v34, %v17106_v41  ;;  %17136 = vmatprep.subr.bf16.mxu1 %v18611_v56  ;;  %v8141_v14 = vadd.f32 %v8140_v50, %v8068_v23  ;;  %v28572_v56 = vld [vmem:[#allocation27_spill] sm:$0xff]  ;;  %v28573_v24 = vld [vmem:[#allocation26_spill] sm:$0xff]  ;;  %v28574_v53 = vld [vmem:[#allocation21_spill] sm:$0xff] }
 0x542   :  { %v17109_v6 = vpop.f32.mrf.mxu0  ;;  %v18631_v41 = vld [vmem:[%s28454_s4 + $0xa8] ss:$12 sps:$4 sm:$0xff]   ;;  %v18645_v23 = vld [vmem:[%s28454_s4 + $0x158] ss:$12 sps:$4 sm:$0xff]  }
 0x543   :  { %v8148_v4 = vpop.f32.mrf.mxu1  ;;  %v8071_v33 = vadd.f32 %v17108_v47, %v7998_v40  ;;  %15166 = vmatmul.mubr.msk.bf16.gmra.mxu1 %vm8696_vm2, %v8208_v3  ;;  %17459 = vmatmul.mubr.msk.bf16.gmra.mxu0 %vm8696_vm2, %v8208_v3  ;;  %v10570_v18 = vrot.slane %v8208_v3, 4  ;;  %v8175_v25 = vmax.f32 %v8141_v14, 0.0  ;;  %v18644_v34 = vld [vmem:[%s28454_s4 + $0x64] ss:$12 sps:$4 sm:$0xff]   ;;  %v18651_v47 = vld [vmem:[%s28454_s4 + $0x80] ss:$12 sps:$4 sm:$0xff]  }
 0x544   :  { %v17110_v29 = vpop.f32.mrf.mxu0  ;;  %17137 = vmatpush3.bf16.msra.mxu1 %v18612_v58  ;;  %8855 = vmatprep.mubr.bf16.mxu1 %v28549_v11  ;;  %v18650_v58 = vld [vmem:[%s28454_s4 + $0x140] ss:$12 sps:$4 sm:$0xff]   ;;  %v28576_v40 = vld [vmem:[#allocation28_spill] sm:$0xff] }
 0x545   :  { %v17440_v10 = vpop.f32.mrf.mxu1  ;;  %v8144_v52 = vadd.f32 %v8143_v22, %v8071_v33  ;;  %v17111_v60 = vadd.f32 %v17110_v29, %v17109_v6  ;;  %17462 = vmatprep.mubr.msk.bf16.mxu0 %vm20078_vm0, %v28550_v17  ;;  %17138 = vmatprep.subr.bf16.mxu1 %v18616_v54  ;;  %v25922_v37 = vsel %vm9755_vm1, %v10564_v55, %v10570_v18  ;;  %v18636_v22 = vld [vmem:[%s28454_s4 + $0x94] ss:$12 sps:$4 sm:$0xff]   ;;  %v28578_v6 = vld [vmem:[#allocation31_spill] sm:$0xff]  ;;  %v18660_v29 = vld [vmem:[%s28454_s4 + $0x110] ss:$12 sps:$4 sm:$0xff]  }
 0x546   :  { %v17112_v32 = vpop.f32.mrf.mxu0  ;;  %9449 = vmatpush1.bf16.msra.mxu0 %v18628_v2  ;;  %v28577_v3 = vld [vmem:[#allocation22_spill] sm:$0xff]  ;;  %v18655_v2 = vld [vmem:[%s28454_s4 + $0x128] ss:$12 sps:$4 sm:$0xff]   ;;  %v18649_v14 = vld [vmem:[%s28454_s4 + $0x4c] ss:$12 sps:$4 sm:$0xff]  }
 0x547   :  { %v8151_v57 = vpop.f32.mrf.mxu1  ;;  %v8178_v30 = vmax.f32 %v8144_v52, 0.0  ;;  %v8076_v28 = vadd.f32 %v17111_v60, %v8003_v0  ;;  %17183 = vmatprep.subr.bf16.mxu0 %v18640_v1  ;;  %v18654_v0 = vld [vmem:[%s28454_s4 + $0x34] ss:$12 sps:$4 sm:$0xff]   ;;  %v28581_v60 = vld [vmem:[#allocation33_spill] sm:$0xff] }
 0x548   :  { %v17113_v50 = vpop.f32.mrf.mxu0  ;;  %17139 = vmatpush3.bf16.msra.mxu1 %v18617_v61  ;;  %v28579_v10 = vld [vmem:[#allocation30_spill] sm:$0xff]  ;;  %v28580_v61 = vld [vmem:[#allocation23_spill] sm:$0xff] }
 0x549   :  { %v17441_v9 = vpop.f32.mrf.mxu1  ;;  %v25929_v55 = vpack.c.bf16 %v8178_v30, %v8175_v25  ;;  %v17114_v27 = vadd.f32 %v17113_v50, %v17112_v32  ;;  %17140 = vmatprep.subr.bf16.mxu1 %v18621_v12  ;;  %v8149_v7 = vadd.f32 %v8148_v4, %v8076_v28  ;;  %v18642_v4 = vld [vmem:[%s28454_s4 + $0x60] ss:$12 sps:$4 sm:$0xff]   ;;  %v18652_v12 = vld [vmem:[%s28454_s4 + $0x30] ss:$12 sps:$4 sm:$0xff]   ;;  %v18657_v25 = vld [vmem:[%s28454_s4 + $0x18] ss:$12 sps:$4 sm:$0xff]  }
 0x54a   :  { %v18659_v32 = vld [vmem:[%s28454_s4 + $0x1c] ss:$12 sps:$4 sm:$0xff]   ;;  %v18664_v30 = vld [vmem:[%s28454_s4 + $0x4] ss:$12 sps:$4 sm:$0xff]   ;;  %v18670_v9 = vld [vmem:[%s28454_s4 + $0xe0] ss:$12 sps:$4 sm:$0xff]  }
 0x54b   :  { %v8079_v36 = vadd.f32 %v17114_v27, %v8006_v42  ;;  %15167 = vmatmul.mubr.msk.bf16.gmra.mxu1 %vm8696_vm2, %v25929_v55  ;;  %17463 = vmatmul.mubr.msk.bf16.gmra.mxu0 %vm8696_vm2, %v25929_v55  ;;  %v28522_v21 = vrot.slane %v25929_v55, 4  ;;  %v8181_v39 = vmax.f32 %v8149_v7, 0.0  ;;  %v18666_v28 = vld [vmem:[%s28454_s4 + $0x38] ss:$12 sps:$4 sm:$0xff]   ;;  %v28583_v42 = vld [vmem:[#allocation24_spill] sm:$0xff] }
 0x54c   :  { %8865 = vmatprep.mubr.bf16.mxu1 %v28549_v11  ;;  %17141 = vmatpush3.bf16.msra.mxu1 %v18622_v46  ;;  %v28582_v46 = vld [vmem:[#allocation32_spill] sm:$0xff]  ;;  %v18662_v7 = vld [vmem:[%s28454_s4] ss:$12 sps:$4 sm:$0xff]  }
 0x54d   :  { %v8152_v13 = vadd.f32 %v8151_v57, %v8079_v36  ;;  %17466 = vmatprep.mubr.msk.bf16.mxu0 %vm20078_vm0, %v28550_v17  ;;  %17142 = vmatprep.subr.bf16.mxu1 %v18626_v43  ;;  %v25951_v49 = vsel %vm9755_vm1, %v10570_v18, %v28522_v21  ;;  %v18647_v18 = vld [vmem:[%s28454_s4 + $0x48] ss:$12 sps:$4 sm:$0xff]   ;;  %v18661_v57 = vld [vmem:[%s28454_s4 + $0x50] ss:$12 sps:$4 sm:$0xff]   ;;  %v18669_v36 = vld [vmem:[%s28454_s4 + $0x16c] ss:$12 sps:$4 sm:$0xff]  }
 0x54e   :  { %v28584_v43 = vld [vmem:[#allocation35_spill] sm:$0xff] }
 0x54f   :  { %v8184_v38 = vmax.f32 %v8152_v13, 0.0 }
 0x550   :  { %17143 = vmatpush3.bf16.msra.mxu1 %v18627_v44  ;;  %v18671_v44 = vld [vmem:[%s28454_s4 + $0x20] ss:$12 sps:$4 sm:$0xff]  }
 0x551   :  { %v25953_v8 = vpack.c.bf16 %v8184_v38, %v8181_v39  ;;  %9353 = vmatprep.subr.bf16.mxu1 %v18633_v15  ;;  %v18675_v15 = vld [vmem:[%s28454_s4 + $0xc8] ss:$12 sps:$4 sm:$0xff]  }
 0x552   :  { %v18667_v38 = vld [vmem:[%s28454_s4 + $0x168] ss:$12 sps:$4 sm:$0xff]  }
 0x553   :  { %15168 = vmatmul.mubr.msk.bf16.gmra.mxu1 %vm8696_vm2, %v25953_v8  ;;  %17467 = vmatmul.mubr.msk.bf16.gmra.mxu0 %vm8696_vm2, %v25953_v8 }
 0x554   :  { %8906 = vmatprep.mubr.bf16.mxu1 %v28572_v56  ;;  %9466 = vmatprep.mubr.bf16.mxu0 %v28549_v11 }
 0x55b   :  { %8907 = vmatmul.mubr.bf16.vlgmr.msra.gmra.mxu1 %v28573_v24  ;;  %15234 = vmatmul.mubr.msk.bf16.vlgmr.msra.gmra.mxu0 %vm8696_vm2, %v28574_v53 }
 0x55c   :  { %9354 = vmatpush1.bf16.msra.mxu1 %v18631_v41  ;;  %8914 = vmatprep.mubr.bf16.mxu1 %v28575_v20  ;;  %v18674_v41 = vld [vmem:[%s28454_s4 + $0x154] ss:$12 sps:$4 sm:$0xff]  }
 0x55d   :  { %9355 = vmatprep.subr.bf16.mxu1 %v18636_v22  ;;  %9476 = vmatprep.mubr.bf16.mxu0 %v28549_v11 }
 0x55e   :  { %17184 = vmatpush3.bf16.msra.mxu0 %v18641_v16  ;;  %v18676_v16 = vld [vmem:[%s28454_s4 + $0x8] ss:$12 sps:$4 sm:$0xff]  }
 0x55f   :  { %17185 = vmatprep.subr.bf16.mxu0 %v18645_v23  ;;  %v28587_v23 = vld [vmem:[#allocation34_spill] sm:$0xff] }
 0x560   :  { %9356 = vmatpush1.bf16.msra.mxu1 %v18634_v19  ;;  %v28588_v19 = vld [vmem:[#allocation25_spill] sm:$0xff] }
 0x561   :  { %9357 = vmatprep.subr.bf16.mxu1 %v18639_v35  ;;  %v18682_v35 = vld [vmem:[%s28454_s4 + $0x46c] ss:$12 sps:$4 sm:$0xff]  }
 0x562   :  { %v25993_v45 = vpop.f32.mrf.mxu0  ;;  %17186 = vmatpush3.bf16.msra.mxu0 %v18646_v31 }
 0x563   :  { %8915 = vmatmul.mubr.bf16.gmra.mxu1 %v28576_v40  ;;  %15235 = vmatmul.mubr.msk.bf16.gmra.mxu0 %vm8696_vm2, %v28577_v3 }
 0x564   :  { %v26004_v54 = vpop.f32.mrf.mxu0  ;;  %9358 = vmatpush1.bf16.msra.mxu1 %v18637_v63  ;;  %8922 = vmatprep.mubr.bf16.mxu1 %v28578_v6  ;;  %v28590_v63 = vld [vmem:[#allocation6_spill] sm:$0xff] }
 0x565   :  { %9359 = vmatprep.subr.bf16.mxu1 %v18644_v34  ;;  %9486 = vmatprep.mubr.bf16.mxu0 %v28549_v11  ;;  %v18672_v34 = vld [vmem:[%s28454_s4 + $0x150] ss:$12 sps:$4 sm:$0xff]  }
 0x566   :  { %v26017_v33 = vpop.f32.mrf.mxu0  ;;  %17187 = vmatprep.subr.bf16.mxu0 %v18650_v58  ;;  %v18679_v58 = vld [vmem:[%s28454_s4 + $0x13c] ss:$12 sps:$4 sm:$0xff]  }
 0x567   :  { %17188 = vmatpush3.bf16.msra.mxu0 %v18651_v47 }
 0x568   :  { %v26019_v1 = vpop.f32.mrf.mxu0  ;;  %9360 = vmatpush1.bf16.msra.mxu1 %v18642_v4  ;;  %17189 = vmatprep.subr.bf16.mxu0 %v18655_v2  ;;  %v18677_v2 = vld [vmem:[%s28454_s4 + $0x138] ss:$12 sps:$4 sm:$0xff]  }
 0x569   :  { %9361 = vmatprep.subr.bf16.mxu1 %v18649_v14  ;;  %v18680_v14 = vld [vmem:[%s28454_s4 + $0x468] ss:$12 sps:$4 sm:$0xff]  }
 0x56a   :  { %v26030_v51 = vpop.f32.mrf.mxu0 }
 0x56b   :  { %8923 = vmatmul.mubr.bf16.gmra.mxu1 %v28579_v10  ;;  %15236 = vmatmul.mubr.msk.bf16.gmra.mxu0 %vm8696_vm2, %v28580_v61 }
 0x56c   :  { %v26038_v52 = vpop.f32.mrf.mxu0  ;;  %9362 = vmatpush1.bf16.msra.mxu1 %v18647_v18  ;;  %8930 = vmatprep.mubr.bf16.mxu1 %v28581_v60  ;;  %v18685_v18 = vld [vmem:[%s28454_s4 + $0x124] ss:$12 sps:$4 sm:$0xff]  }
 0x56d   :  { %9363 = vmatprep.subr.bf16.mxu1 %v18654_v0  ;;  %17190 = vmatpush3.bf16.msra.mxu0 %v18656_v48  ;;  %v18688_v48 = vld [vmem:[%s28454_s4 + $0x454] ss:$12 sps:$4 sm:$0xff]  }
 0x56e   :  { %v26050_v59 = vpop.f32.mrf.mxu0  ;;  %9496 = vmatprep.mubr.bf16.mxu0 %v28549_v11  ;;  %17191 = vmatprep.subr.bf16.mxu0 %v18660_v29  ;;  %v28594_v29 = vld [vmem:[#allocation5_spill] sm:$0xff] }
 0x570   :  { %v26056_v26 = vpop.f32.mrf.mxu0  ;;  %9364 = vmatpush1.bf16.msra.mxu1 %v18652_v12 }
 0x571   :  { %9365 = vmatprep.subr.bf16.mxu1 %v18659_v32  ;;  %17192 = vmatpush3.bf16.msra.mxu0 %v18661_v57  ;;  %v18683_v32 = vld [vmem:[%s28454_s4 + $0x120] ss:$12 sps:$4 sm:$0xff]   ;;  %v18686_v57 = vld [vmem:[%s28454_s4 + $0x450] ss:$12 sps:$4 sm:$0xff]  }
 0x572   :  { %v26067_v50 = vpop.f32.mrf.mxu0  ;;  %17193 = vmatprep.subr.bf16.mxu0 %v18665_v5  ;;  %v28596_v5 = vld [vmem:[#allocation8_spill] sm:$0xff] }
 0x573   :  { %8931 = vmatmul.mubr.bf16.gmra.mxu1 %v28582_v46  ;;  %15237 = vmatmul.mubr.msk.bf16.gmra.mxu0 %vm8696_vm2, %v28583_v42 }
 0x574   :  { %v26075_v27 = vpop.f32.mrf.mxu0  ;;  %9366 = vmatpush1.bf16.msra.mxu1 %v18657_v25  ;;  %8938 = vmatprep.mubr.bf16.mxu1 %v28584_v43  ;;  %v18691_v25 = vld [vmem:[%s28454_s4 + $0x10c] ss:$12 sps:$4 sm:$0xff]  }
 0x575   :  { %9367 = vmatprep.subr.bf16.mxu1 %v18664_v30  ;;  %17194 = vmatpush3.bf16.msra.mxu0 %v18666_v28  ;;  %v18694_v30 = vld [vmem:[%s28454_s4 + $0x43c] ss:$12 sps:$4 sm:$0xff]  }
 0x576   :  { %v26087_v13 = vpop.f32.mrf.mxu0  ;;  %9506 = vmatprep.mubr.bf16.mxu0 %v28549_v11  ;;  %17195 = vmatprep.subr.bf16.mxu0 %v18670_v9 }
 0x578   :  { %v26093_v39 = vpop.f32.mrf.mxu0  ;;  %9368 = vmatpush1.bf16.msra.mxu1 %v18662_v7  ;;  %v18689_v7 = vld [vmem:[%s28454_s4 + $0x108] ss:$12 sps:$4 sm:$0xff]  }
 0x579   :  { %28585 = vst [vmem:[#allocation37_spill] sm:$0xff] %v26093_v39  ;;  %9369 = vmatprep.subr.bf16.mxu1 %v18669_v36  ;;  %17196 = vmatpush3.bf16.msra.mxu0 %v18671_v44  ;;  %v18692_v36 = vld [vmem:[%s28454_s4 + $0x438] ss:$12 sps:$4 sm:$0xff]   ;;  %v18697_v44 = vld [vmem:[%s28454_s4 + $0xf4] ss:$12 sps:$4 sm:$0xff]  }
 0x57a   :  { %v26101_v22 = vpop.f32.mrf.mxu0  ;;  %17197 = vmatprep.subr.bf16.mxu0 %v18675_v15  ;;  %v18700_v15 = vld [vmem:[%s28454_s4 + $0x424] ss:$12 sps:$4 sm:$0xff]  }
 0x57b   :  { %28586 = vst [vmem:[#allocation39_spill] sm:$0xff] %v26101_v22  ;;  %8939 = vmatmul.mubr.bf16.gmra.mxu1 %v28587_v23  ;;  %15238 = vmatmul.mubr.msk.bf16.gmra.mxu0 %vm8696_vm2, %v28588_v19 }
 0x57c   :  { %v26112_v31 = vpop.f32.mrf.mxu0  ;;  %9370 = vmatpush2.bf16.msra.mxu1 %v18667_v38  ;;  %9385 = vmatprep.mubr.bf16.mxu1 %v28590_v63  ;;  %v28597_v38 = vld [vmem:[#allocation7_spill] sm:$0xff] }
 0x57d   :  { %28589 = vst [vmem:[#allocation36_spill] sm:$0xff] %v26112_v31  ;;  %9547 = vmatprep.mubr.bf16.mxu0 %v28590_v63  ;;  %9371 = vmatprep.subr.bf16.mxu1 %v18674_v41  ;;  %v18695_v41 = vld [vmem:[%s28454_s4 + $0xf0] ss:$12 sps:$4 sm:$0xff]  }
 0x57e   :  { %v26122_v47 = vpop.f32.mrf.mxu0  ;;  %17198 = vmatpush3.bf16.msra.mxu0 %v18676_v16  ;;  %v18698_v16 = vld [vmem:[%s28454_s4 + $0x420] ss:$12 sps:$4 sm:$0xff]   ;;  %v18703_v63 = vld [vmem:[%s28454_s4 + $0xdc] ss:$12 sps:$4 sm:$0xff]  }
 0x57f   :  { %28591 = vst [vmem:[#allocation38_spill] sm:$0xff] %v26122_v47  ;;  %10128 = vmatprep.subr.bf16.mxu0 %v18682_v35  ;;  %v28598_v35 = vld [vmem:[#allocation12_spill] sm:$0xff] }
 0x580   :  { %v26124_v4 = vpop.f32.mrf.mxu0  ;;  %9372 = vmatpush2.bf16.msra.mxu1 %v18672_v34  ;;  %v18706_v34 = vld [vmem:[%s28454_s4 + $0x40c] ss:$12 sps:$4 sm:$0xff]  }
 0x581   :  { %28592 = vst [vmem:[#allocation40_spill] sm:$0xff] %v26124_v4  ;;  %9373 = vmatprep.subr.bf16.mxu1 %v18679_v58  ;;  %v18701_v58 = vld [vmem:[%s28454_s4 + $0xd8] ss:$12 sps:$4 sm:$0xff]   ;;  %v18782_v4 = vld [vmem:[%s28454_s4 + $0x3e0] ss:$12 sps:$4 sm:$0xff]  }
 0x582   :  { %v26135_v0 = vpop.f32.mrf.mxu0 }
 0x583   :  { %28593 = vst [vmem:[#allocation27_spill] sm:$0xff] %v26135_v0  ;;  %9548 = vmatmul.mubr.bf16.vlgmr.msra.gmra.mxu0 %v28594_v29 }
 0x584   :  { %v26141_v12 = vpop.f32.mrf.mxu0  ;;  %9374 = vmatpush2.bf16.msra.mxu1 %v18677_v2  ;;  %10129 = vmatpush1.bf16.msra.mxu0 %v18680_v14  ;;  %v18704_v2 = vld [vmem:[%s28454_s4 + $0x408] ss:$12 sps:$4 sm:$0xff]   ;;  %v18709_v14 = vld [vmem:[%s28454_s4 + $0xc4] ss:$12 sps:$4 sm:$0xff]  }
 0x585   :  { %28595 = vst [vmem:[#allocation26_spill] sm:$0xff] %v26141_v12  ;;  %9555 = vmatprep.mubr.bf16.mxu0 %v28596_v5  ;;  %9375 = vmatprep.subr.bf16.mxu1 %v18685_v18  ;;  %v18712_v18 = vld [vmem:[%s28454_s4 + $0x3f4] ss:$12 sps:$4 sm:$0xff]  }
 0x586   :  { %v8790_v28 = vpop.f32.mrf.mxu0  ;;  %10130 = vmatprep.subr.bf16.mxu0 %v18688_v48  ;;  %v28599_v48 = vld [vmem:[#allocation11_spill] sm:$0xff] }
 0x587   :  { %v18716_v28 = vld [vmem:[%s28454_s4 + $0x1d0] ss:$12 sps:$4 sm:$0xff]  }
 0x588   :  { %v8791_v9 = vpop.f32.mrf.mxu0  ;;  %9376 = vmatpush2.bf16.msra.mxu1 %v18683_v32  ;;  %10131 = vmatpush1.bf16.msra.mxu0 %v18686_v57  ;;  %v18707_v32 = vld [vmem:[%s28454_s4 + $0xc0] ss:$12 sps:$4 sm:$0xff]   ;;  %v18710_v57 = vld [vmem:[%s28454_s4 + $0x3f0] ss:$12 sps:$4 sm:$0xff]  }
 0x589   :  { %9377 = vmatprep.subr.bf16.mxu1 %v18691_v25  ;;  %10132 = vmatprep.subr.bf16.mxu0 %v18694_v30  ;;  %v28600_v25 = vld [vmem:[#allocation16_spill] sm:$0xff]  ;;  %v18715_v30 = vld [vmem:[%s28454_s4 + $0x3dc] ss:$12 sps:$4 sm:$0xff]   ;;  %v18713_v9 = vld [vmem:[%s28454_s4 + $0x3d8] ss:$12 sps:$4 sm:$0xff]  }
 0x58b   :  { %9556 = vmatmul.mubr.bf16.gmra.mxu0 %v28597_v38 }
 0x58c   :  { %9378 = vmatpush2.bf16.msra.mxu1 %v18689_v7  ;;  %10133 = vmatpush1.bf16.msra.mxu0 %v18692_v36  ;;  %v18719_v7 = vld [vmem:[%s28454_s4 + $0x3c4] ss:$12 sps:$4 sm:$0xff]   ;;  %v28601_v36 = vld [vmem:[#allocation15_spill] sm:$0xff] }
 0x58d   :  { %9563 = vmatprep.mubr.bf16.mxu0 %v28598_v35  ;;  %9379 = vmatprep.subr.bf16.mxu1 %v18697_v44  ;;  %v18723_v44 = vld [vmem:[%s28454_s4 + $0x1b8] ss:$12 sps:$4 sm:$0xff]  }
 0x58e   :  { %10134 = vmatprep.subr.bf16.mxu0 %v18700_v15  ;;  %v28602_v15 = vld [vmem:[#allocation20_spill] sm:$0xff] }
 0x590   :  { %9380 = vmatpush2.bf16.msra.mxu1 %v18695_v41  ;;  %10135 = vmatpush1.bf16.msra.mxu0 %v18698_v16  ;;  %v18717_v41 = vld [vmem:[%s28454_s4 + $0x3c0] ss:$12 sps:$4 sm:$0xff]  }
 0x591   :  { %9381 = vmatprep.subr.bf16.mxu1 %v18703_v63  ;;  %10136 = vmatprep.subr.bf16.mxu0 %v18706_v34  ;;  %v18733_v16 = vld [vmem:[%s28454_s4 + $0x1a0] ss:$12 sps:$4 sm:$0xff]  }
 0x592   :  { %v18726_v63 = vld [vmem:[%s28454_s4 + $0x514] ss:$12 sps:$4 sm:$0xff]   ;;  %v28603_v34 = vld [vmem:[#allocation19_spill] sm:$0xff] }
 0x593   :  { %9564 = vmatmul.mubr.bf16.gmra.mxu0 %v28599_v48 }
 0x594   :  { %9382 = vmatpush2.bf16.msra.mxu1 %v18701_v58  ;;  %10137 = vmatpush1.bf16.msra.mxu0 %v18704_v2  ;;  %v28604_v58 = vld [vmem:[#allocation10_spill] sm:$0xff]  ;;  %v18724_v2 = vld [vmem:[%s28454_s4 + $0x510] ss:$12 sps:$4 sm:$0xff]  }
 0x595   :  { %9571 = vmatprep.mubr.bf16.mxu0 %v28600_v25  ;;  %9383 = vmatprep.subr.bf16.mxu1 %v18709_v14  ;;  %v18740_v14 = vld [vmem:[%s28454_s4 + $0x188] ss:$12 sps:$4 sm:$0xff]  }
 0x596   :  { %10138 = vmatprep.subr.bf16.mxu0 %v18712_v18  ;;  %v18727_v18 = vld [vmem:[%s28454_s4 + $0x4f8] ss:$12 sps:$4 sm:$0xff]  }
 0x598   :  { %9384 = vmatpush2.bf16.msra.mxu1 %v18707_v32  ;;  %10139 = vmatpush1.bf16.msra.mxu0 %v18710_v57  ;;  %v18732_v32 = vld [vmem:[%s28454_s4 + $0x4e4] ss:$12 sps:$4 sm:$0xff]   ;;  %v18730_v57 = vld [vmem:[%s28454_s4 + $0x4e0] ss:$12 sps:$4 sm:$0xff]  }
 0x599   :  { %17470 = vmatprep.subr.bf16.mxu1 %v28550_v17  ;;  %10140 = vmatprep.subr.bf16.mxu0 %v18715_v30  ;;  %v18736_v30 = vld [vmem:[%s28454_s4 + $0x4cc] ss:$12 sps:$4 sm:$0xff]  }
 0x59b   :  { %9386 = vmatmul.mubr.bf16.vlgmr.msra.gmra.mxu1 %v28594_v29  ;;  %9572 = vmatmul.mubr.bf16.gmra.mxu0 %v28601_v36  ;;  %v18722_v29 = vld [vmem:[%s28454_s4 + $0x52c] ss:$12 sps:$4 sm:$0xff]  }
 0x59c   :  { %9395 = vmatprep.mubr.bf16.mxu1 %v28596_v5  ;;  %17471 = vmatpush3.bf16.msra.mxu1 %v18716_v28  ;;  %v18720_v5 = vld [vmem:[%s28454_s4 + $0x528] ss:$12 sps:$4 sm:$0xff]  }
 0x59d   :  { %10141 = vmatpush1.bf16.msra.mxu0 %v18713_v9  ;;  %9579 = vmatprep.mubr.bf16.mxu0 %v28602_v15  ;;  %v18734_v28 = vld [vmem:[%s28454_s4 + $0x4c8] ss:$12 sps:$4 sm:$0xff]   ;;  %v18737_v9 = vld [vmem:[%s28454_s4 + $0x4b0] ss:$12 sps:$4 sm:$0xff]  }
 0x59e   :  { %10142 = vmatprep.subr.bf16.mxu0 %v18719_v7  ;;  %17472 = vmatprep.subr.bf16.mxu1 %v28550_v17  ;;  %v18743_v7 = vld [vmem:[%s28454_s4 + $0x49c] ss:$12 sps:$4 sm:$0xff]  }
 0x5a0   :  { %17473 = vmatpush3.bf16.msra.mxu1 %v18723_v44  ;;  %v18741_v44 = vld [vmem:[%s28454_s4 + $0x498] ss:$12 sps:$4 sm:$0xff]  }
 0x5a1   :  { %10143 = vmatpush1.bf16.msra.mxu0 %v18717_v41  ;;  %17474 = vmatprep.subr.bf16.mxu1 %v28550_v17  ;;  %v18746_v41 = vld [vmem:[%s28454_s4 + $0x484] ss:$12 sps:$4 sm:$0xff]  }
 0x5a2   :  { %10144 = vmatprep.subr.bf16.mxu0 %v18722_v29  ;;  %v18744_v29 = vld [vmem:[%s28454_s4 + $0x480] ss:$12 sps:$4 sm:$0xff]  }
 0x5a3   :  { %9396 = vmatmul.mubr.bf16.gmra.mxu1 %v28597_v38  ;;  %9580 = vmatmul.mubr.bf16.gmra.mxu0 %v28603_v34  ;;  %v18729_v38 = vld [vmem:[%s28454_s4 + $0x4fc] ss:$12 sps:$4 sm:$0xff]  }
 0x5a4   :  { %9405 = vmatprep.mubr.bf16.mxu1 %v28598_v35  ;;  %10160 = vmatprep.mubr.bf16.mxu0 %v28604_v58  ;;  %v18749_v35 = vld [vmem:[%s28454_s4 + $0x58c] ss:$12 sps:$4 sm:$0xff]  }
 0x5a5   :  { %10145 = vmatpush2.bf16.msra.mxu0 %v18720_v5  ;;  %17475 = vmatpush3.bf16.msra.mxu1 %v18733_v16  ;;  %v18747_v5 = vld [vmem:[%s28454_s4 + $0x588] ss:$12 sps:$4 sm:$0xff]  }
 0x5a6   :  { %10146 = vmatprep.subr.bf16.mxu0 %v18726_v63  ;;  %17476 = vmatprep.subr.bf16.mxu1 %v28550_v17  ;;  %v18752_v16 = vld [vmem:[%s28454_s4 + $0x574] ss:$12 sps:$4 sm:$0xff]   ;;  %v18756_v63 = vld [vmem:[%s28454_s4 + $0x590] ss:$12 sps:$4 sm:$0xff]  }
 0x5a9   :  { %10147 = vmatpush2.bf16.msra.mxu0 %v18724_v2  ;;  %17477 = vmatpush3.bf16.msra.mxu1 %v18740_v14  ;;  %v28605_v2 = vld [vmem:[#allocation9_spill] sm:$0xff] }
 0x5aa   :  { %10148 = vmatprep.subr.bf16.mxu0 %v18729_v38  ;;  %10217 = vmatprep.subr.bf16.mxu1 %v18749_v35  ;;  %v18750_v14 = vld [vmem:[%s28454_s4 + $0x570] ss:$12 sps:$4 sm:$0xff]   ;;  %v28606_v38 = vld [vmem:[#allocation14_spill] sm:$0xff] }
 0x5ab   :  { %9406 = vmatmul.mubr.bf16.gmra.mxu1 %v28599_v48  ;;  %v18739_v48 = vld [vmem:[%s28454_s4 + $0x4b4] ss:$12 sps:$4 sm:$0xff]   ;;  %v18755_v35 = vld [vmem:[%s28454_s4 + $0x55c] ss:$12 sps:$4 sm:$0xff]  }
 0x5ac   :  { %9415 = vmatprep.mubr.bf16.mxu1 %v28600_v25 }
 0x5ad   :  { %10149 = vmatpush2.bf16.msra.mxu0 %v18727_v18  ;;  %v18757_v18 = vld [vmem:[%s28454_s4 + $0x578] ss:$12 sps:$4 sm:$0xff]  }
 0x5ae   :  { %10150 = vmatprep.subr.bf16.mxu0 %v18732_v32  ;;  %v18753_v32 = vld [vmem:[%s28454_s4 + $0x558] ss:$12 sps:$4 sm:$0xff]  }
 0x5b1   :  { %10151 = vmatpush2.bf16.msra.mxu0 %v18730_v57  ;;  %v18760_v57 = vld [vmem:[%s28454_s4 + $0x544] ss:$12 sps:$4 sm:$0xff]  }
 0x5b2   :  { %10152 = vmatprep.subr.bf16.mxu0 %v18736_v30  ;;  %v18761_v30 = vld [vmem:[%s28454_s4 + $0x560] ss:$12 sps:$4 sm:$0xff]  }
 0x5b3   :  { %9416 = vmatmul.mubr.bf16.gmra.mxu1 %v28601_v36 }
 0x5b4   :  { %9425 = vmatprep.mubr.bf16.mxu1 %v28602_v15 }
 0x5b5   :  { %10153 = vmatpush2.bf16.msra.mxu0 %v18734_v28  ;;  %v28607_v28 = vld [vmem:[#allocation13_spill] sm:$0xff] }
 0x5b6   :  { %10154 = vmatprep.subr.bf16.mxu0 %v18739_v48  ;;  %v28608_v48 = vld [vmem:[#allocation18_spill] sm:$0xff] }
 0x5b9   :  { %10155 = vmatpush2.bf16.msra.mxu0 %v18737_v9  ;;  %v18758_v9 = vld [vmem:[%s28454_s4 + $0x540] ss:$12 sps:$4 sm:$0xff]  }
 0x5ba   :  { %10156 = vmatprep.subr.bf16.mxu0 %v18743_v7  ;;  %v18762_v7 = vld [vmem:[%s28454_s4 + $0x548] ss:$12 sps:$4 sm:$0xff]  }
 0x5bb   :  { %9426 = vmatmul.mubr.bf16.gmra.mxu1 %v28603_v34 }
 0x5bc   :  { %17478 = vmatprep.mubr.msk.bf16.mxu1 %vm20078_vm0, %v28550_v17 }
 0x5bd   :  { %10157 = vmatpush2.bf16.msra.mxu0 %v18741_v44  ;;  %v18763_v44 = vld [vmem:[%s28454_s4 + $0x530] ss:$12 sps:$4 sm:$0xff]  }
 0x5be   :  { %10158 = vmatprep.subr.bf16.mxu0 %v18746_v41  ;;  %v18775_v41 = vld [vmem:[%s28454_s4 + $0x76c] ss:$12 sps:$4 sm:$0xff]  }
 0x5c1   :  { %10159 = vmatpush2.bf16.msra.mxu0 %v18744_v29  ;;  %v26352_v29 = vrot.slane %v28602_v15, 4  ;;  %v26367_v15 = vrot.slane %v28603_v34, 4  ;;  %v18764_v34 = vld [vmem:[%s28454_s4 + $0x470] ss:$12 sps:$4 sm:$0xff]  }
 0x5c2   :  { %17498 = vmatprep.subr.bf16.mxu0 %v28550_v17 }
 0x5c3   :  { %17479 = vmatmul.mubr.msk.bf16.vlgmr.msra.gmra.mxu1 %vm8696_vm2, %v28574_v53 }
 0x5c4   :  { %10161 = vmatmul.mubr.bf16.vlgmr.msra.gmra.mxu0 %v28605_v2  ;;  %10218 = vmatpush1.bf16.msra.mxu1 %v18747_v5  ;;  %v28609_v5 = vld [vmem:[#allocation17_spill] sm:$0xff] }
 0x5c5   :  { %10170 = vmatprep.mubr.bf16.mxu0 %v28606_v38  ;;  %17482 = vmatprep.mubr.msk.bf16.mxu1 %vm20078_vm0, %v28550_v17 }
 0x5c6   :  { %10219 = vmatprep.subr.bf16.mxu1 %v18752_v16  ;;  %17499 = vmatpush3.bf16.msra.mxu0 %v18756_v63  ;;  %v28610_v16 = vrot.slane %v28600_v25, 4  ;;  %v9763_v25 = vrot.slane %v28577_v3, 4 }
 0x5c7   :  { %17500 = vmatprep.subr.bf16.mxu0 %v28550_v17 }
 0x5c8   :  { %10220 = vmatpush1.bf16.msra.mxu1 %v18750_v14  ;;  %v26361_v63 = vsel %vm9755_vm1, %v28610_v16, %v26352_v29  ;;  %v28611_v14 = vrot.slane %v28601_v36, 4  ;;  %v9762_v36 = vrot.slane %v28574_v53, 4  ;;  %v18780_v53 = vld [vmem:[%s28454_s4 + $0x754] ss:$12 sps:$4 sm:$0xff]  }
 0x5c9   :  { %10221 = vmatprep.subr.bf16.mxu1 %v18755_v35 }
 0x5ca   :  { %17501 = vmatpush3.bf16.msra.mxu0 %v18757_v18  ;;  %v26375_v35 = vsel %vm9755_vm1, %v28611_v14, %v26367_v15  ;;  %v18765_v18 = vld [vmem:[%s28454_s4 + $0x518] ss:$12 sps:$4 sm:$0xff]  }
 0x5cb   :  { %17483 = vmatmul.mubr.msk.bf16.gmra.mxu1 %vm8696_vm2, %v28577_v3  ;;  %17502 = vmatprep.subr.bf16.mxu0 %v28550_v17  ;;  %v18766_v3 = vld [vmem:[%s28454_s4 + $0x458] ss:$12 sps:$4 sm:$0xff]  }
 0x5cc   :  { %10171 = vmatmul.mubr.bf16.gmra.mxu0 %v28607_v28  ;;  %17486 = vmatprep.mubr.msk.bf16.mxu1 %vm20078_vm0, %v28550_v17  ;;  %v18783_v14 = vld [vmem:[%s28454_s4 + $0x738] ss:$12 sps:$4 sm:$0xff]  }
 0x5cd   :  { %10180 = vmatprep.mubr.bf16.mxu0 %v28608_v48  ;;  %10222 = vmatpush1.bf16.msra.mxu1 %v18753_v32  ;;  %v9764_v32 = vsel %vm9755_vm1, %v9762_v36, %v9763_v25 }
 0x5ce   :  { %10223 = vmatprep.subr.bf16.mxu1 %v18760_v57  ;;  %17503 = vmatpush3.bf16.msra.mxu0 %v18761_v30  ;;  %v18773_v57 = vld [vmem:[%s28454_s4 + $0x768] ss:$12 sps:$4 sm:$0xff]   ;;  %v18767_v30 = vld [vmem:[%s28454_s4 + $0x500] ss:$12 sps:$4 sm:$0xff]  }
 0x5cf   :  { %17504 = vmatprep.subr.bf16.mxu0 %v28550_v17 }
 0x5d1   :  { %10224 = vmatpush1.bf16.msra.mxu1 %v18758_v9  ;;  %v9769_v9 = vrot.slane %v28580_v61, 4 }
 0x5d2   :  { %17505 = vmatpush3.bf16.msra.mxu0 %v18762_v7  ;;  %17238 = vmatprep.subr.bf16.mxu1 %v18763_v44  ;;  %v18778_v7 = vld [vmem:[%s28454_s4 + $0x750] ss:$12 sps:$4 sm:$0xff]  }
 0x5d3   :  { %17487 = vmatmul.mubr.msk.bf16.gmra.mxu1 %vm8696_vm2, %v28580_v61  ;;  %11018 = vmatprep.subr.bf16.mxu0 %v18775_v41  ;;  %v18785_v44 = vld [vmem:[%s28454_s4 + $0x73c] ss:$12 sps:$4 sm:$0xff]   ;;  %v18768_v41 = vld [vmem:[%s28454_s4 + $0x440] ss:$12 sps:$4 sm:$0xff]   ;;  %v9770_v16 = vsel %vm9755_vm1, %v9763_v25, %v9769_v9 }
 0x5d4   :  { %10181 = vmatmul.mubr.bf16.gmra.mxu0 %v28609_v5  ;;  %17490 = vmatprep.mubr.msk.bf16.mxu1 %vm20078_vm0, %v28550_v17  ;;  %v18769_v61 = vld [vmem:[%s28454_s4 + $0x4e8] ss:$12 sps:$4 sm:$0xff]  }
 0x5d5   :  { %10190 = vmatprep.mubr.bf16.mxu0 %v26361_v63  ;;  %v18770_v25 = vld [vmem:[%s28454_s4 + $0x428] ss:$12 sps:$4 sm:$0xff]  }
 0x5db   :  { %17491 = vmatmul.mubr.msk.bf16.gmra.mxu1 %vm8696_vm2, %v28583_v42 }
 0x5dc   :  { %10191 = vmatmul.mubr.bf16.gmra.mxu0 %v26375_v35  ;;  %17494 = vmatprep.mubr.msk.bf16.mxu1 %vm20078_vm0, %v28550_v17 }
 0x5dd   :  { %10200 = vmatprep.mubr.bf16.mxu0 %v26352_v29 }
 0x5e3   :  { %17495 = vmatmul.mubr.msk.bf16.gmra.mxu1 %vm8696_vm2, %v28588_v19 }
 0x5e4   :  { %10201 = vmatmul.mubr.bf16.gmra.mxu0 %v26367_v15  ;;  %10241 = vmatprep.mubr.bf16.mxu1 %v28549_v11 }
 0x5e5   :  { %17506 = vmatprep.mubr.msk.bf16.mxu0 %vm20078_vm0, %v28550_v17 }
 0x5eb   :  { %15384 = vmatmul.mubr.msk.bf16.vlgmr.msra.gmra.mxu1 %vm8696_vm2, %v9764_v32 }
 0x5ec   :  { %17507 = vmatmul.mubr.msk.bf16.vlgmr.msra.gmra.mxu0 %vm8696_vm2, %v9764_v32  ;;  %17239 = vmatpush3.bf16.msra.mxu1 %v18764_v34 }
 0x5ed   :  { %17240 = vmatprep.subr.bf16.mxu1 %v18765_v18  ;;  %10251 = vmatprep.mubr.bf16.mxu1 %v28549_v11  ;;  %v18790_v18 = vld [vmem:[%s28454_s4 + $0x724] ss:$12 sps:$4 sm:$0xff]  }
 0x5ee   :  { %17510 = vmatprep.mubr.msk.bf16.mxu0 %vm20078_vm0, %v28550_v17  ;;  %11019 = vmatpush1.bf16.msra.mxu0 %v18773_v57 }
 0x5ef   :  { %11020 = vmatprep.subr.bf16.mxu0 %v18780_v53  ;;  %v18771_v53 = vld [vmem:[%s28454_s4 + $0x4d0] ss:$12 sps:$4 sm:$0xff]  }
 0x5f0   :  { %17241 = vmatpush3.bf16.msra.mxu1 %v18766_v3  ;;  %v9775_v3 = vrot.slane %v28583_v42, 4  ;;  %v18772_v42 = vld [vmem:[%s28454_s4 + $0x410] ss:$12 sps:$4 sm:$0xff]  }
 0x5f1   :  { %17242 = vmatprep.subr.bf16.mxu1 %v18767_v30  ;;  %v18788_v30 = vld [vmem:[%s28454_s4 + $0x720] ss:$12 sps:$4 sm:$0xff]  }
 0x5f2   :  { %11021 = vmatpush1.bf16.msra.mxu0 %v18778_v7 }
 0x5f3   :  { %15385 = vmatmul.mubr.msk.bf16.gmra.mxu1 %vm8696_vm2, %v9770_v16  ;;  %v26431_v36 = vpop.f32.mrf.mxu1  ;;  %v26433_v34 = vpop.f32.mrf.mxu0  ;;  %11022 = vmatprep.subr.bf16.mxu0 %v18785_v44 }
 0x5f4   :  { %17511 = vmatmul.mubr.msk.bf16.gmra.mxu0 %vm8696_vm2, %v9770_v16  ;;  %17243 = vmatpush3.bf16.msra.mxu1 %v18768_v41  ;;  %v18800_v41 = vld [vmem:[%s28454_s4 + $0x710] ss:$12 sps:$4 sm:$0xff]  }
 0x5f5   :  { %v26442_v32 = vpop.f32.mrf.mxu1  ;;  %v17452_v57 = vpop.f32.mrf.mxu0  ;;  %10261 = vmatprep.mubr.bf16.mxu1 %v28549_v11  ;;  %17244 = vmatprep.subr.bf16.mxu1 %v18769_v61 }
 0x5f6   :  { %17514 = vmatprep.mubr.msk.bf16.mxu0 %vm20078_vm0, %v28550_v17  ;;  %11023 = vmatpush1.bf16.msra.mxu0 %v18783_v14  ;;  %v9776_v14 = vsel %vm9755_vm1, %v9769_v9, %v9775_v3  ;;  %v18776_v57 = vld [vmem:[%s28454_s4 + $0x4b8] ss:$12 sps:$4 sm:$0xff]  }
 0x5f7   :  { %v26454_v7 = vpop.f32.mrf.mxu1  ;;  %v26456_v44 = vpop.f32.mrf.mxu0  ;;  %11024 = vmatprep.subr.bf16.mxu0 %v18790_v18 }
 0x5f8   :  { %17245 = vmatpush3.bf16.msra.mxu1 %v18770_v25 }
 0x5f9   :  { %v26464_v61 = vpop.f32.mrf.mxu1  ;;  %v17453_v16 = vpop.f32.mrf.mxu0  ;;  %17246 = vmatprep.subr.bf16.mxu1 %v18771_v53  ;;  %v18777_v53 = vld [vmem:[%s28454_s4 + $0x3f8] ss:$12 sps:$4 sm:$0xff]  }
 0x5fa   :  { %11025 = vmatpush1.bf16.msra.mxu0 %v18788_v30  ;;  %v18781_v30 = vld [vmem:[%s28454_s4 + $0x4a0] ss:$12 sps:$4 sm:$0xff]  }
 0x5fb   :  { %15386 = vmatmul.mubr.msk.bf16.gmra.mxu1 %vm8696_vm2, %v9776_v14  ;;  %v26471_v18 = vpop.f32.mrf.mxu1  ;;  %v26473_v25 = vpop.f32.mrf.mxu0  ;;  %17293 = vmatprep.subr.bf16.mxu0 %v18800_v41  ;;  %v9781_v41 = vrot.slane %v28588_v19, 4  ;;  %v18786_v19 = vld [vmem:[%s28454_s4 + $0x488] ss:$12 sps:$4 sm:$0xff]  }
 0x5fc   :  { %17515 = vmatmul.mubr.msk.bf16.gmra.mxu0 %vm8696_vm2, %v9776_v14  ;;  %17247 = vmatpush3.bf16.msra.mxu1 %v18772_v42 }
 0x5fd   :  { %v26479_v9 = vpop.f32.mrf.mxu1  ;;  %v17456_v16 = vpop.f32.mrf.mxu0  ;;  %10271 = vmatprep.mubr.bf16.mxu1 %v28549_v11  ;;  %17518 = vmatprep.mubr.msk.bf16.mxu0 %vm20078_vm0, %v28550_v17  ;;  %v9782_v39 = vsel %vm9755_vm1, %v9775_v3, %v9781_v41  ;;  %v18787_v3 = vld [vmem:[%s28454_s4 + $0x3c8] ss:$12 sps:$4 sm:$0xff]  }
 0x5fe   :  { %17248 = vmatprep.subr.bf16.mxu1 %v18776_v57 }
 0x5ff   :  { %v26488_v42 = vpop.f32.mrf.mxu1  ;;  %v26490_v14 = vpop.f32.mrf.mxu0 }
 0x600   :  { %17249 = vmatpush3.bf16.msra.mxu1 %v18777_v53 }
 0x601   :  { %v26492_v21 = vpop.f32.mrf.mxu1  ;;  %v17457_v16 = vpop.f32.mrf.mxu0  ;;  %17250 = vmatprep.subr.bf16.mxu1 %v18781_v30 }
 0x602   :  { %v18793_v16 = vld [vmem:[%s28454_s4 + $0x64c] ss:$12 sps:$4 sm:$0xff]  }
 0x603   :  { %15387 = vmatmul.mubr.msk.bf16.gmra.mxu1 %vm8696_vm2, %v9782_v39  ;;  %v26502_v57 = vpop.f32.mrf.mxu1  ;;  %v26504_v12 = vpop.f32.mrf.mxu0 }
 0x604   :  { %17519 = vmatmul.mubr.msk.bf16.gmra.mxu0 %vm8696_vm2, %v9782_v39  ;;  %10281 = vmatprep.mubr.bf16.mxu1 %v28549_v11 }
 0x605   :  { %v26508_v53 = vpop.f32.mrf.mxu1  ;;  %v17460_v30 = vpop.f32.mrf.mxu0  ;;  %17251 = vmatpush3.bf16.msra.mxu1 %v18782_v4  ;;  %17522 = vmatprep.mubr.msk.bf16.mxu0 %vm20078_vm0, %v28550_v17 }
 0x606   :  { %17252 = vmatprep.subr.bf16.mxu1 %v18786_v19 }
 0x607   :  { %v26518_v0 = vpop.f32.mrf.mxu1  ;;  %v26520_v39 = vpop.f32.mrf.mxu0 }
 0x608   :  { %28612 = vst [vmem:[#allocation21_spill] sm:$0xff] %v26518_v0 }
 0x609   :  { %v26522_v47 = vpop.f32.mrf.mxu1  ;;  %v17461_v30 = vpop.f32.mrf.mxu0  ;;  %17253 = vmatpush3.bf16.msra.mxu1 %v18787_v3  ;;  %v18791_v3 = vld [vmem:[%s28454_s4 + $0x648] ss:$12 sps:$4 sm:$0xff]  }
 0x60a   :  { %28613 = vst [vmem:[#allocation29_spill] sm:$0xff] %v26522_v47  ;;  %10929 = vmatprep.subr.bf16.mxu1 %v18793_v16 }
 0x60b   :  { %15388 = vmatmul.mubr.msk.bf16.gmra.mxu1 %vm8696_vm2, %v9781_v41  ;;  %v26525_v4 = vpop.f32.mrf.mxu1  ;;  %v26527_v31 = vpop.f32.mrf.mxu0 }
 0x60c   :  { %28614 = vst [vmem:[#allocation28_spill] sm:$0xff] %v26525_v4  ;;  %17523 = vmatmul.mubr.msk.bf16.gmra.mxu0 %vm8696_vm2, %v9781_v41  ;;  %10322 = vmatprep.mubr.bf16.mxu1 %v28604_v58  ;;  %v18796_v58 = vld [vmem:[%s28454_s4 + $0x634] ss:$12 sps:$4 sm:$0xff]  }
 0x60d   :  { %v26531_v19 = vpop.f32.mrf.mxu1  ;;  %v17464_v22 = vpop.f32.mrf.mxu0  ;;  %11042 = vmatprep.mubr.bf16.mxu0 %v28549_v11 }
 0x60e   :  { %28615 = vst [vmem:[#allocation22_spill] sm:$0xff] %v26531_v19  ;;  %v18801_v22 = vld [vmem:[%s28454_s4 + $0x650] ss:$12 sps:$4 sm:$0xff]   ;;  %v18805_v19 = vld [vmem:[%s28454_s4 + $0x6f8] ss:$12 sps:$4 sm:$0xff]  }
 0x60f   :  { %v26534_v0 = vpop.f32.mrf.mxu1  ;;  %v26536_v30 = vpop.f32.mrf.mxu0 }
 0x610   :  { %28616 = vst [vmem:[#allocation31_spill] sm:$0xff] %v26534_v0 }
 0x611   :  { %v26541_v16 = vpop.f32.mrf.mxu1  ;;  %v17465_v47 = vpop.f32.mrf.mxu0 }
 0x612   :  { %28617 = vst [vmem:[#allocation30_spill] sm:$0xff] %v26541_v16  ;;  %v18794_v47 = vld [vmem:[%s28454_s4 + $0x630] ss:$12 sps:$4 sm:$0xff]  }
 0x613   :  { %10323 = vmatmul.mubr.bf16.vlgmr.msra.gmra.mxu1 %v28605_v2  ;;  %v26550_v41 = vpop.f32.mrf.mxu1  ;;  %v26552_v0 = vpop.f32.mrf.mxu0 }
 0x614   :  { %28618 = vst [vmem:[#allocation23_spill] sm:$0xff] %v26550_v41  ;;  %10930 = vmatpush1.bf16.msra.mxu1 %v18791_v3  ;;  %15534 = vmatmul.mubr.msk.bf16.vlgmr.msra.gmra.mxu0 %vm8696_vm2, %v25886_v62  ;;  %v18799_v41 = vld [vmem:[%s28454_s4 + $0x61c] ss:$12 sps:$4 sm:$0xff]   ;;  %v18806_v3 = vld [vmem:[%s28454_s4 + $0x638] ss:$12 sps:$4 sm:$0xff]  }
 0x615   :  { %10330 = vmatprep.mubr.bf16.mxu1 %v28606_v38  ;;  %v26563_v16 = vpop.f32.mrf.mxu1  ;;  %v17468_v2 = vpop.f32.mrf.mxu0  ;;  %10931 = vmatprep.subr.bf16.mxu1 %v18796_v58  ;;  %v18810_v38 = vld [vmem:[%s28454_s4 + $0x6e0] ss:$12 sps:$4 sm:$0xff]   ;;  %v18797_v58 = vld [vmem:[%s28454_s4 + $0x618] ss:$12 sps:$4 sm:$0xff]  }
 0x616   :  { %28619 = vst [vmem:[#allocation33_spill] sm:$0xff] %v26563_v16  ;;  %11052 = vmatprep.mubr.bf16.mxu0 %v28549_v11  ;;  %17294 = vmatpush3.bf16.msra.mxu0 %v18801_v22  ;;  %v18804_v22 = vld [vmem:[%s28454_s4 + $0x604] ss:$12 sps:$4 sm:$0xff]  }
 0x617   :  { %v8871_v62 = vpop.f32.mrf.mxu1  ;;  %v9015_v4 = vpop.f32.mrf.mxu0  ;;  %17295 = vmatprep.subr.bf16.mxu0 %v18805_v19 }
 0x618   :  { %10932 = vmatpush1.bf16.msra.mxu1 %v18794_v47  ;;  %v18811_v62 = vld [vmem:[%s28454_s4 + $0x620] ss:$12 sps:$4 sm:$0xff]  }
 0x619   :  { %v8872_v2 = vpop.f32.mrf.mxu1  ;;  %v17469_v16 = vpop.f32.mrf.mxu0  ;;  %10933 = vmatprep.subr.bf16.mxu1 %v18799_v41  ;;  %v18802_v41 = vld [vmem:[%s28454_s4 + $0x600] ss:$12 sps:$4 sm:$0xff]  }
 0x61a   :  { %17296 = vmatpush3.bf16.msra.mxu0 %v18806_v3  ;;  %v18815_v16 = vld [vmem:[%s28454_s4 + $0x6c8] ss:$12 sps:$4 sm:$0xff]   ;;  %v18809_v3 = vld [vmem:[%s28454_s4 + $0x5ec] ss:$12 sps:$4 sm:$0xff]  }
 0x61b   :  { %10331 = vmatmul.mubr.bf16.gmra.mxu1 %v28607_v28  ;;  %v17144_v4 = vpop.f32.mrf.mxu1  ;;  %v26585_v19 = vpop.f32.mrf.mxu0  ;;  %17297 = vmatprep.subr.bf16.mxu0 %v18810_v38 }
 0x61c   :  { %28620 = vst [vmem:[#allocation32_spill] sm:$0xff] %v26585_v19  ;;  %10934 = vmatpush1.bf16.msra.mxu1 %v18797_v58  ;;  %15535 = vmatmul.mubr.msk.bf16.gmra.mxu0 %vm8696_vm2, %v25922_v37  ;;  %v18816_v58 = vld [vmem:[%s28454_s4 + $0x608] ss:$12 sps:$4 sm:$0xff]  }
 0x61d   :  { %10338 = vmatprep.mubr.bf16.mxu1 %v28608_v48  ;;  %v17145_v47 = vpop.f32.mrf.mxu1  ;;  %v26596_v28 = vpop.f32.mrf.mxu0  ;;  %10935 = vmatprep.subr.bf16.mxu1 %v18804_v22  ;;  %v18820_v48 = vld [vmem:[%s28454_s4 + $0x6b0] ss:$12 sps:$4 sm:$0xff]  }
 0x61e   :  { %v17146_v38 = vadd.f32 %v17145_v47, %v17144_v4  ;;  %11062 = vmatprep.mubr.bf16.mxu0 %v28549_v11  ;;  %17298 = vmatpush3.bf16.msra.mxu0 %v18811_v62  ;;  %v18807_v62 = vld [vmem:[%s28454_s4 + $0x5e8] ss:$12 sps:$4 sm:$0xff]  }
 0x61f   :  { %v17147_v2 = vpop.f32.mrf.mxu1  ;;  %v26605_v19 = vpop.f32.mrf.mxu0  ;;  %17299 = vmatprep.subr.bf16.mxu0 %v18815_v16  ;;  %v18814_v16 = vld [vmem:[%s28454_s4 + $0x5d4] ss:$12 sps:$4 sm:$0xff]  }
 0x620   :  { %28621 = vst [vmem:[#allocation24_spill] sm:$0xff] %v26605_v19  ;;  %v26611_v22 = vadd.f32 %v17146_v38, %v26433_v34  ;;  %10936 = vmatpush1.bf16.msra.mxu1 %v18802_v41  ;;  %v18821_v34 = vld [vmem:[%s28454_s4 + $0x5f0] ss:$12 sps:$4 sm:$0xff]  }
 0x621   :  { %v17148_v4 = vpop.f32.mrf.mxu1  ;;  %v26616_v47 = vpop.f32.mrf.mxu0  ;;  %10937 = vmatprep.subr.bf16.mxu1 %v18809_v3  ;;  %v18825_v3 = vld [vmem:[%s28454_s4 + $0x698] ss:$12 sps:$4 sm:$0xff]  }
 0x622   :  { %28622 = vst [vmem:[#allocation35_spill] sm:$0xff] %v26616_v47  ;;  %v17149_v19 = vadd.f32 %v17148_v4, %v17147_v2  ;;  %17300 = vmatpush3.bf16.msra.mxu0 %v18816_v58  ;;  %v18812_v58 = vld [vmem:[%s28454_s4 + $0x5d0] ss:$12 sps:$4 sm:$0xff]  }
 0x623   :  { %10339 = vmatmul.mubr.bf16.gmra.mxu1 %v28609_v5  ;;  %v17150_v41 = vpop.f32.mrf.mxu1  ;;  %v26625_v38 = vpop.f32.mrf.mxu0  ;;  %17301 = vmatprep.subr.bf16.mxu0 %v18820_v48  ;;  %v18819_v48 = vld [vmem:[%s28454_s4 + $0x5bc] ss:$12 sps:$4 sm:$0xff]  }
 0x624   :  { %v26631_v47 = vadd.f32 %v17149_v19, %v26456_v44  ;;  %10938 = vmatpush1.bf16.msra.mxu1 %v18807_v62  ;;  %15536 = vmatmul.mubr.msk.bf16.gmra.mxu0 %vm8696_vm2, %v25951_v49  ;;  %v18826_v19 = vld [vmem:[%s28454_s4 + $0x5d8] ss:$12 sps:$4 sm:$0xff]  }
 0x625   :  { %10346 = vmatprep.mubr.bf16.mxu1 %v26361_v63  ;;  %v17151_v5 = vpop.f32.mrf.mxu1  ;;  %v26639_v2 = vpop.f32.mrf.mxu0  ;;  %10939 = vmatprep.subr.bf16.mxu1 %v18814_v16  ;;  %v26651_v63 = vrot.slane %v25953_v8, 4  ;;  %v18830_v16 = vld [vmem:[%s28454_s4 + $0x680] ss:$12 sps:$4 sm:$0xff]   ;;  %v18824_v8 = vld [vmem:[%s28454_s4 + $0x5a4] ss:$12 sps:$4 sm:$0xff]  }
 0x626   :  { %28623 = vst [vmem:[#allocation34_spill] sm:$0xff] %v26639_v2  ;;  %v17152_v44 = vadd.f32 %v17151_v5, %v17150_v41  ;;  %11072 = vmatprep.mubr.bf16.mxu0 %v28549_v11  ;;  %17302 = vmatpush3.bf16.msra.mxu0 %v18821_v34  ;;  %v18817_v34 = vld [vmem:[%s28454_s4 + $0x5b8] ss:$12 sps:$4 sm:$0xff]  }
 0x627   :  { %v17153_v62 = vpop.f32.mrf.mxu1  ;;  %v26648_v4 = vpop.f32.mrf.mxu0  ;;  %17303 = vmatprep.subr.bf16.mxu0 %v18825_v3 }
 0x628   :  { %v26657_v41 = vadd.f32 %v17152_v44, %v26473_v25  ;;  %10940 = vmatpush1.bf16.msra.mxu1 %v18812_v58  ;;  %v18831_v25 = vld [vmem:[%s28454_s4 + $0x5c0] ss:$12 sps:$4 sm:$0xff]   ;;  %v28625_v58 = vrot.slane %v25929_v55, 4 }
 0x629   :  { %v17154_v5 = vpop.f32.mrf.mxu1  ;;  %v26662_v2 = vpop.f32.mrf.mxu0  ;;  %10941 = vmatprep.subr.bf16.mxu1 %v18819_v48  ;;  %v18822_v55 = vld [vmem:[%s28454_s4 + $0x5a0] ss:$12 sps:$4 sm:$0xff]  }
 0x62a   :  { %28624 = vst [vmem:[#allocation25_spill] sm:$0xff] %v26662_v2  ;;  %v17155_v3 = vadd.f32 %v17154_v5, %v17153_v62  ;;  %17304 = vmatpush3.bf16.msra.mxu0 %v18826_v19  ;;  %v26675_v44 = vsel %vm9755_vm1, %v28625_v58, %v26651_v63  ;;  %v18835_v19 = vld [vmem:[%s28454_s4 + $0x668] ss:$12 sps:$4 sm:$0xff]  }
 0x62b   :  { %10347 = vmatmul.mubr.bf16.gmra.mxu1 %v26375_v35  ;;  %v17156_v2 = vpop.f32.mrf.mxu1  ;;  %v26677_v48 = vpop.f32.mrf.mxu0  ;;  %17305 = vmatprep.subr.bf16.mxu0 %v18830_v16  ;;  %v18829_v16 = vld [vmem:[%s28454_s4 + $0x70c] ss:$12 sps:$4 sm:$0xff]  }
 0x62c   :  { %28626 = vst [vmem:[#allocation6_spill] sm:$0xff] %v26677_v48  ;;  %v26683_v62 = vadd.f32 %v17155_v3, %v26490_v14  ;;  %10942 = vmatpush1.bf16.msra.mxu1 %v18817_v34  ;;  %15537 = vmatmul.mubr.msk.bf16.gmra.mxu0 %vm8696_vm2, %v26675_v44  ;;  %v18836_v34 = vld [vmem:[%s28454_s4 + $0x5a8] ss:$12 sps:$4 sm:$0xff]   ;;  %v10560_v48 = vrot.slane %v28572_v56, 4  ;;  %v18832_v56 = vld [vmem:[%s28454_s4 + $0x6f0] ss:$12 sps:$4 sm:$0xff]  }
 0x62d   :  { %10354 = vmatprep.mubr.bf16.mxu1 %v26352_v29  ;;  %v17157_v35 = vpop.f32.mrf.mxu1  ;;  %v26691_v5 = vpop.f32.mrf.mxu0  ;;  %10943 = vmatprep.subr.bf16.mxu1 %v18824_v8  ;;  %v18827_v8 = vld [vmem:[%s28454_s4 + $0x708] ss:$12 sps:$4 sm:$0xff]  }
 0x62e   :  { %28627 = vst [vmem:[#allocation5_spill] sm:$0xff] %v26691_v5  ;;  %v17158_v14 = vadd.f32 %v17157_v35, %v17156_v2  ;;  %11082 = vmatprep.mubr.bf16.mxu0 %v28549_v11  ;;  %17306 = vmatpush3.bf16.msra.mxu0 %v18831_v25  ;;  %v10561_v2 = vrot.slane %v28575_v20, 4 }
 0x62f   :  { %v17159_v3 = vpop.f32.mrf.mxu1  ;;  %v26700_v58 = vpop.f32.mrf.mxu0  ;;  %17307 = vmatprep.subr.bf16.mxu0 %v18835_v19  ;;  %v18834_v19 = vld [vmem:[%s28454_s4 + $0x6f4] ss:$12 sps:$4 sm:$0xff]  }
 0x630   :  { %v26703_v29 = vadd.f32 %v17158_v14, %v26504_v12  ;;  %10944 = vmatpush1.bf16.msra.mxu1 %v18822_v55  ;;  %v10562_v20 = vsel %vm9755_vm1, %v10560_v48, %v10561_v2 }
 0x631   :  { %v17160_v35 = vpop.f32.mrf.mxu1  ;;  %v26709_v25 = vpop.f32.mrf.mxu0  ;;  %10945 = vmatprep.subr.bf16.mxu1 %v18829_v16 }
 0x632   :  { %28628 = vst [vmem:[#allocation8_spill] sm:$0xff] %v26709_v25  ;;  %v17161_v5 = vadd.f32 %v17160_v35, %v17159_v3  ;;  %17308 = vmatpush3.bf16.msra.mxu0 %v18836_v34  ;;  %v10558_v34 = vrot.slane %v28576_v40, 4  ;;  %v18837_v35 = vld [vmem:[%s28454_s4 + $0x6d8] ss:$12 sps:$4 sm:$0xff]   ;;  %v10557_v25 = vrot.slane %v28573_v24, 4 }
 0x633   :  { %10355 = vmatmul.mubr.bf16.gmra.mxu1 %v26367_v15  ;;  %v17162_v12 = vpop.f32.mrf.mxu1  ;;  %v26716_v55 = vpop.f32.mrf.mxu0  ;;  %v18842_v40 = vld [vmem:[%s28454_s4 + $0x6c4] ss:$12 sps:$4 sm:$0xff]  }
 0x634   :  { %v26719_v14 = vadd.f32 %v17161_v5, %v26520_v39  ;;  %10946 = vmatpush2.bf16.msra.mxu1 %v18827_v8  ;;  %15538 = vmatmul.mubr.msk.bf16.gmra.mxu0 %vm8696_vm2, %v26651_v63  ;;  %v18839_v39 = vld [vmem:[%s28454_s4 + $0x6dc] ss:$12 sps:$4 sm:$0xff]  }
 0x635   :  { %10961 = vmatprep.mubr.bf16.mxu1 %v10562_v20  ;;  %11123 = vmatprep.mubr.bf16.mxu0 %v10562_v20  ;;  %v17163_v16 = vpop.f32.mrf.mxu1  ;;  %v26727_v15 = vpop.f32.mrf.mxu0  ;;  %v10568_v20 = vrot.slane %v28578_v6, 4  ;;  %v18840_v6 = vld [vmem:[%s28454_s4 + $0x6c0] ss:$12 sps:$4 sm:$0xff]  }
 0x636   :  { %28629 = vst [vmem:[#allocation7_spill] sm:$0xff] %v26727_v15  ;;  %v17164_v5 = vadd.f32 %v17163_v16, %v17162_v12  ;;  %10947 = vmatprep.subr.bf16.mxu1 %v18834_v19 }
 0x637   :  { %v17165_v3 = vpop.f32.mrf.mxu1  ;;  %v26733_v8 = vpop.f32.mrf.mxu0  ;;  %v10569_v24 = vsel %vm9755_vm1, %v10561_v2, %v10568_v20 }
 0x638   :  { %v26736_v48 = vadd.f32 %v17164_v5, %v26527_v31  ;;  %10948 = vmatpush2.bf16.msra.mxu1 %v18832_v56  ;;  %v26749_v31 = vsel %vm9755_vm1, %v10557_v25, %v10558_v34  ;;  %v18845_v25 = vld [vmem:[%s28454_s4 + $0x6ac] ss:$12 sps:$4 sm:$0xff]  }
 0x639   :  { %v17166_v15 = vpop.f32.mrf.mxu1  ;;  %v26743_v12 = vpop.f32.mrf.mxu0  ;;  %10949 = vmatprep.subr.bf16.mxu1 %v18839_v39 }
 0x63a   :  { %28630 = vst [vmem:[#allocation12_spill] sm:$0xff] %v26743_v12  ;;  %v17167_v19 = vadd.f32 %v17166_v15, %v17165_v3  ;;  %v10566_v3 = vrot.slane %v28579_v10, 4  ;;  %v18843_v12 = vld [vmem:[%s28454_s4 + $0x6a8] ss:$12 sps:$4 sm:$0xff]  }
 0x63b   :  { %v17168_v56 = vpop.f32.mrf.mxu1  ;;  %v26751_v16 = vpop.f32.mrf.mxu0 }
 0x63c   :  { %28631 = vst [vmem:[#allocation11_spill] sm:$0xff] %v26751_v16  ;;  %v26754_v5 = vadd.f32 %v17167_v19, %v26536_v30  ;;  %10950 = vmatpush2.bf16.msra.mxu1 %v18837_v35  ;;  %11124 = vmatmul.mubr.bf16.vlgmr.msra.gmra.mxu0 %v26749_v31  ;;  %v10567_v10 = vsel %vm9755_vm1, %v10558_v34, %v10566_v3 }
 0x63d   :  { %11131 = vmatprep.mubr.bf16.mxu0 %v10569_v24  ;;  %v17169_v15 = vpop.f32.mrf.mxu1  ;;  %v26761_v39 = vpop.f32.mrf.mxu0  ;;  %10951 = vmatprep.subr.bf16.mxu1 %v18842_v40 }
 0x63e   :  { %28632 = vst [vmem:[#allocation16_spill] sm:$0xff] %v26761_v39  ;;  %v17170_v30 = vadd.f32 %v17169_v15, %v17168_v56  ;;  %v10574_v39 = vrot.slane %v28581_v60, 4  ;;  %v18848_v56 = vld [vmem:[%s28454_s4 + $0x694] ss:$12 sps:$4 sm:$0xff]  }
 0x63f   :  { %v17171_v35 = vpop.f32.mrf.mxu1  ;;  %v9512_v19 = vpop.f32.mrf.mxu0 }
 0x640   :  { %v26768_v2 = vadd.f32 %v17170_v30, %v26552_v0  ;;  %10952 = vmatpush2.bf16.msra.mxu1 %v18840_v6  ;;  %v10575_v0 = vsel %vm9755_vm1, %v10568_v20, %v10574_v39  ;;  %v18846_v6 = vld [vmem:[%s28454_s4 + $0x690] ss:$12 sps:$4 sm:$0xff]   ;;  %v10572_v30 = vrot.slane %v28582_v46, 4  ;;  %v18849_v20 = vld [vmem:[%s28454_s4 + $0x678] ss:$12 sps:$4 sm:$0xff]  }
 0x641   :  { %v17172_v40 = vpop.f32.mrf.mxu1  ;;  %v9513_v16 = vpop.f32.mrf.mxu0  ;;  %10953 = vmatprep.subr.bf16.mxu1 %v18845_v25 }
 0x642   :  { %v18851_v16 = vld [vmem:[%s28454_s4 + $0x67c] ss:$12 sps:$4 sm:$0xff]   ;;  %v18854_v40 = vld [vmem:[%s28454_s4 + $0x664] ss:$12 sps:$4 sm:$0xff]   ;;  %v26799_v46 = vsel %vm9755_vm1, %v10566_v3, %v10572_v30 }
 0x643   :  { %v17199_v15 = vpop.f32.mrf.mxu0 }
 0x644   :  { %10954 = vmatpush2.bf16.msra.mxu1 %v18843_v12  ;;  %11132 = vmatmul.mubr.bf16.gmra.mxu0 %v10567_v10  ;;  %v26790_v12 = vrot.slane %v28584_v43, 4 }
 0x645   :  { %11139 = vmatprep.mubr.bf16.mxu0 %v10575_v0  ;;  %v17200_v60 = vpop.f32.mrf.mxu0  ;;  %10955 = vmatprep.subr.bf16.mxu1 %v18848_v56 }
 0x646   :  { %v17201_v25 = vadd.f32 %v17200_v60, %v17199_v15  ;;  %v26804_v43 = vsel %vm9755_vm1, %v10574_v39, %v26790_v12 }
 0x647   :  { %v17202_v34 = vpop.f32.mrf.mxu0 }
 0x648   :  { %10956 = vmatpush2.bf16.msra.mxu1 %v18846_v6  ;;  %v26793_v35 = vadd.f32 %v17201_v25, %v26611_v22  ;;  %v18852_v22 = vld [vmem:[%s28454_s4 + $0x660] ss:$12 sps:$4 sm:$0xff]  }
 0x649   :  { %v17203_v19 = vpop.f32.mrf.mxu0  ;;  %10957 = vmatprep.subr.bf16.mxu1 %v18851_v16  ;;  %v26814_v16 = vrot.slane %v28587_v23, 4 }
 0x64a   :  { %v17204_v56 = vadd.f32 %v17203_v19, %v17202_v34 }
 0x64b   :  { %v17205_v15 = vpop.f32.mrf.mxu0  ;;  %v26826_v19 = vsel %vm9755_vm1, %v10572_v30, %v26814_v16 }
 0x64c   :  { %10958 = vmatpush2.bf16.msra.mxu1 %v18849_v20  ;;  %11140 = vmatmul.mubr.bf16.gmra.mxu0 %v26799_v46  ;;  %v26810_v6 = vadd.f32 %v17204_v56, %v26631_v47  ;;  %v18855_v47 = vld [vmem:[%s28454_s4 + $0x770] ss:$12 sps:$4 sm:$0xff]   ;;  %v18856_v56 = vld [vmem:[%s28454_s4 + $0x758] ss:$12 sps:$4 sm:$0xff]  }
 0x64d   :  { %11147 = vmatprep.mubr.bf16.mxu0 %v26804_v43  ;;  %v17206_v60 = vpop.f32.mrf.mxu0  ;;  %10959 = vmatprep.subr.bf16.mxu1 %v18854_v40 }
 0x64e   :  { %v17207_v3 = vadd.f32 %v17206_v60, %v17205_v15 }
 0x64f   :  { %v17208_v25 = vpop.f32.mrf.mxu0 }
 0x650   :  { %10960 = vmatpush2.bf16.msra.mxu1 %v18852_v22  ;;  %v26817_v39 = vadd.f32 %v17207_v3, %v26657_v41  ;;  %v8828_v22 = vadd.f32 %v26431_v36, %v25993_v45  ;;  %v18858_v45 = vld [vmem:[%s28454_s4 + $0x728] ss:$12 sps:$4 sm:$0xff]   ;;  %v8832_v36 = vadd.f32 %v26454_v7, %v26017_v33  ;;  %v8838_v33 = vadd.f32 %v26471_v18, %v26030_v51 }
 0x651   :  { %v17209_v34 = vpop.f32.mrf.mxu0  ;;  %17526 = vmatprep.subr.bf16.mxu1 %v28550_v17  ;;  %v18861_v51 = vld [vmem:[%s28455_s6 + $0x194] ss:$8 sps:$4 sm:$0xff]   ;;  %v8842_v18 = vadd.f32 %v26488_v42, %v26050_v59 }
 0x652   :  { %v17210_v20 = vadd.f32 %v17209_v34, %v17208_v25  ;;  %v8830_v34 = vadd.f32 %v26442_v32, %v26004_v54  ;;  %11613 = vmatprep.subr.bf16.mxu0 %v18861_v51 }
 0x653   :  { %10962 = vmatmul.mubr.bf16.vlgmr.msra.gmra.mxu1 %v26749_v31  ;;  %v17211_v23 = vpop.f32.mrf.mxu0 }
 0x654   :  { %10971 = vmatprep.mubr.bf16.mxu1 %v10569_v24  ;;  %11148 = vmatmul.mubr.bf16.gmra.mxu0 %v26826_v19  ;;  %v26830_v41 = vadd.f32 %v17210_v20, %v26683_v62  ;;  %v18857_v62 = vld [vmem:[%s28454_s4 + $0x740] ss:$12 sps:$4 sm:$0xff]  }
 0x655   :  { %17527 = vmatpush3.bf16.msra.mxu1 %v18855_v47  ;;  %11155 = vmatprep.mubr.bf16.mxu0 %v26790_v12  ;;  %v17212_v40 = vpop.f32.mrf.mxu0 }
 0x656   :  { %v17213_v31 = vadd.f32 %v17212_v40, %v17211_v23  ;;  %17528 = vmatprep.subr.bf16.mxu1 %v28550_v17 }
 0x657   :  { %v17214_v30 = vpop.f32.mrf.mxu0 }
 0x658   :  { %v26838_v15 = vadd.f32 %v17213_v31, %v26703_v29 }
 0x659   :  { %v17215_v24 = vpop.f32.mrf.mxu0  ;;  %17529 = vmatpush3.bf16.msra.mxu1 %v18856_v56 }
 0x65a   :  { %v17216_v60 = vadd.f32 %v17215_v24, %v17214_v30  ;;  %17530 = vmatprep.subr.bf16.mxu1 %v28550_v17 }
 0x65b   :  { %10972 = vmatmul.mubr.bf16.gmra.mxu1 %v10567_v10  ;;  %v9387_v3 = vpop.f32.mrf.mxu1  ;;  %v17217_v25 = vpop.f32.mrf.mxu0 }
 0x65c   :  { %v26848_v29 = vadd.f32 %v9387_v3, %v8828_v22  ;;  %10981 = vmatprep.mubr.bf16.mxu1 %v10575_v0  ;;  %11156 = vmatmul.mubr.bf16.gmra.mxu0 %v26814_v16  ;;  %v26852_v47 = vadd.f32 %v17216_v60, %v26719_v14  ;;  %v8834_v14 = vadd.f32 %v26464_v61, %v26019_v1 }
 0x65d   :  { %v9389_v20 = vpop.f32.mrf.mxu1  ;;  %v17218_v23 = vpop.f32.mrf.mxu0  ;;  %17531 = vmatpush3.bf16.msra.mxu1 %v18857_v62  ;;  %v8840_v1 = vadd.f32 %v26479_v9, %v26038_v52  ;;  %v18859_v52 = vld [vmem:[%s28455_s6 + $0x190] ss:$8 sps:$4 sm:$0xff]  }
 0x65e   :  { %v26859_v10 = vadd.f32 %v9389_v20, %v8830_v34  ;;  %v17219_v54 = vadd.f32 %v17218_v23, %v17217_v25  ;;  %17532 = vmatprep.subr.bf16.mxu1 %v28550_v17  ;;  %11614 = vmatpush1.bf16.msra.mxu0 %v18859_v52  ;;  %v18864_v23 = vld [vmem:[%s28455_s6 + $0x184] ss:$8 sps:$4 sm:$0xff]  }
 0x65f   :  { %v9391_v32 = vpop.f32.mrf.mxu1  ;;  %v17220_v0 = vpop.f32.mrf.mxu0  ;;  %11615 = vmatprep.subr.bf16.mxu0 %v18864_v23  ;;  %v28640_v52 = vld [vmem:[#allocation31_spill] sm:$0xff] }
 0x660   :  { %v26864_v40 = vadd.f32 %v9391_v32, %v8832_v36  ;;  %v26867_v56 = vadd.f32 %v17219_v54, %v26736_v48  ;;  %v18876_v23 = vld [vmem:[%s28455_s6 + $0x144] ss:$8 sps:$4 sm:$0xff]  }
 0x661   :  { %v9393_v31 = vpop.f32.mrf.mxu1  ;;  %v17221_v30 = vpop.f32.mrf.mxu0  ;;  %17533 = vmatpush3.bf16.msra.mxu1 %v18858_v45  ;;  %v8848_v45 = vadd.f32 %v26502_v57, %v26067_v50  ;;  %v18867_v50 = vld [vmem:[%s28455_s6 + $0x174] ss:$8 sps:$4 sm:$0xff]  }
 0x662   :  { %v26871_v7 = vadd.f32 %v9393_v31, %v8834_v14  ;;  %v17222_v24 = vadd.f32 %v17221_v30, %v17220_v0  ;;  %v28633_v57 = vld [vmem:[#allocation21_spill] sm:$0xff]  ;;  %v18870_v31 = vld [vmem:[%s28455_s6 + $0x164] ss:$8 sps:$4 sm:$0xff]  }
 0x663   :  { %10982 = vmatmul.mubr.bf16.gmra.mxu1 %v26799_v46  ;;  %v9397_v62 = vpop.f32.mrf.mxu1  ;;  %v17223_v22 = vpop.f32.mrf.mxu0  ;;  %v8852_v0 = vadd.f32 %v28633_v57, %v26087_v13  ;;  %v28635_v30 = vld [vmem:[#allocation39_spill] sm:$0xff]  ;;  %v28645_v57 = vld [vmem:[#allocation26_spill] sm:$0xff] }
 0x664   :  { %v26876_v61 = vadd.f32 %v9397_v62, %v8838_v33  ;;  %10991 = vmatprep.mubr.bf16.mxu1 %v26804_v43  ;;  %v26880_v48 = vadd.f32 %v17222_v24, %v26754_v5  ;;  %v8844_v5 = vadd.f32 %v26492_v21, %v26056_v26  ;;  %v18862_v21 = vld [vmem:[%s28455_s6 + $0x180] ss:$8 sps:$4 sm:$0xff]   ;;  %v28636_v33 = vld [vmem:[#allocation28_spill] sm:$0xff] }
 0x665   :  { %v9399_v60 = vpop.f32.mrf.mxu1  ;;  %v17224_v3 = vpop.f32.mrf.mxu0  ;;  %11616 = vmatpush1.bf16.msra.mxu0 %v18862_v21  ;;  %v8858_v13 = vadd.f32 %v28636_v33, %v28635_v30  ;;  %v18868_v24 = vld [vmem:[%s28455_s6 + $0x160] ss:$8 sps:$4 sm:$0xff]   ;;  %v18879_v30 = vld [vmem:[%s28455_s6 + $0x134] ss:$8 sps:$4 sm:$0xff]  }
 0x666   :  { %v26887_v46 = vadd.f32 %v9399_v60, %v8840_v1  ;;  %v17225_v25 = vadd.f32 %v17224_v3, %v17223_v22  ;;  %11617 = vmatprep.subr.bf16.mxu0 %v18867_v50  ;;  %v28637_v22 = vld [vmem:[#allocation36_spill] sm:$0xff]  ;;  %v28638_v1 = vld [vmem:[#allocation22_spill] sm:$0xff]  ;;  %v28643_v21 = vld [vmem:[#allocation23_spill] sm:$0xff] }
 0x667   :  { %v9401_v9 = vpop.f32.mrf.mxu1  ;;  %v17226_v43 = vpop.f32.mrf.mxu0  ;;  %v8860_v60 = vadd.f32 %v28638_v1, %v28637_v22  ;;  %v18882_v22 = vld [vmem:[%s28455_s6 + $0x124] ss:$8 sps:$4 sm:$0xff]   ;;  %v18880_v1 = vld [vmem:[%s28455_s6 + $0x120] ss:$8 sps:$4 sm:$0xff]  }
 0x668   :  { %v26894_v34 = vadd.f32 %v9401_v9, %v8842_v18  ;;  %v26897_v20 = vadd.f32 %v17225_v25, %v26768_v2  ;;  %v8850_v2 = vadd.f32 %v26508_v53, %v26075_v27  ;;  %v18873_v18 = vld [vmem:[%s28455_s6 + $0x154] ss:$8 sps:$4 sm:$0xff]   ;;  %v28639_v25 = vld [vmem:[#allocation38_spill] sm:$0xff]  ;;  %v18871_v43 = vld [vmem:[%s28455_s6 + $0x150] ss:$8 sps:$4 sm:$0xff]  }
 0x669   :  { %v9403_v59 = vpop.f32.mrf.mxu1  ;;  %v17227_v42 = vpop.f32.mrf.mxu0  ;;  %v8862_v9 = vadd.f32 %v28640_v52, %v28639_v25  ;;  %v18885_v52 = vld [vmem:[%s28455_s6 + $0x214] ss:$8 sps:$4 sm:$0xff]  }
 0x66a   :  { %v26904_v36 = vadd.f32 %v9403_v59, %v8844_v5 }
 0x66b   :  { %10992 = vmatmul.mubr.bf16.gmra.mxu1 %v26826_v19  ;;  %v9407_v26 = vpop.f32.mrf.mxu1  ;;  %v18865_v19 = vld [vmem:[%s28455_s6 + $0x170] ss:$8 sps:$4 sm:$0xff]  }
 0x66c   :  { %v26912_v54 = vadd.f32 %v9407_v26, %v8848_v45  ;;  %11001 = vmatprep.mubr.bf16.mxu1 %v26790_v12  ;;  %11618 = vmatpush1.bf16.msra.mxu0 %v18865_v19  ;;  %v28642_v45 = vld [vmem:[#allocation27_spill] sm:$0xff] }
 0x66d   :  { %v9409_v32 = vpop.f32.mrf.mxu1  ;;  %11619 = vmatprep.subr.bf16.mxu0 %v18870_v31  ;;  %v8868_v26 = vadd.f32 %v28643_v21, %v28642_v45  ;;  %v18888_v45 = vld [vmem:[%s28455_s6 + $0x204] ss:$8 sps:$4 sm:$0xff]  }
 0x66e   :  { %v26920_v14 = vadd.f32 %v9409_v32, %v8850_v2  ;;  %v18874_v2 = vld [vmem:[%s28455_s6 + $0x140] ss:$8 sps:$4 sm:$0xff]   ;;  %v28644_v32 = vld [vmem:[#allocation41_spill] sm:$0xff] }
 0x66f   :  { %v9411_v27 = vpop.f32.mrf.mxu1 }
 0x670   :  { %v26925_v53 = vadd.f32 %v9411_v27, %v8852_v0  ;;  %11620 = vmatpush1.bf16.msra.mxu0 %v18868_v24  ;;  %v28646_v0 = vld [vmem:[#allocation33_spill] sm:$0xff] }
 0x671   :  { %v26927_v12 = vpop.f32.mrf.mxu1  ;;  %11621 = vmatprep.subr.bf16.mxu0 %v18873_v18  ;;  %v8870_v19 = vadd.f32 %v28646_v0, %v28645_v57  ;;  %v18891_v57 = vld [vmem:[%s28455_s6 + $0x1f4] ss:$8 sps:$4 sm:$0xff]  }
 0x672   :  { %28634 = vst [vmem:[#allocation15_spill] sm:$0xff] %v26927_v12 }
 0x673   :  { %11002 = vmatmul.mubr.bf16.gmra.mxu1 %v26814_v16  ;;  %v9417_v62 = vpop.f32.mrf.mxu1 }
 0x674   :  { %v26940_v3 = vadd.f32 %v9417_v62, %v8858_v13  ;;  %17534 = vmatprep.mubr.msk.bf16.mxu1 %vm20078_vm0, %v28550_v17  ;;  %11622 = vmatpush1.bf16.msra.mxu0 %v18871_v43  ;;  %v18877_v13 = vld [vmem:[%s28455_s6 + $0x130] ss:$8 sps:$4 sm:$0xff]  }
 0x675   :  { %v9419_v51 = vpop.f32.mrf.mxu1  ;;  %11623 = vmatprep.subr.bf16.mxu0 %v18876_v23 }
 0x676   :  { %v26949_v16 = vadd.f32 %v9419_v51, %v8860_v60 }
 0x677   :  { %v9421_v5 = vpop.f32.mrf.mxu1 }
 0x678   :  { %v26954_v59 = vadd.f32 %v9421_v5, %v8862_v9  ;;  %11624 = vmatpush1.bf16.msra.mxu0 %v18874_v2 }
 0x679   :  { %v26956_v42 = vpop.f32.mrf.mxu1  ;;  %11625 = vmatprep.subr.bf16.mxu0 %v18879_v30 }
 0x67a   :  { %28641 = vst [vmem:[#allocation20_spill] sm:$0xff] %v26956_v42 }
 0x67b   :  { %17535 = vmatmul.mubr.msk.bf16.vlgmr.msra.gmra.mxu1 %vm8696_vm2, %v28644_v32  ;;  %v9427_v50 = vpop.f32.mrf.mxu1 }
 0x67c   :  { %v26970_v27 = vadd.f32 %v9427_v50, %v8868_v26  ;;  %17538 = vmatprep.mubr.msk.bf16.mxu1 %vm20078_vm0, %v28550_v17  ;;  %11626 = vmatpush1.bf16.msra.mxu0 %v18877_v13  ;;  %v18886_v26 = vld [vmem:[%s28455_s6 + $0x200] ss:$8 sps:$4 sm:$0xff]   ;;  %v18894_v13 = vld [vmem:[%s28455_s6 + $0x1e4] ss:$8 sps:$4 sm:$0xff]  }
 0x67d   :  { %v9429_v31 = vpop.f32.mrf.mxu1  ;;  %11627 = vmatprep.subr.bf16.mxu0 %v18882_v22 }
 0x67e   :  { %v26977_v33 = vadd.f32 %v9429_v31, %v8870_v19 }
 0x67f   :  { %v9431_v24 = vpop.f32.mrf.mxu1 }
 0x680   :  { %11628 = vmatpush1.bf16.msra.mxu0 %v18880_v1 }
 0x681   :  { %v9432_v62 = vpop.f32.mrf.mxu1  ;;  %11629 = vmatprep.subr.bf16.mxu0 %v18885_v52 }
 0x682   :  { %v18892_v62 = vld [vmem:[%s28455_s6 + $0x1e0] ss:$8 sps:$4 sm:$0xff]  }
 0x683   :  { %17539 = vmatmul.mubr.msk.bf16.gmra.mxu1 %vm8696_vm2, %v25922_v37  ;;  %v9621_v60 = vpop.f32.mrf.mxu1  ;;  %v18883_v37 = vld [vmem:[%s28455_s6 + $0x210] ss:$8 sps:$4 sm:$0xff]  }
 0x684   :  { %v26991_v51 = vadd.f32 %v9621_v60, %v26793_v35  ;;  %v26993_v18 = vpop.f32.mrf.mxu0  ;;  %17542 = vmatprep.mubr.msk.bf16.mxu1 %vm20078_vm0, %v28550_v17  ;;  %11630 = vmatpush2.bf16.msra.mxu0 %v18883_v37 }
 0x685   :  { %v17480_v25 = vpop.f32.mrf.mxu1  ;;  %11631 = vmatprep.subr.bf16.mxu0 %v18888_v45 }
 0x686   :  { %v27000_v9 = vpop.f32.mrf.mxu0  ;;  %v18897_v25 = vld [vmem:[%s28455_s6 + $0x1d4] ss:$8 sps:$4 sm:$0xff]  }
 0x687   :  { %v9624_v43 = vpop.f32.mrf.mxu1 }
 0x688   :  { %v27006_v35 = vadd.f32 %v9624_v43, %v26810_v6  ;;  %v27008_v5 = vpop.f32.mrf.mxu0  ;;  %11632 = vmatpush2.bf16.msra.mxu0 %v18886_v26  ;;  %v18898_v26 = vld [vmem:[%s28455_s6 + $0x1c0] ss:$8 sps:$4 sm:$0xff]  }
 0x689   :  { %v17481_v23 = vpop.f32.mrf.mxu1  ;;  %11633 = vmatprep.subr.bf16.mxu0 %v18891_v57 }
 0x68a   :  { %v27013_v21 = vpop.f32.mrf.mxu0  ;;  %v18900_v23 = vld [vmem:[%s28455_s6 + $0x1c4] ss:$8 sps:$4 sm:$0xff]  }
 0x68b   :  { %17543 = vmatmul.mubr.msk.bf16.gmra.mxu1 %vm8696_vm2, %v25951_v49  ;;  %v9629_v2 = vpop.f32.mrf.mxu1  ;;  %v18889_v49 = vld [vmem:[%s28455_s6 + $0x1f0] ss:$8 sps:$4 sm:$0xff]  }
 0x68c   :  { %v27021_v6 = vadd.f32 %v9629_v2, %v26817_v39  ;;  %v27023_v32 = vpop.f32.mrf.mxu0  ;;  %17546 = vmatprep.mubr.msk.bf16.mxu1 %vm20078_vm0, %v28550_v17  ;;  %11634 = vmatpush2.bf16.msra.mxu0 %v18889_v49 }
 0x68d   :  { %v17484_v50 = vpop.f32.mrf.mxu1  ;;  %11635 = vmatprep.subr.bf16.mxu0 %v18894_v13 }
 0x68e   :  { %v27030_v0 = vpop.f32.mrf.mxu0 }
 0x68f   :  { %v9632_v19 = vpop.f32.mrf.mxu1 }
 0x690   :  { %v27036_v39 = vadd.f32 %v9632_v19, %v26830_v41  ;;  %v27038_v31 = vpop.f32.mrf.mxu0  ;;  %11636 = vmatpush2.bf16.msra.mxu0 %v18892_v62  ;;  %v18903_v19 = vld [vmem:[%s28455_s6 + $0x1b4] ss:$8 sps:$4 sm:$0xff]  }
 0x691   :  { %v17485_v30 = vpop.f32.mrf.mxu1  ;;  %11637 = vmatprep.subr.bf16.mxu0 %v18897_v25 }
 0x692   :  { %v27043_v24 = vpop.f32.mrf.mxu0 }
 0x693   :  { %17547 = vmatmul.mubr.msk.bf16.gmra.mxu1 %vm8696_vm2, %v26675_v44  ;;  %v9637_v22 = vpop.f32.mrf.mxu1  ;;  %v18895_v44 = vld [vmem:[%s28455_s6 + $0x1d0] ss:$8 sps:$4 sm:$0xff]  }
 0x694   :  { %v27051_v41 = vadd.f32 %v9637_v22, %v26838_v15  ;;  %v27053_v1 = vpop.f32.mrf.mxu0  ;;  %17550 = vmatprep.mubr.msk.bf16.mxu1 %vm20078_vm0, %v28550_v17  ;;  %11638 = vmatpush2.bf16.msra.mxu0 %v18895_v44  ;;  %v18904_v44 = vld [vmem:[%s28455_s6 + $0x1a0] ss:$8 sps:$4 sm:$0xff]  }
 0x695   :  { %v17488_v60 = vpop.f32.mrf.mxu1  ;;  %11639 = vmatprep.subr.bf16.mxu0 %v18900_v23 }
 0x696   :  { %v27060_v52 = vpop.f32.mrf.mxu0  ;;  %v18906_v60 = vld [vmem:[%s28455_s6 + $0x1a4] ss:$8 sps:$4 sm:$0xff]  }
 0x697   :  { %v9640_v37 = vpop.f32.mrf.mxu1 }
 0x698   :  { %v27066_v15 = vadd.f32 %v9640_v37, %v26852_v47  ;;  %v27068_v43 = vpop.f32.mrf.mxu0  ;;  %11640 = vmatpush2.bf16.msra.mxu0 %v18898_v26 }
 0x699   :  { %v17489_v17 = vpop.f32.mrf.mxu1  ;;  %11641 = vmatprep.subr.bf16.mxu0 %v18903_v19 }
 0x69a   :  { %v27073_v45 = vpop.f32.mrf.mxu0 }
 0x69b   :  { %17551 = vmatmul.mubr.msk.bf16.gmra.mxu1 %vm8696_vm2, %v26651_v63  ;;  %v9645_v2 = vpop.f32.mrf.mxu1  ;;  %v18901_v63 = vld [vmem:[%s28455_s6 + $0x1b0] ss:$8 sps:$4 sm:$0xff]  }
 0x69c   :  { %v27081_v47 = vadd.f32 %v9645_v2, %v26867_v56  ;;  %v27083_v50 = vpop.f32.mrf.mxu0  ;;  %11686 = vmatprep.mubr.bf16.mxu1 %v28549_v11  ;;  %11642 = vmatpush2.bf16.msra.mxu0 %v18901_v63  ;;  %v18907_v63 = vld [vmem:[%s28455_s6 + $0x230] ss:$8 sps:$4 sm:$0xff]  }
 0x69d   :  { %v17492_v57 = vpop.f32.mrf.mxu1  ;;  %11643 = vmatprep.subr.bf16.mxu0 %v18906_v60  ;;  %v28648_v11 = vld [vmem:[#allocation24_spill] sm:$0xff] }
 0x69e   :  { %v27086_v49 = vpop.f32.mrf.mxu0  ;;  %v9473_v12 = vadd.f32 %v28648_v11, %v26864_v40  ;;  %v28649_v40 = vld [vmem:[#allocation34_spill] sm:$0xff] }
 0x69f   :  { %v9648_v30 = vpop.f32.mrf.mxu1 }
 0x6a0   :  { %v27095_v56 = vadd.f32 %v9648_v30, %v26880_v48  ;;  %v27097_v13 = vpop.f32.mrf.mxu0  ;;  %11644 = vmatpush2.bf16.msra.mxu0 %v18904_v44 }
 0x6a1   :  { %v17493_v62 = vpop.f32.mrf.mxu1 }
 0x6a2   :  { %v27099_v22 = vpop.f32.mrf.mxu0  ;;  %v28647_v62 = vld [vmem:[#allocation32_spill] sm:$0xff] }
 0x6a3   :  { %v9653_v25 = vpop.f32.mrf.mxu1  ;;  %v9469_v60 = vadd.f32 %v28647_v62, %v26848_v29 }
 0x6a4   :  { %v27108_v37 = vadd.f32 %v9653_v25, %v26897_v20  ;;  %v27110_v48 = vpop.f32.mrf.mxu0  ;;  %v18909_v20 = vld [vmem:[%s28455_s6 + $0x234] ss:$8 sps:$4 sm:$0xff]  }
 0x6a5   :  { %v17496_v17 = vpop.f32.mrf.mxu1  ;;  %11666 = vmatprep.subr.bf16.mxu1 %v18909_v20 }
 0x6a6   :  { %v27112_v23 = vpop.f32.mrf.mxu0  ;;  %11667 = vmatpush1.bf16.msra.mxu1 %v18907_v63 }
 0x6a7   :  { %v9656_v26 = vpop.f32.mrf.mxu1 }
 0x6a8   :  { %v10206_v2 = vpop.f32.mrf.mxu0  ;;  %v9471_v26 = vadd.f32 %v26596_v28, %v26859_v10 }
 0x6a9   :  { %v17497_v57 = vpop.f32.mrf.mxu1 }
 0x6aa   :  { %v10207_v19 = vpop.f32.mrf.mxu0 }
 0x6ab   :  { %v10243_v30 = vpop.f32.mrf.mxu1 }
 0x6ac   :  { %v10244_v25 = vadd.f32 %v10243_v30, %v26993_v18  ;;  %v27123_v44 = vpop.f32.mrf.mxu0 }
 0x6ad   :  { %v10245_v17 = vpop.f32.mrf.mxu1 }
 0x6ae   :  { %v27127_v2 = vadd.f32 %v10244_v25, %v9469_v60  ;;  %v10246_v57 = vadd.f32 %v10245_v17, %v27000_v9  ;;  %v17508_v19 = vpop.f32.mrf.mxu0  ;;  %v9479_v9 = vadd.f32 %v26625_v38, %v26876_v61  ;;  %v9481_v25 = vadd.f32 %v28649_v40, %v26887_v46  ;;  %v28652_v40 = vld [vmem:[#allocation5_spill] sm:$0xff] }
 0x6af   :  { %v10247_v42 = vpop.f32.mrf.mxu1  ;;  %v28650_v19 = vld [vmem:[#allocation25_spill] sm:$0xff] }
 0x6b0   :  { %v27132_v29 = vadd.f32 %v10246_v57, %v9471_v26  ;;  %v10248_v18 = vadd.f32 %v10247_v42, %v27008_v5  ;;  %v27135_v30 = vpop.f32.mrf.mxu0  ;;  %v9483_v26 = vadd.f32 %v26648_v4, %v26894_v34 }
 0x6b1   :  { %v27137_v20 = vpop.f32.mrf.mxu1 }
 0x6b2   :  { %v27139_v62 = vadd.f32 %v10248_v18, %v9473_v12  ;;  %v17509_v28 = vpop.f32.mrf.mxu0  ;;  %v9485_v18 = vadd.f32 %v28650_v19, %v26904_v36  ;;  %v18912_v36 = vld [vmem:[%s28455_s6 + $0x224] ss:$8 sps:$4 sm:$0xff]  }
 0x6b3   :  { %v10253_v10 = vpop.f32.mrf.mxu1  ;;  %11668 = vmatprep.subr.bf16.mxu1 %v18912_v36 }
 0x6b4   :  { %v10254_v63 = vadd.f32 %v10253_v10, %v27023_v32  ;;  %v27144_v60 = vpop.f32.mrf.mxu0 }
 0x6b5   :  { %v10255_v11 = vpop.f32.mrf.mxu1 }
 0x6b6   :  { %v27148_v42 = vadd.f32 %v10254_v63, %v9479_v9  ;;  %v10256_v5 = vadd.f32 %v10255_v11, %v27030_v0  ;;  %v17512_v17 = vpop.f32.mrf.mxu0  ;;  %v28651_v9 = vld [vmem:[#allocation6_spill] sm:$0xff] }
 0x6b7   :  { %v10257_v12 = vpop.f32.mrf.mxu1  ;;  %v9489_v63 = vadd.f32 %v28651_v9, %v26912_v54  ;;  %v18910_v11 = vld [vmem:[%s28455_s6 + $0x220] ss:$8 sps:$4 sm:$0xff]  }
 0x6b8   :  { %v27153_v57 = vadd.f32 %v10256_v5, %v9481_v25  ;;  %v10258_v38 = vadd.f32 %v10257_v12, %v27038_v31  ;;  %v27156_v61 = vpop.f32.mrf.mxu0  ;;  %v9491_v25 = vadd.f32 %v28652_v40, %v26920_v14  ;;  %11669 = vmatpush1.bf16.msra.mxu1 %v18910_v11  ;;  %v9493_v12 = vadd.f32 %v26700_v58, %v26925_v53  ;;  %v18915_v14 = vld [vmem:[%s28455_s6 + $0x114] ss:$8 sps:$4 sm:$0xff]   ;;  %v28653_v9 = vld [vmem:[#allocation7_spill] sm:$0xff] }
 0x6b9   :  { %v10259_v32 = vpop.f32.mrf.mxu1  ;;  %11931 = vmatprep.subr.bf16.mxu0 %v18915_v14  ;;  %v9499_v58 = vadd.f32 %v26716_v55, %v26940_v3 }
 0x6ba   :  { %v27160_v46 = vadd.f32 %v10258_v38, %v9483_v26  ;;  %v10260_v28 = vadd.f32 %v10259_v32, %v27043_v24  ;;  %v17513_v0 = vpop.f32.mrf.mxu0 }
 0x6bb   :  { %v10263_v10 = vpop.f32.mrf.mxu1 }
 0x6bc   :  { %v27165_v4 = vadd.f32 %v10260_v28, %v9485_v18  ;;  %v10264_v34 = vadd.f32 %v10263_v10, %v27053_v1  ;;  %v27168_v31 = vpop.f32.mrf.mxu0 }
 0x6bd   :  { %v10265_v24 = vpop.f32.mrf.mxu1 }
 0x6be   :  { %v27178_v5 = vadd.f32 %v10264_v34, %v9489_v63  ;;  %v10266_v54 = vadd.f32 %v10265_v24, %v27060_v52  ;;  %v17516_v17 = vpop.f32.mrf.mxu0  ;;  %v9501_v63 = vadd.f32 %v28653_v9, %v26949_v16  ;;  %v9503_v24 = vadd.f32 %v26733_v8, %v26954_v59  ;;  %v28654_v8 = vld [vmem:[#allocation11_spill] sm:$0xff] }
 0x6bf   :  { %v10267_v1 = vpop.f32.mrf.mxu1  ;;  %v9509_v59 = vadd.f32 %v28654_v8, %v26970_v27 }
 0x6c0   :  { %v27183_v26 = vadd.f32 %v10266_v54, %v9491_v25  ;;  %v10268_v38 = vadd.f32 %v10267_v1, %v27068_v43  ;;  %v27186_v32 = vpop.f32.mrf.mxu0 }
 0x6c1   :  { %v10269_v19 = vpop.f32.mrf.mxu1 }
 0x6c2   :  { %v27191_v18 = vadd.f32 %v10268_v38, %v9493_v12  ;;  %v27194_v52 = vadd.f32 %v10269_v19, %v27073_v45  ;;  %v17517_v28 = vpop.f32.mrf.mxu0  ;;  %v28655_v38 = vld [vmem:[#allocation16_spill] sm:$0xff] }
 0x6c3   :  { %v10273_v0 = vpop.f32.mrf.mxu1  ;;  %v9511_v14 = vadd.f32 %v28655_v38, %v26977_v33 }
 0x6c4   :  { %v10274_v53 = vadd.f32 %v10273_v0, %v27083_v50  ;;  %v27199_v43 = vpop.f32.mrf.mxu0 }
 0x6c5   :  { %v10275_v10 = vpop.f32.mrf.mxu1 }
 0x6c6   :  { %v27203_v34 = vadd.f32 %v10274_v53, %v9499_v58  ;;  %v10276_v11 = vadd.f32 %v10275_v10, %v27086_v49  ;;  %v17520_v45 = vpop.f32.mrf.mxu0  ;;  %v18924_v49 = vld [vmem:[%s28455_s6 + $0x74] ss:$8 sps:$4 sm:$0xff]  }
 0x6c7   :  { %v10277_v36 = vpop.f32.mrf.mxu1  ;;  %11878 = vmatprep.subr.bf16.mxu1 %v18924_v49 }
 0x6c8   :  { %v27208_v40 = vadd.f32 %v10276_v11, %v9501_v63  ;;  %v10278_v55 = vadd.f32 %v10277_v36, %v27097_v13  ;;  %v27211_v3 = vpop.f32.mrf.mxu0 }
 0x6c9   :  { %v10279_v50 = vpop.f32.mrf.mxu1 }
 0x6ca   :  { %v27213_v25 = vadd.f32 %v10278_v55, %v9503_v24  ;;  %v27216_v16 = vadd.f32 %v10279_v50, %v27099_v22  ;;  %v17521_v54 = vpop.f32.mrf.mxu0 }
 0x6cb   :  { %v10283_v17 = vpop.f32.mrf.mxu1 }
 0x6cc   :  { %v10284_v1 = vadd.f32 %v10283_v17, %v27110_v48  ;;  %v27224_v13 = vpop.f32.mrf.mxu0 }
 0x6cd   :  { %v10285_v12 = vpop.f32.mrf.mxu1 }
 0x6ce   :  { %v27228_v22 = vadd.f32 %v10284_v1, %v9509_v59  ;;  %v10286_v19 = vadd.f32 %v10285_v12, %v27112_v23  ;;  %v17524_v28 = vpop.f32.mrf.mxu0 }
 0x6cf   :  { %v10287_v0 = vpop.f32.mrf.mxu1 }
 0x6d0   :  { %v27231_v58 = vadd.f32 %v10286_v19, %v9511_v14  ;;  %v10431_v53 = vpop.f32.mrf.mxu0 }
 0x6d1   :  { %v10288_v10 = vpop.f32.mrf.mxu1 }
 0x6d2   :  { %v17525_v27 = vpop.f32.mrf.mxu0 }
 0x6d3   :  { %v17254_v9 = vpop.f32.mrf.mxu1 }
 0x6d4   :  { %v27233_v48 = vpop.f32.mrf.mxu0 }
 0x6d5   :  { %v17255_v63 = vpop.f32.mrf.mxu1 }
 0x6d6   :  { %v17256_v11 = vadd.f32 %v17255_v63, %v17254_v9  ;;  %v27235_v45 = vpop.f32.mrf.mxu0 }
 0x6d7   :  { %v17257_v36 = vpop.f32.mrf.mxu1 }
 0x6d8   :  { %v10397_v33 = vadd.f32 %v17256_v11, %v27123_v44  ;;  %v27238_v24 = vpop.f32.mrf.mxu0 }
 0x6d9   :  { %v17258_v23 = vpop.f32.mrf.mxu1 }
 0x6da   :  { %v17259_v55 = vadd.f32 %v17258_v23, %v17257_v36  ;;  %v27240_v50 = vpop.f32.mrf.mxu0  ;;  %v27243_v54 = vadd.f32 %v10397_v33, %v26991_v51 }
 0x6db   :  { %v17260_v49 = vpop.f32.mrf.mxu1 }
 0x6dc   :  { %v10400_v17 = vadd.f32 %v17259_v55, %v27135_v30  ;;  %v27246_v8 = vpop.f32.mrf.mxu0 }
 0x6dd   :  { %v17261_v59 = vpop.f32.mrf.mxu1 }
 0x6de   :  { %v17262_v1 = vadd.f32 %v17261_v59, %v17260_v49  ;;  %v27248_v12 = vpop.f32.mrf.mxu0  ;;  %v27251_v44 = vadd.f32 %v10400_v17, %v27006_v35 }
 0x6df   :  { %v17263_v38 = vpop.f32.mrf.mxu1 }
 0x6e0   :  { %v10405_v14 = vadd.f32 %v17262_v1, %v27144_v60  ;;  %v27254_v19 = vpop.f32.mrf.mxu0 }
 0x6e1   :  { %v17264_v28 = vpop.f32.mrf.mxu1 }
 0x6e2   :  { %v17265_v51 = vadd.f32 %v17264_v28, %v17263_v38  ;;  %v27256_v0 = vpop.f32.mrf.mxu0  ;;  %v27259_v30 = vadd.f32 %v10405_v14, %v27021_v6 }
 0x6e3   :  { %v17266_v53 = vpop.f32.mrf.mxu1 }
 0x6e4   :  { %v10408_v10 = vadd.f32 %v17265_v51, %v27156_v61  ;;  %v27262_v27 = vpop.f32.mrf.mxu0 }
 0x6e5   :  { %v17267_v9 = vpop.f32.mrf.mxu1 }
 0x6e6   :  { %v17268_v35 = vadd.f32 %v17267_v9, %v17266_v53  ;;  %v27264_v63 = vpop.f32.mrf.mxu0  ;;  %v27267_v60 = vadd.f32 %v10408_v10, %v27036_v39 }
 0x6e7   :  { %v17269_v11 = vpop.f32.mrf.mxu1 }
 0x6e8   :  { %28656 = vst [vmem:[#allocation19_spill] sm:$0xff] %v27267_v60  ;;  %v10413_v36 = vadd.f32 %v17268_v35, %v27168_v31  ;;  %v27270_v33 = vpop.f32.mrf.mxu0  ;;  %v28666_v60 = vld [vmem:[#allocation4_spill] sm:$0xff] }
 0x6e9   :  { %v17270_v23 = vpop.f32.mrf.mxu1 }
 0x6ea   :  { %v17271_v6 = vadd.f32 %v17270_v23, %v17269_v11  ;;  %v27272_v55 = vpop.f32.mrf.mxu0  ;;  %v27275_v61 = vadd.f32 %v10413_v36, %v27051_v41 }
 0x6eb   :  { %v17272_v49 = vpop.f32.mrf.mxu1 }
 0x6ec   :  { %28657 = vst [vmem:[#allocation10_spill] sm:$0xff] %v27275_v61  ;;  %v10416_v17 = vadd.f32 %v17271_v6, %v27186_v32  ;;  %v27278_v59 = vpop.f32.mrf.mxu0 }
 0x6ed   :  { %v17273_v1 = vpop.f32.mrf.mxu1 }
 0x6ee   :  { %v17274_v39 = vadd.f32 %v17273_v1, %v17272_v49  ;;  %v27280_v38 = vpop.f32.mrf.mxu0  ;;  %v27283_v31 = vadd.f32 %v10416_v17, %v27066_v15 }
 0x6ef   :  { %v17275_v14 = vpop.f32.mrf.mxu1 }
 0x6f0   :  { %28658 = vst [vmem:[#allocation9_spill] sm:$0xff] %v27283_v31  ;;  %v10421_v28 = vadd.f32 %v17274_v39, %v27199_v43  ;;  %v27286_v51 = vpop.f32.mrf.mxu0 }
 0x6f1   :  { %v17276_v53 = vpop.f32.mrf.mxu1 }
 0x6f2   :  { %v17277_v41 = vadd.f32 %v17276_v53, %v17275_v14  ;;  %v27288_v10 = vpop.f32.mrf.mxu0  ;;  %v27291_v32 = vadd.f32 %v10421_v28, %v27081_v47 }
 0x6f3   :  { %v17278_v9 = vpop.f32.mrf.mxu1 }
 0x6f4   :  { %28659 = vst [vmem:[#allocation14_spill] sm:$0xff] %v27291_v32  ;;  %v10424_v35 = vadd.f32 %v17277_v41, %v27211_v3  ;;  %v27294_v11 = vpop.f32.mrf.mxu0 }
 0x6f5   :  { %v17279_v36 = vpop.f32.mrf.mxu1 }
 0x6f6   :  { %v17280_v15 = vadd.f32 %v17279_v36, %v17278_v9  ;;  %v27296_v23 = vpop.f32.mrf.mxu0  ;;  %v27299_v43 = vadd.f32 %v10424_v35, %v27095_v56 }
 0x6f7   :  { %v17281_v6 = vpop.f32.mrf.mxu1 }
 0x6f8   :  { %28660 = vst [vmem:[#allocation13_spill] sm:$0xff] %v27299_v43  ;;  %v10429_v49 = vadd.f32 %v17280_v15, %v27224_v13  ;;  %v11088_v17 = vpop.f32.mrf.mxu0  ;;  %v28664_v43 = vld [vmem:[#allocation3_spill] sm:$0xff] }
 0x6f9   :  { %v17282_v1 = vpop.f32.mrf.mxu1 }
 0x6fa   :  { %v11089_v39 = vpop.f32.mrf.mxu0  ;;  %v27303_v47 = vadd.f32 %v10429_v49, %v27108_v37  ;;  %v27322_v1 = vld [vmem:[%s28456_s5] sm:$0x7] }
 0x6fc   :  { %28661 = vst [vmem:[#allocation18_spill] sm:$0xff] %v27303_v47  ;;  %v27305_v14 = vpop.f32.mrf.mxu0 }
 0x6fe   :  { %v27307_v3 = vpop.f32.mrf.mxu0 }
 0x700   :  { %v27309_v28 = vpop.f32.mrf.mxu0 }
 0x702   :  { %v27311_v53 = vpop.f32.mrf.mxu0 }
 0x704   :  { %v17315_v41 = vpop.f32.mrf.mxu0 }
 0x706   :  { %v17316_v56 = vpop.f32.mrf.mxu0 }
 0x707   :  { %v27313_v9 = vadd.f32 %v17316_v56, %v17315_v41 }
 0x708   :  { %v17318_v35 = vpop.f32.mrf.mxu0 }
 0x70a   :  { %v17319_v13 = vpop.f32.mrf.mxu0 }
 0x70b   :  { %v27315_v36 = vadd.f32 %v17319_v13, %v17318_v35  ;;  %v27329_v35 = vrot.slane %v27322_v1, %v28664_v43 }
 0x70c   :  { %v17321_v15 = vpop.f32.mrf.mxu0 }
 0x70e   :  { %v17322_v6 = vpop.f32.mrf.mxu0 }
 0x70f   :  { %v27317_v37 = vadd.f32 %v17322_v6, %v17321_v15  ;;  %v10250_v15 = vadd.f32 %v27137_v20, %v27013_v21  ;;  %v27344_v21 = vrot.slane %v27322_v1, %v28666_v60 }
 0x710   :  { %v17324_v49 = vpop.f32.mrf.mxu0 }
 0x711   :  { %28662 = vst [vmem:[#allocation17_spill] sm:$0xff] %v27317_v37 }
 0x712   :  { %v17325_v17 = vpop.f32.mrf.mxu0 }
 0x713   :  { %v27324_v39 = vadd.f32 %v17325_v17, %v17324_v49  ;;  %v10963_v47 = vpop.f32.mrf.mxu1  ;;  %v28665_v17 = vld [vmem:[#allocation35_spill] sm:$0xff] }
 0x714   :  { %v11045_v41 = vadd.f32 %v27233_v48, %v10963_v47  ;;  %v17327_v56 = vpop.f32.mrf.mxu0  ;;  %v9475_v48 = vadd.f32 %v28665_v17, %v26871_v7 }
 0x715   :  { %28663 = vst [vmem:[#allocation21_spill] sm:$0xff] %v27324_v39  ;;  %v10965_v13 = vpop.f32.mrf.mxu1 }
 0x716   :  { %v11235_v6 = vadd.f32 %v11045_v41, %v27127_v2  ;;  %v11047_v32 = vadd.f32 %v27235_v45, %v10965_v13  ;;  %v17328_v31 = vpop.f32.mrf.mxu0  ;;  %v10438_v20 = vadd.f32 %v10250_v15, %v9475_v48 }
 0x717   :  { %v27335_v61 = vadd.f32 %v17328_v31, %v17327_v56  ;;  %v10967_v49 = vpop.f32.mrf.mxu1 }
 0x718   :  { %v11236_v47 = vadd.f32 %v11047_v32, %v27132_v29  ;;  %v11049_v43 = vadd.f32 %v27238_v24, %v10967_v49  ;;  %v17330_v39 = vpop.f32.mrf.mxu0  ;;  %v11279_v37 = vadd.f32 %v27329_v35, %v11235_v6 }
 0x719   :  { %v10969_v2 = vpop.f32.mrf.mxu1 }
 0x71a   :  { %v11238_v45 = vadd.f32 %v11049_v43, %v27139_v62  ;;  %v11051_v31 = vadd.f32 %v27240_v50, %v10969_v2  ;;  %v17331_v41 = vpop.f32.mrf.mxu0  ;;  %v11306_v6 = vmax.f32 %v11279_v37, 0.0  ;;  %v11280_v49 = vadd.f32 %v27344_v21, %v11236_v47 }
 0x71b   :  { %v27348_v56 = vadd.f32 %v17331_v41, %v17330_v39  ;;  %v10973_v7 = vpop.f32.mrf.mxu1 }
 0x71c   :  { %v11282_v29 = vadd.f32 %v27329_v35, %v11238_v45  ;;  %v11239_v24 = vadd.f32 %v11051_v31, %v10438_v20  ;;  %v11055_v32 = vadd.f32 %v27246_v8, %v10973_v7  ;;  %v17333_v13 = vpop.f32.mrf.mxu0  ;;  %v28667_v45 = vld [vmem:[#allocation37_spill] sm:$0xff]  ;;  %v11307_v7 = vmax.f32 %v11280_v49, 0.0 }
 0x71d   :  { %v10975_v17 = vpop.f32.mrf.mxu1  ;;  %v28668_v31 = vld [vmem:[#allocation29_spill] sm:$0xff] }
 0x71e   :  { %v11309_v60 = vmax.f32 %v11282_v29, 0.0  ;;  %v11283_v15 = vadd.f32 %v27344_v21, %v11239_v24  ;;  %v11241_v62 = vadd.f32 %v11055_v32, %v27148_v42  ;;  %v11057_v50 = vadd.f32 %v27248_v12, %v10975_v17  ;;  %v17334_v43 = vpop.f32.mrf.mxu0  ;;  %v28669_v32 = vld [vmem:[#allocation15_spill] sm:$0xff] }
 0x71f   :  { %v27356_v39 = vadd.f32 %v17334_v43, %v17333_v13  ;;  %v10977_v48 = vpop.f32.mrf.mxu1  ;;  %v8854_v41 = vadd.f32 %v28668_v31, %v28667_v45 }
 0x720   :  { %v27358_v2 = vpack.c.bf16 %v11309_v60, %v11306_v6  ;;  %v11310_v20 = vmax.f32 %v11283_v15, 0.0  ;;  %v11285_v8 = vadd.f32 %v27329_v35, %v11241_v62  ;;  %v11242_v37 = vadd.f32 %v11057_v50, %v27153_v57  ;;  %v17336_v47 = vpop.f32.mrf.mxu0 }
 0x721   :  { %v11059_v42 = vadd.f32 %v27254_v19, %v10977_v48  ;;  %v10979_v29 = vpop.f32.mrf.mxu1  ;;  %v9414_v13 = vadd.f32 %v28669_v32, %v8854_v41 }
 0x722   :  { %v11061_v12 = vadd.f32 %v27256_v0, %v10979_v29  ;;  %v17337_v24 = vpop.f32.mrf.mxu0  ;;  %v27368_v17 = vpack.c.bf16 %v11310_v20, %v11307_v7  ;;  %v11286_v62 = vadd.f32 %v27344_v21, %v11242_v37  ;;  %v18913_v0 = vld [vmem:[%s28455_s6 + $0x110] ss:$8 sps:$4 sm:$0xff]   ;;  %v11312_v47 = vmax.f32 %v11285_v8, 0.0  ;;  %v18916_v8 = vld [vmem:[%s28455_s6 + $0x100] ss:$8 sps:$4 sm:$0xff]  }
 0x723   :  { %v11244_v60 = vadd.f32 %v11059_v42, %v27160_v46  ;;  %v10983_v6 = vpop.f32.mrf.mxu1  ;;  %v11424_v46 = vrot.slane %v27358_v2, 4  ;;  %v28670_v20 = vld [vmem:[#allocation8_spill] sm:$0xff] }
 0x724   :  { %v11245_v57 = vadd.f32 %v11061_v12, %v27165_v4  ;;  %v11065_v15 = vadd.f32 %v27262_v27, %v10983_v6  ;;  %v11425_v50 = vrot.slane %v27368_v17, 4  ;;  %v18918_v27 = vld [vmem:[%s28455_s6 + $0x104] ss:$8 sps:$4 sm:$0xff]   ;;  %v9495_v37 = vadd.f32 %v28670_v20, %v9414_v13  ;;  %v28675_v20 = vld [vmem:[#allocation12_spill] sm:$0xff] }
 0x725   :  { %v11288_v49 = vadd.f32 %v27329_v35, %v11244_v60  ;;  %v10985_v19 = vpop.f32.mrf.mxu1  ;;  %v11313_v24 = vmax.f32 %v11286_v62, 0.0  ;;  %v28673_v13 = vmov 0   ;;  %v28674_v62 = vld [vmem:[#allocation20_spill] sm:$0xff] }
 0x726   :  { %v11289_v43 = vadd.f32 %v27344_v21, %v11245_v57  ;;  %v11247_v48 = vadd.f32 %v11065_v15, %v27178_v5  ;;  %v11067_v4 = vadd.f32 %v27264_v63, %v10985_v19  ;;  %11645 = vmatprep.mubr.bf16.mxu0 %v11425_v50  ;;  %v28671_v5 = vld [vmem:[#allocation40_spill] sm:$0xff]  ;;  %v28672_v63 = vld [vmem:[#allocation30_spill] sm:$0xff]  ;;  %v10450_v6 = vadd.f32 %v27194_v52, %v9495_v37 }
 0x727   :  { %v11315_v45 = vmax.f32 %v11288_v49, 0.0  ;;  %v10987_v31 = vpop.f32.mrf.mxu1  ;;  %11646 = vmatmul.mubr.bf16.vlgmr.msra.gmra.mxu0 %v11424_v46  ;;  %v8864_v12 = vadd.f32 %v28672_v63, %v28671_v5  ;;  %v18921_v15 = vld [vmem:[%s28455_s6 + $0x2b4] ss:$8 sps:$4 sm:$0xff]  }
 0x728   :  { %v11316_v41 = vmax.f32 %v11289_v43, 0.0  ;;  %v11291_v7 = vadd.f32 %v27329_v35, %v11247_v48  ;;  %v11248_v42 = vadd.f32 %v11067_v4, %v27183_v26  ;;  %v11069_v29 = vadd.f32 %v27270_v33, %v10987_v31  ;;  %11932 = vmatpush1.bf16.msra.mxu0 %v18913_v0  ;;  %11951 = vmatprep.mubr.bf16.mxu0 %v28673_v13 }
 0x729   :  { %v27391_v32 = vpack.c.bf16 %v11315_v45, %v11312_v47  ;;  %v10989_v60 = vpop.f32.mrf.mxu1  ;;  %11933 = vmatprep.subr.bf16.mxu0 %v18918_v27  ;;  %v9424_v49 = vadd.f32 %v28674_v62, %v8864_v12 }
 0x72a   :  { %v11292_v26 = vadd.f32 %v27344_v21, %v11248_v42  ;;  %v11250_v33 = vadd.f32 %v11069_v29, %v27191_v18  ;;  %v11071_v57 = vadd.f32 %v27272_v55, %v10989_v60  ;;  %v27405_v50 = vpack.c.bf16 %v11316_v41, %v11313_v24 }
 0x72b   :  { %v10993_v19 = vpop.f32.mrf.mxu1  ;;  %v11318_v43 = vmax.f32 %v11291_v7, 0.0  ;;  %v9505_v37 = vadd.f32 %v28675_v20, %v9424_v49 }
 0x72c   :  { %v11294_v0 = vadd.f32 %v27329_v35, %v11250_v33  ;;  %v11251_v46 = vadd.f32 %v11071_v57, %v10450_v6  ;;  %v11075_v52 = vadd.f32 %v27278_v59, %v10993_v19  ;;  %11934 = vmatpush1.bf16.msra.mxu0 %v18916_v8  ;;  %v11319_v7 = vmax.f32 %v11292_v26, 0.0 }
 0x72d   :  { %v10995_v48 = vpop.f32.mrf.mxu1  ;;  %12180 = vmatprep.subr.bf16.mxu0 %v18921_v15  ;;  %v10456_v5 = vadd.f32 %v27216_v16, %v9505_v37 }
 0x72e   :  { %v11321_v18 = vmax.f32 %v11294_v0, 0.0  ;;  %v11295_v55 = vadd.f32 %v27344_v21, %v11251_v46  ;;  %v11253_v4 = vadd.f32 %v11075_v52, %v27203_v34  ;;  %v11077_v27 = vadd.f32 %v27280_v38, %v10995_v48 }
 0x72f   :  { %v10997_v47 = vpop.f32.mrf.mxu1  ;;  %v17311_v0 = vadd.f32 %v27307_v3, %v27305_v14 }
 0x730   :  { %v27413_v45 = vpack.c.bf16 %v11321_v18, %v11318_v43  ;;  %v11322_v31 = vmax.f32 %v11295_v55, 0.0  ;;  %v11297_v41 = vadd.f32 %v27329_v35, %v11253_v4  ;;  %v11254_v59 = vadd.f32 %v11077_v27, %v27208_v40 }
 0x731   :  { %v11079_v42 = vadd.f32 %v27286_v51, %v10997_v47  ;;  %v10999_v29 = vpop.f32.mrf.mxu1 }
 0x732   :  { %v11298_v34 = vadd.f32 %v27344_v21, %v11254_v59  ;;  %v11081_v38 = vadd.f32 %v27288_v10, %v10999_v29  ;;  %v27422_v24 = vpack.c.bf16 %v11322_v31, %v11319_v7  ;;  %v11324_v33 = vmax.f32 %v11297_v41, 0.0 }
 0x733   :  { %v11256_v63 = vadd.f32 %v11079_v42, %v27213_v25  ;;  %v11003_v12 = vpop.f32.mrf.mxu1 }
 0x734   :  { %v11257_v60 = vadd.f32 %v11081_v38, %v10456_v5  ;;  %v11085_v8 = vadd.f32 %v27294_v11, %v11003_v12  ;;  %v11325_v15 = vmax.f32 %v11298_v34, 0.0  ;;  %v28678_v5 = vld [vmem:[#allocation19_spill] sm:$0xff] }
 0x735   :  { %v11300_v40 = vadd.f32 %v27329_v35, %v11256_v63  ;;  %v11005_v6 = vpop.f32.mrf.mxu1  ;;  %v18930_v38 = vld [vmem:[%s28455_s6 + $0x64] ss:$8 sps:$4 sm:$0xff]   ;;  %v18925_v63 = vld [vmem:[%s28455_s6 + $0x2a0] ss:$8 sps:$4 sm:$0xff]  }
 0x736   :  { %v11301_v51 = vadd.f32 %v27344_v21, %v11257_v60  ;;  %v11259_v26 = vadd.f32 %v11085_v8, %v27228_v22  ;;  %v11087_v16 = vadd.f32 %v27296_v23, %v11005_v6  ;;  %v28679_v60 = vld [vmem:[#allocation17_spill] sm:$0xff] }
 0x737   :  { %v11327_v57 = vmax.f32 %v11300_v40, 0.0  ;;  %v11007_v10 = vpop.f32.mrf.mxu1  ;;  %v18933_v40 = vld [vmem:[%s28455_s6 + $0x294] ss:$8 sps:$4 sm:$0xff]  }
 0x738   :  { %v11328_v25 = vmax.f32 %v11301_v51, 0.0  ;;  %v27430_v62 = vadd.f32 %v27329_v35, %v11259_v26  ;;  %v11260_v49 = vadd.f32 %v11087_v16, %v27231_v58  ;;  %v17314_v35 = vadd.f32 %v27311_v53, %v27309_v28  ;;  %v28676_v58 = vld [vmem:[#allocation2_spill] sm:$0xff]  ;;  %v18936_v10 = vld [vmem:[%s28455_s6 + $0x54] ss:$8 sps:$4 sm:$0xff]  }
 0x739   :  { %v27433_v11 = vpack.c.bf16 %v11327_v57, %v11324_v33  ;;  %v11008_v19 = vpop.f32.mrf.mxu1  ;;  %v28677_v18 = vsub.s32 2, %v28676_v58  ;;  %v18928_v51 = vld [vmem:[%s28455_s6 + $0x60] ss:$8 sps:$4 sm:$0xff]   ;;  %v18942_v58 = vld [vmem:[%s28455_s6 + $0x44] ss:$8 sps:$4 sm:$0xff]  }
 0x73a   :  { %v27438_v22 = vadd.f32 %v27344_v21, %v11260_v49  ;;  %v27440_v23 = vpack.c.bf16 %v11328_v25, %v11325_v15  ;;  %v28680_v33 = vld [vmem:[#allocation10_spill] sm:$0xff]  ;;  %v18931_v25 = vld [vmem:[%s28455_s6 + $0x290] ss:$8 sps:$4 sm:$0xff]  }
 0x73b   :  { %v11197_v46 = vpop.f32.mrf.mxu1  ;;  %v27448_v55 = vrot.slane %v27322_v1, %v28677_v18  ;;  %v18919_v1 = vld [vmem:[%s28455_s6 + $0x2b0] ss:$8 sps:$4 sm:$0xff]  }
 0x73c   :  { %v11198_v52 = vadd.f32 %v17311_v0, %v11197_v46  ;;  %v28681_v19 = vld [vmem:[#allocation21_spill] sm:$0xff]  ;;  %v18939_v46 = vld [vmem:[%s28455_s6 + $0x284] ss:$8 sps:$4 sm:$0xff]  }
 0x73d   :  { %v17536_v43 = vpop.f32.mrf.mxu1 }
 0x73e   :  { %v11237_v48 = vadd.f32 %v11198_v52, %v27243_v54  ;;  %v18934_v43 = vld [vmem:[%s28455_s6 + $0x50] ss:$8 sps:$4 sm:$0xff]  }
 0x73f   :  { %v11200_v4 = vpop.f32.mrf.mxu1 }
 0x740   :  { %v11201_v14 = vadd.f32 %v17314_v35, %v11200_v4  ;;  %v11281_v21 = vadd.f32 %v27448_v55, %v11237_v48  ;;  %v28682_v35 = vld [vmem:[#allocation9_spill] sm:$0xff]  ;;  %v18937_v4 = vld [vmem:[%s28455_s6 + $0x280] ss:$8 sps:$4 sm:$0xff]  }
 0x741   :  { %v17537_v3 = vpop.f32.mrf.mxu1 }
 0x742   :  { %v11240_v27 = vadd.f32 %v11201_v14, %v27251_v44  ;;  %v11308_v53 = vmax.f32 %v11281_v21, 0.0  ;;  %v18945_v21 = vld [vmem:[%s28455_s6 + $0x274] ss:$8 sps:$4 sm:$0xff]  }
 0x743   :  { %v11205_v20 = vpop.f32.mrf.mxu1 }
 0x744   :  { %v11284_v37 = vadd.f32 %v27448_v55, %v11240_v27  ;;  %v11206_v47 = vadd.f32 %v27313_v9, %v11205_v20  ;;  %v18927_v9 = vld [vmem:[%s28455_s6 + $0x2a4] ss:$8 sps:$4 sm:$0xff]   ;;  %v18940_v20 = vld [vmem:[%s28455_s6 + $0x40] ss:$8 sps:$4 sm:$0xff]  }
 0x745   :  { %v17540_v28 = vpop.f32.mrf.mxu1 }
 0x746   :  { %v11311_v54 = vmax.f32 %v11284_v37, 0.0  ;;  %v11243_v31 = vadd.f32 %v11206_v47, %v27259_v30  ;;  %v18922_v30 = vld [vmem:[%s28455_s6 + $0x70] ss:$8 sps:$4 sm:$0xff]   ;;  %v28683_v28 = vld [vmem:[#allocation14_spill] sm:$0xff] }
 0x747   :  { %v11208_v41 = vpop.f32.mrf.mxu1 }
 0x748   :  { %v11335_v59 = vpack.c.bf16 %v11311_v54, %v11308_v53  ;;  %v11287_v7 = vadd.f32 %v27448_v55, %v11243_v31  ;;  %v11209_v44 = vadd.f32 %v27315_v36, %v11208_v41  ;;  %v18943_v31 = vld [vmem:[%s28455_s6 + $0x270] ss:$8 sps:$4 sm:$0xff]  }
 0x749   :  { %v17541_v42 = vpop.f32.mrf.mxu1 }
 0x74a   :  { %v11426_v29 = vrot.slane %v11335_v59, 4  ;;  %v11246_v34 = vadd.f32 %v11209_v44, %v28678_v5  ;;  %15653 = vmatmul.mubr.msk.bf16.vlgmr.msra.gmra.mxu0 %vm11609_vm3, %v11335_v59  ;;  %v11314_v26 = vmax.f32 %v11287_v7, 0.0  ;;  %v18951_v7 = vld [vmem:[%s28455_s6 + $0x264] ss:$8 sps:$4 sm:$0xff]   ;;  %v28684_v42 = vld [vmem:[#allocation13_spill] sm:$0xff] }
 0x74b   :  { %12181 = vmatpush1.bf16.msra.mxu0 %v18919_v1  ;;  %v11213_v36 = vpop.f32.mrf.mxu1  ;;  %12212 = vmatprep.mubr.bf16.mxu0 %v27405_v50  ;;  %v18949_v5 = vld [vmem:[%s28455_s6 + $0x260] ss:$8 sps:$4 sm:$0xff]  }
 0x74c   :  { %v11290_v12 = vadd.f32 %v27448_v55, %v11246_v34  ;;  %v11214_v8 = vadd.f32 %v28679_v60, %v11213_v36  ;;  %15616 = vmatmul.mubr.msk.bf16.vlgmr.msra.gmra.mxu1 %vm11609_vm3, %v11426_v29  ;;  %12182 = vmatprep.subr.bf16.mxu0 %v18927_v9  ;;  %v18946_v9 = vld [vmem:[%s28455_s6 + $0x30] ss:$8 sps:$4 sm:$0xff]   ;;  %v18954_v29 = vld [vmem:[%s28455_s6 + $0x24] ss:$8 sps:$4 sm:$0xff]   ;;  %v18957_v36 = vld [vmem:[%s28455_s6 + $0x254] ss:$8 sps:$4 sm:$0xff]  }
 0x74d   :  { %11879 = vmatpush1.bf16.msra.mxu1 %v18922_v30  ;;  %v17544_v6 = vpop.f32.mrf.mxu1  ;;  %11910 = vmatprep.mubr.bf16.mxu1 %v27368_v17 }
 0x74e   :  { %v11317_v16 = vmax.f32 %v11290_v12, 0.0  ;;  %v11249_v57 = vadd.f32 %v11214_v8, %v28680_v33  ;;  %11880 = vmatprep.subr.bf16.mxu1 %v18930_v38  ;;  %v18952_v12 = vld [vmem:[%s28455_s6 + $0x20] ss:$8 sps:$4 sm:$0xff]  }
 0x74f   :  { %12183 = vmatpush1.bf16.msra.mxu0 %v18925_v63  ;;  %v11216_v15 = vpop.f32.mrf.mxu1 }
 0x750   :  { %v27492_v17 = vpack.c.bf16 %v11317_v16, %v11314_v26  ;;  %v11293_v49 = vadd.f32 %v27448_v55, %v11249_v57  ;;  %v11217_v0 = vadd.f32 %v28681_v19, %v11216_v15  ;;  %12184 = vmatprep.subr.bf16.mxu0 %v18933_v40  ;;  %v28685_v40 = vld [vmem:[#allocation18_spill] sm:$0xff]  ;;  %v18955_v26 = vld [vmem:[%s28455_s6 + $0x250] ss:$8 sps:$4 sm:$0xff]  }
 0x751   :  { %11881 = vmatpush1.bf16.msra.mxu1 %v18928_v51  ;;  %v17545_v52 = vpop.f32.mrf.mxu1  ;;  %v18963_v57 = vld [vmem:[%s28455_s6 + $0x244] ss:$8 sps:$4 sm:$0xff]   ;;  %v18958_v15 = vld [vmem:[%s28455_s6 + $0x10] ss:$8 sps:$4 sm:$0xff]   ;;  %v18964_v19 = vld [vmem:[%s28455_s6] ss:$8 sps:$4 sm:$0xff]  }
 0x752   :  { %v11252_v48 = vadd.f32 %v11217_v0, %v28682_v35  ;;  %11882 = vmatprep.subr.bf16.mxu1 %v18936_v10  ;;  %v11320_v37 = vmax.f32 %v11293_v49, 0.0  ;;  %v18969_v49 = vld [vmem:[%s28455_s6 + $0x334] ss:$8 sps:$4 sm:$0xff]   ;;  %v18975_v52 = vld [vmem:[%s28455_s6 + $0x324] ss:$8 sps:$4 sm:$0xff]  }
 0x753   :  { %12185 = vmatpush1.bf16.msra.mxu0 %v18931_v25  ;;  %v11221_v18 = vpop.f32.mrf.mxu1  ;;  %v18966_v25 = vld [vmem:[%s28455_s6 + $0x4] ss:$8 sps:$4 sm:$0xff]   ;;  %v18972_v0 = vld [vmem:[%s28455_s6 + $0xf4] ss:$8 sps:$4 sm:$0xff]  }
 0x754   :  { %v11296_v14 = vadd.f32 %v27448_v55, %v11252_v48  ;;  %v11222_v3 = vadd.f32 %v27335_v61, %v11221_v18  ;;  %12186 = vmatprep.subr.bf16.mxu0 %v18939_v46  ;;  %v18948_v61 = vld [vmem:[%s28455_s6 + $0x34] ss:$8 sps:$4 sm:$0xff]   ;;  %v18967_v46 = vld [vmem:[%s28455_s6 + $0x330] ss:$8 sps:$4 sm:$0xff]   ;;  %v18978_v35 = vld [vmem:[%s28455_s6 + $0xe4] ss:$8 sps:$4 sm:$0xff]  }
 0x755   :  { %11883 = vmatpush1.bf16.msra.mxu1 %v18934_v43  ;;  %v17548_v27 = vpop.f32.mrf.mxu1  ;;  %v18970_v43 = vld [vmem:[%s28455_s6 + $0xf0] ss:$8 sps:$4 sm:$0xff]   ;;  %v18973_v48 = vld [vmem:[%s28455_s6 + $0x320] ss:$8 sps:$4 sm:$0xff]  }
 0x756   :  { %v11323_v47 = vmax.f32 %v11296_v14, 0.0  ;;  %v11255_v53 = vadd.f32 %v11222_v3, %v28683_v28  ;;  %11884 = vmatprep.subr.bf16.mxu1 %v18942_v58  ;;  %v18981_v58 = vld [vmem:[%s28455_s6 + $0x314] ss:$8 sps:$4 sm:$0xff]   ;;  %v18976_v18 = vld [vmem:[%s28455_s6 + $0xe0] ss:$8 sps:$4 sm:$0xff]  }
 0x757   :  { %12187 = vmatpush1.bf16.msra.mxu0 %v18937_v4  ;;  %v11224_v54 = vpop.f32.mrf.mxu1  ;;  %v18984_v4 = vld [vmem:[%s28455_s6 + $0xd4] ss:$8 sps:$4 sm:$0xff]   ;;  %v18979_v14 = vld [vmem:[%s28455_s6 + $0x310] ss:$8 sps:$4 sm:$0xff]   ;;  %v18987_v3 = vld [vmem:[%s28455_s6 + $0x304] ss:$8 sps:$4 sm:$0xff]  }
 0x758   :  { %v27524_v41 = vpack.c.bf16 %v11323_v47, %v11320_v37  ;;  %v11299_v1 = vadd.f32 %v27448_v55, %v11255_v53  ;;  %v11225_v59 = vadd.f32 %v27348_v56, %v11224_v54  ;;  %12188 = vmatprep.subr.bf16.mxu0 %v18945_v21  ;;  %v18982_v21 = vld [vmem:[%s28455_s6 + $0xd0] ss:$8 sps:$4 sm:$0xff]   ;;  %v18990_v27 = vld [vmem:[%s28455_s6 + $0xc4] ss:$8 sps:$4 sm:$0xff]   ;;  %v18993_v37 = vld [vmem:[%s28455_s6 + $0x2f4] ss:$8 sps:$4 sm:$0xff]  }
 0x759   :  { %11885 = vmatpush1.bf16.msra.mxu1 %v18940_v20  ;;  %v17549_v44 = vpop.f32.mrf.mxu1  ;;  %v18985_v20 = vld [vmem:[%s28455_s6 + $0x300] ss:$8 sps:$4 sm:$0xff]   ;;  %v18996_v28 = vld [vmem:[%s28455_s6 + $0xb4] ss:$8 sps:$4 sm:$0xff]   ;;  %v18991_v53 = vld [vmem:[%s28455_s6 + $0x2f0] ss:$8 sps:$4 sm:$0xff]  }
 0x75a   :  { %v11258_v30 = vadd.f32 %v11225_v59, %v28684_v42  ;;  %11886 = vmatprep.subr.bf16.mxu1 %v18948_v61  ;;  %v11326_v60 = vmax.f32 %v11299_v1, 0.0  ;;  %v18988_v47 = vld [vmem:[%s28455_s6 + $0xc0] ss:$8 sps:$4 sm:$0xff]   ;;  %v18999_v61 = vld [vmem:[%s28455_s6 + $0x2e4] ss:$8 sps:$4 sm:$0xff]  }
 0x75b   :  { %12189 = vmatpush1.bf16.msra.mxu0 %v18943_v31  ;;  %v11229_v56 = vpop.f32.mrf.mxu1  ;;  %v18994_v54 = vld [vmem:[%s28455_s6 + $0xb0] ss:$8 sps:$4 sm:$0xff]   ;;  %v19002_v31 = vld [vmem:[%s28455_s6 + $0xa4] ss:$8 sps:$4 sm:$0xff]   ;;  %v18997_v1 = vld [vmem:[%s28455_s6 + $0x2e0] ss:$8 sps:$4 sm:$0xff]  }
 0x75c   :  { %v11302_v34 = vadd.f32 %v27448_v55, %v11258_v30  ;;  %v11230_v38 = vadd.f32 %v27356_v39, %v11229_v56  ;;  %12190 = vmatprep.subr.bf16.mxu0 %v18951_v7  ;;  %v18960_v39 = vld [vmem:[%s28455_s6 + $0x14] ss:$8 sps:$4 sm:$0xff]   ;;  %v19000_v7 = vld [vmem:[%s28455_s6 + $0xa0] ss:$8 sps:$4 sm:$0xff]   ;;  %v19011_v42 = vld [vmem:[%s28455_s6 + $0x2c4] ss:$8 sps:$4 sm:$0xff]  }
 0x75d   :  { %11887 = vmatpush1.bf16.msra.mxu1 %v18946_v9  ;;  %v17552_v63 = vpop.f32.mrf.mxu1  ;;  %v19005_v59 = vld [vmem:[%s28455_s6 + $0x2d4] ss:$8 sps:$4 sm:$0xff]   ;;  %v19003_v9 = vld [vmem:[%s28455_s6 + $0x2d0] ss:$8 sps:$4 sm:$0xff]   ;;  %v19009_v56 = vld [vmem:[%s28455_s6 + $0x2c0] ss:$8 sps:$4 sm:$0xff]  }
 0x75e   :  { %v11329_v8 = vmax.f32 %v11302_v34, 0.0  ;;  %v11261_v6 = vadd.f32 %v11230_v38, %v28685_v40  ;;  %11888 = vmatprep.subr.bf16.mxu1 %v18954_v29  ;;  %v19008_v44 = vld [vmem:[%s28455_s6 + $0x94] ss:$8 sps:$4 sm:$0xff]   ;;  %v19006_v30 = vld [vmem:[%s28455_s6 + $0x90] ss:$8 sps:$4 sm:$0xff]  }
 0x75f   :  { %12191 = vmatpush1.bf16.msra.mxu0 %v18949_v5  ;;  %v11232_v51 = vpop.f32.mrf.mxu1  ;;  %v19014_v29 = vld [vmem:[%s28455_s6 + $0x84] ss:$8 sps:$4 sm:$0xff]   ;;  %v19017_v5 = vld [vmem:[%s28455_s6 + $0x474] ss:$8 sps:$4 sm:$0xff]   ;;  %v19012_v34 = vld [vmem:[%s28455_s6 + $0x80] ss:$8 sps:$4 sm:$0xff]  }
 0x760   :  { %v27556_v16 = vpack.c.bf16 %v11329_v8, %v11326_v60  ;;  %v27559_v33 = vadd.f32 %v27448_v55, %v11261_v6  ;;  %12192 = vmatprep.subr.bf16.mxu0 %v18957_v36  ;;  %v18961_v55 = vld [vmem:[%s28455_s6 + $0x240] ss:$8 sps:$4 sm:$0xff]   ;;  %v19020_v38 = vld [vmem:[%s28455_s6 + $0x354] ss:$8 sps:$4 sm:$0xff]   ;;  %v19015_v36 = vld [vmem:[%s28455_s6 + $0x470] ss:$8 sps:$4 sm:$0xff]  }
 0x761   :  { %11889 = vmatpush1.bf16.msra.mxu1 %v18952_v12  ;;  %v17553_v10 = vpop.f32.mrf.mxu1  ;;  %v19023_v63 = vld [vmem:[%s28455_s6 + $0x464] ss:$8 sps:$4 sm:$0xff]   ;;  %v19018_v12 = vld [vmem:[%s28455_s6 + $0x350] ss:$8 sps:$4 sm:$0xff]   ;;  %v19021_v8 = vld [vmem:[%s28455_s6 + $0x460] ss:$8 sps:$4 sm:$0xff]  }
 0x762   :  { %11890 = vmatprep.subr.bf16.mxu1 %v18960_v39  ;;  %v19026_v60 = vld [vmem:[%s28455_s6 + $0x344] ss:$8 sps:$4 sm:$0xff]   ;;  %v19029_v40 = vld [vmem:[%s28455_s6 + $0x4f4] ss:$8 sps:$4 sm:$0xff]   ;;  %v19024_v6 = vld [vmem:[%s28455_s6 + $0x340] ss:$8 sps:$4 sm:$0xff]  }
 0x763   :  { %12193 = vmatpush1.bf16.msra.mxu0 %v18955_v26  ;;  %v19032_v39 = vld [vmem:[%s28455_s6 + $0x3d4] ss:$8 sps:$4 sm:$0xff]   ;;  %v12306_v51 = vrot.slane %v27492_v17, 4  ;;  %v19035_v26 = vld [vmem:[%s28455_s6 + $0x4e4] ss:$8 sps:$4 sm:$0xff]  }
 0x764   :  { %12194 = vmatprep.subr.bf16.mxu0 %v18963_v57  ;;  %v19030_v57 = vld [vmem:[%s28455_s6 + $0x3d0] ss:$8 sps:$4 sm:$0xff]   ;;  %v19038_v10 = vld [vmem:[%s28455_s6 + $0x3c4] ss:$8 sps:$4 sm:$0xff]  }
 0x765   :  { %11891 = vmatpush1.bf16.msra.mxu1 %v18958_v15  ;;  %v12305_v15 = vrot.slane %v27405_v50, 4  ;;  %v19044_v50 = vld [vmem:[%s28455_s6 + $0x3b4] ss:$8 sps:$4 sm:$0xff]  }
 0x766   :  { %11892 = vmatprep.subr.bf16.mxu1 %v18966_v25  ;;  %v19033_v25 = vld [vmem:[%s28455_s6 + $0x4e0] ss:$8 sps:$4 sm:$0xff]  }
 0x767   :  { %12195 = vmatpush1.bf16.msra.mxu0 %v18961_v55  ;;  %v19041_v55 = vld [vmem:[%s28455_s6 + $0x4d4] ss:$8 sps:$4 sm:$0xff]  }
 0x768   :  { %12196 = vmatprep.subr.bf16.mxu0 %v18969_v49  ;;  %v19036_v49 = vld [vmem:[%s28455_s6 + $0x3c0] ss:$8 sps:$4 sm:$0xff]  }
 0x769   :  { %11893 = vmatpush1.bf16.msra.mxu1 %v18964_v19  ;;  %v19047_v19 = vld [vmem:[%s28455_s6 + $0x4c4] ss:$8 sps:$4 sm:$0xff]  }
 0x76a   :  { %11894 = vmatprep.subr.bf16.mxu1 %v18972_v0  ;;  %v19042_v0 = vld [vmem:[%s28455_s6 + $0x3b0] ss:$8 sps:$4 sm:$0xff]  }
 0x76b   :  { %12197 = vmatpush2.bf16.msra.mxu0 %v18967_v46  ;;  %v19050_v46 = vld [vmem:[%s28455_s6 + $0x3a4] ss:$8 sps:$4 sm:$0xff]  }
 0x76c   :  { %12198 = vmatprep.subr.bf16.mxu0 %v18975_v52  ;;  %v19045_v52 = vld [vmem:[%s28455_s6 + $0x4c0] ss:$8 sps:$4 sm:$0xff]  }
 0x76d   :  { %11895 = vmatpush2.bf16.msra.mxu1 %v18970_v43  ;;  %v19053_v43 = vld [vmem:[%s28455_s6 + $0x4b4] ss:$8 sps:$4 sm:$0xff]  }
 0x76e   :  { %11896 = vmatprep.subr.bf16.mxu1 %v18978_v35  ;;  %v19048_v35 = vld [vmem:[%s28455_s6 + $0x3a0] ss:$8 sps:$4 sm:$0xff]  }
 0x76f   :  { %12199 = vmatpush2.bf16.msra.mxu0 %v18973_v48  ;;  %v19056_v48 = vld [vmem:[%s28455_s6 + $0x394] ss:$8 sps:$4 sm:$0xff]  }
 0x770   :  { %12200 = vmatprep.subr.bf16.mxu0 %v18981_v58  ;;  %v19051_v58 = vld [vmem:[%s28455_s6 + $0x4b0] ss:$8 sps:$4 sm:$0xff]  }
 0x771   :  { %11897 = vmatpush2.bf16.msra.mxu1 %v18976_v18  ;;  %v19059_v18 = vld [vmem:[%s28455_s6 + $0x4a4] ss:$8 sps:$4 sm:$0xff]  }
 0x772   :  { %11898 = vmatprep.subr.bf16.mxu1 %v18984_v4  ;;  %v19054_v4 = vld [vmem:[%s28455_s6 + $0x390] ss:$8 sps:$4 sm:$0xff]  }
 0x773   :  { %12201 = vmatpush2.bf16.msra.mxu0 %v18979_v14  ;;  %v19062_v14 = vld [vmem:[%s28455_s6 + $0x384] ss:$8 sps:$4 sm:$0xff]  }
 0x774   :  { %12202 = vmatprep.subr.bf16.mxu0 %v18987_v3  ;;  %v19057_v3 = vld [vmem:[%s28455_s6 + $0x4a0] ss:$8 sps:$4 sm:$0xff]  }
 0x775   :  { %11899 = vmatpush2.bf16.msra.mxu1 %v18982_v21  ;;  %v19065_v21 = vld [vmem:[%s28455_s6 + $0x494] ss:$8 sps:$4 sm:$0xff]  }
 0x776   :  { %11900 = vmatprep.subr.bf16.mxu1 %v18990_v27  ;;  %v19060_v27 = vld [vmem:[%s28455_s6 + $0x380] ss:$8 sps:$4 sm:$0xff]  }
 0x777   :  { %12203 = vmatpush2.bf16.msra.mxu0 %v18985_v20  ;;  %v19068_v20 = vld [vmem:[%s28455_s6 + $0x374] ss:$8 sps:$4 sm:$0xff]  }
 0x778   :  { %12204 = vmatprep.subr.bf16.mxu0 %v18993_v37  ;;  %v19063_v37 = vld [vmem:[%s28455_s6 + $0x490] ss:$8 sps:$4 sm:$0xff]  }
 0x779   :  { %11901 = vmatpush2.bf16.msra.mxu1 %v18988_v47  ;;  %v19071_v47 = vld [vmem:[%s28455_s6 + $0x484] ss:$8 sps:$4 sm:$0xff]  }
 0x77a   :  { %11902 = vmatprep.subr.bf16.mxu1 %v18996_v28  ;;  %v19066_v28 = vld [vmem:[%s28455_s6 + $0x370] ss:$8 sps:$4 sm:$0xff]  }
 0x77b   :  { %12205 = vmatpush2.bf16.msra.mxu0 %v18991_v53  ;;  %v19074_v53 = vld [vmem:[%s28455_s6 + $0x364] ss:$8 sps:$4 sm:$0xff]  }
 0x77c   :  { %12206 = vmatprep.subr.bf16.mxu0 %v18999_v61  ;;  %v19069_v61 = vld [vmem:[%s28455_s6 + $0x480] ss:$8 sps:$4 sm:$0xff]  }
 0x77d   :  { %11903 = vmatpush2.bf16.msra.mxu1 %v18994_v54  ;;  %v19077_v54 = vld [vmem:[%s28455_s6 + $0x574] ss:$8 sps:$4 sm:$0xff]  }
 0x77e   :  { %11904 = vmatprep.subr.bf16.mxu1 %v19002_v31  ;;  %v19072_v31 = vld [vmem:[%s28455_s6 + $0x360] ss:$8 sps:$4 sm:$0xff]  }
 0x77f   :  { %12207 = vmatpush2.bf16.msra.mxu0 %v18997_v1  ;;  %v19080_v1 = vld [vmem:[%s28455_s6 + $0x454] ss:$8 sps:$4 sm:$0xff]  }
 0x780   :  { %12208 = vmatprep.subr.bf16.mxu0 %v19005_v59  ;;  %v19075_v59 = vld [vmem:[%s28455_s6 + $0x570] ss:$8 sps:$4 sm:$0xff]  }
 0x781   :  { %11905 = vmatpush2.bf16.msra.mxu1 %v19000_v7  ;;  %v19083_v7 = vld [vmem:[%s28455_s6 + $0x564] ss:$8 sps:$4 sm:$0xff]  }
 0x782   :  { %11906 = vmatprep.subr.bf16.mxu1 %v19008_v44  ;;  %v19078_v44 = vld [vmem:[%s28455_s6 + $0x450] ss:$8 sps:$4 sm:$0xff]  }
 0x783   :  { %12209 = vmatpush2.bf16.msra.mxu0 %v19003_v9  ;;  %v19086_v9 = vld [vmem:[%s28455_s6 + $0x444] ss:$8 sps:$4 sm:$0xff]  }
 0x784   :  { %12210 = vmatprep.subr.bf16.mxu0 %v19011_v42  ;;  %v19081_v42 = vld [vmem:[%s28455_s6 + $0x560] ss:$8 sps:$4 sm:$0xff]  }
 0x785   :  { %11907 = vmatpush2.bf16.msra.mxu1 %v19006_v30  ;;  %v19089_v30 = vld [vmem:[%s28455_s6 + $0x554] ss:$8 sps:$4 sm:$0xff]  }
 0x786   :  { %11908 = vmatprep.subr.bf16.mxu1 %v19014_v29  ;;  %v19084_v29 = vld [vmem:[%s28455_s6 + $0x440] ss:$8 sps:$4 sm:$0xff]  }
 0x787   :  { %12211 = vmatpush2.bf16.msra.mxu0 %v19009_v56  ;;  %v19092_v56 = vld [vmem:[%s28455_s6 + $0x434] ss:$8 sps:$4 sm:$0xff]  }
 0x788   :  { %12545 = vmatprep.subr.bf16.mxu0 %v19017_v5  ;;  %v19087_v5 = vld [vmem:[%s28455_s6 + $0x550] ss:$8 sps:$4 sm:$0xff]  }
 0x789   :  { %11909 = vmatpush2.bf16.msra.mxu1 %v19012_v34  ;;  %v19095_v34 = vld [vmem:[%s28455_s6 + $0x544] ss:$8 sps:$4 sm:$0xff]  }
 0x78a   :  { %12213 = vmatmul.mubr.bf16.vlgmr.msra.gmra.mxu0 %v27391_v32  ;;  %12233 = vmatprep.subr.bf16.mxu1 %v19020_v38  ;;  %v19090_v38 = vld [vmem:[%s28455_s6 + $0x430] ss:$8 sps:$4 sm:$0xff]  }
 0x78b   :  { %12546 = vmatpush1.bf16.msra.mxu0 %v19015_v36  ;;  %12565 = vmatprep.mubr.bf16.mxu0 %v28673_v13  ;;  %v19098_v36 = vld [vmem:[%s28455_s6 + $0x424] ss:$8 sps:$4 sm:$0xff]  }
 0x78c   :  { %11911 = vmatmul.mubr.bf16.vlgmr.msra.gmra.mxu1 %v27358_v2  ;;  %12547 = vmatprep.subr.bf16.mxu0 %v19023_v63  ;;  %v19027_v2 = vld [vmem:[%s28455_s6 + $0x4f0] ss:$8 sps:$4 sm:$0xff]   ;;  %v19093_v63 = vld [vmem:[%s28455_s6 + $0x540] ss:$8 sps:$4 sm:$0xff]  }
 0x78d   :  { %12234 = vmatpush1.bf16.msra.mxu1 %v19018_v12  ;;  %12253 = vmatprep.mubr.bf16.mxu1 %v28673_v13  ;;  %v19101_v12 = vld [vmem:[%s28455_s6 + $0x534] ss:$8 sps:$4 sm:$0xff]  }
 0x78e   :  { %12235 = vmatprep.subr.bf16.mxu1 %v19026_v60  ;;  %v19096_v60 = vld [vmem:[%s28455_s6 + $0x420] ss:$8 sps:$4 sm:$0xff]  }
 0x78f   :  { %12548 = vmatpush1.bf16.msra.mxu0 %v19021_v8  ;;  %v19104_v8 = vld [vmem:[%s28455_s6 + $0x414] ss:$8 sps:$4 sm:$0xff]  }
 0x790   :  { %12796 = vmatprep.subr.bf16.mxu0 %v19029_v40  ;;  %v19099_v40 = vld [vmem:[%s28455_s6 + $0x530] ss:$8 sps:$4 sm:$0xff]  }
 0x791   :  { %12236 = vmatpush1.bf16.msra.mxu1 %v19024_v6  ;;  %v19107_v6 = vld [vmem:[%s28455_s6 + $0x524] ss:$8 sps:$4 sm:$0xff]  }
 0x792   :  { %15799 = vmatmul.mubr.msk.bf16.vlgmr.msra.gmra.mxu0 %vm11609_vm3, %v12306_v51  ;;  %12492 = vmatprep.subr.bf16.mxu1 %v19032_v39  ;;  %v19102_v39 = vld [vmem:[%s28455_s6 + $0x410] ss:$8 sps:$4 sm:$0xff]   ;;  %v19105_v51 = vld [vmem:[%s28455_s6 + $0x520] ss:$8 sps:$4 sm:$0xff]  }
 0x793   :  { %12797 = vmatpush1.bf16.msra.mxu0 %v19027_v2  ;;  %12828 = vmatprep.mubr.bf16.mxu0 %v27422_v24  ;;  %v19110_v2 = vld [vmem:[%s28455_s6 + $0x404] ss:$8 sps:$4 sm:$0xff]  }
 0x794   :  { %15726 = vmatmul.mubr.msk.bf16.vlgmr.msra.gmra.mxu1 %vm11609_vm3, %v27492_v17  ;;  %12798 = vmatprep.subr.bf16.mxu0 %v19035_v26  ;;  %v19039_v17 = vld [vmem:[%s28455_s6 + $0x4d0] ss:$8 sps:$4 sm:$0xff]   ;;  %v19113_v26 = vld [vmem:[%s28455_s6 + $0x514] ss:$8 sps:$4 sm:$0xff]  }
 0x795   :  { %12493 = vmatpush1.bf16.msra.mxu1 %v19030_v57  ;;  %12524 = vmatprep.mubr.bf16.mxu1 %v12305_v15  ;;  %v19108_v57 = vld [vmem:[%s28455_s6 + $0x400] ss:$8 sps:$4 sm:$0xff]   ;;  %v19111_v15 = vld [vmem:[%s28455_s6 + $0x510] ss:$8 sps:$4 sm:$0xff]  }
 0x796   :  { %12494 = vmatprep.subr.bf16.mxu1 %v19038_v10  ;;  %v19116_v10 = vld [vmem:[%s28455_s6 + $0x3f4] ss:$8 sps:$4 sm:$0xff]  }
 0x797   :  { %12799 = vmatpush1.bf16.msra.mxu0 %v19033_v25  ;;  %v19119_v25 = vld [vmem:[%s28455_s6 + $0x504] ss:$8 sps:$4 sm:$0xff]  }
 0x798   :  { %12800 = vmatprep.subr.bf16.mxu0 %v19041_v55  ;;  %v19114_v55 = vld [vmem:[%s28455_s6 + $0x3f0] ss:$8 sps:$4 sm:$0xff]  }
 0x799   :  { %12495 = vmatpush1.bf16.msra.mxu1 %v19036_v49  ;;  %v19122_v49 = vld [vmem:[%s28455_s6 + $0x3e4] ss:$8 sps:$4 sm:$0xff]  }
 0x79a   :  { %12496 = vmatprep.subr.bf16.mxu1 %v19044_v50  ;;  %v19117_v50 = vld [vmem:[%s28455_s6 + $0x500] ss:$8 sps:$4 sm:$0xff]  }
 0x79b   :  { %12801 = vmatpush1.bf16.msra.mxu0 %v19039_v17  ;;  %v19125_v17 = vld [vmem:[%s28455_s6 + $0x6b4] ss:$8 sps:$4 sm:$0xff]  }
 0x79c   :  { %12802 = vmatprep.subr.bf16.mxu0 %v19047_v19  ;;  %v19120_v19 = vld [vmem:[%s28455_s6 + $0x3e0] ss:$8 sps:$4 sm:$0xff]  }
 0x79d   :  { %12497 = vmatpush1.bf16.msra.mxu1 %v19042_v0  ;;  %v19128_v0 = vld [vmem:[%s28455_s6 + $0x594] ss:$8 sps:$4 sm:$0xff]  }
 0x79e   :  { %12498 = vmatprep.subr.bf16.mxu1 %v19050_v46  ;;  %v19123_v46 = vld [vmem:[%s28455_s6 + $0x6b0] ss:$8 sps:$4 sm:$0xff]  }
 0x79f   :  { %12803 = vmatpush1.bf16.msra.mxu0 %v19045_v52  ;;  %v19131_v52 = vld [vmem:[%s28455_s6 + $0x6a4] ss:$8 sps:$4 sm:$0xff]  }
 0x7a0   :  { %12804 = vmatprep.subr.bf16.mxu0 %v19053_v43  ;;  %v19126_v43 = vld [vmem:[%s28455_s6 + $0x590] ss:$8 sps:$4 sm:$0xff]  }
 0x7a1   :  { %12499 = vmatpush1.bf16.msra.mxu1 %v19048_v35  ;;  %v12304_v35 = vrot.slane %v27391_v32, 4  ;;  %v19137_v32 = vld [vmem:[%s28455_s6 + $0x734] ss:$8 sps:$4 sm:$0xff]  }
 0x7a2   :  { %12500 = vmatprep.subr.bf16.mxu1 %v19056_v48  ;;  %v19134_v48 = vld [vmem:[%s28455_s6 + $0x584] ss:$8 sps:$4 sm:$0xff]  }
 0x7a3   :  { %12805 = vmatpush1.bf16.msra.mxu0 %v19051_v58  ;;  %v19129_v58 = vld [vmem:[%s28455_s6 + $0x6a0] ss:$8 sps:$4 sm:$0xff]  }
 0x7a4   :  { %12806 = vmatprep.subr.bf16.mxu0 %v19059_v18  ;;  %v19132_v18 = vld [vmem:[%s28455_s6 + $0x580] ss:$8 sps:$4 sm:$0xff]  }
 0x7a5   :  { %12501 = vmatpush1.bf16.msra.mxu1 %v19054_v4  ;;  %v19140_v4 = vld [vmem:[%s28455_s6 + $0x614] ss:$8 sps:$4 sm:$0xff]  }
 0x7a6   :  { %12502 = vmatprep.subr.bf16.mxu1 %v19062_v14  ;;  %v19135_v14 = vld [vmem:[%s28455_s6 + $0x730] ss:$8 sps:$4 sm:$0xff]  }
 0x7a7   :  { %12807 = vmatpush1.bf16.msra.mxu0 %v19057_v3  ;;  %v12922_v3 = vrot.slane %v27524_v41, 4 }
 0x7a8   :  { %12808 = vmatprep.subr.bf16.mxu0 %v19065_v21  ;;  %v19143_v21 = vld [vmem:[%s28455_s6 + $0x724] ss:$8 sps:$4 sm:$0xff]  }
 0x7a9   :  { %12503 = vmatpush1.bf16.msra.mxu1 %v19060_v27  ;;  %v19138_v27 = vld [vmem:[%s28455_s6 + $0x610] ss:$8 sps:$4 sm:$0xff]  }
 0x7aa   :  { %12504 = vmatprep.subr.bf16.mxu1 %v19068_v20  ;;  %v19146_v20 = vld [vmem:[%s28455_s6 + $0x604] ss:$8 sps:$4 sm:$0xff]  }
 0x7ab   :  { %12809 = vmatpush1.bf16.msra.mxu0 %v19063_v37  ;;  %v12921_v37 = vrot.slane %v27422_v24, 4  ;;  %v19152_v24 = vld [vmem:[%s28455_s6 + $0x5f4] ss:$8 sps:$4 sm:$0xff]  }
 0x7ac   :  { %12810 = vmatprep.subr.bf16.mxu0 %v19071_v47  ;;  %v19141_v47 = vld [vmem:[%s28455_s6 + $0x720] ss:$8 sps:$4 sm:$0xff]  }
 0x7ad   :  { %12505 = vmatpush1.bf16.msra.mxu1 %v19066_v28  ;;  %v19149_v28 = vld [vmem:[%s28455_s6 + $0x714] ss:$8 sps:$4 sm:$0xff]  }
 0x7ae   :  { %12506 = vmatprep.subr.bf16.mxu1 %v19074_v53  ;;  %v19144_v53 = vld [vmem:[%s28455_s6 + $0x600] ss:$8 sps:$4 sm:$0xff]  }
 0x7af   :  { %12811 = vmatpush1.bf16.msra.mxu0 %v19069_v61  ;;  %v19155_v61 = vld [vmem:[%s28455_s6 + $0x704] ss:$8 sps:$4 sm:$0xff]  }
 0x7b0   :  { %12812 = vmatprep.subr.bf16.mxu0 %v19077_v54  ;;  %v19150_v54 = vld [vmem:[%s28455_s6 + $0x5f0] ss:$8 sps:$4 sm:$0xff]  }
 0x7b1   :  { %12507 = vmatpush1.bf16.msra.mxu1 %v19072_v31  ;;  %v19158_v31 = vld [vmem:[%s28455_s6 + $0x5e4] ss:$8 sps:$4 sm:$0xff]  }
 0x7b2   :  { %12508 = vmatprep.subr.bf16.mxu1 %v19080_v1  ;;  %v19153_v1 = vld [vmem:[%s28455_s6 + $0x700] ss:$8 sps:$4 sm:$0xff]  }
 0x7b3   :  { %12813 = vmatpush2.bf16.msra.mxu0 %v19075_v59  ;;  %v19161_v59 = vld [vmem:[%s28455_s6 + $0x6f4] ss:$8 sps:$4 sm:$0xff]  }
 0x7b4   :  { %12814 = vmatprep.subr.bf16.mxu0 %v19083_v7  ;;  %v19156_v7 = vld [vmem:[%s28455_s6 + $0x5e0] ss:$8 sps:$4 sm:$0xff]  }
 0x7b5   :  { %12509 = vmatpush2.bf16.msra.mxu1 %v19078_v44  ;;  %v19164_v44 = vld [vmem:[%s28455_s6 + $0x5d4] ss:$8 sps:$4 sm:$0xff]  }
 0x7b6   :  { %12510 = vmatprep.subr.bf16.mxu1 %v19086_v9  ;;  %v19159_v9 = vld [vmem:[%s28455_s6 + $0x6f0] ss:$8 sps:$4 sm:$0xff]  }
 0x7b7   :  { %12815 = vmatpush2.bf16.msra.mxu0 %v19081_v42 }
 0x7b8   :  { %12816 = vmatprep.subr.bf16.mxu0 %v19089_v30  ;;  %v19167_v30 = vld [vmem:[%s28455_s6 + $0x6e4] ss:$8 sps:$4 sm:$0xff]  }
 0x7b9   :  { %12511 = vmatpush2.bf16.msra.mxu1 %v19084_v29  ;;  %v19162_v29 = vld [vmem:[%s28455_s6 + $0x5d0] ss:$8 sps:$4 sm:$0xff]  }
 0x7ba   :  { %12512 = vmatprep.subr.bf16.mxu1 %v19092_v56 }
 0x7bb   :  { %12817 = vmatpush2.bf16.msra.mxu0 %v19087_v5  ;;  %v19170_v5 = vld [vmem:[%s28455_s6 + $0x5c4] ss:$8 sps:$4 sm:$0xff]  }
 0x7bc   :  { %12818 = vmatprep.subr.bf16.mxu0 %v19095_v34  ;;  %v19165_v34 = vld [vmem:[%s28455_s6 + $0x6e0] ss:$8 sps:$4 sm:$0xff]  }
 0x7bd   :  { %12513 = vmatpush2.bf16.msra.mxu1 %v19090_v38 }
 0x7be   :  { %12514 = vmatprep.subr.bf16.mxu1 %v19098_v36  ;;  %v19173_v36 = vld [vmem:[%s28455_s6 + $0x6d4] ss:$8 sps:$4 sm:$0xff]  }
 0x7bf   :  { %12819 = vmatpush2.bf16.msra.mxu0 %v19093_v63  ;;  %v19168_v63 = vld [vmem:[%s28455_s6 + $0x5c0] ss:$8 sps:$4 sm:$0xff]  }
 0x7c0   :  { %12820 = vmatprep.subr.bf16.mxu0 %v19101_v12 }
 0x7c1   :  { %12515 = vmatpush2.bf16.msra.mxu1 %v19096_v60  ;;  %v19176_v60 = vld [vmem:[%s28455_s6 + $0x5b4] ss:$8 sps:$4 sm:$0xff]  }
 0x7c2   :  { %12516 = vmatprep.subr.bf16.mxu1 %v19104_v8  ;;  %v19171_v8 = vld [vmem:[%s28455_s6 + $0x6d0] ss:$8 sps:$4 sm:$0xff]  }
 0x7c3   :  { %12821 = vmatpush2.bf16.msra.mxu0 %v19099_v40  ;;  %v19179_v40 = vld [vmem:[%s28455_s6 + $0x6c4] ss:$8 sps:$4 sm:$0xff]  }
 0x7c4   :  { %12822 = vmatprep.subr.bf16.mxu0 %v19107_v6  ;;  %v19174_v6 = vld [vmem:[%s28455_s6 + $0x5b0] ss:$8 sps:$4 sm:$0xff]  }
 0x7c5   :  { %12517 = vmatpush2.bf16.msra.mxu1 %v19102_v39  ;;  %v19182_v39 = vld [vmem:[%s28455_s6 + $0x5a4] ss:$8 sps:$4 sm:$0xff]  }
 0x7c6   :  { %12518 = vmatprep.subr.bf16.mxu1 %v19110_v2  ;;  %v19177_v2 = vld [vmem:[%s28455_s6 + $0x6c0] ss:$8 sps:$4 sm:$0xff]  }
 0x7c7   :  { %12823 = vmatpush2.bf16.msra.mxu0 %v19105_v51  ;;  %v19185_v51 = vld [vmem:[%s28455_s6 + $0x7b4] ss:$8 sps:$4 sm:$0xff]  }
 0x7c8   :  { %12824 = vmatprep.subr.bf16.mxu0 %v19113_v26  ;;  %v19180_v26 = vld [vmem:[%s28455_s6 + $0x5a0] ss:$8 sps:$4 sm:$0xff]  }
 0x7c9   :  { %12519 = vmatpush2.bf16.msra.mxu1 %v19108_v57  ;;  %v19188_v57 = vld [vmem:[%s28455_s6 + $0x694] ss:$8 sps:$4 sm:$0xff]  }
 0x7ca   :  { %12520 = vmatprep.subr.bf16.mxu1 %v19116_v10  ;;  %v19183_v10 = vld [vmem:[%s28455_s6 + $0x7b0] ss:$8 sps:$4 sm:$0xff]  }
 0x7cb   :  { %12825 = vmatpush2.bf16.msra.mxu0 %v19111_v15  ;;  %v19191_v15 = vld [vmem:[%s28455_s6 + $0x7a4] ss:$8 sps:$4 sm:$0xff]  }
 0x7cc   :  { %12826 = vmatprep.subr.bf16.mxu0 %v19119_v25  ;;  %v19186_v25 = vld [vmem:[%s28455_s6 + $0x690] ss:$8 sps:$4 sm:$0xff]  }
 0x7cd   :  { %12521 = vmatpush2.bf16.msra.mxu1 %v19114_v55  ;;  %v19194_v55 = vld [vmem:[%s28455_s6 + $0x684] ss:$8 sps:$4 sm:$0xff]  }
 0x7ce   :  { %12522 = vmatprep.subr.bf16.mxu1 %v19122_v49  ;;  %v19189_v49 = vld [vmem:[%s28455_s6 + $0x7a0] ss:$8 sps:$4 sm:$0xff]  }
 0x7cf   :  { %12827 = vmatpush2.bf16.msra.mxu0 %v19117_v50  ;;  %v19197_v50 = vld [vmem:[%s28455_s6 + $0x794] ss:$8 sps:$4 sm:$0xff]  }
 0x7d0   :  { %13161 = vmatprep.subr.bf16.mxu0 %v19125_v17  ;;  %v19192_v17 = vld [vmem:[%s28455_s6 + $0x680] ss:$8 sps:$4 sm:$0xff]  }
 0x7d1   :  { %12523 = vmatpush2.bf16.msra.mxu1 %v19120_v19  ;;  %v19200_v19 = vld [vmem:[%s28455_s6 + $0x674] ss:$8 sps:$4 sm:$0xff]  }
 0x7d2   :  { %12829 = vmatmul.mubr.bf16.vlgmr.msra.gmra.mxu0 %v27413_v45  ;;  %12849 = vmatprep.subr.bf16.mxu1 %v19128_v0  ;;  %v19195_v0 = vld [vmem:[%s28455_s6 + $0x790] ss:$8 sps:$4 sm:$0xff]  }
 0x7d3   :  { %13162 = vmatpush1.bf16.msra.mxu0 %v19123_v46  ;;  %13181 = vmatprep.mubr.bf16.mxu0 %v28673_v13  ;;  %v19203_v46 = vld [vmem:[%s28455_s6 + $0x784] ss:$8 sps:$4 sm:$0xff]  }
 0x7d4   :  { %12525 = vmatmul.mubr.bf16.vlgmr.msra.gmra.mxu1 %v12304_v35  ;;  %13163 = vmatprep.subr.bf16.mxu0 %v19131_v52  ;;  %v19198_v52 = vld [vmem:[%s28455_s6 + $0x670] ss:$8 sps:$4 sm:$0xff]   ;;  %v19201_v35 = vld [vmem:[%s28455_s6 + $0x780] ss:$8 sps:$4 sm:$0xff]  }
 0x7d5   :  { %12850 = vmatpush1.bf16.msra.mxu1 %v19126_v43  ;;  %12869 = vmatprep.mubr.bf16.mxu1 %v28673_v13  ;;  %v19206_v43 = vld [vmem:[%s28455_s6 + $0x664] ss:$8 sps:$4 sm:$0xff]  }
 0x7d6   :  { %12851 = vmatprep.subr.bf16.mxu1 %v19134_v48  ;;  %v19209_v48 = vld [vmem:[%s28455_s6 + $0x774] ss:$8 sps:$4 sm:$0xff]  }
 0x7d7   :  { %13164 = vmatpush1.bf16.msra.mxu0 %v19129_v58  ;;  %v19204_v58 = vld [vmem:[%s28455_s6 + $0x660] ss:$8 sps:$4 sm:$0xff]  }
 0x7d8   :  { %13412 = vmatprep.subr.bf16.mxu0 %v19137_v32  ;;  %v19212_v32 = vld [vmem:[%s28455_s6 + $0x654] ss:$8 sps:$4 sm:$0xff]  }
 0x7d9   :  { %12852 = vmatpush1.bf16.msra.mxu1 %v19132_v18  ;;  %v19207_v18 = vld [vmem:[%s28455_s6 + $0x770] ss:$8 sps:$4 sm:$0xff]  }
 0x7da   :  { %15945 = vmatmul.mubr.msk.bf16.vlgmr.msra.gmra.mxu0 %vm11609_vm3, %v12922_v3  ;;  %13108 = vmatprep.subr.bf16.mxu1 %v19140_v4  ;;  %v19215_v4 = vld [vmem:[%s28455_s6 + $0x764] ss:$8 sps:$4 sm:$0xff]  }
 0x7db   :  { %13413 = vmatpush1.bf16.msra.mxu0 %v19135_v14  ;;  %13444 = vmatprep.mubr.bf16.mxu0 %v27440_v23  ;;  %v19210_v14 = vld [vmem:[%s28455_s6 + $0x650] ss:$8 sps:$4 sm:$0xff]  }
 0x7dc   :  { %15872 = vmatmul.mubr.msk.bf16.vlgmr.msra.gmra.mxu1 %vm11609_vm3, %v27524_v41  ;;  %13414 = vmatprep.subr.bf16.mxu0 %v19143_v21  ;;  %v19147_v41 = vld [vmem:[%s28455_s6 + $0x710] ss:$8 sps:$4 sm:$0xff]   ;;  %v19218_v21 = vld [vmem:[%s28455_s6 + $0x644] ss:$8 sps:$4 sm:$0xff]  }
 0x7dd   :  { %13109 = vmatpush1.bf16.msra.mxu1 %v19138_v27  ;;  %13140 = vmatprep.mubr.bf16.mxu1 %v12921_v37  ;;  %v19213_v27 = vld [vmem:[%s28455_s6 + $0x760] ss:$8 sps:$4 sm:$0xff]  }
 0x7de   :  { %13110 = vmatprep.subr.bf16.mxu1 %v19146_v20 }
 0x7df   :  { %13415 = vmatpush1.bf16.msra.mxu0 %v19141_v47  ;;  %v19221_v47 = vld [vmem:[%s28455_s6 + $0x754] ss:$8 sps:$4 sm:$0xff]  }
 0x7e0   :  { %13416 = vmatprep.subr.bf16.mxu0 %v19149_v28 }
 0x7e1   :  { %13111 = vmatpush1.bf16.msra.mxu1 %v19144_v53  ;;  %v19216_v53 = vld [vmem:[%s28455_s6 + $0x640] ss:$8 sps:$4 sm:$0xff]  }
 0x7e2   :  { %13112 = vmatprep.subr.bf16.mxu1 %v19152_v24 }
 0x7e3   :  { %13417 = vmatpush1.bf16.msra.mxu0 %v19147_v41 }
 0x7e4   :  { %13418 = vmatprep.subr.bf16.mxu0 %v19155_v61  ;;  %v19224_v61 = vld [vmem:[%s28455_s6 + $0x634] ss:$8 sps:$4 sm:$0xff]  }
 0x7e5   :  { %13113 = vmatpush1.bf16.msra.mxu1 %v19150_v54 }
 0x7e6   :  { %13114 = vmatprep.subr.bf16.mxu1 %v19158_v31  ;;  %v19219_v31 = vld [vmem:[%s28455_s6 + $0x750] ss:$8 sps:$4 sm:$0xff]  }
 0x7e7   :  { %13419 = vmatpush1.bf16.msra.mxu0 %v19153_v1  ;;  %v27989_v42 = vpop.f32.mrf.mxu0 }
 0x7e8   :  { %13420 = vmatprep.subr.bf16.mxu0 %v19161_v59 }
 0x7e9   :  { %13115 = vmatpush1.bf16.msra.mxu1 %v19156_v7  ;;  %v27997_v56 = vpop.f32.mrf.mxu0  ;;  %v19227_v7 = vld [vmem:[%s28455_s6 + $0x744] ss:$8 sps:$4 sm:$0xff]  }
 0x7ea   :  { %13116 = vmatprep.subr.bf16.mxu1 %v19164_v44  ;;  %v19222_v44 = vld [vmem:[%s28455_s6 + $0x630] ss:$8 sps:$4 sm:$0xff]  }
 0x7eb   :  { %13421 = vmatpush1.bf16.msra.mxu0 %v19159_v9  ;;  %v11651_v38 = vpop.f32.mrf.mxu0 }
 0x7ec   :  { %13422 = vmatprep.subr.bf16.mxu0 %v19167_v30  ;;  %v19225_v30 = vld [vmem:[%s28455_s6 + $0x740] ss:$8 sps:$4 sm:$0xff]   ;;  %v19239_v38 = vld [vmem:[%s28455_s6 + $0x8e4] ss:$8 sps:$4 sm:$0xff]  }
 0x7ed   :  { %13117 = vmatpush1.bf16.msra.mxu1 %v19162_v29  ;;  %v11652_v12 = vpop.f32.mrf.mxu0  ;;  %v19233_v29 = vld [vmem:[%s28455_s6 + $0x8f4] ss:$8 sps:$4 sm:$0xff]  }
 0x7ee   :  { %13118 = vmatprep.subr.bf16.mxu1 %v19170_v5  ;;  %v19236_v5 = vld [vmem:[%s28455_s6 + $0x7d4] ss:$8 sps:$4 sm:$0xff]   ;;  %v19242_v12 = vld [vmem:[%s28455_s6 + $0x7c4] ss:$8 sps:$4 sm:$0xff]  }
 0x7ef   :  { %13423 = vmatpush1.bf16.msra.mxu0 %v19165_v34  ;;  %v19231_v34 = vld [vmem:[%s28455_s6 + $0x8f0] ss:$8 sps:$4 sm:$0xff]  }
 0x7f0   :  { %13424 = vmatprep.subr.bf16.mxu0 %v19173_v36  ;;  %v19234_v36 = vld [vmem:[%s28455_s6 + $0x7d0] ss:$8 sps:$4 sm:$0xff]  }
 0x7f1   :  { %13119 = vmatpush1.bf16.msra.mxu1 %v19168_v63  ;;  %v12920_v63 = vrot.slane %v27413_v45, 4  ;;  %v19245_v45 = vld [vmem:[%s28455_s6 + $0x974] ss:$8 sps:$4 sm:$0xff]  }
 0x7f2   :  { %13120 = vmatprep.subr.bf16.mxu1 %v19176_v60  ;;  %v19237_v60 = vld [vmem:[%s28455_s6 + $0x8e0] ss:$8 sps:$4 sm:$0xff]  }
 0x7f3   :  { %13425 = vmatpush1.bf16.msra.mxu0 %v19171_v8  ;;  %v19240_v8 = vld [vmem:[%s28455_s6 + $0x7c0] ss:$8 sps:$4 sm:$0xff]  }
 0x7f4   :  { %13426 = vmatprep.subr.bf16.mxu0 %v19179_v40  ;;  %v11331_v40 = vmax.f32 %v27438_v22, 0.0  ;;  %v19246_v22 = vld [vmem:[%s28455_s6 + $0x850] ss:$8 sps:$4 sm:$0xff]  }
 0x7f5   :  { %13121 = vmatpush1.bf16.msra.mxu1 %v19174_v6  ;;  %v19248_v6 = vld [vmem:[%s28455_s6 + $0x854] ss:$8 sps:$4 sm:$0xff]  }
 0x7f6   :  { %13122 = vmatprep.subr.bf16.mxu1 %v19182_v39  ;;  %v19243_v39 = vld [vmem:[%s28455_s6 + $0x970] ss:$8 sps:$4 sm:$0xff]  }
 0x7f7   :  { %13427 = vmatpush1.bf16.msra.mxu0 %v19177_v2  ;;  %v13538_v2 = vrot.slane %v27556_v16, 4 }
 0x7f8   :  { %13428 = vmatprep.subr.bf16.mxu0 %v19185_v51  ;;  %v19251_v51 = vld [vmem:[%s28455_s6 + $0x964] ss:$8 sps:$4 sm:$0xff]  }
 0x7f9   :  { %13123 = vmatpush1.bf16.msra.mxu1 %v19180_v26  ;;  %v11346_v26 = vpack.c.bf16 %v11331_v40, %v11331_v40 }
 0x7fa   :  { %13124 = vmatprep.subr.bf16.mxu1 %v19188_v57  ;;  %v19254_v57 = vld [vmem:[%s28455_s6 + $0x844] ss:$8 sps:$4 sm:$0xff]  }
 0x7fb   :  { %13429 = vmatpush2.bf16.msra.mxu0 %v19183_v10  ;;  %v13537_v10 = vrot.slane %v27440_v23, 4  ;;  %v19260_v23 = vld [vmem:[%s28455_s6 + $0x834] ss:$8 sps:$4 sm:$0xff]  }
 0x7fc   :  { %13430 = vmatprep.subr.bf16.mxu0 %v19191_v15  ;;  %v19249_v15 = vld [vmem:[%s28455_s6 + $0x960] ss:$8 sps:$4 sm:$0xff]  }
 0x7fd   :  { %13125 = vmatpush2.bf16.msra.mxu1 %v19186_v25  ;;  %v19257_v25 = vld [vmem:[%s28455_s6 + $0x954] ss:$8 sps:$4 sm:$0xff]  }
 0x7fe   :  { %13126 = vmatprep.subr.bf16.mxu1 %v19194_v55  ;;  %v19252_v55 = vld [vmem:[%s28455_s6 + $0x840] ss:$8 sps:$4 sm:$0xff]  }
 0x7ff   :  { %13431 = vmatpush2.bf16.msra.mxu0 %v19189_v49  ;;  %v19263_v49 = vld [vmem:[%s28455_s6 + $0x944] ss:$8 sps:$4 sm:$0xff]  }
 0x800   :  { %13432 = vmatprep.subr.bf16.mxu0 %v19197_v50  ;;  %v19258_v50 = vld [vmem:[%s28455_s6 + $0x830] ss:$8 sps:$4 sm:$0xff]  }
 0x801   :  { %13127 = vmatpush2.bf16.msra.mxu1 %v19192_v17  ;;  %v19266_v17 = vld [vmem:[%s28455_s6 + $0x824] ss:$8 sps:$4 sm:$0xff]  }
 0x802   :  { %13128 = vmatprep.subr.bf16.mxu1 %v19200_v19  ;;  %v19261_v19 = vld [vmem:[%s28455_s6 + $0x940] ss:$8 sps:$4 sm:$0xff]  }
 0x803   :  { %13433 = vmatpush2.bf16.msra.mxu0 %v19195_v0  ;;  %v19269_v0 = vld [vmem:[%s28455_s6 + $0x934] ss:$8 sps:$4 sm:$0xff]  }
 0x804   :  { %13434 = vmatprep.subr.bf16.mxu0 %v19203_v46  ;;  %v19264_v46 = vld [vmem:[%s28455_s6 + $0x820] ss:$8 sps:$4 sm:$0xff]  }
 0x805   :  { %13129 = vmatpush2.bf16.msra.mxu1 %v19198_v52  ;;  %v19272_v52 = vld [vmem:[%s28455_s6 + $0x814] ss:$8 sps:$4 sm:$0xff]  }
 0x806   :  { %13130 = vmatprep.subr.bf16.mxu1 %v19206_v43  ;;  %v19267_v43 = vld [vmem:[%s28455_s6 + $0x930] ss:$8 sps:$4 sm:$0xff]  }
 0x807   :  { %13435 = vmatpush2.bf16.msra.mxu0 %v19201_v35  ;;  %v19275_v35 = vld [vmem:[%s28455_s6 + $0x924] ss:$8 sps:$4 sm:$0xff]  }
 0x808   :  { %13436 = vmatprep.subr.bf16.mxu0 %v19209_v48  ;;  %v19270_v48 = vld [vmem:[%s28455_s6 + $0x810] ss:$8 sps:$4 sm:$0xff]  }
 0x809   :  { %13131 = vmatpush2.bf16.msra.mxu1 %v19204_v58  ;;  %v19278_v58 = vld [vmem:[%s28455_s6 + $0x804] ss:$8 sps:$4 sm:$0xff]  }
 0x80a   :  { %v28095_v3 = vpop.f32.mrf.mxu0  ;;  %13132 = vmatprep.subr.bf16.mxu1 %v19212_v32  ;;  %v19273_v32 = vld [vmem:[%s28455_s6 + $0x920] ss:$8 sps:$4 sm:$0xff]  }
 0x80b   :  { %13437 = vmatpush2.bf16.msra.mxu0 %v19207_v18  ;;  %v19281_v18 = vld [vmem:[%s28455_s6 + $0x914] ss:$8 sps:$4 sm:$0xff]  }
 0x80c   :  { %v11688_v20 = vpop.f32.mrf.mxu1  ;;  %v28103_v37 = vpop.f32.mrf.mxu0  ;;  %13438 = vmatprep.subr.bf16.mxu0 %v19215_v4  ;;  %v19276_v4 = vld [vmem:[%s28455_s6 + $0x800] ss:$8 sps:$4 sm:$0xff]  }
 0x80d   :  { %v28109_v28 = vadd.f32 %v11688_v20, %v27989_v42  ;;  %13133 = vmatpush2.bf16.msra.mxu1 %v19210_v14  ;;  %v19230_v42 = vld [vmem:[%s28455_s6 + $0x624] ss:$8 sps:$4 sm:$0xff]   ;;  %v19284_v14 = vld [vmem:[%s28455_s6 + $0x7f4] ss:$8 sps:$4 sm:$0xff]   ;;  %v19282_v20 = vld [vmem:[%s28455_s6 + $0x7f0] ss:$8 sps:$4 sm:$0xff]  }
 0x80e   :  { %v11690_v24 = vpop.f32.mrf.mxu1  ;;  %v11957_v41 = vpop.f32.mrf.mxu0  ;;  %13134 = vmatprep.subr.bf16.mxu1 %v19218_v21  ;;  %v19279_v21 = vld [vmem:[%s28455_s6 + $0x910] ss:$8 sps:$4 sm:$0xff]  }
 0x80f   :  { %v28118_v54 = vadd.f32 %v11690_v24, %v27997_v56  ;;  %13439 = vmatpush2.bf16.msra.mxu0 %v19213_v27  ;;  %v19228_v56 = vld [vmem:[%s28455_s6 + $0x620] ss:$8 sps:$4 sm:$0xff]   ;;  %v19287_v27 = vld [vmem:[%s28455_s6 + $0x904] ss:$8 sps:$4 sm:$0xff]   ;;  %v19293_v24 = vld [vmem:[%s28455_s6 + $0x9f4] ss:$8 sps:$4 sm:$0xff]  }
 0x810   :  { %v11692_v1 = vpop.f32.mrf.mxu1  ;;  %v11958_v59 = vpop.f32.mrf.mxu0  ;;  %13440 = vmatprep.subr.bf16.mxu0 %v19221_v47  ;;  %v19290_v47 = vld [vmem:[%s28455_s6 + $0x7e4] ss:$8 sps:$4 sm:$0xff]   ;;  %v19288_v41 = vld [vmem:[%s28455_s6 + $0x7e0] ss:$8 sps:$4 sm:$0xff]  }
 0x811   :  { %13135 = vmatpush2.bf16.msra.mxu1 %v19216_v53  ;;  %v19285_v53 = vld [vmem:[%s28455_s6 + $0x900] ss:$8 sps:$4 sm:$0xff]   ;;  %v19299_v1 = vld [vmem:[%s28455_s6 + $0x9e4] ss:$8 sps:$4 sm:$0xff]   ;;  %v19294_v59 = vld [vmem:[%s28455_s6 + $0x8d0] ss:$8 sps:$4 sm:$0xff]  }
 0x812   :  { %v11693_v9 = vpop.f32.mrf.mxu1  ;;  %13136 = vmatprep.subr.bf16.mxu1 %v19224_v61  ;;  %v19296_v61 = vld [vmem:[%s28455_s6 + $0x8d4] ss:$8 sps:$4 sm:$0xff]  }
 0x813   :  { %13441 = vmatpush2.bf16.msra.mxu0 %v19219_v31  ;;  %v19291_v31 = vld [vmem:[%s28455_s6 + $0x9f0] ss:$8 sps:$4 sm:$0xff]   ;;  %v19305_v9 = vld [vmem:[%s28455_s6 + $0x9d4] ss:$8 sps:$4 sm:$0xff]  }
 0x814   :  { %13442 = vmatprep.subr.bf16.mxu0 %v19227_v7  ;;  %v19302_v7 = vld [vmem:[%s28455_s6 + $0x8c4] ss:$8 sps:$4 sm:$0xff]  }
 0x815   :  { %13137 = vmatpush2.bf16.msra.mxu1 %v19222_v44  ;;  %v19297_v44 = vld [vmem:[%s28455_s6 + $0x9e0] ss:$8 sps:$4 sm:$0xff]  }
 0x816   :  { %13138 = vmatprep.subr.bf16.mxu1 %v19230_v42  ;;  %v19300_v42 = vld [vmem:[%s28455_s6 + $0x8c0] ss:$8 sps:$4 sm:$0xff]  }
 0x817   :  { %13443 = vmatpush2.bf16.msra.mxu0 %v19225_v30  ;;  %v19308_v30 = vld [vmem:[%s28455_s6 + $0x8b4] ss:$8 sps:$4 sm:$0xff]  }
 0x818   :  { %13777 = vmatprep.subr.bf16.mxu0 %v19233_v29  ;;  %v19303_v29 = vld [vmem:[%s28455_s6 + $0x9d0] ss:$8 sps:$4 sm:$0xff]  }
 0x819   :  { %13139 = vmatpush2.bf16.msra.mxu1 %v19228_v56  ;;  %v19311_v56 = vld [vmem:[%s28455_s6 + $0x9c4] ss:$8 sps:$4 sm:$0xff]  }
 0x81a   :  { %13445 = vmatmul.mubr.bf16.vlgmr.msra.gmra.mxu0 %v27433_v11  ;;  %13465 = vmatprep.subr.bf16.mxu1 %v19236_v5  ;;  %v19306_v5 = vld [vmem:[%s28455_s6 + $0x8b0] ss:$8 sps:$4 sm:$0xff]  }
 0x81b   :  { %13778 = vmatpush1.bf16.msra.mxu0 %v19231_v34  ;;  %13797 = vmatprep.mubr.bf16.mxu0 %v28673_v13 }
 0x81c   :  { %13141 = vmatmul.mubr.bf16.vlgmr.msra.gmra.mxu1 %v12920_v63  ;;  %13779 = vmatprep.subr.bf16.mxu0 %v19239_v38  ;;  %v19314_v38 = vld [vmem:[%s28455_s6 + $0x8a4] ss:$8 sps:$4 sm:$0xff]  }
 0x81d   :  { %13466 = vmatpush1.bf16.msra.mxu1 %v19234_v36  ;;  %13485 = vmatprep.mubr.bf16.mxu1 %v28673_v13  ;;  %v19309_v36 = vld [vmem:[%s28455_s6 + $0x9c0] ss:$8 sps:$4 sm:$0xff]  }
 0x81e   :  { %13467 = vmatprep.subr.bf16.mxu1 %v19242_v12 }
 0x81f   :  { %13780 = vmatpush1.bf16.msra.mxu0 %v19237_v60  ;;  %v19317_v60 = vld [vmem:[%s28455_s6 + $0x9b4] ss:$8 sps:$4 sm:$0xff]  }
 0x820   :  { %14028 = vmatprep.subr.bf16.mxu0 %v19245_v45 }
 0x821   :  { %13468 = vmatpush1.bf16.msra.mxu1 %v19240_v8  ;;  %v19312_v8 = vld [vmem:[%s28455_s6 + $0x8a0] ss:$8 sps:$4 sm:$0xff]  }
 0x822   :  { %16091 = vmatmul.mubr.msk.bf16.vlgmr.msra.gmra.mxu0 %vm11609_vm3, %v13538_v2  ;;  %13724 = vmatprep.subr.bf16.mxu1 %v19248_v6 }
 0x823   :  { %14029 = vmatpush1.bf16.msra.mxu0 %v19243_v39  ;;  %14060 = vmatprep.mubr.bf16.mxu0 %v11346_v26  ;;  %v19320_v39 = vld [vmem:[%s28455_s6 + $0x894] ss:$8 sps:$4 sm:$0xff]  }
 0x824   :  { %16018 = vmatmul.mubr.msk.bf16.vlgmr.msra.gmra.mxu1 %vm11609_vm3, %v27556_v16  ;;  %14030 = vmatprep.subr.bf16.mxu0 %v19251_v51  ;;  %v19255_v16 = vld [vmem:[%s28455_s6 + $0x950] ss:$8 sps:$4 sm:$0xff]  }
 0x825   :  { %13725 = vmatpush1.bf16.msra.mxu1 %v19246_v22  ;;  %13756 = vmatprep.mubr.bf16.mxu1 %v13537_v10  ;;  %v19315_v51 = vld [vmem:[%s28455_s6 + $0x9b0] ss:$8 sps:$4 sm:$0xff]   ;;  %v19323_v22 = vld [vmem:[%s28455_s6 + $0x9a4] ss:$8 sps:$4 sm:$0xff]  }
 0x826   :  { %13726 = vmatprep.subr.bf16.mxu1 %v19254_v57  ;;  %v19318_v57 = vld [vmem:[%s28455_s6 + $0x890] ss:$8 sps:$4 sm:$0xff]  }
 0x827   :  { %14031 = vmatpush1.bf16.msra.mxu0 %v19249_v15 }
 0x828   :  { %14032 = vmatprep.subr.bf16.mxu0 %v19257_v25  ;;  %v19321_v25 = vld [vmem:[%s28455_s6 + $0x9a0] ss:$8 sps:$4 sm:$0xff]  }
 0x829   :  { %13727 = vmatpush1.bf16.msra.mxu1 %v19252_v55 }
 0x82a   :  { %13728 = vmatprep.subr.bf16.mxu1 %v19260_v23 }
 0x82b   :  { %14033 = vmatpush1.bf16.msra.mxu0 %v19255_v16  ;;  %v19329_v16 = vld [vmem:[%s28455_s6 + $0x994] ss:$8 sps:$4 sm:$0xff]  }
 0x82c   :  { %14034 = vmatprep.subr.bf16.mxu0 %v19263_v49 }
 0x82d   :  { %13729 = vmatpush1.bf16.msra.mxu1 %v19258_v50 }
 0x82e   :  { %13730 = vmatprep.subr.bf16.mxu1 %v19266_v17  ;;  %v19324_v17 = vld [vmem:[%s28455_s6 + $0x880] ss:$8 sps:$4 sm:$0xff]  }
 0x82f   :  { %14035 = vmatpush1.bf16.msra.mxu0 %v19261_v19 }
 0x830   :  { %14036 = vmatprep.subr.bf16.mxu0 %v19269_v0 }
 0x831   :  { %13731 = vmatpush1.bf16.msra.mxu1 %v19264_v46  ;;  %v19332_v46 = vld [vmem:[%s28455_s6 + $0x874] ss:$8 sps:$4 sm:$0xff]  }
 0x832   :  { %13732 = vmatprep.subr.bf16.mxu1 %v19272_v52 }
 0x833   :  { %14037 = vmatpush1.bf16.msra.mxu0 %v19267_v43 }
 0x834   :  { %14038 = vmatprep.subr.bf16.mxu0 %v19275_v35 }
 0x835   :  { %13733 = vmatpush1.bf16.msra.mxu1 %v19270_v48 }
 0x836   :  { %13734 = vmatprep.subr.bf16.mxu1 %v19278_v58 }
 0x837   :  { %14039 = vmatpush1.bf16.msra.mxu0 %v19273_v32  ;;  %v19335_v32 = vld [vmem:[%s28455_s6 + $0x984] ss:$8 sps:$4 sm:$0xff]  }
 0x838   :  { %14040 = vmatprep.subr.bf16.mxu0 %v19281_v18 }
 0x839   :  { %13735 = vmatpush1.bf16.msra.mxu1 %v19276_v4 }
 0x83a   :  { %13736 = vmatprep.subr.bf16.mxu1 %v19284_v14  ;;  %v19338_v14 = vld [vmem:[%s28455_s6 + $0x864] ss:$8 sps:$4 sm:$0xff]  }
 0x83b   :  { %14041 = vmatpush1.bf16.msra.mxu0 %v19279_v21  ;;  %v19333_v21 = vld [vmem:[%s28455_s6 + $0x980] ss:$8 sps:$4 sm:$0xff]  }
 0x83c   :  { %14042 = vmatprep.subr.bf16.mxu0 %v19287_v27  ;;  %v11330_v27 = vmax.f32 %v27430_v62, 0.0  ;;  %v13536_v62 = vrot.slane %v27433_v11, 4  ;;  %v19345_v11 = vld [vmem:[%s28457_s8 + $0x78] sm:$0xff]  }
 0x83d   :  { %13737 = vmatpush1.bf16.msra.mxu1 %v19282_v20  ;;  %v19336_v20 = vld [vmem:[%s28455_s6 + $0x860] ss:$8 sps:$4 sm:$0xff]  }
 0x83e   :  { %13738 = vmatprep.subr.bf16.mxu1 %v19290_v47  ;;  %v19341_v47 = vld [vmem:[%s28455_s6 + $0xa14] ss:$8 sps:$4 sm:$0xff]  }
 0x83f   :  { %14043 = vmatpush1.bf16.msra.mxu0 %v19285_v53  ;;  %v11345_v53 = vpack.c.bf16 %v11330_v27, %v11330_v27 }
 0x840   :  { %14044 = vmatprep.subr.bf16.mxu0 %v19293_v24  ;;  %v19339_v24 = vld [vmem:[%s28455_s6 + $0xa10] ss:$8 sps:$4 sm:$0xff]  }
 0x841   :  { %13739 = vmatpush1.bf16.msra.mxu1 %v19288_v41  ;;  %v19344_v41 = vld [vmem:[%s28455_s6 + $0xa04] ss:$8 sps:$4 sm:$0xff]  }
 0x842   :  { %13740 = vmatprep.subr.bf16.mxu1 %v19296_v61  ;;  %v19342_v61 = vld [vmem:[%s28455_s6 + $0xa00] ss:$8 sps:$4 sm:$0xff]  }
 0x843   :  { %14045 = vmatpush2.bf16.msra.mxu0 %v19291_v31  ;;  %v11332_v31 = vmax.f32 %v27559_v33, 0.0  ;;  %v19348_v33 = vld [vmem:[%s28457_s8 + $0x30] sm:$0xff]  }
 0x844   :  { %14046 = vmatprep.subr.bf16.mxu0 %v19299_v1 }
 0x845   :  { %13741 = vmatpush2.bf16.msra.mxu1 %v19294_v59  ;;  %v11347_v1 = vpack.c.bf16 %v11332_v31, %v11332_v31  ;;  %v19346_v59 = vld [vmem:[%s28457_s8 + $0x38] sm:$0xff]  }
 0x846   :  { %13742 = vmatprep.subr.bf16.mxu1 %v19302_v7 }
 0x847   :  { %14047 = vmatpush2.bf16.msra.mxu0 %v19297_v44 }
 0x848   :  { %14048 = vmatprep.subr.bf16.mxu0 %v19305_v9 }
 0x849   :  { %13743 = vmatpush2.bf16.msra.mxu1 %v19300_v42 }
 0x84a   :  { %v12214_v34 = vpop.f32.mrf.mxu0  ;;  %13744 = vmatprep.subr.bf16.mxu1 %v19308_v30 }
 0x84b   :  { %14049 = vmatpush2.bf16.msra.mxu0 %v19303_v29 }
 0x84c   :  { %v11912_v63 = vpop.f32.mrf.mxu1  ;;  %v12216_v12 = vpop.f32.mrf.mxu0  ;;  %14050 = vmatprep.subr.bf16.mxu0 %v19311_v56 }
 0x84d   :  { %v11913_v45 = vadd.f32 %v11912_v63, %v28109_v28  ;;  %13745 = vmatpush2.bf16.msra.mxu1 %v19306_v5 }
 0x84e   :  { %v11914_v40 = vpop.f32.mrf.mxu1  ;;  %v12218_v6 = vpop.f32.mrf.mxu0  ;;  %13746 = vmatprep.subr.bf16.mxu1 %v19314_v38 }
 0x84f   :  { %v11915_v2 = vadd.f32 %v11914_v40, %v28118_v54  ;;  %14051 = vmatpush2.bf16.msra.mxu0 %v19309_v36  ;;  %v19326_v54 = vld [vmem:[%s28455_s6 + $0x884] ss:$8 sps:$4 sm:$0xff]   ;;  %v11954_v49 = vadd.f32 %v28095_v3, %v11913_v45  ;;  %v19327_v3 = vld [vmem:[%s28455_s6 + $0x990] ss:$8 sps:$4 sm:$0xff]  }
 0x850   :  { %v11916_v28 = vpop.f32.mrf.mxu1  ;;  %v12219_v26 = vpop.f32.mrf.mxu0  ;;  %14052 = vmatprep.subr.bf16.mxu0 %v19317_v60 }
 0x851   :  { %13747 = vmatpush2.bf16.msra.mxu1 %v19312_v8  ;;  %v11956_v52 = vadd.f32 %v28103_v37, %v11915_v2  ;;  %v19330_v37 = vld [vmem:[%s28455_s6 + $0x870] ss:$8 sps:$4 sm:$0xff]   ;;  %v19349_v26 = vld [vmem:[%s28457_s8 + $0x68] sm:$0xff]  }
 0x852   :  { %v11917_v10 = vpop.f32.mrf.mxu1  ;;  %v28333_v15 = vpop.f32.mrf.mxu0  ;;  %13748 = vmatprep.subr.bf16.mxu1 %v19320_v39 }
 0x853   :  { %14053 = vmatpush2.bf16.msra.mxu0 %v19315_v51 }
 0x854   :  { %v12255_v55 = vpop.f32.mrf.mxu1  ;;  %v28341_v23 = vpop.f32.mrf.mxu0  ;;  %14054 = vmatprep.subr.bf16.mxu0 %v19323_v22 }
 0x855   :  { %v12256_v50 = vadd.f32 %v12255_v55, %v12214_v34  ;;  %13749 = vmatpush2.bf16.msra.mxu1 %v19318_v57  ;;  %v19350_v57 = vld [vmem:[%s28457_s8 + $0x28] sm:$0xff]   ;;  %v19354_v55 = vld [vmem:[%s28457_s8 + $0x18] sm:$0xff]  }
 0x856   :  { %v12257_v19 = vpop.f32.mrf.mxu1  ;;  %v12571_v0 = vpop.f32.mrf.mxu0  ;;  %13750 = vmatprep.subr.bf16.mxu1 %v19326_v54  ;;  %v19352_v54 = vld [vmem:[%s28457_s8 + $0x20] sm:$0xff]  }
 0x857   :  { %v12262_v43 = vadd.f32 %v12256_v50, %v11954_v49  ;;  %v12258_v35 = vadd.f32 %v12257_v19, %v12216_v12  ;;  %14055 = vmatpush2.bf16.msra.mxu0 %v19321_v25  ;;  %v19353_v25 = vld [vmem:[%s28457_s8 + $0x58] sm:$0xff]   ;;  %v19357_v49 = vld [vmem:[%s28457_s8 + $0x48] sm:$0xff]   ;;  %v19360_v19 = vld [vmem:[%s28457_s8] sm:$0xff]  }
 0x858   :  { %v12259_v48 = vpop.f32.mrf.mxu1  ;;  %v12572_v58 = vpop.f32.mrf.mxu0  ;;  %14056 = vmatprep.subr.bf16.mxu0 %v19329_v16  ;;  %v19356_v16 = vld [vmem:[%s28457_s8 + $0x10] sm:$0xff]   ;;  %v19358_v50 = vld [vmem:[%s28457_s8 + $0x8] sm:$0xff]  }
 0x859   :  { %v12263_v18 = vadd.f32 %v12258_v35, %v11956_v52  ;;  %13751 = vmatpush2.bf16.msra.mxu1 %v19324_v17  ;;  %v19359_v17 = vld [vmem:[%s28457_s8 + $0x40] sm:$0xff]  }
 0x85a   :  { %v12260_v4 = vpop.f32.mrf.mxu1  ;;  %13752 = vmatprep.subr.bf16.mxu1 %v19332_v46 }
 0x85b   :  { %14057 = vmatpush2.bf16.msra.mxu0 %v19327_v3 }
 0x85c   :  { %14058 = vmatprep.subr.bf16.mxu0 %v19335_v32 }
 0x85d   :  { %13753 = vmatpush2.bf16.msra.mxu1 %v19330_v37 }
 0x85e   :  { %13754 = vmatprep.subr.bf16.mxu1 %v19338_v14 }
 0x85f   :  { %14059 = vmatpush2.bf16.msra.mxu0 %v19333_v21 }
 0x861   :  { %13755 = vmatpush2.bf16.msra.mxu1 %v19336_v20 }
 0x862   :  { %14061 = vmatmul.mubr.bf16.vlgmr.msra.gmra.mxu0 %v11345_v53  ;;  %14081 = vmatprep.subr.bf16.mxu1 %v19341_v47 }
 0x864   :  { %13757 = vmatmul.mubr.bf16.vlgmr.msra.gmra.mxu1 %v13536_v62 }
 0x865   :  { %14082 = vmatpush1.bf16.msra.mxu1 %v19339_v24  ;;  %14101 = vmatprep.mubr.bf16.mxu1 %v28673_v13  ;;  %v19347_v13 = vld [vmem:[%s28457_s8 + $0x70] sm:$0xff]  }
 0x866   :  { %14083 = vmatprep.subr.bf16.mxu1 %v19344_v41 }
 0x869   :  { %14084 = vmatpush1.bf16.msra.mxu1 %v19342_v61 }
 0x86a   :  { %17348 = vmatprep.subr.bf16.mxu1 %v19345_v11 }
 0x86c   :  { %16164 = vmatmul.mubr.msk.bf16.vlgmr.msra.gmra.mxu1 %vm11609_vm3, %v11347_v1 }
 0x86d   :  { %17349 = vmatpush3.bf16.msra.mxu1 %v19346_v59 }
 0x86e   :  { %17350 = vmatprep.subr.bf16.mxu1 %v19347_v13 }
 0x871   :  { %17351 = vmatpush3.bf16.msra.mxu1 %v19348_v33 }
 0x872   :  { %17352 = vmatprep.subr.bf16.mxu1 %v19349_v26 }
 0x875   :  { %17353 = vmatpush3.bf16.msra.mxu1 %v19350_v57 }
 0x892   :  { %v12830_v7 = vpop.f32.mrf.mxu0 }
 0x894   :  { %v12526_v44 = vpop.f32.mrf.mxu1  ;;  %v12832_v9 = vpop.f32.mrf.mxu0 }
 0x895   :  { %v12568_v42 = vadd.f32 %v28333_v15, %v12526_v44  ;;  %v19351_v15 = vld [vmem:[%s28457_s8 + $0x60] sm:$0xff]  }
 0x896   :  { %v12528_v30 = vpop.f32.mrf.mxu1  ;;  %v12834_v29 = vpop.f32.mrf.mxu0  ;;  %17354 = vmatprep.subr.bf16.mxu1 %v19351_v15 }
 0x897   :  { %v12574_v56 = vadd.f32 %v12568_v42, %v12262_v43  ;;  %v12570_v5 = vadd.f32 %v28341_v23, %v12528_v30  ;;  %17355 = vmatpush3.bf16.msra.mxu1 %v19352_v54  ;;  %v19355_v23 = vld [vmem:[%s28457_s8 + $0x50] sm:$0xff]   ;;  %v14112_v29 = vld [vmem:[%s28458_s7] sm:$0x3] }
 0x898   :  { %v12530_v34 = vpop.f32.mrf.mxu1  ;;  %v12835_v38 = vpop.f32.mrf.mxu0  ;;  %17356 = vmatprep.subr.bf16.mxu1 %v19353_v25  ;;  %v16165_v25 = vld [vmem:[%s28459_s9] ss:$0 sm:$0xff] }
 0x899   :  { %v12575_v36 = vadd.f32 %v12570_v5, %v12263_v18 }
 0x89a   :  { %v12531_v63 = vpop.f32.mrf.mxu1  ;;  %v13183_v12 = vpop.f32.mrf.mxu0 }
 0x89b   :  { %17357 = vmatpush3.bf16.msra.mxu1 %v19354_v55 }
 0x89c   :  { %v12871_v60 = vpop.f32.mrf.mxu1  ;;  %v13185_v45 = vpop.f32.mrf.mxu0  ;;  %17358 = vmatprep.subr.bf16.mxu1 %v19355_v23 }
 0x89d   :  { %v12872_v8 = vadd.f32 %v12871_v60, %v12830_v7 }
 0x89e   :  { %v12873_v40 = vpop.f32.mrf.mxu1  ;;  %v13187_v6 = vpop.f32.mrf.mxu0 }
 0x89f   :  { %v12878_v39 = vadd.f32 %v12872_v8, %v12574_v56  ;;  %v12874_v2 = vadd.f32 %v12873_v40, %v12832_v9  ;;  %17359 = vmatpush3.bf16.msra.mxu1 %v19356_v16  ;;  %v28687_v40 = vld [vmem:[#allocation4_spill] sm:$0xff] }
 0x8a0   :  { %v12875_v51 = vpop.f32.mrf.mxu1  ;;  %v13188_v28 = vpop.f32.mrf.mxu0  ;;  %17360 = vmatprep.subr.bf16.mxu1 %v19357_v49  ;;  %v14121_v6 = vrot.slane %v14112_v29, %v28687_v40 }
 0x8a1   :  { %v12879_v22 = vadd.f32 %v12874_v2, %v12575_v36  ;;  %v28686_v36 = vld [vmem:[#allocation3_spill] sm:$0xff] }
 0x8a2   :  { %v12876_v10 = vpop.f32.mrf.mxu1  ;;  %v14117_v63 = vrot.slane %v14112_v29, %v28686_v36 }
 0x8a3   :  { %17361 = vmatpush3.bf16.msra.mxu1 %v19358_v50 }
 0x8a4   :  { %17362 = vmatprep.subr.bf16.mxu1 %v19359_v17 }
 0x8a7   :  { %17363 = vmatpush3.bf16.msra.mxu1 %v19360_v19 }
 0x8da   :  { %v13446_v0 = vpop.f32.mrf.mxu0 }
 0x8dc   :  { %v13142_v46 = vpop.f32.mrf.mxu1  ;;  %v13448_v52 = vpop.f32.mrf.mxu0 }
 0x8dd   :  { %v13184_v43 = vadd.f32 %v13183_v12, %v13142_v46 }
 0x8de   :  { %v13144_v35 = vpop.f32.mrf.mxu1  ;;  %v13450_v3 = vpop.f32.mrf.mxu0 }
 0x8df   :  { %v13190_v48 = vadd.f32 %v13184_v43, %v12878_v39  ;;  %v13186_v58 = vadd.f32 %v13185_v45, %v13144_v35 }
 0x8e0   :  { %v13146_v32 = vpop.f32.mrf.mxu1  ;;  %v13451_v18 = vpop.f32.mrf.mxu0 }
 0x8e1   :  { %v13191_v37 = vadd.f32 %v13186_v58, %v12879_v22 }
 0x8e2   :  { %v13147_v4 = vpop.f32.mrf.mxu1  ;;  %v13799_v14 = vpop.f32.mrf.mxu0 }
 0x8e4   :  { %v13487_v21 = vpop.f32.mrf.mxu1  ;;  %v13801_v27 = vpop.f32.mrf.mxu0 }
 0x8e5   :  { %v13488_v20 = vadd.f32 %v13487_v21, %v13446_v0 }
 0x8e6   :  { %v13489_v47 = vpop.f32.mrf.mxu1  ;;  %v13803_v53 = vpop.f32.mrf.mxu0 }
 0x8e7   :  { %v13494_v24 = vadd.f32 %v13488_v20, %v13190_v48  ;;  %v13490_v62 = vadd.f32 %v13489_v47, %v13448_v52 }
 0x8e8   :  { %v13491_v41 = vpop.f32.mrf.mxu1  ;;  %v13804_v61 = vpop.f32.mrf.mxu0 }
 0x8e9   :  { %v13495_v31 = vadd.f32 %v13490_v62, %v13191_v37 }
 0x8ea   :  { %v13492_v1 = vpop.f32.mrf.mxu1 }
 0x922   :  { %v14062_v11 = vpop.f32.mrf.mxu0 }
 0x924   :  { %v13758_v59 = vpop.f32.mrf.mxu1  ;;  %v14064_v13 = vpop.f32.mrf.mxu0 }
 0x925   :  { %v13800_v42 = vadd.f32 %v13799_v14, %v13758_v59 }
 0x926   :  { %v13760_v33 = vpop.f32.mrf.mxu1  ;;  %v14066_v7 = vpop.f32.mrf.mxu0 }
 0x927   :  { %v13802_v56 = vadd.f32 %v13801_v27, %v13760_v33  ;;  %v13806_v34 = vadd.f32 %v13800_v42, %v13494_v24 }
 0x928   :  { %v13762_v44 = vpop.f32.mrf.mxu1  ;;  %v14067_v9 = vpop.f32.mrf.mxu0 }
 0x929   :  { %v13807_v60 = vadd.f32 %v13802_v56, %v13495_v31 }
 0x92a   :  { %v13763_v30 = vpop.f32.mrf.mxu1 }
 0x92c   :  { %v14103_v5 = vpop.f32.mrf.mxu1 }
 0x92d   :  { %v14104_v38 = vadd.f32 %v14103_v5, %v14062_v11 }
 0x92e   :  { %v14105_v12 = vpop.f32.mrf.mxu1 }
 0x92f   :  { %v14110_v45 = vadd.f32 %v14104_v38, %v13806_v34  ;;  %v14106_v8 = vadd.f32 %v14105_v12, %v14064_v13 }
 0x930   :  { %v14107_v39 = vpop.f32.mrf.mxu1 }
 0x931   :  { %v14124_v2 = vadd.f32 %v14117_v63, %v14110_v45  ;;  %v14111_v51 = vadd.f32 %v14106_v8, %v13807_v60 }
 0x932   :  { %v14108_v28 = vpop.f32.mrf.mxu1 }
 0x933   :  { %v14125_v26 = vadd.f32 %v14121_v6, %v14111_v51  ;;  %v14126_v22 = vmax.f32 %v14124_v2, 0.0 }
 0x935   :  { %v14127_v57 = vmax.f32 %v14125_v26, 0.0  ;;  %v14128_v15 = vpack.c.bf16 %v14126_v22, %v14126_v22 }
 0x937   :  { %v14129_v10 = vpack.c.bf16 %v14127_v57, %v14127_v57 }
 0x939   :  { %14297 = vmatprep.mubr.bf16.mxu1 %v14129_v10 }
 0x93a   :  { %14298 = vmatmul.mubr.bf16.vlgmr.msra.gmra.mxu1 %v14128_v15 }
 0x9fa   :  { %v17364_v54 = vpop.f32.mrf.mxu1 }
 0x9fc   :  { %v17365_v55 = vpop.f32.mrf.mxu1 }
 0x9fd   :  { %v17366_v23 = vadd.f32 %v17365_v55, %v17364_v54 }
 0x9fe   :  { %v17367_v16 = vpop.f32.mrf.mxu1 }
 0x9ff   :  { %v14300_v49 = vadd.f32 %v17366_v23, %v16165_v25 }
 0xa00   :  { %v17368_v50 = vpop.f32.mrf.mxu1 }
 0xa01   :  { %14305 = vst [vmem:[%s28460_s10] sm:$0xff] %v14300_v49 }

</bundles_post_ra>
